<compile_context>
chip_gen: v5e
topology: v5e:2x2
jax: 0.10.0
libtpu: 0.0.40
codegen_flags: <defaults>
</compile_context>

<pallas_src>
import functools
import math

import numpy as np
import jax
import jax.numpy as jnp
from jax.experimental import pallas as pl
from jax.experimental.pallas import tpu as pltpu


# Small config consistent with AttentionModel(n_layers, hidden_dim, num_heads)
N_LAYERS = 2                   # ResAttentionBlock = first_layer + N_LAYERS extra blocks
N_BLOCKS = N_LAYERS + 1
HIDDEN = 32
HEADS = 4
T_EMBED_DIM = 128
D_MODEL = 2 * HIDDEN           # d_model of the MultiHeadAttention inside each block
DEPTH = D_MODEL // HEADS

_INV_SQRT2 = 1.0 / math.sqrt(2.0)
_MASK_VAL = -1e9


# ---------------------------------------------------------------------------
# In-kernel math helpers
# ---------------------------------------------------------------------------
def _erf_poly(x):
    # Abramowitz & Stegun 7.1.26 (|err| < 1.5e-7): exact-gelu semantics without
    # relying on an erf lowering inside Mosaic.  The divide goes to the EUP.
    a1, a2, a3, a4, a5 = 0.254829592, -0.284496736, 1.421413741, -1.453152027, 1.061405429
    p = 0.3275911
    sgn = jnp.where(x < 0.0, -1.0, 1.0)
    ax = jnp.abs(x)
    t = pl.reciprocal(1.0 + p * ax, approx=True)
    poly = ((((a5 * t + a4) * t + a3) * t + a2) * t + a1) * t
    return sgn * (1.0 - poly * jnp.exp(-ax * ax))


def _gelu(x):
    # torch.nn.functional.gelu default (exact / erf form).
    return 0.5 * x * (1.0 + _erf_poly(x * _INV_SQRT2))


def _mha_2d(z, wqkv, bqkv, wo, bo, mask_bias, *, heads, depth):
    """Multi-head attention over S rows with a block-diagonal additive mask.

    z: [S, 2H] (rows = batch-of-groups folded into one axis), wqkv: [2H, 3*dm],
    wo: [dm, dm], mask_bias: [S, S] with 0 for same-group pairs and -1e9 otherwise.
    Everything is a flat 2-D, lane-dense matmul.
    """
    f32 = jnp.float32
    dm = heads * depth
    qkv = jnp.dot(z, wqkv, preferred_element_type=f32) + bqkv            # [S, 3*dm]
    scale = 1.0 / math.sqrt(depth)
    head_outs = []
    for hi in range(heads):
        lo = hi * depth
        q = qkv[:, lo:lo + depth]                                        # [S, depth]
        k = qkv[:, dm + lo:dm + lo + depth]
        v = qkv[:, 2 * dm + lo:2 * dm + lo + depth]
        sc = jnp.einsum("qd,kd->qk", q, k, preferred_element_type=f32) * scale
        sc = sc + mask_bias
        sc = sc - jnp.max(sc, axis=-1, keepdims=True)
        p = jnp.exp(sc)
        p = p * pl.reciprocal(jnp.sum(p, axis=-1, keepdims=True), approx=True)
        head_outs.append(jnp.dot(p, v, preferred_element_type=f32))     # [S, depth]
    o = jnp.concatenate(head_outs, axis=-1)                              # [S, dm]
    return jnp.dot(o, wo, preferred_element_type=f32) + bo               # [S, dm]


# ---------------------------------------------------------------------------
# The single fused kernel: one grid step == one batch element, all blocks inside.
# ---------------------------------------------------------------------------
def _fused_forward_kernel(st_ref, te_ref,
                          w1_ref, b1_ref, w2_ref, b2_ref,
                          wt_ref, bt_ref,
                          wrd_ref, brd_ref, wrn_ref, brn_ref,
                          wqkv_d_ref, bqkv_d_ref, wqkv_n_ref, bqkv_n_ref,
                          wo_d_ref, bo_d_ref, wo_n_ref, bo_n_ref,
                          w3_ref, b3_ref, w4_ref, b4_ref,
                          perm_ref, permt_ref, mask_d_ref, mask_n_ref,
                          out_ref, *, n_blocks, hidden, heads, depth, out_scale):
    f32 = jnp.float32

    # Stem: gelu(preprocess @ W1 + b1)                       [S, 2] -> [S, H]
    s = _gelu(jnp.dot(st_ref[0], w1_ref[...], preferred_element_type=f32) + b1_ref[...])

    # Time-embedding hidden state for this batch element     [1, 128] -> [1, H]
    t_h = jnp.dot(te_ref[0], w2_ref[...], preferred_element_type=f32) + b2_ref[...]

    perm, permt = perm_ref[...], permt_ref[...]
    mask_d, mask_n = mask_d_ref[...], mask_n_ref[...]

    skip = jnp.zeros_like(s)
    for bi in range(n_blocks):
        # per-block linear_t
        t_lin = jnp.dot(t_h, wt_ref[bi], preferred_element_type=f32) + bt_ref[bi]
        y = s + t_lin                                              # [S, H] ((n, d) order)
        # rows permuted to (d, n) order for the N-direction branch (in-VMEM permutation
        # via an MXU matmul — replaces the XLA transpose of the previous version)
        y_n = jnp.dot(perm, y, preferred_element_type=f32)          # [S, H]

        # row projections (lane-dense, 64 output columns)
        z_d = jnp.dot(y, wrd_ref[bi], preferred_element_type=f32) + brd_ref[bi]
        z_n = jnp.dot(y_n, wrn_ref[bi], preferred_element_type=f32) + brn_ref[bi]

        a_d = _mha_2d(z_d, wqkv_d_ref[bi], bqkv_d_ref[bi], wo_d_ref[bi], bo_d_ref[bi],
                      mask_d, heads=heads, depth=depth)              # [S, 2H]
        a_n = _mha_2d(z_n, wqkv_n_ref[bi], bqkv_n_ref[bi], wo_n_ref[bi], bo_n_ref[bi],
                      mask_n, heads=heads, depth=depth)              # [S, 2H]
        a_n = jnp.dot(permt, a_n, preferred_element_type=f32)        # back to (n, d) order

        g = _gelu(a_d + a_n)                                         # [S, 2H]
        s = (s + g[:, :hidden]) * _INV_SQRT2                         # residual half
        skip = skip + g[:, hidden:]                                  # skip half (accum)

    # Tail: skip / sqrt(n_layers) -> gelu(@W3+b3) -> gelu(@W4+b4)
    x = skip * out_scale
    h1 = _gelu(jnp.dot(x, w3_ref[...], preferred_element_type=f32) + b3_ref[...])
    # final [H -> 1] projection as VPU multiply + lane reduction (no 1-column MXU pass)
    e = jnp.sum(h1 * w4_ref[...], axis=-1, keepdims=True) + b4_ref[...]
    out_ref[0] = _gelu(e)


# ---------------------------------------------------------------------------
# pallas_call wrapper
# ---------------------------------------------------------------------------
def _full_spec(shape):
    zeros = (0,) * len(shape)
    return pl.BlockSpec(tuple(shape), lambda i, _z=zeros: _z)


def _batched_spec(shape):
    blk = (1,) + tuple(shape[1:])
    ntrail = len(shape) - 1
    return pl.BlockSpec(blk, lambda i, _n=ntrail: (i,) + (0,) * _n)


def _build_aux(n, d):
    """Permutation matrix (n,d)->(d,n) row order and block-diagonal attention masks."""
    s = n * d
    perm = np.zeros((s, s), np.float32)
    for ni in range(n):
        for di in range(d):
            perm[di * n + ni, ni * d + di] = 1.0
    grp_d = np.arange(s) // d          # (n, d) row order -> group = n
    grp_n = np.arange(s) // n          # (d, n) row order -> group = d
    mask_d = np.where(grp_d[:, None] == grp_d[None, :], 0.0, _MASK_VAL).astype(np.float32)
    mask_n = np.where(grp_n[:, None] == grp_n[None, :], 0.0, _MASK_VAL).astype(np.float32)
    return (jnp.asarray(perm), jnp.asarray(perm.T),
            jnp.asarray(mask_d), jnp.asarray(mask_n))


def _cost_estimate(b, s, args_bytes):
    h, dm, hd, dp, nb = HIDDEN, D_MODEL, HEADS, DEPTH, N_BLOCKS
    per_block = (2 * s * s * (h + dm)            # row permutations (in/out)
                 + 2 * 2 * s * h * dm            # linear_d / linear_n
                 + 2 * 2 * s * dm * 3 * dm       # fused QKV projections
                 + 2 * 2 * hd * 2 * s * s * dp   # scores + p@v, both directions
                 + 2 * 2 * s * dm * dm)          # output projections
    flops = b * (nb * per_block + 2 * s * 2 * h + 2 * s * h * h + 2 * s * h)
    trans = b * (nb * (2 * hd * s * s + 3 * s * dm) + 3 * s * h)
    return pl.CostEstimate(flops=int(flops), transcendentals=int(trans),
                           bytes_accessed=int(args_bytes))


def attention_model_pallas(pp, xt, t):
    b, n, d = xt.shape
    s_rows = n * d
    st3 = preprocess(xt).reshape(b, s_rows, 2)
    te3 = positional_embedding(t, T_EMBED_DIM).reshape(b, 1, T_EMBED_DIM)
    perm, permt, mask_d, mask_n = _build_aux(n, d)

    args = (st3, te3,
            pp["w1"], pp["b1"], pp["w2"], pp["b2"],
            pp["wt"], pp["bt"],
            pp["wrd"], pp["brd"], pp["wrn"], pp["brn"],
            pp["wqkv_d"], pp["bqkv_d"], pp["wqkv_n"], pp["bqkv_n"],
            pp["wo_d"], pp["bo_d"], pp["wo_n"], pp["bo_n"],
            pp["w3"], pp["b3"], pp["w4row"], pp["b4"],
            perm, permt, mask_d, mask_n)

    in_specs = [_batched_spec(st3.shape), _batched_spec(te3.shape)]
    in_specs += [_full_spec(a.shape) for a in args[2:]]

    args_bytes = sum(int(np.prod(a.shape)) for a in args) * 4 + b * s_rows * 4
    kernel = functools.partial(
        _fused_forward_kernel,
        n_blocks=N_BLOCKS, hidden=HIDDEN, heads=HEADS, depth=DEPTH,
        out_scale=1.0 / math.sqrt(N_LAYERS * 1.0))

    eps = pl.pallas_call(
        kernel,
        out_shape=jax.ShapeDtypeStruct((b, s_rows, 1), jnp.float32),
        grid=(b,),
        in_specs=in_specs,
        out_specs=pl.BlockSpec((1, s_rows, 1), lambda i: (i, 0, 0)),
        compiler_params=pltpu.CompilerParams(dimension_semantics=("parallel",)),
        cost_estimate=_cost_estimate(b, s_rows, args_bytes),
    )(*args)
    return eps.reshape(b, n, d)


# ---------------------------------------------------------------------------
# Shared (XLA) input prep: preprocess / positional embedding
# ---------------------------------------------------------------------------
def positional_embedding(t, dim):
    # TODO(synk): PositionalEmbedding source not provided; standard sinusoidal
    # diffusion-timestep embedding (sin/cos halves with log-spaced freqs) assumed.
    half = dim // 2
    freqs = jnp.exp(-math.log(10000.0) * jnp.arange(half, dtype=jnp.float32) / half)
    args = t.astype(jnp.float32) * freqs[None, :]                     # [B, half]
    return jnp.concatenate([jnp.sin(args), jnp.cos(args)], axis=-1)   # [B, dim]


def preprocess(xt):
    # TODO(synk): `preprocess` source not provided; assumed it pairs each value of
    # xt with its (broadcast) sequence index -> st[b, i, j, :] = (xt[b, i, j], i).
    b, n, d = xt.shape
    yt = jnp.arange(n, dtype=xt.dtype)[None, :, None]                 # [1, N, 1]
    return jnp.stack([xt, jnp.broadcast_to(yt, (b, n, d))], axis=-1)  # [B, N, D, 2]


# ---------------------------------------------------------------------------
# Parameter preparation for the fused kernel (pure layout work, done once)
# ---------------------------------------------------------------------------
def prepare_pallas_params(params):
    def stack(fn):
        return jnp.stack([fn(blk) for blk in params["blocks"]], axis=0)

    def qkv_w(a):   # fused [2H, 3*2H] = [wq | wk | wv]
        return jnp.concatenate([a["wq"], a["wk"], a["wv"]], axis=1)

    def qkv_b(a):
        return jnp.concatenate([a["bq"], a["bk"], a["bv"]], axis=0).reshape(1, -1)

    return {
        "w1": params["w1"], "b1": params["b1"].reshape(1, -1),
        "w2": params["w2"], "b2": params["b2"].reshape(1, -1),
        "w3": params["w3"], "b3": params["b3"].reshape(1, -1),
        "w4row": params["w4"].reshape(1, -1),          # [H, 1] -> [1, H]
        "b4": params["b4"].reshape(1, 1),
        "wt": stack(lambda blk: blk["wt"]),
        "bt": stack(lambda blk: blk["bt"].reshape(1, -1)),
        "wrd": stack(lambda blk: blk["wd"]),
        "brd": stack(lambda blk: blk["bd"].reshape(1, -1)),
        "wrn": stack(lambda blk: blk["wn"]),
        "brn": stack(lambda blk: blk["bn"].reshape(1, -1)),
        "wqkv_d": stack(lambda blk: qkv_w(blk["attn_d"])),
        "bqkv_d": stack(lambda blk: qkv_b(blk["attn_d"])),
        "wqkv_n": stack(lambda blk: qkv_w(blk["attn_n"])),
        "bqkv_n": stack(lambda blk: qkv_b(blk["attn_n"])),
        "wo_d": stack(lambda blk: blk["attn_d"]["wo"]),
        "bo_d": stack(lambda blk: blk["attn_d"]["bo"].reshape(1, -1)),
        "wo_n": stack(lambda blk: blk["attn_n"]["wo"]),
        "bo_n": stack(lambda blk: blk["attn_n"]["bo"].reshape(1, -1)),
    }


# ---------------------------------------------------------------------------
# Pure-JAX reference implementation (HIGHEST precision, exact erf gelu)
# ---------------------------------------------------------------------------
def _ref_linear(x, w, bvec):
    return jnp.dot(x, w, precision=jax.lax.Precision.HIGHEST) + bvec[None, :]


def _ref_gelu(x):
    return jax.nn.gelu(x, approximate=False)


def _ref_mha(a, x):
    # TODO(synk): dot_product_attention source not provided; standard
    # softmax(QK^T / sqrt(depth)) V assumed.
    bb, s, dm = x.shape
    x2 = x.reshape(bb * s, dm)
    q = _ref_linear(x2, a["wq"], a["bq"]).reshape(bb, s, dm)
    k = _ref_linear(x2, a["wk"], a["bk"]).reshape(bb, s, dm)
    v = _ref_linear(x2, a["wv"], a["bv"]).reshape(bb, s, dm)

    def split(z):
        return z.reshape(bb, s, HEADS, DEPTH).transpose(0, 2, 1, 3)

    q, k, v = split(q), split(k), split(v)
    sc = jnp.einsum("bhqd,bhkd->bhqk", q, k,
                    precision=jax.lax.Precision.HIGHEST) / math.sqrt(DEPTH)
    p = jax.nn.softmax(sc, axis=-1)
    o = jnp.einsum("bhqk,bhkd->bhqd", p, v, precision=jax.lax.Precision.HIGHEST)
    o = o.transpose(0, 2, 1, 3).reshape(bb * s, dm)
    return _ref_linear(o, a["wo"], a["bo"]).reshape(bb, s, dm)


def _ref_block(blk, s, t):
    b, n, d, h = s.shape
    t_lin = _ref_linear(t, blk["wt"], blk["bt"])
    y = s + t_lin[:, None, None, :]
    y_d = _ref_linear(y.reshape(b * n * d, h), blk["wd"], blk["bd"]).reshape(b * n, d, 2 * h)
    y_r = jnp.transpose(y, (0, 2, 1, 3)).reshape(b * d * n, h)
    y_r = _ref_linear(y_r, blk["wn"], blk["bn"]).reshape(b * d, n, 2 * h)
    a_d = _ref_mha(blk["attn_d"], y_d).reshape(b, n, d, 2 * h)
    a_n = _ref_mha(blk["attn_n"], y_r).reshape(b, d, n, 2 * h).transpose(0, 2, 1, 3)
    yy = a_d + a_n
    residual = _ref_gelu(yy[..., :h])
    skip = _ref_gelu(yy[..., h:])
    return (s + residual) / math.sqrt(2.0), skip


def attention_model_ref(params, xt, t):
    b, n, d = xt.shape
    st = preprocess(xt).reshape(-1, 2)
    st = _ref_gelu(_ref_linear(st, params["w1"], params["b1"])).reshape(b, n, d, HIDDEN)
    te = positional_embedding(t, T_EMBED_DIM)
    te = _ref_linear(te, params["w2"], params["b2"])
    res, skip = _ref_block(params["blocks"][0], st, te)
    for blk in params["blocks"][1:]:
        res, sk = _ref_block(blk, res, te)
        skip = skip + sk
    eps = skip / math.sqrt(N_LAYERS * 1.0)
    eps = _ref_gelu(_ref_linear(eps.reshape(-1, HIDDEN), params["w3"], params["b3"]))
    eps = _ref_gelu(_ref_linear(eps, params["w4"], params["b4"]))
    return eps.reshape(b, n, d)


# ---------------------------------------------------------------------------
# Deterministic parameter init (PyTorch-Linear-like uniform init)
# ---------------------------------------------------------------------------
def _init_linear(key, fan_in, fan_out):
    kw, kb = jax.random.split(key)
    bound = 1.0 / math.sqrt(fan_in)
    w = jax.random.uniform(kw, (fan_in, fan_out), jnp.float32, -bound, bound)
    b = jax.random.uniform(kb, (fan_out,), jnp.float32, -bound, bound)
    return w, b


def init_params(key):
    n_linear = 4 + N_BLOCKS * (3 + 2 * 4)
    keys = iter(jax.random.split(key, n_linear))
    lin = lambda fi, fo: _init_linear(next(keys), fi, fo)
    p = {}
    p["w1"], p["b1"] = lin(2, HIDDEN)
    p["w2"], p["b2"] = lin(T_EMBED_DIM, HIDDEN)
    p["w3"], p["b3"] = lin(HIDDEN, HIDDEN)
    p["w4"], p["b4"] = lin(HIDDEN, 1)
    blocks = []
    for _ in range(N_BLOCKS):
        blk = {}
        blk["wd"], blk["bd"] = lin(HIDDEN, D_MODEL)
        blk["wn"], blk["bn"] = lin(HIDDEN, D_MODEL)
        blk["wt"], blk["bt"] = lin(HIDDEN, HIDDEN)
        for name in ("attn_d", "attn_n"):
            a = {}
            a["wq"], a["bq"] = lin(D_MODEL, D_MODEL)
            a["wk"], a["bk"] = lin(D_MODEL, D_MODEL)
            a["wv"], a["bv"] = lin(D_MODEL, D_MODEL)
            a["wo"], a["bo"] = lin(D_MODEL, D_MODEL)
            blk[name] = a
        blocks.append(blk)
    p["blocks"] = blocks
    return p


if __name__ == "__main__":
    key = jax.random.PRNGKey(0)
    kp, kx, kt = jax.random.split(key, 3)
    params = init_params(kp)
    pp = prepare_pallas_params(params)

    B, N, D = 2, 8, 4
    xt = jax.random.normal(kx, (B, N, D), jnp.float32)
    t = jax.random.uniform(kt, (B, 1), jnp.float32, 0.0, 1.0)

    fwd_pallas = jax.jit(attention_model_pallas)
    fwd_ref = jax.jit(attention_model_ref)

    out = jax.block_until_ready(fwd_pallas(pp, xt, t))
    ref = jax.block_until_ready(fwd_ref(params, xt, t))

    assert out.shape == (B, N, D), out.shape
    assert bool(jnp.all(jnp.isfinite(out)))
    assert bool(jnp.allclose(out, ref, rtol=2e-2, atol=2e-2)), \
        float(jnp.max(jnp.abs(out - ref)))
    print("KERNEL_OK")
</pallas_src>

<mosaic_0001>
module attributes {stable_mosaic.version = 11 : i64} {
  func.func @_fused_forward_kernel(%arg0: i32, %arg1: memref<1x32x2xf32, #tpu.memory_space<vmem>>, %arg2: memref<1x1x128xf32, #tpu.memory_space<vmem>>, %arg3: memref<2x32xf32, #tpu.memory_space<vmem>>, %arg4: memref<1x32xf32, #tpu.memory_space<vmem>>, %arg5: memref<128x32xf32, #tpu.memory_space<vmem>>, %arg6: memref<1x32xf32, #tpu.memory_space<vmem>>, %arg7: memref<3x32x32xf32, #tpu.memory_space<vmem>>, %arg8: memref<3x1x32xf32, #tpu.memory_space<vmem>>, %arg9: memref<3x32x64xf32, #tpu.memory_space<vmem>>, %arg10: memref<3x1x64xf32, #tpu.memory_space<vmem>>, %arg11: memref<3x32x64xf32, #tpu.memory_space<vmem>>, %arg12: memref<3x1x64xf32, #tpu.memory_space<vmem>>, %arg13: memref<3x64x192xf32, #tpu.memory_space<vmem>>, %arg14: memref<3x1x192xf32, #tpu.memory_space<vmem>>, %arg15: memref<3x64x192xf32, #tpu.memory_space<vmem>>, %arg16: memref<3x1x192xf32, #tpu.memory_space<vmem>>, %arg17: memref<3x64x64xf32, #tpu.memory_space<vmem>>, %arg18: memref<3x1x64xf32, #tpu.memory_space<vmem>>, %arg19: memref<3x64x64xf32, #tpu.memory_space<vmem>>, %arg20: memref<3x1x64xf32, #tpu.memory_space<vmem>>, %arg21: memref<32x32xf32, #tpu.memory_space<vmem>>, %arg22: memref<1x32xf32, #tpu.memory_space<vmem>>, %arg23: memref<1x32xf32, #tpu.memory_space<vmem>>, %arg24: memref<1x1xf32, #tpu.memory_space<vmem>>, %arg25: memref<32x32xf32, #tpu.memory_space<vmem>>, %arg26: memref<32x32xf32, #tpu.memory_space<vmem>>, %arg27: memref<32x32xf32, #tpu.memory_space<vmem>>, %arg28: memref<32x32xf32, #tpu.memory_space<vmem>>, %arg29: memref<1x32x1xf32, #tpu.memory_space<vmem>>) attributes {dimension_semantics = [#tpu.dimension_semantics<parallel>], iteration_bounds = array<i64: 2>, scalar_prefetch = 0 : i64, scratch_operands = 0 : i64, tpu.core_type = #tpu.core_type<tc>, window_params = [{transform_indices = @transform_0, window_bounds = array<i64: 1, 32, 2>}, {transform_indices = @transform_1, window_bounds = array<i64: 1, 1, 128>}, {pipeline_mode = #tpu.pipeline_mode<synchronous>, transform_indices = @transform_2, window_bounds = array<i64: 2, 32>}, {pipeline_mode = #tpu.pipeline_mode<synchronous>, transform_indices = @transform_3, window_bounds = array<i64: 1, 32>}, {pipeline_mode = #tpu.pipeline_mode<synchronous>, transform_indices = @transform_4, window_bounds = array<i64: 128, 32>}, {pipeline_mode = #tpu.pipeline_mode<synchronous>, transform_indices = @transform_5, window_bounds = array<i64: 1, 32>}, {pipeline_mode = #tpu.pipeline_mode<synchronous>, transform_indices = @transform_6, window_bounds = array<i64: 3, 32, 32>}, {pipeline_mode = #tpu.pipeline_mode<synchronous>, transform_indices = @transform_7, window_bounds = array<i64: 3, 1, 32>}, {pipeline_mode = #tpu.pipeline_mode<synchronous>, transform_indices = @transform_8, window_bounds = array<i64: 3, 32, 64>}, {pipeline_mode = #tpu.pipeline_mode<synchronous>, transform_indices = @transform_9, window_bounds = array<i64: 3, 1, 64>}, {pipeline_mode = #tpu.pipeline_mode<synchronous>, transform_indices = @transform_10, window_bounds = array<i64: 3, 32, 64>}, {pipeline_mode = #tpu.pipeline_mode<synchronous>, transform_indices = @transform_11, window_bounds = array<i64: 3, 1, 64>}, {pipeline_mode = #tpu.pipeline_mode<synchronous>, transform_indices = @transform_12, window_bounds = array<i64: 3, 64, 192>}, {pipeline_mode = #tpu.pipeline_mode<synchronous>, transform_indices = @transform_13, window_bounds = array<i64: 3, 1, 192>}, {pipeline_mode = #tpu.pipeline_mode<synchronous>, transform_indices = @transform_14, window_bounds = array<i64: 3, 64, 192>}, {pipeline_mode = #tpu.pipeline_mode<synchronous>, transform_indices = @transform_15, window_bounds = array<i64: 3, 1, 192>}, {pipeline_mode = #tpu.pipeline_mode<synchronous>, transform_indices = @transform_16, window_bounds = array<i64: 3, 64, 64>}, {pipeline_mode = #tpu.pipeline_mode<synchronous>, transform_indices = @transform_17, window_bounds = array<i64: 3, 1, 64>}, {pipeline_mode = #tpu.pipeline_mode<synchronous>, transform_indices = @transform_18, window_bounds = array<i64: 3, 64, 64>}, {pipeline_mode = #tpu.pipeline_mode<synchronous>, transform_indices = @transform_19, window_bounds = array<i64: 3, 1, 64>}, {pipeline_mode = #tpu.pipeline_mode<synchronous>, transform_indices = @transform_20, window_bounds = array<i64: 32, 32>}, {pipeline_mode = #tpu.pipeline_mode<synchronous>, transform_indices = @transform_21, window_bounds = array<i64: 1, 32>}, {pipeline_mode = #tpu.pipeline_mode<synchronous>, transform_indices = @transform_22, window_bounds = array<i64: 1, 32>}, {pipeline_mode = #tpu.pipeline_mode<synchronous>, transform_indices = @transform_23, window_bounds = array<i64: 1, 1>}, {pipeline_mode = #tpu.pipeline_mode<synchronous>, transform_indices = @transform_24, window_bounds = array<i64: 32, 32>}, {pipeline_mode = #tpu.pipeline_mode<synchronous>, transform_indices = @transform_25, window_bounds = array<i64: 32, 32>}, {pipeline_mode = #tpu.pipeline_mode<synchronous>, transform_indices = @transform_26, window_bounds = array<i64: 32, 32>}, {pipeline_mode = #tpu.pipeline_mode<synchronous>, transform_indices = @transform_27, window_bounds = array<i64: 32, 32>}, {transform_indices = @transform_28, window_bounds = array<i64: 1, 32, 1>}]} {
    %c0 = arith.constant 0 : index
    %c0_0 = arith.constant 0 : index
    %c0_1 = arith.constant 0 : index
    %0 = vector.load %arg1[%c0, %c0_0, %c0_1] : memref<1x32x2xf32, #tpu.memory_space<vmem>>, vector<1x32x2xf32>
    %1 = vector.shape_cast %0 : vector<1x32x2xf32> to vector<32x2xf32>
    %c0_2 = arith.constant 0 : index
    %c0_3 = arith.constant 0 : index
    %2 = vector.load %arg3[%c0_2, %c0_3] : memref<2x32xf32, #tpu.memory_space<vmem>>, vector<2x32xf32>
    %cst = arith.constant dense<0.000000e+00> : vector<32x32xf32>
    %3 = tpu.matmul %1, %2, %cst {dimension_numbers = #tpu.dot_dimension_numbers<[1], [0], [0], [1], [0, 0, 1, 1], [], []>} : vector<32x2xf32>, vector<2x32xf32>, vector<32x32xf32> -> vector<32x32xf32>
    %c0_4 = arith.constant 0 : index
    %c0_5 = arith.constant 0 : index
    %4 = vector.load %arg4[%c0_4, %c0_5] : memref<1x32xf32, #tpu.memory_space<vmem>>, vector<1x32xf32>
    %5 = vector.broadcast %4 : vector<1x32xf32> to vector<32x32xf32>
    %6 = arith.addf %3, %5 : vector<32x32xf32>
    %cst_6 = arith.constant 5.000000e-01 : f32
    %7 = vector.broadcast %cst_6 : f32 to vector<32x32xf32>
    %8 = arith.mulf %7, %6 : vector<32x32xf32>
    %cst_7 = arith.constant 0.707106769 : f32
    %9 = vector.broadcast %cst_7 : f32 to vector<32x32xf32>
    %10 = arith.mulf %6, %9 : vector<32x32xf32>
    %cst_8 = arith.constant 0.000000e+00 : f32
    %11 = vector.broadcast %cst_8 : f32 to vector<32x32xf32>
    %12 = arith.cmpf olt, %10, %11 : vector<32x32xf32>
    %cst_9 = arith.constant -1.000000e+00 : f32
    %cst_10 = arith.constant 1.000000e+00 : f32
    %13 = vector.broadcast %cst_9 : f32 to vector<32x32xf32>
    %14 = vector.broadcast %cst_10 : f32 to vector<32x32xf32>
    %15 = arith.select %12, %13, %14 : vector<32x32xi1>, vector<32x32xf32>
    %16 = math.absf %10 : vector<32x32xf32>
    %cst_11 = arith.constant 0.327591091 : f32
    %17 = vector.broadcast %cst_11 : f32 to vector<32x32xf32>
    %18 = arith.mulf %17, %16 : vector<32x32xf32>
    %cst_12 = arith.constant 1.000000e+00 : f32
    %19 = vector.broadcast %cst_12 : f32 to vector<32x32xf32>
    %20 = arith.addf %19, %18 : vector<32x32xf32>
    %21 = tpu.reciprocal %20 {approx = true} : vector<32x32xf32> -> vector<32x32xf32>
    %cst_13 = arith.constant 1.06140542 : f32
    %22 = vector.broadcast %cst_13 : f32 to vector<32x32xf32>
    %23 = arith.mulf %22, %21 : vector<32x32xf32>
    %cst_14 = arith.constant -1.45315206 : f32
    %24 = vector.broadcast %cst_14 : f32 to vector<32x32xf32>
    %25 = arith.addf %23, %24 : vector<32x32xf32>
    %26 = arith.mulf %25, %21 : vector<32x32xf32>
    %cst_15 = arith.constant 1.42141378 : f32
    %27 = vector.broadcast %cst_15 : f32 to vector<32x32xf32>
    %28 = arith.addf %26, %27 : vector<32x32xf32>
    %29 = arith.mulf %28, %21 : vector<32x32xf32>
    %cst_16 = arith.constant -0.284496725 : f32
    %30 = vector.broadcast %cst_16 : f32 to vector<32x32xf32>
    %31 = arith.addf %29, %30 : vector<32x32xf32>
    %32 = arith.mulf %31, %21 : vector<32x32xf32>
    %cst_17 = arith.constant 0.254829586 : f32
    %33 = vector.broadcast %cst_17 : f32 to vector<32x32xf32>
    %34 = arith.addf %32, %33 : vector<32x32xf32>
    %35 = arith.mulf %34, %21 : vector<32x32xf32>
    %cst_18 = arith.constant 0.000000e+00 : f32
    %36 = vector.broadcast %cst_18 : f32 to vector<32x32xf32>
    %37 = arith.subf %36, %16 : vector<32x32xf32>
    %38 = arith.mulf %37, %16 : vector<32x32xf32>
    %39 = math.exp %38 : vector<32x32xf32>
    %40 = arith.mulf %35, %39 : vector<32x32xf32>
    %cst_19 = arith.constant 1.000000e+00 : f32
    %41 = vector.broadcast %cst_19 : f32 to vector<32x32xf32>
    %42 = arith.subf %41, %40 : vector<32x32xf32>
    %43 = arith.mulf %15, %42 : vector<32x32xf32>
    %cst_20 = arith.constant 1.000000e+00 : f32
    %44 = vector.broadcast %cst_20 : f32 to vector<32x32xf32>
    %45 = arith.addf %44, %43 : vector<32x32xf32>
    %46 = arith.mulf %8, %45 : vector<32x32xf32>
    %c0_21 = arith.constant 0 : index
    %c0_22 = arith.constant 0 : index
    %c0_23 = arith.constant 0 : index
    %47 = vector.load %arg2[%c0_21, %c0_22, %c0_23] : memref<1x1x128xf32, #tpu.memory_space<vmem>>, vector<1x1x128xf32>
    %48 = vector.shape_cast %47 : vector<1x1x128xf32> to vector<1x128xf32>
    %c0_24 = arith.constant 0 : index
    %c0_25 = arith.constant 0 : index
    %49 = vector.load %arg5[%c0_24, %c0_25] : memref<128x32xf32, #tpu.memory_space<vmem>>, vector<128x32xf32>
    %cst_26 = arith.constant dense<0.000000e+00> : vector<1x32xf32>
    %50 = tpu.matmul %48, %49, %cst_26 {dimension_numbers = #tpu.dot_dimension_numbers<[1], [0], [0], [1], [0, 0, 1, 1], [], []>} : vector<1x128xf32>, vector<128x32xf32>, vector<1x32xf32> -> vector<1x32xf32>
    %c0_27 = arith.constant 0 : index
    %c0_28 = arith.constant 0 : index
    %51 = vector.load %arg6[%c0_27, %c0_28] : memref<1x32xf32, #tpu.memory_space<vmem>>, vector<1x32xf32>
    %52 = arith.addf %50, %51 : vector<1x32xf32>
    %c0_29 = arith.constant 0 : index
    %c0_30 = arith.constant 0 : index
    %53 = vector.load %arg25[%c0_29, %c0_30] : memref<32x32xf32, #tpu.memory_space<vmem>>, vector<32x32xf32>
    %c0_31 = arith.constant 0 : index
    %c0_32 = arith.constant 0 : index
    %54 = vector.load %arg26[%c0_31, %c0_32] : memref<32x32xf32, #tpu.memory_space<vmem>>, vector<32x32xf32>
    %c0_33 = arith.constant 0 : index
    %c0_34 = arith.constant 0 : index
    %55 = vector.load %arg27[%c0_33, %c0_34] : memref<32x32xf32, #tpu.memory_space<vmem>>, vector<32x32xf32>
    %c0_35 = arith.constant 0 : index
    %c0_36 = arith.constant 0 : index
    %56 = vector.load %arg28[%c0_35, %c0_36] : memref<32x32xf32, #tpu.memory_space<vmem>>, vector<32x32xf32>
    %cst_37 = arith.constant 0.000000e+00 : f32
    %57 = vector.broadcast %cst_37 : f32 to vector<32x32xf32>
    %c0_38 = arith.constant 0 : index
    %c0_39 = arith.constant 0 : index
    %c0_40 = arith.constant 0 : index
    %58 = vector.load %arg7[%c0_38, %c0_39, %c0_40] : memref<3x32x32xf32, #tpu.memory_space<vmem>>, vector<1x32x32xf32>
    %59 = vector.shape_cast %58 : vector<1x32x32xf32> to vector<32x32xf32>
    %cst_41 = arith.constant dense<0.000000e+00> : vector<1x32xf32>
    %60 = tpu.matmul %52, %59, %cst_41 {dimension_numbers = #tpu.dot_dimension_numbers<[1], [0], [0], [1], [0, 0, 1, 1], [], []>} : vector<1x32xf32>, vector<32x32xf32>, vector<1x32xf32> -> vector<1x32xf32>
    %c0_42 = arith.constant 0 : index
    %c0_43 = arith.constant 0 : index
    %c0_44 = arith.constant 0 : index
    %61 = vector.load %arg8[%c0_42, %c0_43, %c0_44] : memref<3x1x32xf32, #tpu.memory_space<vmem>>, vector<1x1x32xf32>
    %62 = vector.shape_cast %61 : vector<1x1x32xf32> to vector<1x32xf32>
    %63 = arith.addf %60, %62 : vector<1x32xf32>
    %64 = vector.broadcast %63 : vector<1x32xf32> to vector<32x32xf32>
    %65 = arith.addf %46, %64 : vector<32x32xf32>
    %cst_45 = arith.constant dense<0.000000e+00> : vector<32x32xf32>
    %66 = tpu.matmul %53, %65, %cst_45 {dimension_numbers = #tpu.dot_dimension_numbers<[1], [0], [0], [1], [0, 0, 1, 1], [], []>} : vector<32x32xf32>, vector<32x32xf32>, vector<32x32xf32> -> vector<32x32xf32>
    %c0_46 = arith.constant 0 : index
    %c0_47 = arith.constant 0 : index
    %c0_48 = arith.constant 0 : index
    %67 = vector.load %arg9[%c0_46, %c0_47, %c0_48] : memref<3x32x64xf32, #tpu.memory_space<vmem>>, vector<1x32x64xf32>
    %68 = vector.shape_cast %67 : vector<1x32x64xf32> to vector<32x64xf32>
    %cst_49 = arith.constant dense<0.000000e+00> : vector<32x64xf32>
    %69 = tpu.matmul %65, %68, %cst_49 {dimension_numbers = #tpu.dot_dimension_numbers<[1], [0], [0], [1], [0, 0, 1, 1], [], []>} : vector<32x32xf32>, vector<32x64xf32>, vector<32x64xf32> -> vector<32x64xf32>
    %c0_50 = arith.constant 0 : index
    %c0_51 = arith.constant 0 : index
    %c0_52 = arith.constant 0 : index
    %70 = vector.load %arg10[%c0_50, %c0_51, %c0_52] : memref<3x1x64xf32, #tpu.memory_space<vmem>>, vector<1x1x64xf32>
    %71 = vector.shape_cast %70 : vector<1x1x64xf32> to vector<1x64xf32>
    %72 = vector.broadcast %71 : vector<1x64xf32> to vector<32x64xf32>
    %73 = arith.addf %69, %72 : vector<32x64xf32>
    %c0_53 = arith.constant 0 : index
    %c0_54 = arith.constant 0 : index
    %c0_55 = arith.constant 0 : index
    %74 = vector.load %arg11[%c0_53, %c0_54, %c0_55] : memref<3x32x64xf32, #tpu.memory_space<vmem>>, vector<1x32x64xf32>
    %75 = vector.shape_cast %74 : vector<1x32x64xf32> to vector<32x64xf32>
    %cst_56 = arith.constant dense<0.000000e+00> : vector<32x64xf32>
    %76 = tpu.matmul %66, %75, %cst_56 {dimension_numbers = #tpu.dot_dimension_numbers<[1], [0], [0], [1], [0, 0, 1, 1], [], []>} : vector<32x32xf32>, vector<32x64xf32>, vector<32x64xf32> -> vector<32x64xf32>
    %c0_57 = arith.constant 0 : index
    %c0_58 = arith.constant 0 : index
    %c0_59 = arith.constant 0 : index
    %77 = vector.load %arg12[%c0_57, %c0_58, %c0_59] : memref<3x1x64xf32, #tpu.memory_space<vmem>>, vector<1x1x64xf32>
    %78 = vector.shape_cast %77 : vector<1x1x64xf32> to vector<1x64xf32>
    %79 = vector.broadcast %78 : vector<1x64xf32> to vector<32x64xf32>
    %80 = arith.addf %76, %79 : vector<32x64xf32>
    %c0_60 = arith.constant 0 : index
    %c0_61 = arith.constant 0 : index
    %c0_62 = arith.constant 0 : index
    %81 = vector.load %arg13[%c0_60, %c0_61, %c0_62] : memref<3x64x192xf32, #tpu.memory_space<vmem>>, vector<1x64x192xf32>
    %82 = vector.shape_cast %81 : vector<1x64x192xf32> to vector<64x192xf32>
    %c0_63 = arith.constant 0 : index
    %c0_64 = arith.constant 0 : index
    %c0_65 = arith.constant 0 : index
    %83 = vector.load %arg14[%c0_63, %c0_64, %c0_65] : memref<3x1x192xf32, #tpu.memory_space<vmem>>, vector<1x1x192xf32>
    %84 = vector.shape_cast %83 : vector<1x1x192xf32> to vector<1x192xf32>
    %c0_66 = arith.constant 0 : index
    %c0_67 = arith.constant 0 : index
    %c0_68 = arith.constant 0 : index
    %85 = vector.load %arg17[%c0_66, %c0_67, %c0_68] : memref<3x64x64xf32, #tpu.memory_space<vmem>>, vector<1x64x64xf32>
    %86 = vector.shape_cast %85 : vector<1x64x64xf32> to vector<64x64xf32>
    %c0_69 = arith.constant 0 : index
    %c0_70 = arith.constant 0 : index
    %c0_71 = arith.constant 0 : index
    %87 = vector.load %arg18[%c0_69, %c0_70, %c0_71] : memref<3x1x64xf32, #tpu.memory_space<vmem>>, vector<1x1x64xf32>
    %88 = vector.shape_cast %87 : vector<1x1x64xf32> to vector<1x64xf32>
    %cst_72 = arith.constant dense<0.000000e+00> : vector<32x192xf32>
    %89 = tpu.matmul %73, %82, %cst_72 {dimension_numbers = #tpu.dot_dimension_numbers<[1], [0], [0], [1], [0, 0, 1, 1], [], []>} : vector<32x64xf32>, vector<64x192xf32>, vector<32x192xf32> -> vector<32x192xf32>
    %90 = vector.broadcast %84 : vector<1x192xf32> to vector<32x192xf32>
    %91 = arith.addf %89, %90 : vector<32x192xf32>
    %92 = vector.extract_strided_slice %91 {offsets = [0, 0], sizes = [32, 16], strides = [1, 1]} : vector<32x192xf32> to vector<32x16xf32>
    %93 = vector.extract_strided_slice %91 {offsets = [0, 64], sizes = [32, 16], strides = [1, 1]} : vector<32x192xf32> to vector<32x16xf32>
    %94 = vector.extract_strided_slice %91 {offsets = [0, 128], sizes = [32, 16], strides = [1, 1]} : vector<32x192xf32> to vector<32x16xf32>
    "tpu.trace_start"() <{level = 10 : i32, message = "qd,kd->qk"}> : () -> ()
    %cst_73 = arith.constant dense<0.000000e+00> : vector<32x32xf32>
    %95 = tpu.matmul %92, %93, %cst_73 {dimension_numbers = #tpu.dot_dimension_numbers<[1], [1], [0], [0], [0, 0, 1, 0], [], []>} : vector<32x16xf32>, vector<32x16xf32>, vector<32x32xf32> -> vector<32x32xf32>
    "tpu.trace_stop"() : () -> ()
    %cst_74 = arith.constant 2.500000e-01 : f32
    %96 = vector.broadcast %cst_74 : f32 to vector<32x32xf32>
    %97 = arith.mulf %95, %96 : vector<32x32xf32>
    %98 = arith.addf %97, %55 : vector<32x32xf32>
    %cst_75 = arith.constant dense<0xFF800000> : vector<32xf32>
    %99 = vector.multi_reduction <maximumf>, %98, %cst_75 [1] : vector<32x32xf32> to vector<32xf32>
    %100 = vector.shape_cast %99 : vector<32xf32> to vector<32x1xf32>
    %101 = vector.broadcast %100 : vector<32x1xf32> to vector<32x32xf32>
    %102 = arith.subf %98, %101 : vector<32x32xf32>
    %103 = math.exp %102 : vector<32x32xf32>
    %cst_76 = arith.constant dense<0.000000e+00> : vector<32xf32>
    %104 = vector.multi_reduction <add>, %103, %cst_76 [1] : vector<32x32xf32> to vector<32xf32>
    %105 = vector.shape_cast %104 : vector<32xf32> to vector<32x1xf32>
    %106 = tpu.reciprocal %105 {approx = true} : vector<32x1xf32> -> vector<32x1xf32>
    %107 = vector.broadcast %106 : vector<32x1xf32> to vector<32x32xf32>
    %108 = arith.mulf %103, %107 : vector<32x32xf32>
    %cst_77 = arith.constant dense<0.000000e+00> : vector<32x16xf32>
    %109 = tpu.matmul %108, %94, %cst_77 {dimension_numbers = #tpu.dot_dimension_numbers<[1], [0], [0], [1], [0, 0, 1, 1], [], []>} : vector<32x32xf32>, vector<32x16xf32>, vector<32x16xf32> -> vector<32x16xf32>
    %110 = vector.extract_strided_slice %91 {offsets = [0, 16], sizes = [32, 16], strides = [1, 1]} : vector<32x192xf32> to vector<32x16xf32>
    %111 = vector.extract_strided_slice %91 {offsets = [0, 80], sizes = [32, 16], strides = [1, 1]} : vector<32x192xf32> to vector<32x16xf32>
    %112 = vector.extract_strided_slice %91 {offsets = [0, 144], sizes = [32, 16], strides = [1, 1]} : vector<32x192xf32> to vector<32x16xf32>
    "tpu.trace_start"() <{level = 10 : i32, message = "qd,kd->qk"}> : () -> ()
    %cst_78 = arith.constant dense<0.000000e+00> : vector<32x32xf32>
    %113 = tpu.matmul %110, %111, %cst_78 {dimension_numbers = #tpu.dot_dimension_numbers<[1], [1], [0], [0], [0, 0, 1, 0], [], []>} : vector<32x16xf32>, vector<32x16xf32>, vector<32x32xf32> -> vector<32x32xf32>
    "tpu.trace_stop"() : () -> ()
    %cst_79 = arith.constant 2.500000e-01 : f32
    %114 = vector.broadcast %cst_79 : f32 to vector<32x32xf32>
    %115 = arith.mulf %113, %114 : vector<32x32xf32>
    %116 = arith.addf %115, %55 : vector<32x32xf32>
    %cst_80 = arith.constant dense<0xFF800000> : vector<32xf32>
    %117 = vector.multi_reduction <maximumf>, %116, %cst_80 [1] : vector<32x32xf32> to vector<32xf32>
    %118 = vector.shape_cast %117 : vector<32xf32> to vector<32x1xf32>
    %119 = vector.broadcast %118 : vector<32x1xf32> to vector<32x32xf32>
    %120 = arith.subf %116, %119 : vector<32x32xf32>
    %121 = math.exp %120 : vector<32x32xf32>
    %cst_81 = arith.constant dense<0.000000e+00> : vector<32xf32>
    %122 = vector.multi_reduction <add>, %121, %cst_81 [1] : vector<32x32xf32> to vector<32xf32>
    %123 = vector.shape_cast %122 : vector<32xf32> to vector<32x1xf32>
    %124 = tpu.reciprocal %123 {approx = true} : vector<32x1xf32> -> vector<32x1xf32>
    %125 = vector.broadcast %124 : vector<32x1xf32> to vector<32x32xf32>
    %126 = arith.mulf %121, %125 : vector<32x32xf32>
    %cst_82 = arith.constant dense<0.000000e+00> : vector<32x16xf32>
    %127 = tpu.matmul %126, %112, %cst_82 {dimension_numbers = #tpu.dot_dimension_numbers<[1], [0], [0], [1], [0, 0, 1, 1], [], []>} : vector<32x32xf32>, vector<32x16xf32>, vector<32x16xf32> -> vector<32x16xf32>
    %128 = vector.extract_strided_slice %91 {offsets = [0, 32], sizes = [32, 16], strides = [1, 1]} : vector<32x192xf32> to vector<32x16xf32>
    %129 = vector.extract_strided_slice %91 {offsets = [0, 96], sizes = [32, 16], strides = [1, 1]} : vector<32x192xf32> to vector<32x16xf32>
    %130 = vector.extract_strided_slice %91 {offsets = [0, 160], sizes = [32, 16], strides = [1, 1]} : vector<32x192xf32> to vector<32x16xf32>
    "tpu.trace_start"() <{level = 10 : i32, message = "qd,kd->qk"}> : () -> ()
    %cst_83 = arith.constant dense<0.000000e+00> : vector<32x32xf32>
    %131 = tpu.matmul %128, %129, %cst_83 {dimension_numbers = #tpu.dot_dimension_numbers<[1], [1], [0], [0], [0, 0, 1, 0], [], []>} : vector<32x16xf32>, vector<32x16xf32>, vector<32x32xf32> -> vector<32x32xf32>
    "tpu.trace_stop"() : () -> ()
    %cst_84 = arith.constant 2.500000e-01 : f32
    %132 = vector.broadcast %cst_84 : f32 to vector<32x32xf32>
    %133 = arith.mulf %131, %132 : vector<32x32xf32>
    %134 = arith.addf %133, %55 : vector<32x32xf32>
    %cst_85 = arith.constant dense<0xFF800000> : vector<32xf32>
    %135 = vector.multi_reduction <maximumf>, %134, %cst_85 [1] : vector<32x32xf32> to vector<32xf32>
    %136 = vector.shape_cast %135 : vector<32xf32> to vector<32x1xf32>
    %137 = vector.broadcast %136 : vector<32x1xf32> to vector<32x32xf32>
    %138 = arith.subf %134, %137 : vector<32x32xf32>
    %139 = math.exp %138 : vector<32x32xf32>
    %cst_86 = arith.constant dense<0.000000e+00> : vector<32xf32>
    %140 = vector.multi_reduction <add>, %139, %cst_86 [1] : vector<32x32xf32> to vector<32xf32>
    %141 = vector.shape_cast %140 : vector<32xf32> to vector<32x1xf32>
    %142 = tpu.reciprocal %141 {approx = true} : vector<32x1xf32> -> vector<32x1xf32>
    %143 = vector.broadcast %142 : vector<32x1xf32> to vector<32x32xf32>
    %144 = arith.mulf %139, %143 : vector<32x32xf32>
    %cst_87 = arith.constant dense<0.000000e+00> : vector<32x16xf32>
    %145 = tpu.matmul %144, %130, %cst_87 {dimension_numbers = #tpu.dot_dimension_numbers<[1], [0], [0], [1], [0, 0, 1, 1], [], []>} : vector<32x32xf32>, vector<32x16xf32>, vector<32x16xf32> -> vector<32x16xf32>
    %146 = vector.extract_strided_slice %91 {offsets = [0, 48], sizes = [32, 16], strides = [1, 1]} : vector<32x192xf32> to vector<32x16xf32>
    %147 = vector.extract_strided_slice %91 {offsets = [0, 112], sizes = [32, 16], strides = [1, 1]} : vector<32x192xf32> to vector<32x16xf32>
    %148 = vector.extract_strided_slice %91 {offsets = [0, 176], sizes = [32, 16], strides = [1, 1]} : vector<32x192xf32> to vector<32x16xf32>
    "tpu.trace_start"() <{level = 10 : i32, message = "qd,kd->qk"}> : () -> ()
    %cst_88 = arith.constant dense<0.000000e+00> : vector<32x32xf32>
    %149 = tpu.matmul %146, %147, %cst_88 {dimension_numbers = #tpu.dot_dimension_numbers<[1], [1], [0], [0], [0, 0, 1, 0], [], []>} : vector<32x16xf32>, vector<32x16xf32>, vector<32x32xf32> -> vector<32x32xf32>
    "tpu.trace_stop"() : () -> ()
    %cst_89 = arith.constant 2.500000e-01 : f32
    %150 = vector.broadcast %cst_89 : f32 to vector<32x32xf32>
    %151 = arith.mulf %149, %150 : vector<32x32xf32>
    %152 = arith.addf %151, %55 : vector<32x32xf32>
    %cst_90 = arith.constant dense<0xFF800000> : vector<32xf32>
    %153 = vector.multi_reduction <maximumf>, %152, %cst_90 [1] : vector<32x32xf32> to vector<32xf32>
    %154 = vector.shape_cast %153 : vector<32xf32> to vector<32x1xf32>
    %155 = vector.broadcast %154 : vector<32x1xf32> to vector<32x32xf32>
    %156 = arith.subf %152, %155 : vector<32x32xf32>
    %157 = math.exp %156 : vector<32x32xf32>
    %cst_91 = arith.constant dense<0.000000e+00> : vector<32xf32>
    %158 = vector.multi_reduction <add>, %157, %cst_91 [1] : vector<32x32xf32> to vector<32xf32>
    %159 = vector.shape_cast %158 : vector<32xf32> to vector<32x1xf32>
    %160 = tpu.reciprocal %159 {approx = true} : vector<32x1xf32> -> vector<32x1xf32>
    %161 = vector.broadcast %160 : vector<32x1xf32> to vector<32x32xf32>
    %162 = arith.mulf %157, %161 : vector<32x32xf32>
    %cst_92 = arith.constant dense<0.000000e+00> : vector<32x16xf32>
    %163 = tpu.matmul %162, %148, %cst_92 {dimension_numbers = #tpu.dot_dimension_numbers<[1], [0], [0], [1], [0, 0, 1, 1], [], []>} : vector<32x32xf32>, vector<32x16xf32>, vector<32x16xf32> -> vector<32x16xf32>
    %164 = tpu.concatenate %109, %127, %145, %163 in 1 : vector<32x16xf32>, vector<32x16xf32>, vector<32x16xf32>, vector<32x16xf32> -> vector<32x64xf32>
    %cst_93 = arith.constant dense<0.000000e+00> : vector<32x64xf32>
    %165 = tpu.matmul %164, %86, %cst_93 {dimension_numbers = #tpu.dot_dimension_numbers<[1], [0], [0], [1], [0, 0, 1, 1], [], []>} : vector<32x64xf32>, vector<64x64xf32>, vector<32x64xf32> -> vector<32x64xf32>
    %166 = vector.broadcast %88 : vector<1x64xf32> to vector<32x64xf32>
    %167 = arith.addf %165, %166 : vector<32x64xf32>
    %c0_94 = arith.constant 0 : index
    %c0_95 = arith.constant 0 : index
    %c0_96 = arith.constant 0 : index
    %168 = vector.load %arg15[%c0_94, %c0_95, %c0_96] : memref<3x64x192xf32, #tpu.memory_space<vmem>>, vector<1x64x192xf32>
    %169 = vector.shape_cast %168 : vector<1x64x192xf32> to vector<64x192xf32>
    %c0_97 = arith.constant 0 : index
    %c0_98 = arith.constant 0 : index
    %c0_99 = arith.constant 0 : index
    %170 = vector.load %arg16[%c0_97, %c0_98, %c0_99] : memref<3x1x192xf32, #tpu.memory_space<vmem>>, vector<1x1x192xf32>
    %171 = vector.shape_cast %170 : vector<1x1x192xf32> to vector<1x192xf32>
    %c0_100 = arith.constant 0 : index
    %c0_101 = arith.constant 0 : index
    %c0_102 = arith.constant 0 : index
    %172 = vector.load %arg19[%c0_100, %c0_101, %c0_102] : memref<3x64x64xf32, #tpu.memory_space<vmem>>, vector<1x64x64xf32>
    %173 = vector.shape_cast %172 : vector<1x64x64xf32> to vector<64x64xf32>
    %c0_103 = arith.constant 0 : index
    %c0_104 = arith.constant 0 : index
    %c0_105 = arith.constant 0 : index
    %174 = vector.load %arg20[%c0_103, %c0_104, %c0_105] : memref<3x1x64xf32, #tpu.memory_space<vmem>>, vector<1x1x64xf32>
    %175 = vector.shape_cast %174 : vector<1x1x64xf32> to vector<1x64xf32>
    %cst_106 = arith.constant dense<0.000000e+00> : vector<32x192xf32>
    %176 = tpu.matmul %80, %169, %cst_106 {dimension_numbers = #tpu.dot_dimension_numbers<[1], [0], [0], [1], [0, 0, 1, 1], [], []>} : vector<32x64xf32>, vector<64x192xf32>, vector<32x192xf32> -> vector<32x192xf32>
    %177 = vector.broadcast %171 : vector<1x192xf32> to vector<32x192xf32>
    %178 = arith.addf %176, %177 : vector<32x192xf32>
    %179 = vector.extract_strided_slice %178 {offsets = [0, 0], sizes = [32, 16], strides = [1, 1]} : vector<32x192xf32> to vector<32x16xf32>
    %180 = vector.extract_strided_slice %178 {offsets = [0, 64], sizes = [32, 16], strides = [1, 1]} : vector<32x192xf32> to vector<32x16xf32>
    %181 = vector.extract_strided_slice %178 {offsets = [0, 128], sizes = [32, 16], strides = [1, 1]} : vector<32x192xf32> to vector<32x16xf32>
    "tpu.trace_start"() <{level = 10 : i32, message = "qd,kd->qk"}> : () -> ()
    %cst_107 = arith.constant dense<0.000000e+00> : vector<32x32xf32>
    %182 = tpu.matmul %179, %180, %cst_107 {dimension_numbers = #tpu.dot_dimension_numbers<[1], [1], [0], [0], [0, 0, 1, 0], [], []>} : vector<32x16xf32>, vector<32x16xf32>, vector<32x32xf32> -> vector<32x32xf32>
    "tpu.trace_stop"() : () -> ()
    %cst_108 = arith.constant 2.500000e-01 : f32
    %183 = vector.broadcast %cst_108 : f32 to vector<32x32xf32>
    %184 = arith.mulf %182, %183 : vector<32x32xf32>
    %185 = arith.addf %184, %56 : vector<32x32xf32>
    %cst_109 = arith.constant dense<0xFF800000> : vector<32xf32>
    %186 = vector.multi_reduction <maximumf>, %185, %cst_109 [1] : vector<32x32xf32> to vector<32xf32>
    %187 = vector.shape_cast %186 : vector<32xf32> to vector<32x1xf32>
    %188 = vector.broadcast %187 : vector<32x1xf32> to vector<32x32xf32>
    %189 = arith.subf %185, %188 : vector<32x32xf32>
    %190 = math.exp %189 : vector<32x32xf32>
    %cst_110 = arith.constant dense<0.000000e+00> : vector<32xf32>
    %191 = vector.multi_reduction <add>, %190, %cst_110 [1] : vector<32x32xf32> to vector<32xf32>
    %192 = vector.shape_cast %191 : vector<32xf32> to vector<32x1xf32>
    %193 = tpu.reciprocal %192 {approx = true} : vector<32x1xf32> -> vector<32x1xf32>
    %194 = vector.broadcast %193 : vector<32x1xf32> to vector<32x32xf32>
    %195 = arith.mulf %190, %194 : vector<32x32xf32>
    %cst_111 = arith.constant dense<0.000000e+00> : vector<32x16xf32>
    %196 = tpu.matmul %195, %181, %cst_111 {dimension_numbers = #tpu.dot_dimension_numbers<[1], [0], [0], [1], [0, 0, 1, 1], [], []>} : vector<32x32xf32>, vector<32x16xf32>, vector<32x16xf32> -> vector<32x16xf32>
    %197 = vector.extract_strided_slice %178 {offsets = [0, 16], sizes = [32, 16], strides = [1, 1]} : vector<32x192xf32> to vector<32x16xf32>
    %198 = vector.extract_strided_slice %178 {offsets = [0, 80], sizes = [32, 16], strides = [1, 1]} : vector<32x192xf32> to vector<32x16xf32>
    %199 = vector.extract_strided_slice %178 {offsets = [0, 144], sizes = [32, 16], strides = [1, 1]} : vector<32x192xf32> to vector<32x16xf32>
    "tpu.trace_start"() <{level = 10 : i32, message = "qd,kd->qk"}> : () -> ()
    %cst_112 = arith.constant dense<0.000000e+00> : vector<32x32xf32>
    %200 = tpu.matmul %197, %198, %cst_112 {dimension_numbers = #tpu.dot_dimension_numbers<[1], [1], [0], [0], [0, 0, 1, 0], [], []>} : vector<32x16xf32>, vector<32x16xf32>, vector<32x32xf32> -> vector<32x32xf32>
    "tpu.trace_stop"() : () -> ()
    %cst_113 = arith.constant 2.500000e-01 : f32
    %201 = vector.broadcast %cst_113 : f32 to vector<32x32xf32>
    %202 = arith.mulf %200, %201 : vector<32x32xf32>
    %203 = arith.addf %202, %56 : vector<32x32xf32>
    %cst_114 = arith.constant dense<0xFF800000> : vector<32xf32>
    %204 = vector.multi_reduction <maximumf>, %203, %cst_114 [1] : vector<32x32xf32> to vector<32xf32>
    %205 = vector.shape_cast %204 : vector<32xf32> to vector<32x1xf32>
    %206 = vector.broadcast %205 : vector<32x1xf32> to vector<32x32xf32>
    %207 = arith.subf %203, %206 : vector<32x32xf32>
    %208 = math.exp %207 : vector<32x32xf32>
    %cst_115 = arith.constant dense<0.000000e+00> : vector<32xf32>
    %209 = vector.multi_reduction <add>, %208, %cst_115 [1] : vector<32x32xf32> to vector<32xf32>
    %210 = vector.shape_cast %209 : vector<32xf32> to vector<32x1xf32>
    %211 = tpu.reciprocal %210 {approx = true} : vector<32x1xf32> -> vector<32x1xf32>
    %212 = vector.broadcast %211 : vector<32x1xf32> to vector<32x32xf32>
    %213 = arith.mulf %208, %212 : vector<32x32xf32>
    %cst_116 = arith.constant dense<0.000000e+00> : vector<32x16xf32>
    %214 = tpu.matmul %213, %199, %cst_116 {dimension_numbers = #tpu.dot_dimension_numbers<[1], [0], [0], [1], [0, 0, 1, 1], [], []>} : vector<32x32xf32>, vector<32x16xf32>, vector<32x16xf32> -> vector<32x16xf32>
    %215 = vector.extract_strided_slice %178 {offsets = [0, 32], sizes = [32, 16], strides = [1, 1]} : vector<32x192xf32> to vector<32x16xf32>
    %216 = vector.extract_strided_slice %178 {offsets = [0, 96], sizes = [32, 16], strides = [1, 1]} : vector<32x192xf32> to vector<32x16xf32>
    %217 = vector.extract_strided_slice %178 {offsets = [0, 160], sizes = [32, 16], strides = [1, 1]} : vector<32x192xf32> to vector<32x16xf32>
    "tpu.trace_start"() <{level = 10 : i32, message = "qd,kd->qk"}> : () -> ()
    %cst_117 = arith.constant dense<0.000000e+00> : vector<32x32xf32>
    %218 = tpu.matmul %215, %216, %cst_117 {dimension_numbers = #tpu.dot_dimension_numbers<[1], [1], [0], [0], [0, 0, 1, 0], [], []>} : vector<32x16xf32>, vector<32x16xf32>, vector<32x32xf32> -> vector<32x32xf32>
    "tpu.trace_stop"() : () -> ()
    %cst_118 = arith.constant 2.500000e-01 : f32
    %219 = vector.broadcast %cst_118 : f32 to vector<32x32xf32>
    %220 = arith.mulf %218, %219 : vector<32x32xf32>
    %221 = arith.addf %220, %56 : vector<32x32xf32>
    %cst_119 = arith.constant dense<0xFF800000> : vector<32xf32>
    %222 = vector.multi_reduction <maximumf>, %221, %cst_119 [1] : vector<32x32xf32> to vector<32xf32>
    %223 = vector.shape_cast %222 : vector<32xf32> to vector<32x1xf32>
    %224 = vector.broadcast %223 : vector<32x1xf32> to vector<32x32xf32>
    %225 = arith.subf %221, %224 : vector<32x32xf32>
    %226 = math.exp %225 : vector<32x32xf32>
    %cst_120 = arith.constant dense<0.000000e+00> : vector<32xf32>
    %227 = vector.multi_reduction <add>, %226, %cst_120 [1] : vector<32x32xf32> to vector<32xf32>
    %228 = vector.shape_cast %227 : vector<32xf32> to vector<32x1xf32>
    %229 = tpu.reciprocal %228 {approx = true} : vector<32x1xf32> -> vector<32x1xf32>
    %230 = vector.broadcast %229 : vector<32x1xf32> to vector<32x32xf32>
    %231 = arith.mulf %226, %230 : vector<32x32xf32>
    %cst_121 = arith.constant dense<0.000000e+00> : vector<32x16xf32>
    %232 = tpu.matmul %231, %217, %cst_121 {dimension_numbers = #tpu.dot_dimension_numbers<[1], [0], [0], [1], [0, 0, 1, 1], [], []>} : vector<32x32xf32>, vector<32x16xf32>, vector<32x16xf32> -> vector<32x16xf32>
    %233 = vector.extract_strided_slice %178 {offsets = [0, 48], sizes = [32, 16], strides = [1, 1]} : vector<32x192xf32> to vector<32x16xf32>
    %234 = vector.extract_strided_slice %178 {offsets = [0, 112], sizes = [32, 16], strides = [1, 1]} : vector<32x192xf32> to vector<32x16xf32>
    %235 = vector.extract_strided_slice %178 {offsets = [0, 176], sizes = [32, 16], strides = [1, 1]} : vector<32x192xf32> to vector<32x16xf32>
    "tpu.trace_start"() <{level = 10 : i32, message = "qd,kd->qk"}> : () -> ()
    %cst_122 = arith.constant dense<0.000000e+00> : vector<32x32xf32>
    %236 = tpu.matmul %233, %234, %cst_122 {dimension_numbers = #tpu.dot_dimension_numbers<[1], [1], [0], [0], [0, 0, 1, 0], [], []>} : vector<32x16xf32>, vector<32x16xf32>, vector<32x32xf32> -> vector<32x32xf32>
    "tpu.trace_stop"() : () -> ()
    %cst_123 = arith.constant 2.500000e-01 : f32
    %237 = vector.broadcast %cst_123 : f32 to vector<32x32xf32>
    %238 = arith.mulf %236, %237 : vector<32x32xf32>
    %239 = arith.addf %238, %56 : vector<32x32xf32>
    %cst_124 = arith.constant dense<0xFF800000> : vector<32xf32>
    %240 = vector.multi_reduction <maximumf>, %239, %cst_124 [1] : vector<32x32xf32> to vector<32xf32>
    %241 = vector.shape_cast %240 : vector<32xf32> to vector<32x1xf32>
    %242 = vector.broadcast %241 : vector<32x1xf32> to vector<32x32xf32>
    %243 = arith.subf %239, %242 : vector<32x32xf32>
    %244 = math.exp %243 : vector<32x32xf32>
    %cst_125 = arith.constant dense<0.000000e+00> : vector<32xf32>
    %245 = vector.multi_reduction <add>, %244, %cst_125 [1] : vector<32x32xf32> to vector<32xf32>
    %246 = vector.shape_cast %245 : vector<32xf32> to vector<32x1xf32>
    %247 = tpu.reciprocal %246 {approx = true} : vector<32x1xf32> -> vector<32x1xf32>
    %248 = vector.broadcast %247 : vector<32x1xf32> to vector<32x32xf32>
    %249 = arith.mulf %244, %248 : vector<32x32xf32>
    %cst_126 = arith.constant dense<0.000000e+00> : vector<32x16xf32>
    %250 = tpu.matmul %249, %235, %cst_126 {dimension_numbers = #tpu.dot_dimension_numbers<[1], [0], [0], [1], [0, 0, 1, 1], [], []>} : vector<32x32xf32>, vector<32x16xf32>, vector<32x16xf32> -> vector<32x16xf32>
    %251 = tpu.concatenate %196, %214, %232, %250 in 1 : vector<32x16xf32>, vector<32x16xf32>, vector<32x16xf32>, vector<32x16xf32> -> vector<32x64xf32>
    %cst_127 = arith.constant dense<0.000000e+00> : vector<32x64xf32>
    %252 = tpu.matmul %251, %173, %cst_127 {dimension_numbers = #tpu.dot_dimension_numbers<[1], [0], [0], [1], [0, 0, 1, 1], [], []>} : vector<32x64xf32>, vector<64x64xf32>, vector<32x64xf32> -> vector<32x64xf32>
    %253 = vector.broadcast %175 : vector<1x64xf32> to vector<32x64xf32>
    %254 = arith.addf %252, %253 : vector<32x64xf32>
    %cst_128 = arith.constant dense<0.000000e+00> : vector<32x64xf32>
    %255 = tpu.matmul %54, %254, %cst_128 {dimension_numbers = #tpu.dot_dimension_numbers<[1], [0], [0], [1], [0, 0, 1, 1], [], []>} : vector<32x32xf32>, vector<32x64xf32>, vector<32x64xf32> -> vector<32x64xf32>
    %256 = arith.addf %167, %255 : vector<32x64xf32>
    %cst_129 = arith.constant 5.000000e-01 : f32
    %257 = vector.broadcast %cst_129 : f32 to vector<32x64xf32>
    %258 = arith.mulf %257, %256 : vector<32x64xf32>
    %cst_130 = arith.constant 0.707106769 : f32
    %259 = vector.broadcast %cst_130 : f32 to vector<32x64xf32>
    %260 = arith.mulf %256, %259 : vector<32x64xf32>
    %cst_131 = arith.constant 0.000000e+00 : f32
    %261 = vector.broadcast %cst_131 : f32 to vector<32x64xf32>
    %262 = arith.cmpf olt, %260, %261 : vector<32x64xf32>
    %cst_132 = arith.constant -1.000000e+00 : f32
    %cst_133 = arith.constant 1.000000e+00 : f32
    %263 = vector.broadcast %cst_132 : f32 to vector<32x64xf32>
    %264 = vector.broadcast %cst_133 : f32 to vector<32x64xf32>
    %265 = arith.select %262, %263, %264 : vector<32x64xi1>, vector<32x64xf32>
    %266 = math.absf %260 : vector<32x64xf32>
    %cst_134 = arith.constant 0.327591091 : f32
    %267 = vector.broadcast %cst_134 : f32 to vector<32x64xf32>
    %268 = arith.mulf %267, %266 : vector<32x64xf32>
    %cst_135 = arith.constant 1.000000e+00 : f32
    %269 = vector.broadcast %cst_135 : f32 to vector<32x64xf32>
    %270 = arith.addf %269, %268 : vector<32x64xf32>
    %271 = tpu.reciprocal %270 {approx = true} : vector<32x64xf32> -> vector<32x64xf32>
    %cst_136 = arith.constant 1.06140542 : f32
    %272 = vector.broadcast %cst_136 : f32 to vector<32x64xf32>
    %273 = arith.mulf %272, %271 : vector<32x64xf32>
    %cst_137 = arith.constant -1.45315206 : f32
    %274 = vector.broadcast %cst_137 : f32 to vector<32x64xf32>
    %275 = arith.addf %273, %274 : vector<32x64xf32>
    %276 = arith.mulf %275, %271 : vector<32x64xf32>
    %cst_138 = arith.constant 1.42141378 : f32
    %277 = vector.broadcast %cst_138 : f32 to vector<32x64xf32>
    %278 = arith.addf %276, %277 : vector<32x64xf32>
    %279 = arith.mulf %278, %271 : vector<32x64xf32>
    %cst_139 = arith.constant -0.284496725 : f32
    %280 = vector.broadcast %cst_139 : f32 to vector<32x64xf32>
    %281 = arith.addf %279, %280 : vector<32x64xf32>
    %282 = arith.mulf %281, %271 : vector<32x64xf32>
    %cst_140 = arith.constant 0.254829586 : f32
    %283 = vector.broadcast %cst_140 : f32 to vector<32x64xf32>
    %284 = arith.addf %282, %283 : vector<32x64xf32>
    %285 = arith.mulf %284, %271 : vector<32x64xf32>
    %cst_141 = arith.constant 0.000000e+00 : f32
    %286 = vector.broadcast %cst_141 : f32 to vector<32x64xf32>
    %287 = arith.subf %286, %266 : vector<32x64xf32>
    %288 = arith.mulf %287, %266 : vector<32x64xf32>
    %289 = math.exp %288 : vector<32x64xf32>
    %290 = arith.mulf %285, %289 : vector<32x64xf32>
    %cst_142 = arith.constant 1.000000e+00 : f32
    %291 = vector.broadcast %cst_142 : f32 to vector<32x64xf32>
    %292 = arith.subf %291, %290 : vector<32x64xf32>
    %293 = arith.mulf %265, %292 : vector<32x64xf32>
    %cst_143 = arith.constant 1.000000e+00 : f32
    %294 = vector.broadcast %cst_143 : f32 to vector<32x64xf32>
    %295 = arith.addf %294, %293 : vector<32x64xf32>
    %296 = arith.mulf %258, %295 : vector<32x64xf32>
    %297 = vector.extract_strided_slice %296 {offsets = [0, 0], sizes = [32, 32], strides = [1, 1]} : vector<32x64xf32> to vector<32x32xf32>
    %298 = arith.addf %46, %297 : vector<32x32xf32>
    %cst_144 = arith.constant 0.707106769 : f32
    %299 = vector.broadcast %cst_144 : f32 to vector<32x32xf32>
    %300 = arith.mulf %298, %299 : vector<32x32xf32>
    %301 = vector.extract_strided_slice %296 {offsets = [0, 32], sizes = [32, 32], strides = [1, 1]} : vector<32x64xf32> to vector<32x32xf32>
    %302 = arith.addf %57, %301 : vector<32x32xf32>
    %c1 = arith.constant 1 : index
    %c0_145 = arith.constant 0 : index
    %c0_146 = arith.constant 0 : index
    %303 = vector.load %arg7[%c1, %c0_145, %c0_146] : memref<3x32x32xf32, #tpu.memory_space<vmem>>, vector<1x32x32xf32>
    %304 = vector.shape_cast %303 : vector<1x32x32xf32> to vector<32x32xf32>
    %cst_147 = arith.constant dense<0.000000e+00> : vector<1x32xf32>
    %305 = tpu.matmul %52, %304, %cst_147 {dimension_numbers = #tpu.dot_dimension_numbers<[1], [0], [0], [1], [0, 0, 1, 1], [], []>} : vector<1x32xf32>, vector<32x32xf32>, vector<1x32xf32> -> vector<1x32xf32>
    %c1_148 = arith.constant 1 : index
    %c0_149 = arith.constant 0 : index
    %c0_150 = arith.constant 0 : index
    %306 = vector.load %arg8[%c1_148, %c0_149, %c0_150] : memref<3x1x32xf32, #tpu.memory_space<vmem>>, vector<1x1x32xf32>
    %307 = vector.shape_cast %306 : vector<1x1x32xf32> to vector<1x32xf32>
    %308 = arith.addf %305, %307 : vector<1x32xf32>
    %309 = vector.broadcast %308 : vector<1x32xf32> to vector<32x32xf32>
    %310 = arith.addf %300, %309 : vector<32x32xf32>
    %cst_151 = arith.constant dense<0.000000e+00> : vector<32x32xf32>
    %311 = tpu.matmul %53, %310, %cst_151 {dimension_numbers = #tpu.dot_dimension_numbers<[1], [0], [0], [1], [0, 0, 1, 1], [], []>} : vector<32x32xf32>, vector<32x32xf32>, vector<32x32xf32> -> vector<32x32xf32>
    %c1_152 = arith.constant 1 : index
    %c0_153 = arith.constant 0 : index
    %c0_154 = arith.constant 0 : index
    %312 = vector.load %arg9[%c1_152, %c0_153, %c0_154] : memref<3x32x64xf32, #tpu.memory_space<vmem>>, vector<1x32x64xf32>
    %313 = vector.shape_cast %312 : vector<1x32x64xf32> to vector<32x64xf32>
    %cst_155 = arith.constant dense<0.000000e+00> : vector<32x64xf32>
    %314 = tpu.matmul %310, %313, %cst_155 {dimension_numbers = #tpu.dot_dimension_numbers<[1], [0], [0], [1], [0, 0, 1, 1], [], []>} : vector<32x32xf32>, vector<32x64xf32>, vector<32x64xf32> -> vector<32x64xf32>
    %c1_156 = arith.constant 1 : index
    %c0_157 = arith.constant 0 : index
    %c0_158 = arith.constant 0 : index
    %315 = vector.load %arg10[%c1_156, %c0_157, %c0_158] : memref<3x1x64xf32, #tpu.memory_space<vmem>>, vector<1x1x64xf32>
    %316 = vector.shape_cast %315 : vector<1x1x64xf32> to vector<1x64xf32>
    %317 = vector.broadcast %316 : vector<1x64xf32> to vector<32x64xf32>
    %318 = arith.addf %314, %317 : vector<32x64xf32>
    %c1_159 = arith.constant 1 : index
    %c0_160 = arith.constant 0 : index
    %c0_161 = arith.constant 0 : index
    %319 = vector.load %arg11[%c1_159, %c0_160, %c0_161] : memref<3x32x64xf32, #tpu.memory_space<vmem>>, vector<1x32x64xf32>
    %320 = vector.shape_cast %319 : vector<1x32x64xf32> to vector<32x64xf32>
    %cst_162 = arith.constant dense<0.000000e+00> : vector<32x64xf32>
    %321 = tpu.matmul %311, %320, %cst_162 {dimension_numbers = #tpu.dot_dimension_numbers<[1], [0], [0], [1], [0, 0, 1, 1], [], []>} : vector<32x32xf32>, vector<32x64xf32>, vector<32x64xf32> -> vector<32x64xf32>
    %c1_163 = arith.constant 1 : index
    %c0_164 = arith.constant 0 : index
    %c0_165 = arith.constant 0 : index
    %322 = vector.load %arg12[%c1_163, %c0_164, %c0_165] : memref<3x1x64xf32, #tpu.memory_space<vmem>>, vector<1x1x64xf32>
    %323 = vector.shape_cast %322 : vector<1x1x64xf32> to vector<1x64xf32>
    %324 = vector.broadcast %323 : vector<1x64xf32> to vector<32x64xf32>
    %325 = arith.addf %321, %324 : vector<32x64xf32>
    %c1_166 = arith.constant 1 : index
    %c0_167 = arith.constant 0 : index
    %c0_168 = arith.constant 0 : index
    %326 = vector.load %arg13[%c1_166, %c0_167, %c0_168] : memref<3x64x192xf32, #tpu.memory_space<vmem>>, vector<1x64x192xf32>
    %327 = vector.shape_cast %326 : vector<1x64x192xf32> to vector<64x192xf32>
    %c1_169 = arith.constant 1 : index
    %c0_170 = arith.constant 0 : index
    %c0_171 = arith.constant 0 : index
    %328 = vector.load %arg14[%c1_169, %c0_170, %c0_171] : memref<3x1x192xf32, #tpu.memory_space<vmem>>, vector<1x1x192xf32>
    %329 = vector.shape_cast %328 : vector<1x1x192xf32> to vector<1x192xf32>
    %c1_172 = arith.constant 1 : index
    %c0_173 = arith.constant 0 : index
    %c0_174 = arith.constant 0 : index
    %330 = vector.load %arg17[%c1_172, %c0_173, %c0_174] : memref<3x64x64xf32, #tpu.memory_space<vmem>>, vector<1x64x64xf32>
    %331 = vector.shape_cast %330 : vector<1x64x64xf32> to vector<64x64xf32>
    %c1_175 = arith.constant 1 : index
    %c0_176 = arith.constant 0 : index
    %c0_177 = arith.constant 0 : index
    %332 = vector.load %arg18[%c1_175, %c0_176, %c0_177] : memref<3x1x64xf32, #tpu.memory_space<vmem>>, vector<1x1x64xf32>
    %333 = vector.shape_cast %332 : vector<1x1x64xf32> to vector<1x64xf32>
    %cst_178 = arith.constant dense<0.000000e+00> : vector<32x192xf32>
    %334 = tpu.matmul %318, %327, %cst_178 {dimension_numbers = #tpu.dot_dimension_numbers<[1], [0], [0], [1], [0, 0, 1, 1], [], []>} : vector<32x64xf32>, vector<64x192xf32>, vector<32x192xf32> -> vector<32x192xf32>
    %335 = vector.broadcast %329 : vector<1x192xf32> to vector<32x192xf32>
    %336 = arith.addf %334, %335 : vector<32x192xf32>
    %337 = vector.extract_strided_slice %336 {offsets = [0, 0], sizes = [32, 16], strides = [1, 1]} : vector<32x192xf32> to vector<32x16xf32>
    %338 = vector.extract_strided_slice %336 {offsets = [0, 64], sizes = [32, 16], strides = [1, 1]} : vector<32x192xf32> to vector<32x16xf32>
    %339 = vector.extract_strided_slice %336 {offsets = [0, 128], sizes = [32, 16], strides = [1, 1]} : vector<32x192xf32> to vector<32x16xf32>
    "tpu.trace_start"() <{level = 10 : i32, message = "qd,kd->qk"}> : () -> ()
    %cst_179 = arith.constant dense<0.000000e+00> : vector<32x32xf32>
    %340 = tpu.matmul %337, %338, %cst_179 {dimension_numbers = #tpu.dot_dimension_numbers<[1], [1], [0], [0], [0, 0, 1, 0], [], []>} : vector<32x16xf32>, vector<32x16xf32>, vector<32x32xf32> -> vector<32x32xf32>
    "tpu.trace_stop"() : () -> ()
    %cst_180 = arith.constant 2.500000e-01 : f32
    %341 = vector.broadcast %cst_180 : f32 to vector<32x32xf32>
    %342 = arith.mulf %340, %341 : vector<32x32xf32>
    %343 = arith.addf %342, %55 : vector<32x32xf32>
    %cst_181 = arith.constant dense<0xFF800000> : vector<32xf32>
    %344 = vector.multi_reduction <maximumf>, %343, %cst_181 [1] : vector<32x32xf32> to vector<32xf32>
    %345 = vector.shape_cast %344 : vector<32xf32> to vector<32x1xf32>
    %346 = vector.broadcast %345 : vector<32x1xf32> to vector<32x32xf32>
    %347 = arith.subf %343, %346 : vector<32x32xf32>
    %348 = math.exp %347 : vector<32x32xf32>
    %cst_182 = arith.constant dense<0.000000e+00> : vector<32xf32>
    %349 = vector.multi_reduction <add>, %348, %cst_182 [1] : vector<32x32xf32> to vector<32xf32>
    %350 = vector.shape_cast %349 : vector<32xf32> to vector<32x1xf32>
    %351 = tpu.reciprocal %350 {approx = true} : vector<32x1xf32> -> vector<32x1xf32>
    %352 = vector.broadcast %351 : vector<32x1xf32> to vector<32x32xf32>
    %353 = arith.mulf %348, %352 : vector<32x32xf32>
    %cst_183 = arith.constant dense<0.000000e+00> : vector<32x16xf32>
    %354 = tpu.matmul %353, %339, %cst_183 {dimension_numbers = #tpu.dot_dimension_numbers<[1], [0], [0], [1], [0, 0, 1, 1], [], []>} : vector<32x32xf32>, vector<32x16xf32>, vector<32x16xf32> -> vector<32x16xf32>
    %355 = vector.extract_strided_slice %336 {offsets = [0, 16], sizes = [32, 16], strides = [1, 1]} : vector<32x192xf32> to vector<32x16xf32>
    %356 = vector.extract_strided_slice %336 {offsets = [0, 80], sizes = [32, 16], strides = [1, 1]} : vector<32x192xf32> to vector<32x16xf32>
    %357 = vector.extract_strided_slice %336 {offsets = [0, 144], sizes = [32, 16], strides = [1, 1]} : vector<32x192xf32> to vector<32x16xf32>
    "tpu.trace_start"() <{level = 10 : i32, message = "qd,kd->qk"}> : () -> ()
    %cst_184 = arith.constant dense<0.000000e+00> : vector<32x32xf32>
    %358 = tpu.matmul %355, %356, %cst_184 {dimension_numbers = #tpu.dot_dimension_numbers<[1], [1], [0], [0], [0, 0, 1, 0], [], []>} : vector<32x16xf32>, vector<32x16xf32>, vector<32x32xf32> -> vector<32x32xf32>
    "tpu.trace_stop"() : () -> ()
    %cst_185 = arith.constant 2.500000e-01 : f32
    %359 = vector.broadcast %cst_185 : f32 to vector<32x32xf32>
    %360 = arith.mulf %358, %359 : vector<32x32xf32>
    %361 = arith.addf %360, %55 : vector<32x32xf32>
    %cst_186 = arith.constant dense<0xFF800000> : vector<32xf32>
    %362 = vector.multi_reduction <maximumf>, %361, %cst_186 [1] : vector<32x32xf32> to vector<32xf32>
    %363 = vector.shape_cast %362 : vector<32xf32> to vector<32x1xf32>
    %364 = vector.broadcast %363 : vector<32x1xf32> to vector<32x32xf32>
    %365 = arith.subf %361, %364 : vector<32x32xf32>
    %366 = math.exp %365 : vector<32x32xf32>
    %cst_187 = arith.constant dense<0.000000e+00> : vector<32xf32>
    %367 = vector.multi_reduction <add>, %366, %cst_187 [1] : vector<32x32xf32> to vector<32xf32>
    %368 = vector.shape_cast %367 : vector<32xf32> to vector<32x1xf32>
    %369 = tpu.reciprocal %368 {approx = true} : vector<32x1xf32> -> vector<32x1xf32>
    %370 = vector.broadcast %369 : vector<32x1xf32> to vector<32x32xf32>
    %371 = arith.mulf %366, %370 : vector<32x32xf32>
    %cst_188 = arith.constant dense<0.000000e+00> : vector<32x16xf32>
    %372 = tpu.matmul %371, %357, %cst_188 {dimension_numbers = #tpu.dot_dimension_numbers<[1], [0], [0], [1], [0, 0, 1, 1], [], []>} : vector<32x32xf32>, vector<32x16xf32>, vector<32x16xf32> -> vector<32x16xf32>
    %373 = vector.extract_strided_slice %336 {offsets = [0, 32], sizes = [32, 16], strides = [1, 1]} : vector<32x192xf32> to vector<32x16xf32>
    %374 = vector.extract_strided_slice %336 {offsets = [0, 96], sizes = [32, 16], strides = [1, 1]} : vector<32x192xf32> to vector<32x16xf32>
    %375 = vector.extract_strided_slice %336 {offsets = [0, 160], sizes = [32, 16], strides = [1, 1]} : vector<32x192xf32> to vector<32x16xf32>
    "tpu.trace_start"() <{level = 10 : i32, message = "qd,kd->qk"}> : () -> ()
    %cst_189 = arith.constant dense<0.000000e+00> : vector<32x32xf32>
    %376 = tpu.matmul %373, %374, %cst_189 {dimension_numbers = #tpu.dot_dimension_numbers<[1], [1], [0], [0], [0, 0, 1, 0], [], []>} : vector<32x16xf32>, vector<32x16xf32>, vector<32x32xf32> -> vector<32x32xf32>
    "tpu.trace_stop"() : () -> ()
    %cst_190 = arith.constant 2.500000e-01 : f32
    %377 = vector.broadcast %cst_190 : f32 to vector<32x32xf32>
    %378 = arith.mulf %376, %377 : vector<32x32xf32>
    %379 = arith.addf %378, %55 : vector<32x32xf32>
    %cst_191 = arith.constant dense<0xFF800000> : vector<32xf32>
    %380 = vector.multi_reduction <maximumf>, %379, %cst_191 [1] : vector<32x32xf32> to vector<32xf32>
    %381 = vector.shape_cast %380 : vector<32xf32> to vector<32x1xf32>
    %382 = vector.broadcast %381 : vector<32x1xf32> to vector<32x32xf32>
    %383 = arith.subf %379, %382 : vector<32x32xf32>
    %384 = math.exp %383 : vector<32x32xf32>
    %cst_192 = arith.constant dense<0.000000e+00> : vector<32xf32>
    %385 = vector.multi_reduction <add>, %384, %cst_192 [1] : vector<32x32xf32> to vector<32xf32>
    %386 = vector.shape_cast %385 : vector<32xf32> to vector<32x1xf32>
    %387 = tpu.reciprocal %386 {approx = true} : vector<32x1xf32> -> vector<32x1xf32>
    %388 = vector.broadcast %387 : vector<32x1xf32> to vector<32x32xf32>
    %389 = arith.mulf %384, %388 : vector<32x32xf32>
    %cst_193 = arith.constant dense<0.000000e+00> : vector<32x16xf32>
    %390 = tpu.matmul %389, %375, %cst_193 {dimension_numbers = #tpu.dot_dimension_numbers<[1], [0], [0], [1], [0, 0, 1, 1], [], []>} : vector<32x32xf32>, vector<32x16xf32>, vector<32x16xf32> -> vector<32x16xf32>
    %391 = vector.extract_strided_slice %336 {offsets = [0, 48], sizes = [32, 16], strides = [1, 1]} : vector<32x192xf32> to vector<32x16xf32>
    %392 = vector.extract_strided_slice %336 {offsets = [0, 112], sizes = [32, 16], strides = [1, 1]} : vector<32x192xf32> to vector<32x16xf32>
    %393 = vector.extract_strided_slice %336 {offsets = [0, 176], sizes = [32, 16], strides = [1, 1]} : vector<32x192xf32> to vector<32x16xf32>
    "tpu.trace_start"() <{level = 10 : i32, message = "qd,kd->qk"}> : () -> ()
    %cst_194 = arith.constant dense<0.000000e+00> : vector<32x32xf32>
    %394 = tpu.matmul %391, %392, %cst_194 {dimension_numbers = #tpu.dot_dimension_numbers<[1], [1], [0], [0], [0, 0, 1, 0], [], []>} : vector<32x16xf32>, vector<32x16xf32>, vector<32x32xf32> -> vector<32x32xf32>
    "tpu.trace_stop"() : () -> ()
    %cst_195 = arith.constant 2.500000e-01 : f32
    %395 = vector.broadcast %cst_195 : f32 to vector<32x32xf32>
    %396 = arith.mulf %394, %395 : vector<32x32xf32>
    %397 = arith.addf %396, %55 : vector<32x32xf32>
    %cst_196 = arith.constant dense<0xFF800000> : vector<32xf32>
    %398 = vector.multi_reduction <maximumf>, %397, %cst_196 [1] : vector<32x32xf32> to vector<32xf32>
    %399 = vector.shape_cast %398 : vector<32xf32> to vector<32x1xf32>
    %400 = vector.broadcast %399 : vector<32x1xf32> to vector<32x32xf32>
    %401 = arith.subf %397, %400 : vector<32x32xf32>
    %402 = math.exp %401 : vector<32x32xf32>
    %cst_197 = arith.constant dense<0.000000e+00> : vector<32xf32>
    %403 = vector.multi_reduction <add>, %402, %cst_197 [1] : vector<32x32xf32> to vector<32xf32>
    %404 = vector.shape_cast %403 : vector<32xf32> to vector<32x1xf32>
    %405 = tpu.reciprocal %404 {approx = true} : vector<32x1xf32> -> vector<32x1xf32>
    %406 = vector.broadcast %405 : vector<32x1xf32> to vector<32x32xf32>
    %407 = arith.mulf %402, %406 : vector<32x32xf32>
    %cst_198 = arith.constant dense<0.000000e+00> : vector<32x16xf32>
    %408 = tpu.matmul %407, %393, %cst_198 {dimension_numbers = #tpu.dot_dimension_numbers<[1], [0], [0], [1], [0, 0, 1, 1], [], []>} : vector<32x32xf32>, vector<32x16xf32>, vector<32x16xf32> -> vector<32x16xf32>
    %409 = tpu.concatenate %354, %372, %390, %408 in 1 : vector<32x16xf32>, vector<32x16xf32>, vector<32x16xf32>, vector<32x16xf32> -> vector<32x64xf32>
    %cst_199 = arith.constant dense<0.000000e+00> : vector<32x64xf32>
    %410 = tpu.matmul %409, %331, %cst_199 {dimension_numbers = #tpu.dot_dimension_numbers<[1], [0], [0], [1], [0, 0, 1, 1], [], []>} : vector<32x64xf32>, vector<64x64xf32>, vector<32x64xf32> -> vector<32x64xf32>
    %411 = vector.broadcast %333 : vector<1x64xf32> to vector<32x64xf32>
    %412 = arith.addf %410, %411 : vector<32x64xf32>
    %c1_200 = arith.constant 1 : index
    %c0_201 = arith.constant 0 : index
    %c0_202 = arith.constant 0 : index
    %413 = vector.load %arg15[%c1_200, %c0_201, %c0_202] : memref<3x64x192xf32, #tpu.memory_space<vmem>>, vector<1x64x192xf32>
    %414 = vector.shape_cast %413 : vector<1x64x192xf32> to vector<64x192xf32>
    %c1_203 = arith.constant 1 : index
    %c0_204 = arith.constant 0 : index
    %c0_205 = arith.constant 0 : index
    %415 = vector.load %arg16[%c1_203, %c0_204, %c0_205] : memref<3x1x192xf32, #tpu.memory_space<vmem>>, vector<1x1x192xf32>
    %416 = vector.shape_cast %415 : vector<1x1x192xf32> to vector<1x192xf32>
    %c1_206 = arith.constant 1 : index
    %c0_207 = arith.constant 0 : index
    %c0_208 = arith.constant 0 : index
    %417 = vector.load %arg19[%c1_206, %c0_207, %c0_208] : memref<3x64x64xf32, #tpu.memory_space<vmem>>, vector<1x64x64xf32>
    %418 = vector.shape_cast %417 : vector<1x64x64xf32> to vector<64x64xf32>
    %c1_209 = arith.constant 1 : index
    %c0_210 = arith.constant 0 : index
    %c0_211 = arith.constant 0 : index
    %419 = vector.load %arg20[%c1_209, %c0_210, %c0_211] : memref<3x1x64xf32, #tpu.memory_space<vmem>>, vector<1x1x64xf32>
    %420 = vector.shape_cast %419 : vector<1x1x64xf32> to vector<1x64xf32>
    %cst_212 = arith.constant dense<0.000000e+00> : vector<32x192xf32>
    %421 = tpu.matmul %325, %414, %cst_212 {dimension_numbers = #tpu.dot_dimension_numbers<[1], [0], [0], [1], [0, 0, 1, 1], [], []>} : vector<32x64xf32>, vector<64x192xf32>, vector<32x192xf32> -> vector<32x192xf32>
    %422 = vector.broadcast %416 : vector<1x192xf32> to vector<32x192xf32>
    %423 = arith.addf %421, %422 : vector<32x192xf32>
    %424 = vector.extract_strided_slice %423 {offsets = [0, 0], sizes = [32, 16], strides = [1, 1]} : vector<32x192xf32> to vector<32x16xf32>
    %425 = vector.extract_strided_slice %423 {offsets = [0, 64], sizes = [32, 16], strides = [1, 1]} : vector<32x192xf32> to vector<32x16xf32>
    %426 = vector.extract_strided_slice %423 {offsets = [0, 128], sizes = [32, 16], strides = [1, 1]} : vector<32x192xf32> to vector<32x16xf32>
    "tpu.trace_start"() <{level = 10 : i32, message = "qd,kd->qk"}> : () -> ()
    %cst_213 = arith.constant dense<0.000000e+00> : vector<32x32xf32>
    %427 = tpu.matmul %424, %425, %cst_213 {dimension_numbers = #tpu.dot_dimension_numbers<[1], [1], [0], [0], [0, 0, 1, 0], [], []>} : vector<32x16xf32>, vector<32x16xf32>, vector<32x32xf32> -> vector<32x32xf32>
    "tpu.trace_stop"() : () -> ()
    %cst_214 = arith.constant 2.500000e-01 : f32
    %428 = vector.broadcast %cst_214 : f32 to vector<32x32xf32>
    %429 = arith.mulf %427, %428 : vector<32x32xf32>
    %430 = arith.addf %429, %56 : vector<32x32xf32>
    %cst_215 = arith.constant dense<0xFF800000> : vector<32xf32>
    %431 = vector.multi_reduction <maximumf>, %430, %cst_215 [1] : vector<32x32xf32> to vector<32xf32>
    %432 = vector.shape_cast %431 : vector<32xf32> to vector<32x1xf32>
    %433 = vector.broadcast %432 : vector<32x1xf32> to vector<32x32xf32>
    %434 = arith.subf %430, %433 : vector<32x32xf32>
    %435 = math.exp %434 : vector<32x32xf32>
    %cst_216 = arith.constant dense<0.000000e+00> : vector<32xf32>
    %436 = vector.multi_reduction <add>, %435, %cst_216 [1] : vector<32x32xf32> to vector<32xf32>
    %437 = vector.shape_cast %436 : vector<32xf32> to vector<32x1xf32>
    %438 = tpu.reciprocal %437 {approx = true} : vector<32x1xf32> -> vector<32x1xf32>
    %439 = vector.broadcast %438 : vector<32x1xf32> to vector<32x32xf32>
    %440 = arith.mulf %435, %439 : vector<32x32xf32>
    %cst_217 = arith.constant dense<0.000000e+00> : vector<32x16xf32>
    %441 = tpu.matmul %440, %426, %cst_217 {dimension_numbers = #tpu.dot_dimension_numbers<[1], [0], [0], [1], [0, 0, 1, 1], [], []>} : vector<32x32xf32>, vector<32x16xf32>, vector<32x16xf32> -> vector<32x16xf32>
    %442 = vector.extract_strided_slice %423 {offsets = [0, 16], sizes = [32, 16], strides = [1, 1]} : vector<32x192xf32> to vector<32x16xf32>
    %443 = vector.extract_strided_slice %423 {offsets = [0, 80], sizes = [32, 16], strides = [1, 1]} : vector<32x192xf32> to vector<32x16xf32>
    %444 = vector.extract_strided_slice %423 {offsets = [0, 144], sizes = [32, 16], strides = [1, 1]} : vector<32x192xf32> to vector<32x16xf32>
    "tpu.trace_start"() <{level = 10 : i32, message = "qd,kd->qk"}> : () -> ()
    %cst_218 = arith.constant dense<0.000000e+00> : vector<32x32xf32>
    %445 = tpu.matmul %442, %443, %cst_218 {dimension_numbers = #tpu.dot_dimension_numbers<[1], [1], [0], [0], [0, 0, 1, 0], [], []>} : vector<32x16xf32>, vector<32x16xf32>, vector<32x32xf32> -> vector<32x32xf32>
    "tpu.trace_stop"() : () -> ()
    %cst_219 = arith.constant 2.500000e-01 : f32
    %446 = vector.broadcast %cst_219 : f32 to vector<32x32xf32>
    %447 = arith.mulf %445, %446 : vector<32x32xf32>
    %448 = arith.addf %447, %56 : vector<32x32xf32>
    %cst_220 = arith.constant dense<0xFF800000> : vector<32xf32>
    %449 = vector.multi_reduction <maximumf>, %448, %cst_220 [1] : vector<32x32xf32> to vector<32xf32>
    %450 = vector.shape_cast %449 : vector<32xf32> to vector<32x1xf32>
    %451 = vector.broadcast %450 : vector<32x1xf32> to vector<32x32xf32>
    %452 = arith.subf %448, %451 : vector<32x32xf32>
    %453 = math.exp %452 : vector<32x32xf32>
    %cst_221 = arith.constant dense<0.000000e+00> : vector<32xf32>
    %454 = vector.multi_reduction <add>, %453, %cst_221 [1] : vector<32x32xf32> to vector<32xf32>
    %455 = vector.shape_cast %454 : vector<32xf32> to vector<32x1xf32>
    %456 = tpu.reciprocal %455 {approx = true} : vector<32x1xf32> -> vector<32x1xf32>
    %457 = vector.broadcast %456 : vector<32x1xf32> to vector<32x32xf32>
    %458 = arith.mulf %453, %457 : vector<32x32xf32>
    %cst_222 = arith.constant dense<0.000000e+00> : vector<32x16xf32>
    %459 = tpu.matmul %458, %444, %cst_222 {dimension_numbers = #tpu.dot_dimension_numbers<[1], [0], [0], [1], [0, 0, 1, 1], [], []>} : vector<32x32xf32>, vector<32x16xf32>, vector<32x16xf32> -> vector<32x16xf32>
    %460 = vector.extract_strided_slice %423 {offsets = [0, 32], sizes = [32, 16], strides = [1, 1]} : vector<32x192xf32> to vector<32x16xf32>
    %461 = vector.extract_strided_slice %423 {offsets = [0, 96], sizes = [32, 16], strides = [1, 1]} : vector<32x192xf32> to vector<32x16xf32>
    %462 = vector.extract_strided_slice %423 {offsets = [0, 160], sizes = [32, 16], strides = [1, 1]} : vector<32x192xf32> to vector<32x16xf32>
    "tpu.trace_start"() <{level = 10 : i32, message = "qd,kd->qk"}> : () -> ()
    %cst_223 = arith.constant dense<0.000000e+00> : vector<32x32xf32>
    %463 = tpu.matmul %460, %461, %cst_223 {dimension_numbers = #tpu.dot_dimension_numbers<[1], [1], [0], [0], [0, 0, 1, 0], [], []>} : vector<32x16xf32>, vector<32x16xf32>, vector<32x32xf32> -> vector<32x32xf32>
    "tpu.trace_stop"() : () -> ()
    %cst_224 = arith.constant 2.500000e-01 : f32
    %464 = vector.broadcast %cst_224 : f32 to vector<32x32xf32>
    %465 = arith.mulf %463, %464 : vector<32x32xf32>
    %466 = arith.addf %465, %56 : vector<32x32xf32>
    %cst_225 = arith.constant dense<0xFF800000> : vector<32xf32>
    %467 = vector.multi_reduction <maximumf>, %466, %cst_225 [1] : vector<32x32xf32> to vector<32xf32>
    %468 = vector.shape_cast %467 : vector<32xf32> to vector<32x1xf32>
    %469 = vector.broadcast %468 : vector<32x1xf32> to vector<32x32xf32>
    %470 = arith.subf %466, %469 : vector<32x32xf32>
    %471 = math.exp %470 : vector<32x32xf32>
    %cst_226 = arith.constant dense<0.000000e+00> : vector<32xf32>
    %472 = vector.multi_reduction <add>, %471, %cst_226 [1] : vector<32x32xf32> to vector<32xf32>
    %473 = vector.shape_cast %472 : vector<32xf32> to vector<32x1xf32>
    %474 = tpu.reciprocal %473 {approx = true} : vector<32x1xf32> -> vector<32x1xf32>
    %475 = vector.broadcast %474 : vector<32x1xf32> to vector<32x32xf32>
    %476 = arith.mulf %471, %475 : vector<32x32xf32>
    %cst_227 = arith.constant dense<0.000000e+00> : vector<32x16xf32>
    %477 = tpu.matmul %476, %462, %cst_227 {dimension_numbers = #tpu.dot_dimension_numbers<[1], [0], [0], [1], [0, 0, 1, 1], [], []>} : vector<32x32xf32>, vector<32x16xf32>, vector<32x16xf32> -> vector<32x16xf32>
    %478 = vector.extract_strided_slice %423 {offsets = [0, 48], sizes = [32, 16], strides = [1, 1]} : vector<32x192xf32> to vector<32x16xf32>
    %479 = vector.extract_strided_slice %423 {offsets = [0, 112], sizes = [32, 16], strides = [1, 1]} : vector<32x192xf32> to vector<32x16xf32>
    %480 = vector.extract_strided_slice %423 {offsets = [0, 176], sizes = [32, 16], strides = [1, 1]} : vector<32x192xf32> to vector<32x16xf32>
    "tpu.trace_start"() <{level = 10 : i32, message = "qd,kd->qk"}> : () -> ()
    %cst_228 = arith.constant dense<0.000000e+00> : vector<32x32xf32>
    %481 = tpu.matmul %478, %479, %cst_228 {dimension_numbers = #tpu.dot_dimension_numbers<[1], [1], [0], [0], [0, 0, 1, 0], [], []>} : vector<32x16xf32>, vector<32x16xf32>, vector<32x32xf32> -> vector<32x32xf32>
    "tpu.trace_stop"() : () -> ()
    %cst_229 = arith.constant 2.500000e-01 : f32
    %482 = vector.broadcast %cst_229 : f32 to vector<32x32xf32>
    %483 = arith.mulf %481, %482 : vector<32x32xf32>
    %484 = arith.addf %483, %56 : vector<32x32xf32>
    %cst_230 = arith.constant dense<0xFF800000> : vector<32xf32>
    %485 = vector.multi_reduction <maximumf>, %484, %cst_230 [1] : vector<32x32xf32> to vector<32xf32>
    %486 = vector.shape_cast %485 : vector<32xf32> to vector<32x1xf32>
    %487 = vector.broadcast %486 : vector<32x1xf32> to vector<32x32xf32>
    %488 = arith.subf %484, %487 : vector<32x32xf32>
    %489 = math.exp %488 : vector<32x32xf32>
    %cst_231 = arith.constant dense<0.000000e+00> : vector<32xf32>
    %490 = vector.multi_reduction <add>, %489, %cst_231 [1] : vector<32x32xf32> to vector<32xf32>
    %491 = vector.shape_cast %490 : vector<32xf32> to vector<32x1xf32>
    %492 = tpu.reciprocal %491 {approx = true} : vector<32x1xf32> -> vector<32x1xf32>
    %493 = vector.broadcast %492 : vector<32x1xf32> to vector<32x32xf32>
    %494 = arith.mulf %489, %493 : vector<32x32xf32>
    %cst_232 = arith.constant dense<0.000000e+00> : vector<32x16xf32>
    %495 = tpu.matmul %494, %480, %cst_232 {dimension_numbers = #tpu.dot_dimension_numbers<[1], [0], [0], [1], [0, 0, 1, 1], [], []>} : vector<32x32xf32>, vector<32x16xf32>, vector<32x16xf32> -> vector<32x16xf32>
    %496 = tpu.concatenate %441, %459, %477, %495 in 1 : vector<32x16xf32>, vector<32x16xf32>, vector<32x16xf32>, vector<32x16xf32> -> vector<32x64xf32>
    %cst_233 = arith.constant dense<0.000000e+00> : vector<32x64xf32>
    %497 = tpu.matmul %496, %418, %cst_233 {dimension_numbers = #tpu.dot_dimension_numbers<[1], [0], [0], [1], [0, 0, 1, 1], [], []>} : vector<32x64xf32>, vector<64x64xf32>, vector<32x64xf32> -> vector<32x64xf32>
    %498 = vector.broadcast %420 : vector<1x64xf32> to vector<32x64xf32>
    %499 = arith.addf %497, %498 : vector<32x64xf32>
    %cst_234 = arith.constant dense<0.000000e+00> : vector<32x64xf32>
    %500 = tpu.matmul %54, %499, %cst_234 {dimension_numbers = #tpu.dot_dimension_numbers<[1], [0], [0], [1], [0, 0, 1, 1], [], []>} : vector<32x32xf32>, vector<32x64xf32>, vector<32x64xf32> -> vector<32x64xf32>
    %501 = arith.addf %412, %500 : vector<32x64xf32>
    %cst_235 = arith.constant 5.000000e-01 : f32
    %502 = vector.broadcast %cst_235 : f32 to vector<32x64xf32>
    %503 = arith.mulf %502, %501 : vector<32x64xf32>
    %cst_236 = arith.constant 0.707106769 : f32
    %504 = vector.broadcast %cst_236 : f32 to vector<32x64xf32>
    %505 = arith.mulf %501, %504 : vector<32x64xf32>
    %cst_237 = arith.constant 0.000000e+00 : f32
    %506 = vector.broadcast %cst_237 : f32 to vector<32x64xf32>
    %507 = arith.cmpf olt, %505, %506 : vector<32x64xf32>
    %cst_238 = arith.constant -1.000000e+00 : f32
    %cst_239 = arith.constant 1.000000e+00 : f32
    %508 = vector.broadcast %cst_238 : f32 to vector<32x64xf32>
    %509 = vector.broadcast %cst_239 : f32 to vector<32x64xf32>
    %510 = arith.select %507, %508, %509 : vector<32x64xi1>, vector<32x64xf32>
    %511 = math.absf %505 : vector<32x64xf32>
    %cst_240 = arith.constant 0.327591091 : f32
    %512 = vector.broadcast %cst_240 : f32 to vector<32x64xf32>
    %513 = arith.mulf %512, %511 : vector<32x64xf32>
    %cst_241 = arith.constant 1.000000e+00 : f32
    %514 = vector.broadcast %cst_241 : f32 to vector<32x64xf32>
    %515 = arith.addf %514, %513 : vector<32x64xf32>
    %516 = tpu.reciprocal %515 {approx = true} : vector<32x64xf32> -> vector<32x64xf32>
    %cst_242 = arith.constant 1.06140542 : f32
    %517 = vector.broadcast %cst_242 : f32 to vector<32x64xf32>
    %518 = arith.mulf %517, %516 : vector<32x64xf32>
    %cst_243 = arith.constant -1.45315206 : f32
    %519 = vector.broadcast %cst_243 : f32 to vector<32x64xf32>
    %520 = arith.addf %518, %519 : vector<32x64xf32>
    %521 = arith.mulf %520, %516 : vector<32x64xf32>
    %cst_244 = arith.constant 1.42141378 : f32
    %522 = vector.broadcast %cst_244 : f32 to vector<32x64xf32>
    %523 = arith.addf %521, %522 : vector<32x64xf32>
    %524 = arith.mulf %523, %516 : vector<32x64xf32>
    %cst_245 = arith.constant -0.284496725 : f32
    %525 = vector.broadcast %cst_245 : f32 to vector<32x64xf32>
    %526 = arith.addf %524, %525 : vector<32x64xf32>
    %527 = arith.mulf %526, %516 : vector<32x64xf32>
    %cst_246 = arith.constant 0.254829586 : f32
    %528 = vector.broadcast %cst_246 : f32 to vector<32x64xf32>
    %529 = arith.addf %527, %528 : vector<32x64xf32>
    %530 = arith.mulf %529, %516 : vector<32x64xf32>
    %cst_247 = arith.constant 0.000000e+00 : f32
    %531 = vector.broadcast %cst_247 : f32 to vector<32x64xf32>
    %532 = arith.subf %531, %511 : vector<32x64xf32>
    %533 = arith.mulf %532, %511 : vector<32x64xf32>
    %534 = math.exp %533 : vector<32x64xf32>
    %535 = arith.mulf %530, %534 : vector<32x64xf32>
    %cst_248 = arith.constant 1.000000e+00 : f32
    %536 = vector.broadcast %cst_248 : f32 to vector<32x64xf32>
    %537 = arith.subf %536, %535 : vector<32x64xf32>
    %538 = arith.mulf %510, %537 : vector<32x64xf32>
    %cst_249 = arith.constant 1.000000e+00 : f32
    %539 = vector.broadcast %cst_249 : f32 to vector<32x64xf32>
    %540 = arith.addf %539, %538 : vector<32x64xf32>
    %541 = arith.mulf %503, %540 : vector<32x64xf32>
    %542 = vector.extract_strided_slice %541 {offsets = [0, 0], sizes = [32, 32], strides = [1, 1]} : vector<32x64xf32> to vector<32x32xf32>
    %543 = arith.addf %300, %542 : vector<32x32xf32>
    %cst_250 = arith.constant 0.707106769 : f32
    %544 = vector.broadcast %cst_250 : f32 to vector<32x32xf32>
    %545 = arith.mulf %543, %544 : vector<32x32xf32>
    %546 = vector.extract_strided_slice %541 {offsets = [0, 32], sizes = [32, 32], strides = [1, 1]} : vector<32x64xf32> to vector<32x32xf32>
    %547 = arith.addf %302, %546 : vector<32x32xf32>
    %c2 = arith.constant 2 : index
    %c0_251 = arith.constant 0 : index
    %c0_252 = arith.constant 0 : index
    %548 = vector.load %arg7[%c2, %c0_251, %c0_252] : memref<3x32x32xf32, #tpu.memory_space<vmem>>, vector<1x32x32xf32>
    %549 = vector.shape_cast %548 : vector<1x32x32xf32> to vector<32x32xf32>
    %cst_253 = arith.constant dense<0.000000e+00> : vector<1x32xf32>
    %550 = tpu.matmul %52, %549, %cst_253 {dimension_numbers = #tpu.dot_dimension_numbers<[1], [0], [0], [1], [0, 0, 1, 1], [], []>} : vector<1x32xf32>, vector<32x32xf32>, vector<1x32xf32> -> vector<1x32xf32>
    %c2_254 = arith.constant 2 : index
    %c0_255 = arith.constant 0 : index
    %c0_256 = arith.constant 0 : index
    %551 = vector.load %arg8[%c2_254, %c0_255, %c0_256] : memref<3x1x32xf32, #tpu.memory_space<vmem>>, vector<1x1x32xf32>
    %552 = vector.shape_cast %551 : vector<1x1x32xf32> to vector<1x32xf32>
    %553 = arith.addf %550, %552 : vector<1x32xf32>
    %554 = vector.broadcast %553 : vector<1x32xf32> to vector<32x32xf32>
    %555 = arith.addf %545, %554 : vector<32x32xf32>
    %cst_257 = arith.constant dense<0.000000e+00> : vector<32x32xf32>
    %556 = tpu.matmul %53, %555, %cst_257 {dimension_numbers = #tpu.dot_dimension_numbers<[1], [0], [0], [1], [0, 0, 1, 1], [], []>} : vector<32x32xf32>, vector<32x32xf32>, vector<32x32xf32> -> vector<32x32xf32>
    %c2_258 = arith.constant 2 : index
    %c0_259 = arith.constant 0 : index
    %c0_260 = arith.constant 0 : index
    %557 = vector.load %arg9[%c2_258, %c0_259, %c0_260] : memref<3x32x64xf32, #tpu.memory_space<vmem>>, vector<1x32x64xf32>
    %558 = vector.shape_cast %557 : vector<1x32x64xf32> to vector<32x64xf32>
    %cst_261 = arith.constant dense<0.000000e+00> : vector<32x64xf32>
    %559 = tpu.matmul %555, %558, %cst_261 {dimension_numbers = #tpu.dot_dimension_numbers<[1], [0], [0], [1], [0, 0, 1, 1], [], []>} : vector<32x32xf32>, vector<32x64xf32>, vector<32x64xf32> -> vector<32x64xf32>
    %c2_262 = arith.constant 2 : index
    %c0_263 = arith.constant 0 : index
    %c0_264 = arith.constant 0 : index
    %560 = vector.load %arg10[%c2_262, %c0_263, %c0_264] : memref<3x1x64xf32, #tpu.memory_space<vmem>>, vector<1x1x64xf32>
    %561 = vector.shape_cast %560 : vector<1x1x64xf32> to vector<1x64xf32>
    %562 = vector.broadcast %561 : vector<1x64xf32> to vector<32x64xf32>
    %563 = arith.addf %559, %562 : vector<32x64xf32>
    %c2_265 = arith.constant 2 : index
    %c0_266 = arith.constant 0 : index
    %c0_267 = arith.constant 0 : index
    %564 = vector.load %arg11[%c2_265, %c0_266, %c0_267] : memref<3x32x64xf32, #tpu.memory_space<vmem>>, vector<1x32x64xf32>
    %565 = vector.shape_cast %564 : vector<1x32x64xf32> to vector<32x64xf32>
    %cst_268 = arith.constant dense<0.000000e+00> : vector<32x64xf32>
    %566 = tpu.matmul %556, %565, %cst_268 {dimension_numbers = #tpu.dot_dimension_numbers<[1], [0], [0], [1], [0, 0, 1, 1], [], []>} : vector<32x32xf32>, vector<32x64xf32>, vector<32x64xf32> -> vector<32x64xf32>
    %c2_269 = arith.constant 2 : index
    %c0_270 = arith.constant 0 : index
    %c0_271 = arith.constant 0 : index
    %567 = vector.load %arg12[%c2_269, %c0_270, %c0_271] : memref<3x1x64xf32, #tpu.memory_space<vmem>>, vector<1x1x64xf32>
    %568 = vector.shape_cast %567 : vector<1x1x64xf32> to vector<1x64xf32>
    %569 = vector.broadcast %568 : vector<1x64xf32> to vector<32x64xf32>
    %570 = arith.addf %566, %569 : vector<32x64xf32>
    %c2_272 = arith.constant 2 : index
    %c0_273 = arith.constant 0 : index
    %c0_274 = arith.constant 0 : index
    %571 = vector.load %arg13[%c2_272, %c0_273, %c0_274] : memref<3x64x192xf32, #tpu.memory_space<vmem>>, vector<1x64x192xf32>
    %572 = vector.shape_cast %571 : vector<1x64x192xf32> to vector<64x192xf32>
    %c2_275 = arith.constant 2 : index
    %c0_276 = arith.constant 0 : index
    %c0_277 = arith.constant 0 : index
    %573 = vector.load %arg14[%c2_275, %c0_276, %c0_277] : memref<3x1x192xf32, #tpu.memory_space<vmem>>, vector<1x1x192xf32>
    %574 = vector.shape_cast %573 : vector<1x1x192xf32> to vector<1x192xf32>
    %c2_278 = arith.constant 2 : index
    %c0_279 = arith.constant 0 : index
    %c0_280 = arith.constant 0 : index
    %575 = vector.load %arg17[%c2_278, %c0_279, %c0_280] : memref<3x64x64xf32, #tpu.memory_space<vmem>>, vector<1x64x64xf32>
    %576 = vector.shape_cast %575 : vector<1x64x64xf32> to vector<64x64xf32>
    %c2_281 = arith.constant 2 : index
    %c0_282 = arith.constant 0 : index
    %c0_283 = arith.constant 0 : index
    %577 = vector.load %arg18[%c2_281, %c0_282, %c0_283] : memref<3x1x64xf32, #tpu.memory_space<vmem>>, vector<1x1x64xf32>
    %578 = vector.shape_cast %577 : vector<1x1x64xf32> to vector<1x64xf32>
    %cst_284 = arith.constant dense<0.000000e+00> : vector<32x192xf32>
    %579 = tpu.matmul %563, %572, %cst_284 {dimension_numbers = #tpu.dot_dimension_numbers<[1], [0], [0], [1], [0, 0, 1, 1], [], []>} : vector<32x64xf32>, vector<64x192xf32>, vector<32x192xf32> -> vector<32x192xf32>
    %580 = vector.broadcast %574 : vector<1x192xf32> to vector<32x192xf32>
    %581 = arith.addf %579, %580 : vector<32x192xf32>
    %582 = vector.extract_strided_slice %581 {offsets = [0, 0], sizes = [32, 16], strides = [1, 1]} : vector<32x192xf32> to vector<32x16xf32>
    %583 = vector.extract_strided_slice %581 {offsets = [0, 64], sizes = [32, 16], strides = [1, 1]} : vector<32x192xf32> to vector<32x16xf32>
    %584 = vector.extract_strided_slice %581 {offsets = [0, 128], sizes = [32, 16], strides = [1, 1]} : vector<32x192xf32> to vector<32x16xf32>
    "tpu.trace_start"() <{level = 10 : i32, message = "qd,kd->qk"}> : () -> ()
    %cst_285 = arith.constant dense<0.000000e+00> : vector<32x32xf32>
    %585 = tpu.matmul %582, %583, %cst_285 {dimension_numbers = #tpu.dot_dimension_numbers<[1], [1], [0], [0], [0, 0, 1, 0], [], []>} : vector<32x16xf32>, vector<32x16xf32>, vector<32x32xf32> -> vector<32x32xf32>
    "tpu.trace_stop"() : () -> ()
    %cst_286 = arith.constant 2.500000e-01 : f32
    %586 = vector.broadcast %cst_286 : f32 to vector<32x32xf32>
    %587 = arith.mulf %585, %586 : vector<32x32xf32>
    %588 = arith.addf %587, %55 : vector<32x32xf32>
    %cst_287 = arith.constant dense<0xFF800000> : vector<32xf32>
    %589 = vector.multi_reduction <maximumf>, %588, %cst_287 [1] : vector<32x32xf32> to vector<32xf32>
    %590 = vector.shape_cast %589 : vector<32xf32> to vector<32x1xf32>
    %591 = vector.broadcast %590 : vector<32x1xf32> to vector<32x32xf32>
    %592 = arith.subf %588, %591 : vector<32x32xf32>
    %593 = math.exp %592 : vector<32x32xf32>
    %cst_288 = arith.constant dense<0.000000e+00> : vector<32xf32>
    %594 = vector.multi_reduction <add>, %593, %cst_288 [1] : vector<32x32xf32> to vector<32xf32>
    %595 = vector.shape_cast %594 : vector<32xf32> to vector<32x1xf32>
    %596 = tpu.reciprocal %595 {approx = true} : vector<32x1xf32> -> vector<32x1xf32>
    %597 = vector.broadcast %596 : vector<32x1xf32> to vector<32x32xf32>
    %598 = arith.mulf %593, %597 : vector<32x32xf32>
    %cst_289 = arith.constant dense<0.000000e+00> : vector<32x16xf32>
    %599 = tpu.matmul %598, %584, %cst_289 {dimension_numbers = #tpu.dot_dimension_numbers<[1], [0], [0], [1], [0, 0, 1, 1], [], []>} : vector<32x32xf32>, vector<32x16xf32>, vector<32x16xf32> -> vector<32x16xf32>
    %600 = vector.extract_strided_slice %581 {offsets = [0, 16], sizes = [32, 16], strides = [1, 1]} : vector<32x192xf32> to vector<32x16xf32>
    %601 = vector.extract_strided_slice %581 {offsets = [0, 80], sizes = [32, 16], strides = [1, 1]} : vector<32x192xf32> to vector<32x16xf32>
    %602 = vector.extract_strided_slice %581 {offsets = [0, 144], sizes = [32, 16], strides = [1, 1]} : vector<32x192xf32> to vector<32x16xf32>
    "tpu.trace_start"() <{level = 10 : i32, message = "qd,kd->qk"}> : () -> ()
    %cst_290 = arith.constant dense<0.000000e+00> : vector<32x32xf32>
    %603 = tpu.matmul %600, %601, %cst_290 {dimension_numbers = #tpu.dot_dimension_numbers<[1], [1], [0], [0], [0, 0, 1, 0], [], []>} : vector<32x16xf32>, vector<32x16xf32>, vector<32x32xf32> -> vector<32x32xf32>
    "tpu.trace_stop"() : () -> ()
    %cst_291 = arith.constant 2.500000e-01 : f32
    %604 = vector.broadcast %cst_291 : f32 to vector<32x32xf32>
    %605 = arith.mulf %603, %604 : vector<32x32xf32>
    %606 = arith.addf %605, %55 : vector<32x32xf32>
    %cst_292 = arith.constant dense<0xFF800000> : vector<32xf32>
    %607 = vector.multi_reduction <maximumf>, %606, %cst_292 [1] : vector<32x32xf32> to vector<32xf32>
    %608 = vector.shape_cast %607 : vector<32xf32> to vector<32x1xf32>
    %609 = vector.broadcast %608 : vector<32x1xf32> to vector<32x32xf32>
    %610 = arith.subf %606, %609 : vector<32x32xf32>
    %611 = math.exp %610 : vector<32x32xf32>
    %cst_293 = arith.constant dense<0.000000e+00> : vector<32xf32>
    %612 = vector.multi_reduction <add>, %611, %cst_293 [1] : vector<32x32xf32> to vector<32xf32>
    %613 = vector.shape_cast %612 : vector<32xf32> to vector<32x1xf32>
    %614 = tpu.reciprocal %613 {approx = true} : vector<32x1xf32> -> vector<32x1xf32>
    %615 = vector.broadcast %614 : vector<32x1xf32> to vector<32x32xf32>
    %616 = arith.mulf %611, %615 : vector<32x32xf32>
    %cst_294 = arith.constant dense<0.000000e+00> : vector<32x16xf32>
    %617 = tpu.matmul %616, %602, %cst_294 {dimension_numbers = #tpu.dot_dimension_numbers<[1], [0], [0], [1], [0, 0, 1, 1], [], []>} : vector<32x32xf32>, vector<32x16xf32>, vector<32x16xf32> -> vector<32x16xf32>
    %618 = vector.extract_strided_slice %581 {offsets = [0, 32], sizes = [32, 16], strides = [1, 1]} : vector<32x192xf32> to vector<32x16xf32>
    %619 = vector.extract_strided_slice %581 {offsets = [0, 96], sizes = [32, 16], strides = [1, 1]} : vector<32x192xf32> to vector<32x16xf32>
    %620 = vector.extract_strided_slice %581 {offsets = [0, 160], sizes = [32, 16], strides = [1, 1]} : vector<32x192xf32> to vector<32x16xf32>
    "tpu.trace_start"() <{level = 10 : i32, message = "qd,kd->qk"}> : () -> ()
    %cst_295 = arith.constant dense<0.000000e+00> : vector<32x32xf32>
    %621 = tpu.matmul %618, %619, %cst_295 {dimension_numbers = #tpu.dot_dimension_numbers<[1], [1], [0], [0], [0, 0, 1, 0], [], []>} : vector<32x16xf32>, vector<32x16xf32>, vector<32x32xf32> -> vector<32x32xf32>
    "tpu.trace_stop"() : () -> ()
    %cst_296 = arith.constant 2.500000e-01 : f32
    %622 = vector.broadcast %cst_296 : f32 to vector<32x32xf32>
    %623 = arith.mulf %621, %622 : vector<32x32xf32>
    %624 = arith.addf %623, %55 : vector<32x32xf32>
    %cst_297 = arith.constant dense<0xFF800000> : vector<32xf32>
    %625 = vector.multi_reduction <maximumf>, %624, %cst_297 [1] : vector<32x32xf32> to vector<32xf32>
    %626 = vector.shape_cast %625 : vector<32xf32> to vector<32x1xf32>
    %627 = vector.broadcast %626 : vector<32x1xf32> to vector<32x32xf32>
    %628 = arith.subf %624, %627 : vector<32x32xf32>
    %629 = math.exp %628 : vector<32x32xf32>
    %cst_298 = arith.constant dense<0.000000e+00> : vector<32xf32>
    %630 = vector.multi_reduction <add>, %629, %cst_298 [1] : vector<32x32xf32> to vector<32xf32>
    %631 = vector.shape_cast %630 : vector<32xf32> to vector<32x1xf32>
    %632 = tpu.reciprocal %631 {approx = true} : vector<32x1xf32> -> vector<32x1xf32>
    %633 = vector.broadcast %632 : vector<32x1xf32> to vector<32x32xf32>
    %634 = arith.mulf %629, %633 : vector<32x32xf32>
    %cst_299 = arith.constant dense<0.000000e+00> : vector<32x16xf32>
    %635 = tpu.matmul %634, %620, %cst_299 {dimension_numbers = #tpu.dot_dimension_numbers<[1], [0], [0], [1], [0, 0, 1, 1], [], []>} : vector<32x32xf32>, vector<32x16xf32>, vector<32x16xf32> -> vector<32x16xf32>
    %636 = vector.extract_strided_slice %581 {offsets = [0, 48], sizes = [32, 16], strides = [1, 1]} : vector<32x192xf32> to vector<32x16xf32>
    %637 = vector.extract_strided_slice %581 {offsets = [0, 112], sizes = [32, 16], strides = [1, 1]} : vector<32x192xf32> to vector<32x16xf32>
    %638 = vector.extract_strided_slice %581 {offsets = [0, 176], sizes = [32, 16], strides = [1, 1]} : vector<32x192xf32> to vector<32x16xf32>
    "tpu.trace_start"() <{level = 10 : i32, message = "qd,kd->qk"}> : () -> ()
    %cst_300 = arith.constant dense<0.000000e+00> : vector<32x32xf32>
    %639 = tpu.matmul %636, %637, %cst_300 {dimension_numbers = #tpu.dot_dimension_numbers<[1], [1], [0], [0], [0, 0, 1, 0], [], []>} : vector<32x16xf32>, vector<32x16xf32>, vector<32x32xf32> -> vector<32x32xf32>
    "tpu.trace_stop"() : () -> ()
    %cst_301 = arith.constant 2.500000e-01 : f32
    %640 = vector.broadcast %cst_301 : f32 to vector<32x32xf32>
    %641 = arith.mulf %639, %640 : vector<32x32xf32>
    %642 = arith.addf %641, %55 : vector<32x32xf32>
    %cst_302 = arith.constant dense<0xFF800000> : vector<32xf32>
    %643 = vector.multi_reduction <maximumf>, %642, %cst_302 [1] : vector<32x32xf32> to vector<32xf32>
    %644 = vector.shape_cast %643 : vector<32xf32> to vector<32x1xf32>
    %645 = vector.broadcast %644 : vector<32x1xf32> to vector<32x32xf32>
    %646 = arith.subf %642, %645 : vector<32x32xf32>
    %647 = math.exp %646 : vector<32x32xf32>
    %cst_303 = arith.constant dense<0.000000e+00> : vector<32xf32>
    %648 = vector.multi_reduction <add>, %647, %cst_303 [1] : vector<32x32xf32> to vector<32xf32>
    %649 = vector.shape_cast %648 : vector<32xf32> to vector<32x1xf32>
    %650 = tpu.reciprocal %649 {approx = true} : vector<32x1xf32> -> vector<32x1xf32>
    %651 = vector.broadcast %650 : vector<32x1xf32> to vector<32x32xf32>
    %652 = arith.mulf %647, %651 : vector<32x32xf32>
    %cst_304 = arith.constant dense<0.000000e+00> : vector<32x16xf32>
    %653 = tpu.matmul %652, %638, %cst_304 {dimension_numbers = #tpu.dot_dimension_numbers<[1], [0], [0], [1], [0, 0, 1, 1], [], []>} : vector<32x32xf32>, vector<32x16xf32>, vector<32x16xf32> -> vector<32x16xf32>
    %654 = tpu.concatenate %599, %617, %635, %653 in 1 : vector<32x16xf32>, vector<32x16xf32>, vector<32x16xf32>, vector<32x16xf32> -> vector<32x64xf32>
    %cst_305 = arith.constant dense<0.000000e+00> : vector<32x64xf32>
    %655 = tpu.matmul %654, %576, %cst_305 {dimension_numbers = #tpu.dot_dimension_numbers<[1], [0], [0], [1], [0, 0, 1, 1], [], []>} : vector<32x64xf32>, vector<64x64xf32>, vector<32x64xf32> -> vector<32x64xf32>
    %656 = vector.broadcast %578 : vector<1x64xf32> to vector<32x64xf32>
    %657 = arith.addf %655, %656 : vector<32x64xf32>
    %c2_306 = arith.constant 2 : index
    %c0_307 = arith.constant 0 : index
    %c0_308 = arith.constant 0 : index
    %658 = vector.load %arg15[%c2_306, %c0_307, %c0_308] : memref<3x64x192xf32, #tpu.memory_space<vmem>>, vector<1x64x192xf32>
    %659 = vector.shape_cast %658 : vector<1x64x192xf32> to vector<64x192xf32>
    %c2_309 = arith.constant 2 : index
    %c0_310 = arith.constant 0 : index
    %c0_311 = arith.constant 0 : index
    %660 = vector.load %arg16[%c2_309, %c0_310, %c0_311] : memref<3x1x192xf32, #tpu.memory_space<vmem>>, vector<1x1x192xf32>
    %661 = vector.shape_cast %660 : vector<1x1x192xf32> to vector<1x192xf32>
    %c2_312 = arith.constant 2 : index
    %c0_313 = arith.constant 0 : index
    %c0_314 = arith.constant 0 : index
    %662 = vector.load %arg19[%c2_312, %c0_313, %c0_314] : memref<3x64x64xf32, #tpu.memory_space<vmem>>, vector<1x64x64xf32>
    %663 = vector.shape_cast %662 : vector<1x64x64xf32> to vector<64x64xf32>
    %c2_315 = arith.constant 2 : index
    %c0_316 = arith.constant 0 : index
    %c0_317 = arith.constant 0 : index
    %664 = vector.load %arg20[%c2_315, %c0_316, %c0_317] : memref<3x1x64xf32, #tpu.memory_space<vmem>>, vector<1x1x64xf32>
    %665 = vector.shape_cast %664 : vector<1x1x64xf32> to vector<1x64xf32>
    %cst_318 = arith.constant dense<0.000000e+00> : vector<32x192xf32>
    %666 = tpu.matmul %570, %659, %cst_318 {dimension_numbers = #tpu.dot_dimension_numbers<[1], [0], [0], [1], [0, 0, 1, 1], [], []>} : vector<32x64xf32>, vector<64x192xf32>, vector<32x192xf32> -> vector<32x192xf32>
    %667 = vector.broadcast %661 : vector<1x192xf32> to vector<32x192xf32>
    %668 = arith.addf %666, %667 : vector<32x192xf32>
    %669 = vector.extract_strided_slice %668 {offsets = [0, 0], sizes = [32, 16], strides = [1, 1]} : vector<32x192xf32> to vector<32x16xf32>
    %670 = vector.extract_strided_slice %668 {offsets = [0, 64], sizes = [32, 16], strides = [1, 1]} : vector<32x192xf32> to vector<32x16xf32>
    %671 = vector.extract_strided_slice %668 {offsets = [0, 128], sizes = [32, 16], strides = [1, 1]} : vector<32x192xf32> to vector<32x16xf32>
    "tpu.trace_start"() <{level = 10 : i32, message = "qd,kd->qk"}> : () -> ()
    %cst_319 = arith.constant dense<0.000000e+00> : vector<32x32xf32>
    %672 = tpu.matmul %669, %670, %cst_319 {dimension_numbers = #tpu.dot_dimension_numbers<[1], [1], [0], [0], [0, 0, 1, 0], [], []>} : vector<32x16xf32>, vector<32x16xf32>, vector<32x32xf32> -> vector<32x32xf32>
    "tpu.trace_stop"() : () -> ()
    %cst_320 = arith.constant 2.500000e-01 : f32
    %673 = vector.broadcast %cst_320 : f32 to vector<32x32xf32>
    %674 = arith.mulf %672, %673 : vector<32x32xf32>
    %675 = arith.addf %674, %56 : vector<32x32xf32>
    %cst_321 = arith.constant dense<0xFF800000> : vector<32xf32>
    %676 = vector.multi_reduction <maximumf>, %675, %cst_321 [1] : vector<32x32xf32> to vector<32xf32>
    %677 = vector.shape_cast %676 : vector<32xf32> to vector<32x1xf32>
    %678 = vector.broadcast %677 : vector<32x1xf32> to vector<32x32xf32>
    %679 = arith.subf %675, %678 : vector<32x32xf32>
    %680 = math.exp %679 : vector<32x32xf32>
    %cst_322 = arith.constant dense<0.000000e+00> : vector<32xf32>
    %681 = vector.multi_reduction <add>, %680, %cst_322 [1] : vector<32x32xf32> to vector<32xf32>
    %682 = vector.shape_cast %681 : vector<32xf32> to vector<32x1xf32>
    %683 = tpu.reciprocal %682 {approx = true} : vector<32x1xf32> -> vector<32x1xf32>
    %684 = vector.broadcast %683 : vector<32x1xf32> to vector<32x32xf32>
    %685 = arith.mulf %680, %684 : vector<32x32xf32>
    %cst_323 = arith.constant dense<0.000000e+00> : vector<32x16xf32>
    %686 = tpu.matmul %685, %671, %cst_323 {dimension_numbers = #tpu.dot_dimension_numbers<[1], [0], [0], [1], [0, 0, 1, 1], [], []>} : vector<32x32xf32>, vector<32x16xf32>, vector<32x16xf32> -> vector<32x16xf32>
    %687 = vector.extract_strided_slice %668 {offsets = [0, 16], sizes = [32, 16], strides = [1, 1]} : vector<32x192xf32> to vector<32x16xf32>
    %688 = vector.extract_strided_slice %668 {offsets = [0, 80], sizes = [32, 16], strides = [1, 1]} : vector<32x192xf32> to vector<32x16xf32>
    %689 = vector.extract_strided_slice %668 {offsets = [0, 144], sizes = [32, 16], strides = [1, 1]} : vector<32x192xf32> to vector<32x16xf32>
    "tpu.trace_start"() <{level = 10 : i32, message = "qd,kd->qk"}> : () -> ()
    %cst_324 = arith.constant dense<0.000000e+00> : vector<32x32xf32>
    %690 = tpu.matmul %687, %688, %cst_324 {dimension_numbers = #tpu.dot_dimension_numbers<[1], [1], [0], [0], [0, 0, 1, 0], [], []>} : vector<32x16xf32>, vector<32x16xf32>, vector<32x32xf32> -> vector<32x32xf32>
    "tpu.trace_stop"() : () -> ()
    %cst_325 = arith.constant 2.500000e-01 : f32
    %691 = vector.broadcast %cst_325 : f32 to vector<32x32xf32>
    %692 = arith.mulf %690, %691 : vector<32x32xf32>
    %693 = arith.addf %692, %56 : vector<32x32xf32>
    %cst_326 = arith.constant dense<0xFF800000> : vector<32xf32>
    %694 = vector.multi_reduction <maximumf>, %693, %cst_326 [1] : vector<32x32xf32> to vector<32xf32>
    %695 = vector.shape_cast %694 : vector<32xf32> to vector<32x1xf32>
    %696 = vector.broadcast %695 : vector<32x1xf32> to vector<32x32xf32>
    %697 = arith.subf %693, %696 : vector<32x32xf32>
    %698 = math.exp %697 : vector<32x32xf32>
    %cst_327 = arith.constant dense<0.000000e+00> : vector<32xf32>
    %699 = vector.multi_reduction <add>, %698, %cst_327 [1] : vector<32x32xf32> to vector<32xf32>
    %700 = vector.shape_cast %699 : vector<32xf32> to vector<32x1xf32>
    %701 = tpu.reciprocal %700 {approx = true} : vector<32x1xf32> -> vector<32x1xf32>
    %702 = vector.broadcast %701 : vector<32x1xf32> to vector<32x32xf32>
    %703 = arith.mulf %698, %702 : vector<32x32xf32>
    %cst_328 = arith.constant dense<0.000000e+00> : vector<32x16xf32>
    %704 = tpu.matmul %703, %689, %cst_328 {dimension_numbers = #tpu.dot_dimension_numbers<[1], [0], [0], [1], [0, 0, 1, 1], [], []>} : vector<32x32xf32>, vector<32x16xf32>, vector<32x16xf32> -> vector<32x16xf32>
    %705 = vector.extract_strided_slice %668 {offsets = [0, 32], sizes = [32, 16], strides = [1, 1]} : vector<32x192xf32> to vector<32x16xf32>
    %706 = vector.extract_strided_slice %668 {offsets = [0, 96], sizes = [32, 16], strides = [1, 1]} : vector<32x192xf32> to vector<32x16xf32>
    %707 = vector.extract_strided_slice %668 {offsets = [0, 160], sizes = [32, 16], strides = [1, 1]} : vector<32x192xf32> to vector<32x16xf32>
    "tpu.trace_start"() <{level = 10 : i32, message = "qd,kd->qk"}> : () -> ()
    %cst_329 = arith.constant dense<0.000000e+00> : vector<32x32xf32>
    %708 = tpu.matmul %705, %706, %cst_329 {dimension_numbers = #tpu.dot_dimension_numbers<[1], [1], [0], [0], [0, 0, 1, 0], [], []>} : vector<32x16xf32>, vector<32x16xf32>, vector<32x32xf32> -> vector<32x32xf32>
    "tpu.trace_stop"() : () -> ()
    %cst_330 = arith.constant 2.500000e-01 : f32
    %709 = vector.broadcast %cst_330 : f32 to vector<32x32xf32>
    %710 = arith.mulf %708, %709 : vector<32x32xf32>
    %711 = arith.addf %710, %56 : vector<32x32xf32>
    %cst_331 = arith.constant dense<0xFF800000> : vector<32xf32>
    %712 = vector.multi_reduction <maximumf>, %711, %cst_331 [1] : vector<32x32xf32> to vector<32xf32>
    %713 = vector.shape_cast %712 : vector<32xf32> to vector<32x1xf32>
    %714 = vector.broadcast %713 : vector<32x1xf32> to vector<32x32xf32>
    %715 = arith.subf %711, %714 : vector<32x32xf32>
    %716 = math.exp %715 : vector<32x32xf32>
    %cst_332 = arith.constant dense<0.000000e+00> : vector<32xf32>
    %717 = vector.multi_reduction <add>, %716, %cst_332 [1] : vector<32x32xf32> to vector<32xf32>
    %718 = vector.shape_cast %717 : vector<32xf32> to vector<32x1xf32>
    %719 = tpu.reciprocal %718 {approx = true} : vector<32x1xf32> -> vector<32x1xf32>
    %720 = vector.broadcast %719 : vector<32x1xf32> to vector<32x32xf32>
    %721 = arith.mulf %716, %720 : vector<32x32xf32>
    %cst_333 = arith.constant dense<0.000000e+00> : vector<32x16xf32>
    %722 = tpu.matmul %721, %707, %cst_333 {dimension_numbers = #tpu.dot_dimension_numbers<[1], [0], [0], [1], [0, 0, 1, 1], [], []>} : vector<32x32xf32>, vector<32x16xf32>, vector<32x16xf32> -> vector<32x16xf32>
    %723 = vector.extract_strided_slice %668 {offsets = [0, 48], sizes = [32, 16], strides = [1, 1]} : vector<32x192xf32> to vector<32x16xf32>
    %724 = vector.extract_strided_slice %668 {offsets = [0, 112], sizes = [32, 16], strides = [1, 1]} : vector<32x192xf32> to vector<32x16xf32>
    %725 = vector.extract_strided_slice %668 {offsets = [0, 176], sizes = [32, 16], strides = [1, 1]} : vector<32x192xf32> to vector<32x16xf32>
    "tpu.trace_start"() <{level = 10 : i32, message = "qd,kd->qk"}> : () -> ()
    %cst_334 = arith.constant dense<0.000000e+00> : vector<32x32xf32>
    %726 = tpu.matmul %723, %724, %cst_334 {dimension_numbers = #tpu.dot_dimension_numbers<[1], [1], [0], [0], [0, 0, 1, 0], [], []>} : vector<32x16xf32>, vector<32x16xf32>, vector<32x32xf32> -> vector<32x32xf32>
    "tpu.trace_stop"() : () -> ()
    %cst_335 = arith.constant 2.500000e-01 : f32
    %727 = vector.broadcast %cst_335 : f32 to vector<32x32xf32>
    %728 = arith.mulf %726, %727 : vector<32x32xf32>
    %729 = arith.addf %728, %56 : vector<32x32xf32>
    %cst_336 = arith.constant dense<0xFF800000> : vector<32xf32>
    %730 = vector.multi_reduction <maximumf>, %729, %cst_336 [1] : vector<32x32xf32> to vector<32xf32>
    %731 = vector.shape_cast %730 : vector<32xf32> to vector<32x1xf32>
    %732 = vector.broadcast %731 : vector<32x1xf32> to vector<32x32xf32>
    %733 = arith.subf %729, %732 : vector<32x32xf32>
    %734 = math.exp %733 : vector<32x32xf32>
    %cst_337 = arith.constant dense<0.000000e+00> : vector<32xf32>
    %735 = vector.multi_reduction <add>, %734, %cst_337 [1] : vector<32x32xf32> to vector<32xf32>
    %736 = vector.shape_cast %735 : vector<32xf32> to vector<32x1xf32>
    %737 = tpu.reciprocal %736 {approx = true} : vector<32x1xf32> -> vector<32x1xf32>
    %738 = vector.broadcast %737 : vector<32x1xf32> to vector<32x32xf32>
    %739 = arith.mulf %734, %738 : vector<32x32xf32>
    %cst_338 = arith.constant dense<0.000000e+00> : vector<32x16xf32>
    %740 = tpu.matmul %739, %725, %cst_338 {dimension_numbers = #tpu.dot_dimension_numbers<[1], [0], [0], [1], [0, 0, 1, 1], [], []>} : vector<32x32xf32>, vector<32x16xf32>, vector<32x16xf32> -> vector<32x16xf32>
    %741 = tpu.concatenate %686, %704, %722, %740 in 1 : vector<32x16xf32>, vector<32x16xf32>, vector<32x16xf32>, vector<32x16xf32> -> vector<32x64xf32>
    %cst_339 = arith.constant dense<0.000000e+00> : vector<32x64xf32>
    %742 = tpu.matmul %741, %663, %cst_339 {dimension_numbers = #tpu.dot_dimension_numbers<[1], [0], [0], [1], [0, 0, 1, 1], [], []>} : vector<32x64xf32>, vector<64x64xf32>, vector<32x64xf32> -> vector<32x64xf32>
    %743 = vector.broadcast %665 : vector<1x64xf32> to vector<32x64xf32>
    %744 = arith.addf %742, %743 : vector<32x64xf32>
    %cst_340 = arith.constant dense<0.000000e+00> : vector<32x64xf32>
    %745 = tpu.matmul %54, %744, %cst_340 {dimension_numbers = #tpu.dot_dimension_numbers<[1], [0], [0], [1], [0, 0, 1, 1], [], []>} : vector<32x32xf32>, vector<32x64xf32>, vector<32x64xf32> -> vector<32x64xf32>
    %746 = arith.addf %657, %745 : vector<32x64xf32>
    %cst_341 = arith.constant 5.000000e-01 : f32
    %747 = vector.broadcast %cst_341 : f32 to vector<32x64xf32>
    %748 = arith.mulf %747, %746 : vector<32x64xf32>
    %cst_342 = arith.constant 0.707106769 : f32
    %749 = vector.broadcast %cst_342 : f32 to vector<32x64xf32>
    %750 = arith.mulf %746, %749 : vector<32x64xf32>
    %cst_343 = arith.constant 0.000000e+00 : f32
    %751 = vector.broadcast %cst_343 : f32 to vector<32x64xf32>
    %752 = arith.cmpf olt, %750, %751 : vector<32x64xf32>
    %cst_344 = arith.constant -1.000000e+00 : f32
    %cst_345 = arith.constant 1.000000e+00 : f32
    %753 = vector.broadcast %cst_344 : f32 to vector<32x64xf32>
    %754 = vector.broadcast %cst_345 : f32 to vector<32x64xf32>
    %755 = arith.select %752, %753, %754 : vector<32x64xi1>, vector<32x64xf32>
    %756 = math.absf %750 : vector<32x64xf32>
    %cst_346 = arith.constant 0.327591091 : f32
    %757 = vector.broadcast %cst_346 : f32 to vector<32x64xf32>
    %758 = arith.mulf %757, %756 : vector<32x64xf32>
    %cst_347 = arith.constant 1.000000e+00 : f32
    %759 = vector.broadcast %cst_347 : f32 to vector<32x64xf32>
    %760 = arith.addf %759, %758 : vector<32x64xf32>
    %761 = tpu.reciprocal %760 {approx = true} : vector<32x64xf32> -> vector<32x64xf32>
    %cst_348 = arith.constant 1.06140542 : f32
    %762 = vector.broadcast %cst_348 : f32 to vector<32x64xf32>
    %763 = arith.mulf %762, %761 : vector<32x64xf32>
    %cst_349 = arith.constant -1.45315206 : f32
    %764 = vector.broadcast %cst_349 : f32 to vector<32x64xf32>
    %765 = arith.addf %763, %764 : vector<32x64xf32>
    %766 = arith.mulf %765, %761 : vector<32x64xf32>
    %cst_350 = arith.constant 1.42141378 : f32
    %767 = vector.broadcast %cst_350 : f32 to vector<32x64xf32>
    %768 = arith.addf %766, %767 : vector<32x64xf32>
    %769 = arith.mulf %768, %761 : vector<32x64xf32>
    %cst_351 = arith.constant -0.284496725 : f32
    %770 = vector.broadcast %cst_351 : f32 to vector<32x64xf32>
    %771 = arith.addf %769, %770 : vector<32x64xf32>
    %772 = arith.mulf %771, %761 : vector<32x64xf32>
    %cst_352 = arith.constant 0.254829586 : f32
    %773 = vector.broadcast %cst_352 : f32 to vector<32x64xf32>
    %774 = arith.addf %772, %773 : vector<32x64xf32>
    %775 = arith.mulf %774, %761 : vector<32x64xf32>
    %cst_353 = arith.constant 0.000000e+00 : f32
    %776 = vector.broadcast %cst_353 : f32 to vector<32x64xf32>
    %777 = arith.subf %776, %756 : vector<32x64xf32>
    %778 = arith.mulf %777, %756 : vector<32x64xf32>
    %779 = math.exp %778 : vector<32x64xf32>
    %780 = arith.mulf %775, %779 : vector<32x64xf32>
    %cst_354 = arith.constant 1.000000e+00 : f32
    %781 = vector.broadcast %cst_354 : f32 to vector<32x64xf32>
    %782 = arith.subf %781, %780 : vector<32x64xf32>
    %783 = arith.mulf %755, %782 : vector<32x64xf32>
    %cst_355 = arith.constant 1.000000e+00 : f32
    %784 = vector.broadcast %cst_355 : f32 to vector<32x64xf32>
    %785 = arith.addf %784, %783 : vector<32x64xf32>
    %786 = arith.mulf %748, %785 : vector<32x64xf32>
    %787 = vector.extract_strided_slice %786 {offsets = [0, 32], sizes = [32, 32], strides = [1, 1]} : vector<32x64xf32> to vector<32x32xf32>
    %788 = arith.addf %547, %787 : vector<32x32xf32>
    %cst_356 = arith.constant 0.707106769 : f32
    %789 = vector.broadcast %cst_356 : f32 to vector<32x32xf32>
    %790 = arith.mulf %788, %789 : vector<32x32xf32>
    %c0_357 = arith.constant 0 : index
    %c0_358 = arith.constant 0 : index
    %791 = vector.load %arg21[%c0_357, %c0_358] : memref<32x32xf32, #tpu.memory_space<vmem>>, vector<32x32xf32>
    %cst_359 = arith.constant dense<0.000000e+00> : vector<32x32xf32>
    %792 = tpu.matmul %790, %791, %cst_359 {dimension_numbers = #tpu.dot_dimension_numbers<[1], [0], [0], [1], [0, 0, 1, 1], [], []>} : vector<32x32xf32>, vector<32x32xf32>, vector<32x32xf32> -> vector<32x32xf32>
    %c0_360 = arith.constant 0 : index
    %c0_361 = arith.constant 0 : index
    %793 = vector.load %arg22[%c0_360, %c0_361] : memref<1x32xf32, #tpu.memory_space<vmem>>, vector<1x32xf32>
    %794 = vector.broadcast %793 : vector<1x32xf32> to vector<32x32xf32>
    %795 = arith.addf %792, %794 : vector<32x32xf32>
    %cst_362 = arith.constant 5.000000e-01 : f32
    %796 = vector.broadcast %cst_362 : f32 to vector<32x32xf32>
    %797 = arith.mulf %796, %795 : vector<32x32xf32>
    %cst_363 = arith.constant 0.707106769 : f32
    %798 = vector.broadcast %cst_363 : f32 to vector<32x32xf32>
    %799 = arith.mulf %795, %798 : vector<32x32xf32>
    %cst_364 = arith.constant 0.000000e+00 : f32
    %800 = vector.broadcast %cst_364 : f32 to vector<32x32xf32>
    %801 = arith.cmpf olt, %799, %800 : vector<32x32xf32>
    %cst_365 = arith.constant -1.000000e+00 : f32
    %cst_366 = arith.constant 1.000000e+00 : f32
    %802 = vector.broadcast %cst_365 : f32 to vector<32x32xf32>
    %803 = vector.broadcast %cst_366 : f32 to vector<32x32xf32>
    %804 = arith.select %801, %802, %803 : vector<32x32xi1>, vector<32x32xf32>
    %805 = math.absf %799 : vector<32x32xf32>
    %cst_367 = arith.constant 0.327591091 : f32
    %806 = vector.broadcast %cst_367 : f32 to vector<32x32xf32>
    %807 = arith.mulf %806, %805 : vector<32x32xf32>
    %cst_368 = arith.constant 1.000000e+00 : f32
    %808 = vector.broadcast %cst_368 : f32 to vector<32x32xf32>
    %809 = arith.addf %808, %807 : vector<32x32xf32>
    %810 = tpu.reciprocal %809 {approx = true} : vector<32x32xf32> -> vector<32x32xf32>
    %cst_369 = arith.constant 1.06140542 : f32
    %811 = vector.broadcast %cst_369 : f32 to vector<32x32xf32>
    %812 = arith.mulf %811, %810 : vector<32x32xf32>
    %cst_370 = arith.constant -1.45315206 : f32
    %813 = vector.broadcast %cst_370 : f32 to vector<32x32xf32>
    %814 = arith.addf %812, %813 : vector<32x32xf32>
    %815 = arith.mulf %814, %810 : vector<32x32xf32>
    %cst_371 = arith.constant 1.42141378 : f32
    %816 = vector.broadcast %cst_371 : f32 to vector<32x32xf32>
    %817 = arith.addf %815, %816 : vector<32x32xf32>
    %818 = arith.mulf %817, %810 : vector<32x32xf32>
    %cst_372 = arith.constant -0.284496725 : f32
    %819 = vector.broadcast %cst_372 : f32 to vector<32x32xf32>
    %820 = arith.addf %818, %819 : vector<32x32xf32>
    %821 = arith.mulf %820, %810 : vector<32x32xf32>
    %cst_373 = arith.constant 0.254829586 : f32
    %822 = vector.broadcast %cst_373 : f32 to vector<32x32xf32>
    %823 = arith.addf %821, %822 : vector<32x32xf32>
    %824 = arith.mulf %823, %810 : vector<32x32xf32>
    %cst_374 = arith.constant 0.000000e+00 : f32
    %825 = vector.broadcast %cst_374 : f32 to vector<32x32xf32>
    %826 = arith.subf %825, %805 : vector<32x32xf32>
    %827 = arith.mulf %826, %805 : vector<32x32xf32>
    %828 = math.exp %827 : vector<32x32xf32>
    %829 = arith.mulf %824, %828 : vector<32x32xf32>
    %cst_375 = arith.constant 1.000000e+00 : f32
    %830 = vector.broadcast %cst_375 : f32 to vector<32x32xf32>
    %831 = arith.subf %830, %829 : vector<32x32xf32>
    %832 = arith.mulf %804, %831 : vector<32x32xf32>
    %cst_376 = arith.constant 1.000000e+00 : f32
    %833 = vector.broadcast %cst_376 : f32 to vector<32x32xf32>
    %834 = arith.addf %833, %832 : vector<32x32xf32>
    %835 = arith.mulf %797, %834 : vector<32x32xf32>
    %c0_377 = arith.constant 0 : index
    %c0_378 = arith.constant 0 : index
    %836 = vector.load %arg23[%c0_377, %c0_378] : memref<1x32xf32, #tpu.memory_space<vmem>>, vector<1x32xf32>
    %837 = vector.broadcast %836 : vector<1x32xf32> to vector<32x32xf32>
    %838 = arith.mulf %835, %837 : vector<32x32xf32>
    %cst_379 = arith.constant dense<0.000000e+00> : vector<32xf32>
    %839 = vector.multi_reduction <add>, %838, %cst_379 [1] : vector<32x32xf32> to vector<32xf32>
    %840 = vector.shape_cast %839 : vector<32xf32> to vector<32x1xf32>
    %c0_380 = arith.constant 0 : index
    %c0_381 = arith.constant 0 : index
    %841 = vector.load %arg24[%c0_380, %c0_381] : memref<1x1xf32, #tpu.memory_space<vmem>>, vector<1x1xf32>
    %842 = vector.broadcast %841 : vector<1x1xf32> to vector<32x1xf32>
    %843 = arith.addf %840, %842 : vector<32x1xf32>
    %cst_382 = arith.constant 5.000000e-01 : f32
    %844 = vector.broadcast %cst_382 : f32 to vector<32x1xf32>
    %845 = arith.mulf %844, %843 : vector<32x1xf32>
    %cst_383 = arith.constant 0.707106769 : f32
    %846 = vector.broadcast %cst_383 : f32 to vector<32x1xf32>
    %847 = arith.mulf %843, %846 : vector<32x1xf32>
    %cst_384 = arith.constant 0.000000e+00 : f32
    %848 = vector.broadcast %cst_384 : f32 to vector<32x1xf32>
    %849 = arith.cmpf olt, %847, %848 : vector<32x1xf32>
    %cst_385 = arith.constant -1.000000e+00 : f32
    %cst_386 = arith.constant 1.000000e+00 : f32
    %850 = vector.broadcast %cst_385 : f32 to vector<32x1xf32>
    %851 = vector.broadcast %cst_386 : f32 to vector<32x1xf32>
    %852 = arith.select %849, %850, %851 : vector<32x1xi1>, vector<32x1xf32>
    %853 = math.absf %847 : vector<32x1xf32>
    %cst_387 = arith.constant 0.327591091 : f32
    %854 = vector.broadcast %cst_387 : f32 to vector<32x1xf32>
    %855 = arith.mulf %854, %853 : vector<32x1xf32>
    %cst_388 = arith.constant 1.000000e+00 : f32
    %856 = vector.broadcast %cst_388 : f32 to vector<32x1xf32>
    %857 = arith.addf %856, %855 : vector<32x1xf32>
    %858 = tpu.reciprocal %857 {approx = true} : vector<32x1xf32> -> vector<32x1xf32>
    %cst_389 = arith.constant 1.06140542 : f32
    %859 = vector.broadcast %cst_389 : f32 to vector<32x1xf32>
    %860 = arith.mulf %859, %858 : vector<32x1xf32>
    %cst_390 = arith.constant -1.45315206 : f32
    %861 = vector.broadcast %cst_390 : f32 to vector<32x1xf32>
    %862 = arith.addf %860, %861 : vector<32x1xf32>
    %863 = arith.mulf %862, %858 : vector<32x1xf32>
    %cst_391 = arith.constant 1.42141378 : f32
    %864 = vector.broadcast %cst_391 : f32 to vector<32x1xf32>
    %865 = arith.addf %863, %864 : vector<32x1xf32>
    %866 = arith.mulf %865, %858 : vector<32x1xf32>
    %cst_392 = arith.constant -0.284496725 : f32
    %867 = vector.broadcast %cst_392 : f32 to vector<32x1xf32>
    %868 = arith.addf %866, %867 : vector<32x1xf32>
    %869 = arith.mulf %868, %858 : vector<32x1xf32>
    %cst_393 = arith.constant 0.254829586 : f32
    %870 = vector.broadcast %cst_393 : f32 to vector<32x1xf32>
    %871 = arith.addf %869, %870 : vector<32x1xf32>
    %872 = arith.mulf %871, %858 : vector<32x1xf32>
    %cst_394 = arith.constant 0.000000e+00 : f32
    %873 = vector.broadcast %cst_394 : f32 to vector<32x1xf32>
    %874 = arith.subf %873, %853 : vector<32x1xf32>
    %875 = arith.mulf %874, %853 : vector<32x1xf32>
    %876 = math.exp %875 : vector<32x1xf32>
    %877 = arith.mulf %872, %876 : vector<32x1xf32>
    %cst_395 = arith.constant 1.000000e+00 : f32
    %878 = vector.broadcast %cst_395 : f32 to vector<32x1xf32>
    %879 = arith.subf %878, %877 : vector<32x1xf32>
    %880 = arith.mulf %852, %879 : vector<32x1xf32>
    %cst_396 = arith.constant 1.000000e+00 : f32
    %881 = vector.broadcast %cst_396 : f32 to vector<32x1xf32>
    %882 = arith.addf %881, %880 : vector<32x1xf32>
    %883 = arith.mulf %845, %882 : vector<32x1xf32>
    %c0_397 = arith.constant 0 : index
    %c0_398 = arith.constant 0 : index
    %c0_399 = arith.constant 0 : index
    %884 = vector.load %arg29[%c0_397, %c0_398, %c0_399] : memref<1x32x1xf32, #tpu.memory_space<vmem>>, vector<1x32x1xf32>
    %885 = vector.shape_cast %884 : vector<1x32x1xf32> to vector<32x1xf32>
    %886 = vector.shape_cast %883 : vector<32x1xf32> to vector<1x32x1xf32>
    tpu.vector_store %arg29[%c0_397, %c0_398, %c0_399], %886 {strides = array<i32>} : memref<1x32x1xf32, #tpu.memory_space<vmem>>, vector<1x32x1xf32>,
    return
  }
  func.func @transform_0(%arg0: i32) -> (i32, i32, i32) {
    %c0_i32 = arith.constant 0 : i32
    %c0_i32_0 = arith.constant 0 : i32
    %c0_i32_1 = arith.constant 0 : i32
    return %arg0, %c0_i32, %c0_i32_0 : i32, i32, i32
  }
  func.func @transform_1(%arg0: i32) -> (i32, i32, i32) {
    %c0_i32 = arith.constant 0 : i32
    %c0_i32_0 = arith.constant 0 : i32
    %c0_i32_1 = arith.constant 0 : i32
    return %arg0, %c0_i32, %c0_i32_0 : i32, i32, i32
  }
  func.func @transform_2(%arg0: i32) -> (i32, i32) {
    %c0_i32 = arith.constant 0 : i32
    %c0_i32_0 = arith.constant 0 : i32
    %c0_i32_1 = arith.constant 0 : i32
    return %c0_i32, %c0_i32_0 : i32, i32
  }
  func.func @transform_3(%arg0: i32) -> (i32, i32) {
    %c0_i32 = arith.constant 0 : i32
    %c0_i32_0 = arith.constant 0 : i32
    %c0_i32_1 = arith.constant 0 : i32
    return %c0_i32, %c0_i32_0 : i32, i32
  }
  func.func @transform_4(%arg0: i32) -> (i32, i32) {
    %c0_i32 = arith.constant 0 : i32
    %c0_i32_0 = arith.constant 0 : i32
    %c0_i32_1 = arith.constant 0 : i32
    return %c0_i32, %c0_i32_0 : i32, i32
  }
  func.func @transform_5(%arg0: i32) -> (i32, i32) {
    %c0_i32 = arith.constant 0 : i32
    %c0_i32_0 = arith.constant 0 : i32
    %c0_i32_1 = arith.constant 0 : i32
    return %c0_i32, %c0_i32_0 : i32, i32
  }
  func.func @transform_6(%arg0: i32) -> (i32, i32, i32) {
    %c0_i32 = arith.constant 0 : i32
    %c0_i32_0 = arith.constant 0 : i32
    %c0_i32_1 = arith.constant 0 : i32
    %c0_i32_2 = arith.constant 0 : i32
    return %c0_i32, %c0_i32_0, %c0_i32_1 : i32, i32, i32
  }
  func.func @transform_7(%arg0: i32) -> (i32, i32, i32) {
    %c0_i32 = arith.constant 0 : i32
    %c0_i32_0 = arith.constant 0 : i32
    %c0_i32_1 = arith.constant 0 : i32
    %c0_i32_2 = arith.constant 0 : i32
    return %c0_i32, %c0_i32_0, %c0_i32_1 : i32, i32, i32
  }
  func.func @transform_8(%arg0: i32) -> (i32, i32, i32) {
    %c0_i32 = arith.constant 0 : i32
    %c0_i32_0 = arith.constant 0 : i32
    %c0_i32_1 = arith.constant 0 : i32
    %c0_i32_2 = arith.constant 0 : i32
    return %c0_i32, %c0_i32_0, %c0_i32_1 : i32, i32, i32
  }
  func.func @transform_9(%arg0: i32) -> (i32, i32, i32) {
    %c0_i32 = arith.constant 0 : i32
    %c0_i32_0 = arith.constant 0 : i32
    %c0_i32_1 = arith.constant 0 : i32
    %c0_i32_2 = arith.constant 0 : i32
    return %c0_i32, %c0_i32_0, %c0_i32_1 : i32, i32, i32
  }
  func.func @transform_10(%arg0: i32) -> (i32, i32, i32) {
    %c0_i32 = arith.constant 0 : i32
    %c0_i32_0 = arith.constant 0 : i32
    %c0_i32_1 = arith.constant 0 : i32
    %c0_i32_2 = arith.constant 0 : i32
    return %c0_i32, %c0_i32_0, %c0_i32_1 : i32, i32, i32
  }
  func.func @transform_11(%arg0: i32) -> (i32, i32, i32) {
    %c0_i32 = arith.constant 0 : i32
    %c0_i32_0 = arith.constant 0 : i32
    %c0_i32_1 = arith.constant 0 : i32
    %c0_i32_2 = arith.constant 0 : i32
    return %c0_i32, %c0_i32_0, %c0_i32_1 : i32, i32, i32
  }
  func.func @transform_12(%arg0: i32) -> (i32, i32, i32) {
    %c0_i32 = arith.constant 0 : i32
    %c0_i32_0 = arith.constant 0 : i32
    %c0_i32_1 = arith.constant 0 : i32
    %c0_i32_2 = arith.constant 0 : i32
    return %c0_i32, %c0_i32_0, %c0_i32_1 : i32, i32, i32
  }
  func.func @transform_13(%arg0: i32) -> (i32, i32, i32) {
    %c0_i32 = arith.constant 0 : i32
    %c0_i32_0 = arith.constant 0 : i32
    %c0_i32_1 = arith.constant 0 : i32
    %c0_i32_2 = arith.constant 0 : i32
    return %c0_i32, %c0_i32_0, %c0_i32_1 : i32, i32, i32
  }
  func.func @transform_14(%arg0: i32) -> (i32, i32, i32) {
    %c0_i32 = arith.constant 0 : i32
    %c0_i32_0 = arith.constant 0 : i32
    %c0_i32_1 = arith.constant 0 : i32
    %c0_i32_2 = arith.constant 0 : i32
    return %c0_i32, %c0_i32_0, %c0_i32_1 : i32, i32, i32
  }
  func.func @transform_15(%arg0: i32) -> (i32, i32, i32) {
    %c0_i32 = arith.constant 0 : i32
    %c0_i32_0 = arith.constant 0 : i32
    %c0_i32_1 = arith.constant 0 : i32
    %c0_i32_2 = arith.constant 0 : i32
    return %c0_i32, %c0_i32_0, %c0_i32_1 : i32, i32, i32
  }
  func.func @transform_16(%arg0: i32) -> (i32, i32, i32) {
    %c0_i32 = arith.constant 0 : i32
    %c0_i32_0 = arith.constant 0 : i32
    %c0_i32_1 = arith.constant 0 : i32
    %c0_i32_2 = arith.constant 0 : i32
    return %c0_i32, %c0_i32_0, %c0_i32_1 : i32, i32, i32
  }
  func.func @transform_17(%arg0: i32) -> (i32, i32, i32) {
    %c0_i32 = arith.constant 0 : i32
    %c0_i32_0 = arith.constant 0 : i32
    %c0_i32_1 = arith.constant 0 : i32
    %c0_i32_2 = arith.constant 0 : i32
    return %c0_i32, %c0_i32_0, %c0_i32_1 : i32, i32, i32
  }
  func.func @transform_18(%arg0: i32) -> (i32, i32, i32) {
    %c0_i32 = arith.constant 0 : i32
    %c0_i32_0 = arith.constant 0 : i32
    %c0_i32_1 = arith.constant 0 : i32
    %c0_i32_2 = arith.constant 0 : i32
    return %c0_i32, %c0_i32_0, %c0_i32_1 : i32, i32, i32
  }
  func.func @transform_19(%arg0: i32) -> (i32, i32, i32) {
    %c0_i32 = arith.constant 0 : i32
    %c0_i32_0 = arith.constant 0 : i32
    %c0_i32_1 = arith.constant 0 : i32
    %c0_i32_2 = arith.constant 0 : i32
    return %c0_i32, %c0_i32_0, %c0_i32_1 : i32, i32, i32
  }
  func.func @transform_20(%arg0: i32) -> (i32, i32) {
    %c0_i32 = arith.constant 0 : i32
    %c0_i32_0 = arith.constant 0 : i32
    %c0_i32_1 = arith.constant 0 : i32
    return %c0_i32, %c0_i32_0 : i32, i32
  }
  func.func @transform_21(%arg0: i32) -> (i32, i32) {
    %c0_i32 = arith.constant 0 : i32
    %c0_i32_0 = arith.constant 0 : i32
    %c0_i32_1 = arith.constant 0 : i32
    return %c0_i32, %c0_i32_0 : i32, i32
  }
  func.func @transform_22(%arg0: i32) -> (i32, i32) {
    %c0_i32 = arith.constant 0 : i32
    %c0_i32_0 = arith.constant 0 : i32
    %c0_i32_1 = arith.constant 0 : i32
    return %c0_i32, %c0_i32_0 : i32, i32
  }
  func.func @transform_23(%arg0: i32) -> (i32, i32) {
    %c0_i32 = arith.constant 0 : i32
    %c0_i32_0 = arith.constant 0 : i32
    %c0_i32_1 = arith.constant 0 : i32
    return %c0_i32, %c0_i32_0 : i32, i32
  }
  func.func @transform_24(%arg0: i32) -> (i32, i32) {
    %c0_i32 = arith.constant 0 : i32
    %c0_i32_0 = arith.constant 0 : i32
    %c0_i32_1 = arith.constant 0 : i32
    return %c0_i32, %c0_i32_0 : i32, i32
  }
  func.func @transform_25(%arg0: i32) -> (i32, i32) {
    %c0_i32 = arith.constant 0 : i32
    %c0_i32_0 = arith.constant 0 : i32
    %c0_i32_1 = arith.constant 0 : i32
    return %c0_i32, %c0_i32_0 : i32, i32
  }
  func.func @transform_26(%arg0: i32) -> (i32, i32) {
    %c0_i32 = arith.constant 0 : i32
    %c0_i32_0 = arith.constant 0 : i32
    %c0_i32_1 = arith.constant 0 : i32
    return %c0_i32, %c0_i32_0 : i32, i32
  }
  func.func @transform_27(%arg0: i32) -> (i32, i32) {
    %c0_i32 = arith.constant 0 : i32
    %c0_i32_0 = arith.constant 0 : i32
    %c0_i32_1 = arith.constant 0 : i32
    return %c0_i32, %c0_i32_0 : i32, i32
  }
  func.func @transform_28(%arg0: i32) -> (i32, i32, i32) {
    %c0_i32 = arith.constant 0 : i32
    %c0_i32_0 = arith.constant 0 : i32
    %c0_i32_1 = arith.constant 0 : i32
    return %arg0, %c0_i32, %c0_i32_0 : i32, i32, i32
  }
}

</mosaic_0001>

<bundles_post_ra>
// kernel: attention_model_pallas.1
= control target key start
LH: loop header
LB: loop body
LE: loop exit
PB: predicated region body
PF: predicated region fallthrough
CT: control target
= control target key end

     0   :  { %s13237_s0 = inlined_call_operand.vmem [shape: f32[2,32,2], index: 0, kind: input, shape index: {}]   ;;  %s13238_s1 = inlined_call_operand.vmem [shape: f32[2,1,128], index: 1, kind: input, shape index: {}]   ;;  %s13239_s2 = inlined_call_operand.vmem [shape: f32[2,32], index: 2, kind: input, shape index: {}]   ;;  %s13240_s3 = inlined_call_operand.hbm [shape: f32[1,32], index: 3, kind: input, shape index: {}]   ;;  %s13241_s4 = inlined_call_operand.vmem [shape: f32[128,32], index: 4, kind: input, shape index: {}]   ;;  %s13242_s5 = inlined_call_operand.hbm [shape: f32[1,32], index: 5, kind: input, shape index: {}]   ;;  %s13243_s6 = inlined_call_operand.vmem [shape: f32[3,32,32], index: 6, kind: input, shape index: {}]   ;;  %s13244_s7 = inlined_call_operand.hbm [shape: f32[3,1,32], index: 7, kind: input, shape index: {}]   ;;  %s13245_s8 = inlined_call_operand.hbm [shape: f32[3,32,64], index: 8, kind: input, shape index: {}]   ;;  %s13246_s9 = inlined_call_operand.hbm [shape: f32[3,1,64], index: 9, kind: input, shape index: {}]   ;;  %s13247_s10 = inlined_call_operand.hbm [shape: f32[3,32,64], index: 10, kind: input, shape index: {}]   ;;  %s13248_s11 = inlined_call_operand.hbm [shape: f32[3,1,64], index: 11, kind: input, shape index: {}]   ;;  %s13249_s12 = inlined_call_operand.vmem [shape: f32[3,64,192], index: 12, kind: input, shape index: {}]   ;;  %s13250_s13 = inlined_call_operand.hbm [shape: f32[3,1,192], index: 13, kind: input, shape index: {}]   ;;  %s13251_s14 = inlined_call_operand.hbm [shape: f32[3,64,192], index: 14, kind: input, shape index: {}]   ;;  %s13252_s15 = inlined_call_operand.hbm [shape: f32[3,1,192], index: 15, kind: input, shape index: {}]   ;;  %s13253_s16 = inlined_call_operand.hbm [shape: f32[3,64,64], index: 16, kind: input, shape index: {}]   ;;  %s13254_s17 = inlined_call_operand.hbm [shape: f32[3,1,64], index: 17, kind: input, shape index: {}]   ;;  %s13255_s18 = inlined_call_operand.hbm [shape: f32[3,64,64], index: 18, kind: input, shape index: {}]   ;;  %s13256_s19 = inlined_call_operand.hbm [shape: f32[3,1,64], index: 19, kind: input, shape index: {}]   ;;  %s13257_s20 = inlined_call_operand.vmem [shape: f32[32,32], index: 20, kind: input, shape index: {}]   ;;  %s13258_s21 = inlined_call_operand.hbm [shape: f32[1,32], index: 21, kind: input, shape index: {}]   ;;  %s13259_s22 = inlined_call_operand.hbm [shape: f32[1,32], index: 22, kind: input, shape index: {}]   ;;  %s13260_s23 = inlined_call_operand.<no memory space> [shape: f32[1,1], index: 23, kind: input, shape index: {}]   ;;  %s13261_s24 = inlined_call_operand.hbm [shape: f32[32,32], index: 24, kind: input, shape index: {}]   ;;  %s13262_s25 = inlined_call_operand.hbm [shape: f32[32,32], index: 25, kind: input, shape index: {}]   ;;  %s13263_s26 = inlined_call_operand.vmem [shape: f32[32,32], index: 26, kind: input, shape index: {}]   ;;  %s13264_s27 = inlined_call_operand.vmem [shape: f32[32,32], index: 27, kind: input, shape index: {}]   ;;  %s13265_s28 = inlined_call_operand.vmem [shape: f32[2,32,1], index: 28, kind: output, shape index: {}]  }
   0x1   :  { %13275 = sst [smem:[#allocation42_spill]] %s13237_s0  ;;  %v33_v0 = vstv %s13260_s23 }
   0x2   :  { %13276 = sst [smem:[#allocation43_spill]] %s13238_s1  ;;  %34 = vst [vmem:[#allocation2] sm:$0x1] %v33_v0 }
   0x3   :  { %13277 = sst [smem:[#allocation44_spill]] %s13239_s2 }
   0x4   :  { %13278 = sst [smem:[#allocation45_spill]] %s13240_s3 }
   0x5   :  { %13279 = sst [smem:[#allocation46_spill]] %s13241_s4 }
   0x6   :  { %13280 = sst [smem:[#allocation47_spill]] %s13242_s5 }
   0x7   :  { %13281 = sst [smem:[#allocation48_spill]] %s13243_s6 }
   0x8   :  { %13282 = sst [smem:[#allocation49_spill]] %s13244_s7 }
   0x9   :  { %13283 = sst [smem:[#allocation50_spill]] %s13245_s8 }
   0xa   :  { %13284 = sst [smem:[#allocation51_spill]] %s13246_s9 }
   0xb   :  { %13285 = sst [smem:[#allocation52_spill]] %s13247_s10 }
   0xc   :  { %13286 = sst [smem:[#allocation53_spill]] %s13248_s11 }
   0xd   :  { %13287 = sst [smem:[#allocation54_spill]] %s13249_s12 }
   0xe   :  { %13288 = sst [smem:[#allocation55_spill]] %s13250_s13 }
   0xf   :  { %13289 = sst [smem:[#allocation56_spill]] %s13252_s15 }
  0x10   :  { %13290 = sst [smem:[#allocation57_spill]] %s13257_s20 }
  0x11   :  { %13291 = sst [smem:[#allocation58_spill]] %s13265_s28 }
  0x12   :  { %35 = vsyncpa [#allocation4], 0 }
  0x13   :  { %36 = vsyncpa [#allocation6], 0 }
  0x14   :  { %37 = vsyncpa [#allocation9], 0 }
  0x15   :  { %38 = vsyncpa [#allocation12], 0 }
  0x16   :  { %39 = vsyncpa [#allocation15], 0 }
  0x17   :  { %40 = vsyncpa [#allocation18], 0 }
  0x18   :  { %41 = vsyncpa [#allocation21], 0 }
  0x19   :  { %42 = vsyncpa [#allocation24], 0 }
  0x1a   :  { %43 = vsyncpa [#allocation27], 0 }
  0x1b   :  { %44 = vsyncpa [#allocation30], 0  ;;  %s10214_s9 = smov 0  }
  0x1c LB: > { %13292 = sst [smem:[#allocation41_spill]] %s10031_s9  ;;  %s10223_s10 = sadd.s32 4294967295, %s10031_s9   ;;  %s10031_s9 = sphi %s10214_s9, %s50_s9  }
  0x1d   : > { %s13293_s3 = sld [smem:[#allocation47_spill]]  ;;  %p8018_p0 = scmp.ge.s32.totalorder %s10031_s9, 1 }
  0x1e   : > { %p679_p1 = scmp.lt.s32.totalorder %s10031_s9, 3  ;;  %p8660_p2 = scmp.eq.s32.totalorder %s10223_s10, 0 }
  0x1f   : > { %s10033_s11 = smov [#allocation5]   ;;  %s13295_s12 = sld [smem:[#allocation50_spill]] }
  0x20   : > { %p10228_p3 = pnand %p8018_p0, %p679_p1  ;;  %s711_s29 = sshll.u32 %s10033_s11, 4  ;;  %s712_s29 = int_to_ptr.vmem [resolvable:$true] %s711_s29 }
  0x21   : > { %s10034_s8 = smov [#allocation8]   ;;  %s13271_s2 = smov 128  }
  0x22   : > { %p8605_p4 = pneg %p10228_p3  ;;  %s739_s5 = sshll.u32 %s10034_s8, 4  ;;  %s740_s5 = int_to_ptr.vmem [resolvable:$true] %s739_s5 }
  0x23   : > { %s709_s6 = sshll.u32 %s13293_s3, 4  ;;  %s13297_s3 = sld [smem:[#allocation52_spill]]  ;;  %s710_s6 = int_to_ptr.hbm [resolvable:$true] %s709_s6 }
  0x24   : > { %p10239_p5 = pnand %p8660_p2, %p8605_p4  ;;  %s13273_s7 = smov 8  }
  0x25   : > { %s737_s1 = sshll.u32 %s13295_s12, 4  ;;  %s10037_s12 = smov [#allocation11]   ;;  %s738_s1 = int_to_ptr.hbm [resolvable:$true] %s737_s1 }
  0x26   : > { %8611 = dma.hbm_to_vmem [thread:$0]  (!%p10239_p5), %s710_s6, 16, %s712_s29, [#allocation6]  }
  0x27   : > { %8617 = dma.hbm_to_vmem [thread:$0]  (!%p10239_p5), %s738_s1, 1536, %s740_s5, [#allocation9], %s13271_s2, %s13271_s2, %s13273_s7  }
  0x28   : > { %s767_s9 = sshll.u32 %s10037_s12, 4  ;;  %s13298_s13 = sld [smem:[#allocation55_spill]]  ;;  %s768_s9 = int_to_ptr.vmem [resolvable:$true] %s767_s9 }
  0x29   : > { %s765_s11 = sshll.u32 %s13297_s3, 4  ;;  %s10038_s6 = smov [#allocation14]   ;;  %s766_s11 = int_to_ptr.hbm [resolvable:$true] %s765_s11 }
  0x2a   : > { %8623 = dma.hbm_to_vmem [thread:$0]  (!%p10239_p5), %s766_s11, 1536, %s768_s9, [#allocation12], %s13271_s2, %s13271_s2, %s13273_s7  }
  0x2b   : > { %s798_s29 = sshll.u32 %s10038_s6, 4  ;;  %s13299_s15 = sld [smem:[#allocation56_spill]]  ;;  %s799_s29 = int_to_ptr.vmem [resolvable:$true] %s798_s29 }
  0x2c   : > { %s10039_s23 = smov 32   ;;  %s10040_s3 = smov 2  }
  0x2d   : > { %s10041_s28 = smov [#allocation17]   ;;  %s852_s11 = sshll.u32 %s13254_s17, 4  ;;  %s853_s11 = int_to_ptr.hbm [resolvable:$true] %s852_s11 }
  0x2e   : > { %s796_s20 = sshll.u32 %s13298_s13, 4  ;;  %s826_s12 = sshll.u32 %s10041_s28, 4  ;;  %s797_s20 = int_to_ptr.hbm [resolvable:$true] %s796_s20  ;;  %s827_s12 = int_to_ptr.vmem [resolvable:$true] %s826_s12 }
  0x2f   : > { %8629 = dma.hbm_to_vmem [thread:$0]  (!%p10239_p5), %s797_s20, 96, %s799_s29, [#allocation15], %s10039_s23, %s10039_s23, %s10040_s3  }
  0x30   : > { %s10042_s6 = smov [#allocation20]   ;;  %s880_s7 = sshll.u32 %s13256_s19, 4  ;;  %s881_s7 = int_to_ptr.hbm [resolvable:$true] %s880_s7 }
  0x31   : > { %s824_s5 = sshll.u32 %s13299_s15, 4  ;;  %s854_s30 = sshll.u32 %s10042_s6, 4  ;;  %s825_s5 = int_to_ptr.hbm [resolvable:$true] %s824_s5  ;;  %s855_s30 = int_to_ptr.vmem [resolvable:$true] %s854_s30 }
  0x32   : > { %8635 = dma.hbm_to_vmem [thread:$0]  (!%p10239_p5), %s825_s5, 96, %s827_s12, [#allocation18], %s10039_s23, %s10039_s23, %s10040_s3  }
  0x33   : > { %s10043_s20 = smov 16   ;;  %s10044_s29 = smov 1  }
  0x34   : > { %8641 = dma.hbm_to_vmem [thread:$0]  (!%p10239_p5), %s853_s11, 48, %s855_s30, [#allocation21], %s10043_s20, %s10043_s20, %s10044_s29  }
  0x35   : > { %s10045_s5 = smov [#allocation23]   ;;  %s910_s12 = sshll.u32 %s13259_s22, 4  ;;  %s911_s12 = int_to_ptr.hbm [resolvable:$true] %s910_s12 }
  0x36   : > { %s882_s23 = sshll.u32 %s10045_s5, 4  ;;  %s13300_s9 = sld [smem:[#allocation45_spill]]  ;;  %s883_s23 = int_to_ptr.vmem [resolvable:$true] %s882_s23 }
  0x37   : > { %8647 = dma.hbm_to_vmem [thread:$0]  (!%p10239_p5), %s881_s7, 48, %s883_s23, [#allocation24], %s10043_s20, %s10043_s20, %s10044_s29  }
  0x38   : > { %s10046_s11 = smov [#allocation26]   ;;  %s10047_s1 = smov [#allocation3]  }
  0x39   : > { %s912_s30 = sshll.u32 %s10046_s11, 4  ;;  %s696_s5 = sshll.u32 %s10047_s1, 4  ;;  %s913_s30 = int_to_ptr.vmem [resolvable:$true] %s912_s30  ;;  %s697_s5 = int_to_ptr.vmem [resolvable:$true] %s696_s5 }
  0x3a   : > { %8653 = dma.hbm_to_vmem [thread:$0]  (!%p10239_p5), %s911_s12, 16, %s913_s30, [#allocation27]  }
  0x3b   : > { %s13301_s13 = sld [smem:[#allocation49_spill]]  ;;  %s10049_s12 = smov [#allocation10]  }
  0x3c   : > { %s694_s6 = sshll.u32 %s13300_s9, 4  ;;  %s13302_s2 = sld [smem:[#allocation51_spill]]  ;;  %s695_s6 = int_to_ptr.hbm [resolvable:$true] %s694_s6 }
  0x3d   : > { %8608 = dma.hbm_to_vmem [thread:$0]  (!%p10239_p5), %s695_s6, 16, %s697_s5, [#allocation4]  }
  0x3e   : > { %s10048_s9 = smov [#allocation7]   ;;  %s13303_s3 = sld [smem:[#allocation53_spill]] }
  0x3f   : > { %s725_s11 = sshll.u32 %s10048_s9, 4  ;;  %s810_s7 = sshll.u32 %s13251_s14, 4  ;;  %s726_s11 = int_to_ptr.vmem [resolvable:$true] %s725_s11  ;;  %s811_s7 = int_to_ptr.hbm [resolvable:$true] %s810_s7 }
  0x40   : > { %s10050_s23 = smov [#allocation13]   ;;  %s10053_s30 = smov [#allocation19]  }
  0x41   : > { %s723_s15 = sshll.u32 %s13301_s13, 4  ;;  %s753_s13 = sshll.u32 %s10049_s12, 4  ;;  %s724_s15 = int_to_ptr.hbm [resolvable:$true] %s723_s15  ;;  %s754_s13 = int_to_ptr.vmem [resolvable:$true] %s753_s13 }
  0x42   : > { %s751_s8 = sshll.u32 %s13302_s2, 4  ;;  %s10051_s2 = smov [#allocation16]   ;;  %s752_s8 = int_to_ptr.hbm [resolvable:$true] %s751_s8 }
  0x43   : > { %8614 = dma.hbm_to_vmem [thread:$0]  (!%p10239_p5), %s724_s15, 48, %s726_s11, [#allocation6], %s10043_s20, %s10043_s20, %s10044_s29  }
  0x44   : > { %s779_s6 = sshll.u32 %s13303_s3, 4  ;;  %s781_s15 = sshll.u32 %s10050_s23, 4  ;;  %s780_s6 = int_to_ptr.hbm [resolvable:$true] %s779_s6  ;;  %s782_s15 = int_to_ptr.vmem [resolvable:$true] %s781_s15 }
  0x45   : > { %8620 = dma.hbm_to_vmem [thread:$0]  (!%p10239_p5), %s752_s8, 48, %s754_s13, [#allocation9], %s10043_s20, %s10043_s20, %s10044_s29  }
  0x46   : > { %8626 = dma.hbm_to_vmem [thread:$0]  (!%p10239_p5), %s780_s6, 48, %s782_s15, [#allocation12], %s10043_s20, %s10043_s20, %s10044_s29  }
  0x47   : > { %s812_s9 = sshll.u32 %s10051_s2, 4  ;;  %s838_s8 = sshll.u32 %s13253_s16, 4  ;;  %s813_s9 = int_to_ptr.vmem [resolvable:$true] %s812_s9  ;;  %s839_s8 = int_to_ptr.hbm [resolvable:$true] %s838_s8 }
  0x48   : > { %s10052_s13 = smov 256   ;;  %s840_s1 = sshll.u32 %s10053_s30, 4  ;;  %s841_s1 = int_to_ptr.vmem [resolvable:$true] %s840_s1 }
  0x49   : > { %8632 = dma.hbm_to_vmem [thread:$0]  (!%p10239_p5), %s811_s7, 6144, %s813_s9, [#allocation15], %s10052_s13, %s10052_s13, %s10043_s20  }
  0x4a   : > { %s866_s29 = sshll.u32 %s13255_s18, 4  ;;  %s13304_s6 = smov 8   ;;  %s867_s29 = int_to_ptr.hbm [resolvable:$true] %s866_s29 }
  0x4b   : > { %s13305_s28 = smov 128   ;;  %s898_s2 = sshll.u32 %s13258_s21, 4  ;;  %s899_s2 = int_to_ptr.hbm [resolvable:$true] %s898_s2 }
  0x4c   : > { %8638 = dma.hbm_to_vmem [thread:$0]  (!%p10239_p5), %s839_s8, 3072, %s841_s1, [#allocation18], %s13305_s28, %s13305_s28, %s13304_s6  }
  0x4d   : > { %s10054_s20 = smov [#allocation22]   ;;  %s10055_s9 = smov [#allocation25]  }
  0x4e   : > { %s868_s7 = sshll.u32 %s10054_s20, 4  ;;  %s900_s11 = sshll.u32 %s10055_s9, 4  ;;  %s869_s7 = int_to_ptr.vmem [resolvable:$true] %s868_s7  ;;  %s901_s11 = int_to_ptr.vmem [resolvable:$true] %s900_s11 }
  0x4f   : > { %8644 = dma.hbm_to_vmem [thread:$0]  (!%p10239_p5), %s867_s29, 3072, %s869_s7, [#allocation21], %s13305_s28, %s13305_s28, %s13304_s6  }
  0x50   : > { %s924_s8 = sshll.u32 %s13261_s24, 4  ;;  %s938_s3 = sshll.u32 %s13262_s25, 4  ;;  %s925_s8 = int_to_ptr.hbm [resolvable:$true] %s924_s8  ;;  %s939_s3 = int_to_ptr.hbm [resolvable:$true] %s938_s3 }
  0x51   : > { %8650 = dma.hbm_to_vmem [thread:$0]  (!%p10239_p5), %s899_s2, 16, %s901_s11, [#allocation24]  }
  0x52   : > { %s10056_s5 = smov [#allocation28]   ;;  %s10057_s29 = smov [#allocation29]  }
  0x53   : > { %s926_s23 = sshll.u32 %s10056_s5, 4  ;;  %s940_s15 = sshll.u32 %s10057_s29, 4  ;;  %s927_s23 = int_to_ptr.vmem [resolvable:$true] %s926_s23  ;;  %s941_s15 = int_to_ptr.vmem [resolvable:$true] %s940_s15 }
  0x54   : > { %8656 = dma.hbm_to_vmem [thread:$0]  (!%p10239_p5), %s925_s8, 512, %s927_s23, [#allocation27], %s13305_s28, %s13305_s28, %s13304_s6  }
  0x55   : > { %8659 = dma.hbm_to_vmem [thread:$0]  (!%p10239_p5), %s939_s3, 512, %s941_s15, [#allocation30], %s13305_s28, %s13305_s28, %s13304_s6  }
  0x56   : > { %976 = sbr.rel (%p10228_p3) target bundleno = 7979 (0x1f2b), region = 132 }
  0x5b   : > { %9990 = dma.done.wait (%p8660_p2), [#allocation4], 16  }
  0x5c   : > { %9992 = vsyncadd (%p8660_p2), [#allocation4], 4294967280 }
  0x5d   : > { %9994 = dma.done.wait (%p8660_p2), [#allocation6], 64  }
  0x5e   : > { %9996 = vsyncadd (%p8660_p2), [#allocation6], 4294967232 }
  0x5f   : > { %9998 = dma.done.wait (%p8660_p2), [#allocation9], 1584  }
  0x60   : > { %10000 = vsyncadd (%p8660_p2), [#allocation9], 4294965712 }
  0x61   : > { %10002 = dma.done.wait (%p8660_p2), [#allocation12], 1584  }
  0x62   : > { %10004 = vsyncadd (%p8660_p2), [#allocation12], 4294965712 }
  0x63   : > { %10006 = dma.done.wait (%p8660_p2), [#allocation15], 6240  }
  0x64   : > { %10008 = vsyncadd (%p8660_p2), [#allocation15], 4294961056 }
  0x65   : > { %10010 = dma.done.wait (%p8660_p2), [#allocation18], 3168  }
  0x66   : > { %10012 = vsyncadd (%p8660_p2), [#allocation18], 4294964128 }
  0x67   : > { %10014 = dma.done.wait (%p8660_p2), [#allocation21], 3120  }
  0x68   : > { %10016 = vsyncadd (%p8660_p2), [#allocation21], 4294964176 }
  0x69   : > { %10018 = dma.done.wait (%p8660_p2), [#allocation24], 64  }
  0x6a   : > { %10020 = vsyncadd (%p8660_p2), [#allocation24], 4294967232 }
  0x6b   : > { %10022 = dma.done.wait (%p8660_p2), [#allocation27], 528  }
  0x6c   : > { %10024 = vsyncadd (%p8660_p2), [#allocation27], 4294966768 }
  0x6d   : > { %10026 = dma.done.wait (%p8660_p2), [#allocation30], 512  }
  0x6e   : > { %10028 = vsyncadd (%p8660_p2), [#allocation30], 4294966784  ;;  %p1139_p6 = scmp.lt.s32.totalorder %s10223_s10, 1  ;;  %s13306_s6 = sld [smem:[#allocation46_spill]]  ;;  %vm1174_vm0 = vcmask 1041408   ;;  %vm1161_vm1 = vcmask 15360  }
  0x6f   : > { %s13307_s13 = sld [smem:[#allocation42_spill]]  ;;  %v1328_v27 = vld [vmem:[#allocation5] sm:$0x1]  ;;  %vm1370_vm2 = vcmask 261120   ;;  %v8917_v34 = vld [vmem:[#allocation3] ss:$0 sm:$0xff] }
  0x70   : > { %s13316_s10 = smov (!%p1139_p6, %s10223_s10), 1  ;;  %s13308_s23 = sld [smem:[#allocation44_spill]]  ;;  %vm1569_vm7 = vcmask 523264   ;;  %vm1652_vm8 = vcmask 130048   ;;  %vm2349_vm9 = vcmask 392192  }
  0x71   : > { %s8523_s20 = sshll.u32 %s13316_s10, 5  ;;  %s13309_s7 = sld [smem:[#allocation48_spill]] }
  0x72   : > { %s13310_s5 = sld [smem:[#allocation43_spill]]  ;;  %s10059_s12 = smov 64  }
  0x73   : > { %s13311_s11 = sld [smem:[#allocation54_spill]]  ;;  %s10061_s30 = smov 96  }
  0x74   : > { %v1327_v1 = vld [vmem:[%s13306_s6 + $0x78] sm:$0xff]  ;;  %v1326_v2 = vld [vmem:[%s13306_s6 + $0x70] sm:$0xff]  ;;  %v1325_v3 = vld [vmem:[%s13306_s6 + $0x68] sm:$0xff]  ;;  %s10062_s1 = smov 48   ;;  %s10063_s3 = smov 16  }
  0x75   : > { %1329 = vmatpush.msra.mxu1 %v1327_v1  ;;  %s10422_s8 = scalar_lea.vmem %s13307_s13, %s8523_s20  ;;  %v1324_v4 = vld [vmem:[%s13306_s6 + $0x60] sm:$0xff]  ;;  %v1323_v6 = vld [vmem:[%s13306_s6 + $0x58] sm:$0xff]  ;;  %v1322_v8 = vld [vmem:[%s13306_s6 + $0x50] sm:$0xff]  ;;  %s10060_s13 = smov 32  }
  0x76   : > { %v1156_v5 = vld [vmem:[%s13308_s23] sm:$0x3]  ;;  %v1321_v11 = vld [vmem:[%s13306_s6 + $0x48] sm:$0xff]  ;;  %v1319_v14 = vld [vmem:[%s13306_s6 + $0x38] sm:$0xff]  ;;  %s13313_s0 = sld [smem:[#allocation58_spill]] }
  0x77   : > { %1330 = vmatpush.msra.mxu1 %v1326_v2  ;;  %8061 = vmatpush.msk.msra.mxu0 %vm1174_vm0, %v1156_v5  ;;  %v1152_v7 = vld [vmem:[%s10422_s8] sm:$0xff]  ;;  %v1368_v9 = vld [vmem:[%s13309_s7 + $0x18] sm:$0xff]  ;;  %v1367_v10 = vld [vmem:[%s13309_s7 + $0x10] sm:$0xff] }
  0x78   : > { %8062 = vmatmul.msk.f32.vlgmr.msra.gmra.mxu0 %vm1161_vm1, %v1152_v7  ;;  %1386 = vmatpush.msra.mxu2 %v1368_v9  ;;  %v1320_v12 = vld [vmem:[%s13306_s6 + $0x40] sm:$0xff]  ;;  %v1153_v13 = vld [vmem:[%s10422_s8 + $0x8] sm:$0xff]  ;;  %v1318_v15 = vld [vmem:[%s13306_s6 + $0x30] sm:$0xff]  ;;  %s1146_s23 = scalar_lea.vmem %s13310_s5, %s13316_s10  ;;  %s10064_s5 = smov 112  }
  0x79   : > { %1331 = vmatpush.msra.mxu1 %v1325_v3  ;;  %v1317_v16 = vld [vmem:[%s13306_s6 + $0x28] sm:$0xff]  ;;  %v1316_v17 = vld [vmem:[%s13306_s6 + $0x20] sm:$0xff]  ;;  %v1154_v18 = vld [vmem:[%s10422_s8 + $0x10] sm:$0xff] }
  0x7a   : > { %1387 = vmatpush.msra.mxu2 %v1367_v10  ;;  %v1315_v19 = vld [vmem:[%s13306_s6 + $0x18] sm:$0xff]  ;;  %v1314_v20 = vld [vmem:[%s13306_s6 + $0x10] sm:$0xff]  ;;  %v1313_v21 = vld [vmem:[%s13306_s6 + $0x8] sm:$0xff] }
  0x7b   : > { %1332 = vmatpush.msra.mxu1 %v1324_v4  ;;  %v1312_v22 = vld [vmem:[%s13306_s6] sm:$0xff]  ;;  %v1155_v23 = vld [vmem:[%s10422_s8 + $0x18] sm:$0xff]  ;;  %v1366_v25 = vld [vmem:[%s13309_s7 + $0x8] sm:$0xff] }
  0x7c   : > { %v1311_v24 = vld [vmem:[%s1146_s23] sm:$0x1]  ;;  %1388 = vmatpush.msra.mxu2 %v1366_v25  ;;  %s10065_s23 = smov 80   ;;  %s13215_s4 = scalar_lea.vmem %s13313_s0, %s8523_s20 }
  0x7d   : > { %1333 = vmatpush.msra.mxu1 %v1323_v6  ;;  %v1365_v26 = vld [vmem:[%s13309_s7] sm:$0xff] }
  0x7e   : > { %1389 = vmatpush.msra.mxu2 %v1365_v26 }
  0x7f   : > { %1334 = vmatpush.msra.mxu1 %v1322_v8 }
  0x80   : > { %8063 = vmatmul.msk.f32.gmra.mxu0 %vm1161_vm1, %v1153_v13 }
  0x81   : > { %1335 = vmatpush.msra.mxu1 %v1321_v11 }
  0x83   : > { %1336 = vmatpush.msra.mxu1 %v1320_v12 }
  0x85   : > { %1337 = vmatpush.msra.mxu1 %v1319_v14 }
  0x87   : > { %1338 = vmatpush.msra.mxu1 %v1318_v15 }
  0x88   : > { %8064 = vmatmul.msk.f32.gmra.mxu0 %vm1161_vm1, %v1154_v18 }
  0x89   : > { %1339 = vmatpush.msra.mxu1 %v1317_v16 }
  0x8b   : > { %1340 = vmatpush.msra.mxu1 %v1316_v17 }
  0x8d   : > { %1341 = vmatpush.msra.mxu1 %v1315_v19 }
  0x8f   : > { %1342 = vmatpush.msra.mxu1 %v1314_v20 }
  0x90   : > { %8065 = vmatmul.msk.f32.gmra.mxu0 %vm1161_vm1, %v1155_v23 }
  0x91   : > { %1343 = vmatpush.msra.mxu1 %v1313_v21 }
  0x93   : > { %1344 = vmatpush.msra.mxu1 %v1312_v22 }
  0x94   : > { %1345 = vmatmul.f32.vlgmr.msra.gmra.mxu1 %v1311_v24 }
  0xf5   : > { %v1195_v30 = vpop.f32.mrf.mxu0 }
  0xf6   : > { %v10503_v39 = vadd.f32 %v8917_v34, %v1195_v30 }
  0xf8   : > { %v10513_v43 = vmul.f32 0.70710677, %v10503_v39 }
  0xfa   : > { %v1223_v47 = vand.u32 2147483647, %v10513_v43  ;;  %vm1215_vm6 = vcmp.lt.f32.partialorder %v10513_v43, 0.0 }
  0xfc   : > { %v1227_v51 = vmul.f32 0.3275911, %v1223_v47  ;;  %v1275_v19 = vsub.f32 0.0, %v1223_v47 }
  0xfd   : > { %v1198_v31 = vpop.f32.mrf.mxu0 }
  0xfe   : > { %v10498_v37 = vadd.f32 %v8917_v34, %v1198_v31  ;;  %v1231_v54 = vadd.f32 1.0, %v1227_v51 }
 0x100   : > { %v10509_v41 = vmul.f32 0.70710677, %v10498_v37  ;;  %v1208_v43 = vmul.f32 0.5, %v10498_v37 }
 0x102   : > { %v1224_v45 = vand.u32 2147483647, %v10509_v41  ;;  %vm1216_vm5 = vcmp.lt.f32.partialorder %v10509_v41, 0.0 }
 0x104   : > { %v1228_v49 = vmul.f32 0.3275911, %v1224_v45  ;;  %v1276_v15 = vsub.f32 0.0, %v1224_v45 }
 0x105   : > { %v1201_v32 = vpop.f32.mrf.mxu0 }
 0x106   : > { %v10496_v36 = vadd.f32 %v8917_v34, %v1201_v32  ;;  %v1232_v53 = vadd.f32 1.0, %v1228_v49  ;;  %v1280_v23 = vmul.f32 %v1276_v15, %v1224_v45 }
 0x108   : > { %v10506_v40 = vmul.f32 0.70710677, %v10496_v36  ;;  %v1285_v32 = vmul.f32 1.442695, %v1280_v23  ;;  %v1443_v23 = vld [vmem:[#allocation8 + $0x18] sm:$0xff] }
 0x10a   : > { %v1225_v44 = vand.u32 2147483647, %v10506_v40  ;;  %vm1217_vm4 = vcmp.lt.f32.partialorder %v10506_v40, 0.0 }
 0x10c   : > { %v1229_v48 = vmul.f32 0.3275911, %v1225_v44  ;;  %v1277_v12 = vsub.f32 0.0, %v1225_v44 }
 0x10d   : > { %v1204_v33 = vpop.f32.mrf.mxu0 }
 0x10e   : > { %v10494_v35 = vadd.f32 %v8917_v34, %v1204_v33  ;;  %v1233_v52 = vadd.f32 1.0, %v1229_v48  ;;  %v1281_v20 = vmul.f32 %v1277_v12, %v1225_v44 }
 0x110   : > { %v10501_v38 = vmul.f32 0.70710677, %v10494_v35 }
 0x111   : > { %v1346_v28 = vpop.f32.mrf.mxu1 }
 0x112   : > { %v10490_v29 = vadd.f32 %v1346_v28, %v1328_v27  ;;  %v1226_v42 = vand.u32 2147483647, %v10501_v38  ;;  %v1279_v27 = vmul.f32 %v1275_v19, %v1223_v47  ;;  %v1287_v28 = vmul.f32 1.442695, %v1281_v20 }
 0x113   : > { %vm1218_vm3 = vcmp.lt.f32.partialorder %v10501_v38, 0.0 }
 0x114   : > { %8066 = vmatmul.msk.f32.vlgmr.msra.gmra.mxu2 %vm1370_vm2, %v10490_v29  ;;  %v1230_v46 = vmul.f32 0.3275911, %v1226_v42  ;;  %v1278_v9 = vsub.f32 0.0, %v1226_v42 }
 0x116   : > { %v1234_v50 = vadd.f32 1.0, %v1230_v46  ;;  %v1282_v16 = vmul.f32 %v1278_v9, %v1226_v42  ;;  %v1283_v46 = vmul.f32 1.442695, %v1279_v27  ;;  %v1441_v27 = vld [vmem:[#allocation8 + $0x8] sm:$0xff] }
 0x118   : > { %8933 = vrcp.f32 %v1234_v50  ;;  %v1289_v24 = vmul.f32 1.442695, %v1282_v16  ;;  %v1207_v16 = vmul.f32 0.5, %v10503_v39 }
 0x119   : > { %8935 = vrcp.f32 %v1233_v52 }
 0x11a   : > { %8937 = vrcp.f32 %v1232_v53 }
 0x11b   : > { %8939 = vrcp.f32 %v1231_v54 }
 0x11c   : > { %8941 = vpow2.f32 %v1289_v24  ;;  %v1442_v24 = vld [vmem:[#allocation8 + $0x10] sm:$0xff] }
 0x11d   : > { %8943 = vpow2.f32 %v1287_v28  ;;  %v1490_v28 = vld [vmem:[#allocation11 + $0x8] sm:$0xff] }
 0x11e   : > { %v8934_v55 = vpop.eup %8933  ;;  %8945 = vpow2.f32 %v1285_v32  ;;  %v1351_v32 = vld [vmem:[#allocation28 + $0x10] sm:$0xff] }
 0x11f   : > { %v8936_v56 = vpop.eup %8935  ;;  %v1242_v57 = vmul.f32 1.0614054, %v8934_v55  ;;  %8947 = vpow2.f32 %v1283_v46  ;;  %v1550_v46 = vld [vmem:[%s13311_s11 + $0x60] sm:$0xff] }
 0x120   : > { %v8938_v58 = vpop.eup %8937  ;;  %v1241_v59 = vmul.f32 1.0614054, %v8936_v56 }
 0x121   : > { %v8940_v60 = vpop.eup %8939  ;;  %v1240_v61 = vmul.f32 1.0614054, %v8938_v58  ;;  %v1246_v62 = vadd.f32 -1.4531521, %v1242_v57 }
 0x122   : > { %v1239_v63 = vmul.f32 1.0614054, %v8940_v60  ;;  %v1245_v0 = vadd.f32 -1.4531521, %v1241_v59  ;;  %v8942_v50 = vpop.eup %8941 }
 0x123   : > { %v1244_v1 = vadd.f32 -1.4531521, %v1240_v61  ;;  %v1250_v2 = vmul.f32 %v8934_v55, %v1246_v62  ;;  %v8944_v52 = vpop.eup %8943 }
 0x124   : > { %v1243_v3 = vadd.f32 -1.4531521, %v1239_v63  ;;  %v1249_v4 = vmul.f32 %v8936_v56, %v1245_v0  ;;  %v8946_v54 = vpop.eup %8945  ;;  %v10058_v0 = vmov 1.0  }
 0x125   : > { %v1248_v5 = vmul.f32 %v8938_v58, %v1244_v1  ;;  %v1254_v6 = vadd.f32 1.4214138, %v1250_v2  ;;  %v8948_v61 = vpop.eup %8947  ;;  %v1220_v38 = vsel %vm1216_vm5, -1.0, %v10058_v0  ;;  %v1219_v40 = vsel %vm1215_vm6, -1.0, %v10058_v0 }
 0x126   : > { %v1247_v7 = vmul.f32 %v8940_v60, %v1243_v3  ;;  %v1253_v8 = vadd.f32 1.4214138, %v1249_v4 }
 0x127   : > { %v1252_v10 = vadd.f32 1.4214138, %v1248_v5  ;;  %v1258_v11 = vmul.f32 %v8934_v55, %v1254_v6  ;;  %v1369_v5 = vld [vmem:[#allocation7] sm:$0x1] }
 0x128   : > { %v1251_v13 = vadd.f32 1.4214138, %v1247_v7  ;;  %v1257_v14 = vmul.f32 %v8936_v56, %v1253_v8  ;;  %v1210_v7 = vmul.f32 0.5, %v10494_v35 }
 0x129   : > { %v1256_v17 = vmul.f32 %v8938_v58, %v1252_v10  ;;  %v1262_v18 = vadd.f32 -0.28449672, %v1258_v11  ;;  %v1209_v10 = vmul.f32 0.5, %v10496_v36 }
 0x12a   : > { %v1255_v21 = vmul.f32 %v8940_v60, %v1251_v13  ;;  %v1261_v22 = vadd.f32 -0.28449672, %v1257_v14 }
 0x12b   : > { %v1260_v25 = vadd.f32 -0.28449672, %v1256_v17  ;;  %v1266_v26 = vmul.f32 %v8934_v55, %v1262_v18 }
 0x12c   : > { %v1259_v30 = vadd.f32 -0.28449672, %v1255_v21  ;;  %v1265_v31 = vmul.f32 %v8936_v56, %v1261_v22  ;;  %v1349_v21 = vld [vmem:[#allocation28] sm:$0xff]  ;;  %v1350_v22 = vld [vmem:[#allocation28 + $0x8] sm:$0xff] }
 0x12d   : > { %v1264_v33 = vmul.f32 %v8938_v58, %v1260_v25  ;;  %v1270_v34 = vadd.f32 0.2548296, %v1266_v26  ;;  %v1492_v25 = vld [vmem:[#allocation11 + $0x18] sm:$0xff]  ;;  %v1491_v26 = vld [vmem:[#allocation11 + $0x10] sm:$0xff] }
 0x12e   : > { %v1263_v42 = vmul.f32 %v8940_v60, %v1259_v30  ;;  %v1269_v48 = vadd.f32 0.2548296, %v1265_v31  ;;  %v1440_v30 = vld [vmem:[#allocation8] sm:$0xff] }
 0x12f   : > { %v1268_v44 = vadd.f32 0.2548296, %v1264_v33  ;;  %v1274_v49 = vmul.f32 %v8934_v55, %v1270_v34  ;;  %v1222_v55 = vsel %vm1218_vm3, -1.0, %v10058_v0  ;;  %v1489_v31 = vld [vmem:[#allocation11] sm:$0xff]  ;;  %v1553_v34 = vld [vmem:[%s13311_s11 + $0x78] sm:$0xff] }
 0x130   : > { %v1267_v45 = vadd.f32 0.2548296, %v1263_v42  ;;  %v1273_v51 = vmul.f32 %v8936_v56, %v1269_v48  ;;  %v1552_v33 = vld [vmem:[%s13311_s11 + $0x70] sm:$0xff]  ;;  %1619 = vmatpush.msrb.mxu1 %v1553_v34  ;;  %v1551_v42 = vld [vmem:[%s13311_s11 + $0x68] sm:$0xff] }
 0x131   : > { %v1272_v47 = vmul.f32 %v8938_v58, %v1268_v44  ;;  %v1294_v53 = vmul.f32 %v8942_v50, %v1274_v49  ;;  %v1221_v58 = vsel %vm1217_vm4, -1.0, %v10058_v0  ;;  %v1548_v48 = vld [vmem:[%s13311_s11 + $0x50] sm:$0xff]  ;;  %v1549_v44 = vld [vmem:[%s13311_s11 + $0x58] sm:$0xff]  ;;  %v1546_v49 = vld [vmem:[%s13311_s11 + $0x40] sm:$0xff] }
 0x132   : > { %v1271_v57 = vmul.f32 %v8940_v60, %v1267_v45  ;;  %v1293_v59 = vmul.f32 %v8944_v52, %v1273_v51  ;;  %1620 = vmatpush.msrb.mxu1 %v1551_v42  ;;  %v1547_v50 = vld [vmem:[%s13311_s11 + $0x48] sm:$0xff]  ;;  %v1544_v51 = vld [vmem:[%s13311_s11 + $0x30] sm:$0xff]  ;;  %v1545_v52 = vld [vmem:[%s13311_s11 + $0x38] sm:$0xff] }
 0x133   : > { %v1292_v62 = vmul.f32 %v8946_v54, %v1272_v47  ;;  %v1298_v63 = vsub.f32 1.0, %v1294_v53  ;;  %v1352_v45 = vld [vmem:[#allocation28 + $0x18] sm:$0xff]  ;;  %v1540_v54 = vld [vmem:[%s13311_s11 + $0x10] sm:$0xff] }
 0x134   : > { %v1291_v1 = vmul.f32 %v8948_v61, %v1271_v57  ;;  %v1297_v56 = vsub.f32 1.0, %v1293_v59  ;;  %1621 = vmatpush.msrb.mxu1 %v1549_v44  ;;  %v1542_v47 = vld [vmem:[%s13311_s11 + $0x20] sm:$0xff]  ;;  %v1543_v53 = vld [vmem:[%s13311_s11 + $0x28] sm:$0xff]  ;;  %v1541_v57 = vld [vmem:[%s13311_s11 + $0x18] sm:$0xff] }
 0x135   : > { %v1296_v60 = vsub.f32 1.0, %v1292_v62  ;;  %v1302_v2 = vmul.f32 %v1298_v63, %v1222_v55  ;;  %v1538_v59 = vld [vmem:[%s13311_s11] sm:$0xff]  ;;  %v1539_v61 = vld [vmem:[%s13311_s11 + $0x8] sm:$0xff] }
 0x136   : > { %v1295_v3 = vsub.f32 1.0, %v1291_v1  ;;  %v1301_v4 = vmul.f32 %v1297_v56, %v1221_v58  ;;  %1622 = vmatpush.msrb.mxu1 %v1547_v50  ;;  %v8918_v55 = vld [vmem:[#allocation10] ss:$0 sm:$0xff] }
 0x137   : > { %v1300_v6 = vmul.f32 %v1296_v60, %v1220_v38  ;;  %v1306_v8 = vadd.f32 1.0, %v1302_v2 }
 0x138   : > { %v1299_v41 = vmul.f32 %v1295_v3, %v1219_v40  ;;  %v1305_v11 = vadd.f32 1.0, %v1301_v4  ;;  %1623 = vmatpush.msrb.mxu1 %v1545_v52 }
 0x139   : > { %v1304_v13 = vadd.f32 1.0, %v1300_v6  ;;  %v10529_v14 = vmul.f32 %v1306_v8, %v1210_v7  ;;  %v1554_v7 = vld [vmem:[#allocation14] sm:$0x3] }
 0x13a   : > { %v1303_v17 = vadd.f32 1.0, %v1299_v41  ;;  %v10532_v18 = vmul.f32 %v1305_v11, %v1209_v10  ;;  %1624 = vmatpush.msrb.mxu1 %v1543_v53  ;;  %v1566_v8 = vperm.slane %v1554_v7, 1 }
 0x13b   : > { %v10535_v19 = vmul.f32 %v1304_v13, %v1208_v43  ;;  %v1565_v43 = vperm.slane %v1554_v7, 0 }
 0x13c   : > { %v10538_v20 = vmul.f32 %v1303_v17, %v1207_v16  ;;  %1625 = vmatpush.msrb.mxu1 %v1541_v57 }
 0x13e   : > { %1626 = vmatpush.msrb.mxu1 %v1539_v61 }
 0x197   : > { %v1391_v9 = vpop.f32.mrf.mxu2 }
 0x198   : > { %v1392_v12 = vadd.f32 %v1391_v9, %v1369_v5 }
 0x19a   : > { %v1394_v15 = vperm.slane %v1392_v12, 0 }
 0x19c   : > { %v1398_v35 = vadd.f32 %v1394_v15, %v10529_v14  ;;  %v1397_v36 = vadd.f32 %v1394_v15, %v10532_v18  ;;  %v1396_v37 = vadd.f32 %v1394_v15, %v10535_v19  ;;  %v1395_v39 = vadd.f32 %v1394_v15, %v10538_v20 }
 0x19e   : > { %1423 = vmatpush.msrb.mxu0 %v1398_v35  ;;  %8525 = vmatpush.msrb.mxu2 %v1398_v35 }
 0x19f   : > { %8526 = vmatpush.msra.mxu3 %v1398_v35 }
 0x1a0   : > { %1424 = vmatpush.msrb.mxu0 %v1397_v36  ;;  %8527 = vmatpush.msrb.mxu2 %v1397_v36 }
 0x1a1   : > { %8528 = vmatpush.msra.mxu3 %v1397_v36 }
 0x1a2   : > { %1425 = vmatpush.msrb.mxu0 %v1396_v37  ;;  %8529 = vmatpush.msrb.mxu2 %v1396_v37 }
 0x1a3   : > { %8530 = vmatpush.msra.mxu3 %v1396_v37 }
 0x1a4   : > { %1426 = vmatpush.msrb.mxu0 %v1395_v39  ;;  %8531 = vmatpush.msrb.mxu2 %v1395_v39 }
 0x1a5   : > { %8532 = vmatpush.msra.mxu3 %v1395_v39  ;;  %8067 = vmatmul.msk.f32.vlgmr.msrb.gmra.mxu0 %vm1370_vm2, %v1349_v21 }
 0x1a6   : > { %8068 = vmatmul.msk.f32.vlgmr.msrb.gmra.mxu2 %vm1370_vm2, %v1350_v22  ;;  %1521 = vmatpush.msra.mxu0 %v1492_v25 }
 0x1a7   : > { %1472 = vmatpush.msra.mxu2 %v1443_v23  ;;  %8069 = vmatmul.msk.f32.vlgmr.msra.gmra.mxu3 %vm1370_vm2, %v1351_v32 }
 0x1a8   : > { %1522 = vmatpush.msra.mxu0 %v1491_v26  ;;  %1590 = vmatpush.msrb.mxu3 %v1552_v33 }
 0x1a9   : > { %1473 = vmatpush.msra.mxu2 %v1442_v24 }
 0x1aa   : > { %1523 = vmatpush.msra.mxu0 %v1490_v28  ;;  %1591 = vmatpush.msrb.mxu3 %v1550_v46 }
 0x1ab   : > { %1474 = vmatpush.msra.mxu2 %v1441_v27 }
 0x1ac   : > { %1524 = vmatpush.msra.mxu0 %v1489_v31  ;;  %1592 = vmatpush.msrb.mxu3 %v1548_v48 }
 0x1ad   : > { %1475 = vmatpush.msra.mxu2 %v1440_v30 }
 0x1ae   : > { %8071 = vmatmul.msk.f32.vlgmr.msra.gmra.mxu2 %vm1370_vm2, %v1395_v39  ;;  %1593 = vmatpush.msrb.mxu3 %v1546_v49 }
 0x1af   : > { %8070 = vmatmul.msk.f32.gmra.mxu3 %vm1370_vm2, %v1352_v45 }
 0x1b0   : > { %1594 = vmatpush.msrb.mxu3 %v1544_v51 }
 0x1b2   : > { %1595 = vmatpush.msrb.mxu3 %v1542_v47 }
 0x1b4   : > { %1596 = vmatpush.msrb.mxu3 %v1540_v54 }
 0x1b6   : > { %8072 = vmatmul.msk.f32.gmra.mxu2 %vm1370_vm2, %v1396_v37  ;;  %1597 = vmatpush.msrb.mxu3 %v1538_v59 }
 0x1be   : > { %8073 = vmatmul.msk.f32.gmra.mxu2 %vm1370_vm2, %v1397_v36 }
 0x1c6   : > { %8074 = vmatmul.msk.f32.gmra.mxu2 %vm1370_vm2, %v1398_v35 }
 0x222   : > { %v1428_v62 = vpop.f32.mrf.mxu0 }
 0x223   : > { %8075 = vmatmul.msk.f32.vlgmr.msra.gmra.mxu0 %vm1370_vm2, %v1428_v62  ;;  %v10704_v62 = vld [vmem:[%s13263_s26] sm:$0xff] }
 0x229   : > { %v1431_v63 = vpop.f32.mrf.mxu2 }
 0x22a   : > { %v1434_v40 = vpop.f32.mrf.mxu3 }
 0x22b   : > { %8076 = vmatmul.msk.f32.gmra.mxu0 %vm1370_vm2, %v1431_v63 }
 0x231   : > { %v1477_v1 = vpop.f32.mrf.mxu2 }
 0x232   : > { %v1478_v56 = vadd.f32 %v8918_v55, %v1477_v1  ;;  %v1437_v5 = vpop.f32.mrf.mxu3 }
 0x233   : > { %8077 = vmatmul.msk.f32.gmra.mxu0 %vm1370_vm2, %v1434_v40 }
 0x234   : > { %8079 = vmatmul.msk.f32.vlgmr.msrb.gmra.mxu3 %vm1569_vm7, %v1478_v56  ;;  %8083 = vmatmul.msk.f32.vlgmr.msrb.gmra.mxu1 %vm1569_vm7, %v1478_v56 }
 0x239   : > { %v1480_v58 = vpop.f32.mrf.mxu2 }
 0x23a   : > { %v1481_v60 = vadd.f32 %v8918_v55, %v1480_v58  ;;  %v10711_v58 = vld [vmem:[%s13263_s26 + $0x8] sm:$0xff] }
 0x23b   : > { %8078 = vmatmul.msk.f32.gmra.mxu0 %vm1370_vm2, %v1437_v5 }
 0x23c   : > { %8080 = vmatmul.msk.f32.gmra.mxu3 %vm1569_vm7, %v1481_v60  ;;  %8084 = vmatmul.msk.f32.gmra.mxu1 %vm1569_vm7, %v1481_v60 }
 0x241   : > { %v1483_v2 = vpop.f32.mrf.mxu2 }
 0x242   : > { %v1484_v38 = vadd.f32 %v8918_v55, %v1483_v2 }
 0x244   : > { %8081 = vmatmul.msk.f32.gmra.mxu3 %vm1569_vm7, %v1484_v38  ;;  %8085 = vmatmul.msk.f32.gmra.mxu1 %vm1569_vm7, %v1484_v38 }
 0x249   : > { %v1486_v3 = vpop.f32.mrf.mxu2 }
 0x24a   : > { %v1487_v4 = vadd.f32 %v8918_v55, %v1486_v3 }
 0x24c   : > { %8082 = vmatmul.msk.f32.gmra.mxu3 %vm1569_vm7, %v1487_v4  ;;  %8086 = vmatmul.msk.f32.gmra.mxu1 %vm1569_vm7, %v1487_v4  ;;  %v10718_v4 = vld [vmem:[%s13263_s26 + $0x10] sm:$0xff] }
 0x2b1   : > { %v1628_v6 = vpop.f32.mrf.mxu1 }
 0x2b2   : > { %v1629_v10 = vadd.f32 %v1628_v6, %v1566_v8 }
 0x2b7   : > { %v1599_v9 = vpop.f32.mrf.mxu3 }
 0x2b8   : > { %v10616_v35 = vadd.f32 %v1599_v9, %v1565_v43 }
 0x2b9   : > { %v1631_v41 = vpop.f32.mrf.mxu1 }
 0x2ba   : > { %v1632_v11 = vadd.f32 %v1631_v41, %v1566_v8 }
 0x2bc   : > { %v10610_v12 = vpack.i.bf16 %v1629_v10, %v1632_v11 }
 0x2bf   : > { %v1602_v13 = vpop.f32.mrf.mxu3 }
 0x2c0   : > { %v10612_v15 = vadd.f32 %v1602_v13, %v1565_v43 }
 0x2c1   : > { %v1634_v16 = vpop.f32.mrf.mxu1 }
 0x2c2   : > { %1646 = vrot.lane.b32.xlu1 %v10612_v15, %s10059_s12  ;;  %v1635_v37 = vadd.f32 %v1634_v16, %v1566_v8 }
 0x2c7   : > { %v1605_v17 = vpop.f32.mrf.mxu3 }
 0x2c8   : > { %v10630_v24 = vadd.f32 %v1605_v17, %v1565_v43 }
 0x2c9   : > { %v1637_v36 = vpop.f32.mrf.mxu1 }
 0x2ca   : > { %v1638_v39 = vadd.f32 %v1637_v36, %v1566_v8  ;;  %1644 = vrot.lane.b32.xlu1 %v10616_v35, %s10059_s12  ;;  %v10725_v8 = vld [vmem:[%s13263_s26 + $0x18] sm:$0xff] }
 0x2cc   : > { %1774 = vmatpush.msrb.mxu0 %v1638_v39  ;;  %v10620_v21 = vpack.i.bf16 %v1635_v37, %v1638_v39 }
 0x2ce   : > { %1775 = vmatpush.msrb.mxu0 %v1635_v37 }
 0x2cf   : > { %v1608_v22 = vpop.f32.mrf.mxu3 }
 0x2d0   : > { %v10622_v23 = vadd.f32 %v1608_v22, %v1565_v43  ;;  %1776 = vmatpush.msrb.mxu0 %v1632_v11 }
 0x2d2   : > { %1975 = vrot.lane.b32.xlu2 %v10622_v23, %s10060_s13  ;;  %1650 = vrot.lane.b32.xlu0 %v10622_v23, %s10059_s12 }
 0x2d3   : > { %1969 = vrot.lane.b32.xlu1 %v10616_v35, %s10060_s13  ;;  %1777 = vmatpush.msrb.mxu0 %v1629_v10 }
 0x2da   : > { %1973 = vrot.lane.b32.xlu2 %v10630_v24, %s10060_s13  ;;  %1648 = vrot.lane.b32.xlu0 %v10630_v24, %s10059_s12 }
 0x2db   : > { %1965 = vrot.lane.b32.xlu1 %v10630_v24, %s10061_s30 }
 0x2e2   : > { %1971 = vrot.lane.b32.xlu0 %v10612_v15, %s10060_s13  ;;  %1961 = vrot.lane.b32.xlu2 %v10616_v35, %s10061_s30 }
 0x2e3   : > { %1801 = vrot.lane.b32.xlu1 %v10612_v15, %s10062_s1 }
 0x2ea   : > { %1963 = vrot.lane.b32.xlu0 %v10612_v15, %s10061_s30  ;;  %1967 = vrot.lane.b32.xlu2 %v10622_v23, %s10061_s30 }
 0x2eb   : > { %2139 = vrot.lane.b32.xlu1 %v10630_v24, %s10063_s3 }
 0x2f2   : > { %1803 = vrot.lane.b32.xlu0 %v10630_v24, %s10062_s1  ;;  %1799 = vrot.lane.b32.xlu2 %v10616_v35, %s10062_s1 }
 0x2f3   : > { %2137 = vrot.lane.b32.xlu1 %v10612_v15, %s10063_s3 }
 0x2fa   : > { %1791 = vrot.lane.b32.xlu0 %v10616_v35, %s10064_s5  ;;  %1795 = vrot.lane.b32.xlu2 %v10630_v24, %s10064_s5 }
 0x302   : > { %1793 = vrot.lane.b32.xlu0 %v10612_v15, %s10064_s5  ;;  %1805 = vrot.lane.b32.xlu2 %v10622_v23, %s10062_s1 }
 0x30a   : > { %1797 = vrot.lane.b32.xlu0 %v10622_v23, %s10064_s5  ;;  %2141 = vrot.lane.b32.xlu2 %v10622_v23, %s10063_s3 }
 0x312   : > { %2129 = vrot.lane.b32.xlu2 %v10612_v15, %s10065_s23 }
 0x32c   : > { %v1976_v25 = vpop.permute.xlu2 %1975 }
 0x334   : > { %v1974_v26 = vpop.permute.xlu2 %1973  ;;  %v1647_v27 = vpop.permute.xlu1 %1646 }
 0x33c   : > { %v1962_v28 = vpop.permute.xlu2 %1961  ;;  %v1645_v30 = vpop.permute.xlu1 %1644 }
 0x344   : > { %v1651_v31 = vpop.permute.xlu0 %1650  ;;  %v1968_v32 = vpop.permute.xlu2 %1967 }
 0x345   : > { %8087 = vmatpush.xpose.msk.msrb.mxu2 %vm1652_vm8, %v1651_v31  ;;  %v1970_v46 = vpop.permute.xlu1 %1969 }
 0x34c   : > { %v1649_v33 = vpop.permute.xlu0 %1648  ;;  %v1800_v34 = vpop.permute.xlu2 %1799 }
 0x34d   : > { %8088 = vmatpush.xpose.msk.msrb.mxu2 %vm1652_vm8, %v1649_v33  ;;  %v1966_v44 = vpop.permute.xlu1 %1965 }
 0x351   : > { %8089 = vmatpush.xpose.msk.msrb.mxu2 %vm1652_vm8, %v1647_v27 }
 0x354   : > { %v1972_v42 = vpop.permute.xlu0 %1971  ;;  %v1796_v48 = vpop.permute.xlu2 %1795 }
 0x355   : > { %8090 = vmatpush.xpose.msk.msrb.mxu2 %vm1652_vm8, %v1645_v30  ;;  %v1802_v45 = vpop.permute.xlu1 %1801 }
 0x358   : > { %8091 = vmatmul.msk.f32.vlgmr.msrb.gmra.mxu2 %vm1652_vm8, %v10616_v35 }
 0x359   : > { %8111 = vmatpush.xpose.msk.msra.mxu2 %vm1652_vm8, %v1976_v25 }
 0x35c   : > { %v1964_v49 = vpop.permute.xlu0 %1963  ;;  %v1806_v50 = vpop.permute.xlu2 %1805 }
 0x35d   : > { %8112 = vmatpush.xpose.msk.msra.mxu2 %vm1652_vm8, %v1974_v26  ;;  %8099 = vmatpush.xpose.msk.msra.mxu3 %vm1652_vm8, %v1806_v50  ;;  %v2140_v52 = vpop.permute.xlu1 %2139 }
 0x360   : > { %8092 = vmatmul.msk.f32.gmra.mxu2 %vm1652_vm8, %v10612_v15 }
 0x361   : > { %8113 = vmatpush.xpose.msk.msra.mxu2 %vm1652_vm8, %v1972_v42 }
 0x364   : > { %v1804_v51 = vpop.permute.xlu0 %1803  ;;  %v2142_v47 = vpop.permute.xlu2 %2141 }
 0x365   : > { %8114 = vmatpush.xpose.msk.msra.mxu2 %vm1652_vm8, %v1970_v46  ;;  %8100 = vmatpush.xpose.msk.msra.mxu3 %vm1652_vm8, %v1804_v51  ;;  %v2138_v54 = vpop.permute.xlu1 %2137 }
 0x368   : > { %8093 = vmatmul.msk.f32.gmra.mxu2 %vm1652_vm8, %v10630_v24 }
 0x369   : > { %8101 = vmatpush.xpose.msk.msra.mxu3 %vm1652_vm8, %v1802_v45 }
 0x36c   : > { %v1792_v53 = vpop.permute.xlu0 %1791 }
 0x36d   : > { %8102 = vmatpush.xpose.msk.msra.mxu3 %vm1652_vm8, %v1800_v34  ;;  %v2130_v34 = vpop.permute.xlu2 %2129 }
 0x370   : > { %8094 = vmatmul.msk.f32.gmra.mxu2 %vm1652_vm8, %v10622_v23  ;;  %8103 = vmatmul.msk.f32.vlgmr.msra.gmra.mxu3 %vm1652_vm8, %v1792_v53 }
 0x371   : > { %8123 = vmatpush.xpose.msk.msrb.mxu3 %vm1652_vm8, %v2142_v47 }
 0x374   : > { %v1794_v57 = vpop.permute.xlu0 %1793 }
 0x375   : > { %8124 = vmatpush.xpose.msk.msrb.mxu3 %vm1652_vm8, %v2140_v52 }
 0x378   : > { %8104 = vmatmul.msk.f32.gmra.mxu3 %vm1652_vm8, %v1794_v57  ;;  %8115 = vmatmul.msk.f32.vlgmr.msra.gmra.mxu2 %vm1652_vm8, %v1962_v28 }
 0x379   : > { %8125 = vmatpush.xpose.msk.msrb.mxu3 %vm1652_vm8, %v2138_v54 }
 0x37c   : > { %v1798_v59 = vpop.permute.xlu0 %1797 }
 0x380   : > { %8105 = vmatmul.msk.f32.gmra.mxu3 %vm1652_vm8, %v1796_v48  ;;  %8116 = vmatmul.msk.f32.gmra.mxu2 %vm1652_vm8, %v1964_v49 }
 0x388   : > { %8106 = vmatmul.msk.f32.gmra.mxu3 %vm1652_vm8, %v1798_v59  ;;  %8117 = vmatmul.msk.f32.gmra.mxu2 %vm1652_vm8, %v1966_v44 }
 0x390   : > { %8118 = vmatmul.msk.f32.gmra.mxu2 %vm1652_vm8, %v1968_v32 }
 0x3db   : > { %v1686_v61 = vpop.f32.mrf.mxu2 }
 0x3dc   : > { %v1698_v63 = vmul.f32 0.25, %v1686_v61 }
 0x3de   : > { %v1702_v55 = vadd.f32 %v1698_v63, %v10704_v62 }
 0x3e0   : > { %v1706_v1 = vsel %vm1370_vm2, %v1702_v55, -inf }
 0x3e1   : > { %1707 = vmax.xlane.f32.xlu0 %v1706_v1 }
 0x3e3   : > { %v1689_v56 = vpop.f32.mrf.mxu2 }
 0x3e4   : > { %v1699_v60 = vmul.f32 0.25, %v1689_v56 }
 0x3e6   : > { %v1703_v2 = vadd.f32 %v1699_v60, %v10711_v58 }
 0x3e8   : > { %v1709_v38 = vsel %vm1370_vm2, %v1703_v2, -inf }
 0x3e9   : > { %1710 = vmax.xlane.f32.xlu1 %v1709_v38 }
 0x3eb   : > { %v1692_v3 = vpop.f32.mrf.mxu2 }
 0x3ec   : > { %v1700_v40 = vmul.f32 0.25, %v1692_v3 }
 0x3ee   : > { %v1704_v5 = vadd.f32 %v1700_v40, %v10718_v4 }
 0x3f0   : > { %v1712_v6 = vsel %vm1370_vm2, %v1704_v5, -inf }
 0x3f1   : > { %1713 = vmax.xlane.f32.xlu2 %v1712_v6 }
 0x3f3   : > { %v1695_v7 = vpop.f32.mrf.mxu2 }
 0x3f4   : > { %v1701_v9 = vmul.f32 0.25, %v1695_v7 }
 0x3f5   : > { %2127 = vrot.lane.b32.xlu0 %v10616_v35, %s10065_s23 }
 0x3f6   : > { %v1705_v41 = vadd.f32 %v1701_v9, %v10725_v8 }
 0x3f8   : > { %v1715_v10 = vsel %vm1370_vm2, %v1705_v41, -inf }
 0x3f9   : > { %1716 = vmax.xlane.f32.xlu2 %v1715_v10 }
 0x3fb   : > { %v2010_v11 = vpop.f32.mrf.mxu2 }
 0x3fc   : > { %v2022_v27 = vmul.f32 0.25, %v2010_v11 }
 0x3fe   : > { %v2026_v28 = vadd.f32 %v2022_v27, %v10704_v62 }
 0x400   : > { %v2030_v30 = vsel %vm1370_vm2, %v2026_v28, -inf }
 0x402   : > { %2135 = vrot.lane.b32.xlu1 %v10616_v35, %s10063_s3 }
 0x403   : > { %v2013_v43 = vpop.f32.mrf.mxu2 }
 0x404   : > { %v2023_v39 = vmul.f32 0.25, %v2013_v43 }
 0x406   : > { %v2027_v35 = vadd.f32 %v2023_v39, %v10711_v58 }
 0x408   : > { %v2033_v26 = vsel %vm1370_vm2, %v2027_v35, -inf }
 0x40b   : > { %v2016_v13 = vpop.f32.mrf.mxu2 }
 0x40c   : > { %v2024_v15 = vmul.f32 0.25, %v2016_v13 }
 0x40e   : > { %v10734_v16 = vadd.f32 %v2024_v15, %v10718_v4 }
 0x410   : > { %v2036_v17 = vsel %vm1370_vm2, %v10734_v16, -inf }
 0x411   : > { %2037 = vmax.xlane.f32.xlu2 %v2036_v17 }
 0x413   : > { %v2019_v36 = vpop.f32.mrf.mxu2 }
 0x414   : > { %v2025_v37 = vmul.f32 0.25, %v2019_v36 }
 0x416   : > { %v2029_v22 = vadd.f32 %v2025_v37, %v10725_v8 }
 0x418   : > { %v2039_v25 = vsel %vm1370_vm2, %v2029_v22, -inf }
 0x419   : > { %2040 = vmax.xlane.f32.xlu2 %v2039_v25 }
 0x41f   : > { %2034 = vmax.xlane.f32.xlu0 %v2033_v26 }
 0x42c   : > { %2031 = vmax.xlane.f32.xlu1 %v2030_v30 }
 0x454   : > { %v1708_v31 = vpop.xlane.xlu0 %1707 }
 0x455   : > { %v1718_v32 = vsub.f32 %v1702_v55, %v1708_v31 }
 0x457   : > { %v1722_v33 = vmul.f32 1.442695, %v1718_v32 }
 0x459   : > { %8949 = vpow2.f32 %v1722_v33 }
 0x45c   : > { %v1711_v46 = vpop.xlane.xlu1 %1710 }
 0x45d   : > { %v1719_v42 = vsub.f32 %v1703_v2, %v1711_v46 }
 0x45f   : > { %v10744_v48 = vpop.eup %8949  ;;  %v1724_v44 = vmul.f32 1.442695, %v1719_v42 }
 0x460   : > { %v1730_v49 = vsel %vm1370_vm2, %v10744_v48, 0.0 }
 0x461   : > { %8951 = vpow2.f32 %v1724_v44  ;;  %1731 = vadd.xlane.f32.xlu0 %v1730_v49 }
 0x464   : > { %v1714_v50 = vpop.xlane.xlu2 %1713 }
 0x465   : > { %v1720_v45 = vsub.f32 %v1704_v5, %v1714_v50  ;;  %v2413_v50 = vld [vmem:[#allocation16 + $0x78] sm:$0xff] }
 0x467   : > { %v10748_v51 = vpop.eup %8951  ;;  %v1726_v52 = vmul.f32 1.442695, %v1720_v45  ;;  %v2128_v1 = vpop.permute.xlu0 %2127  ;;  %v2411_v45 = vld [vmem:[#allocation16 + $0x68] sm:$0xff] }
 0x468   : > { %v1733_v47 = vsel %vm1370_vm2, %v10748_v51, 0.0 }
 0x469   : > { %8953 = vpow2.f32 %v1726_v52  ;;  %1734 = vadd.xlane.f32.xlu2 %v1733_v47  ;;  %v2409_v52 = vld [vmem:[#allocation16 + $0x58] sm:$0xff] }
 0x46c   : > { %v1717_v53 = vpop.xlane.xlu2 %1716 }
 0x46d   : > { %v1721_v54 = vsub.f32 %v1705_v41, %v1717_v53 }
 0x46f   : > { %v10752_v57 = vpop.eup %8953  ;;  %v1728_v59 = vmul.f32 1.442695, %v1721_v54 }
 0x470   : > { %v1736_v61 = vsel %vm1370_vm2, %v10752_v57, 0.0 }
 0x471   : > { %8955 = vpow2.f32 %v1728_v59  ;;  %1737 = vadd.xlane.f32.xlu1 %v1736_v61  ;;  %v2407_v59 = vld [vmem:[#allocation16 + $0x48] sm:$0xff]  ;;  %v2405_v61 = vld [vmem:[#allocation16 + $0x38] sm:$0xff] }
 0x474   : > { %v2136_v63 = vpop.permute.xlu1 %2135 }
 0x475   : > { %8126 = vmatpush.xpose.msk.msrb.mxu3 %vm1652_vm8, %v2136_v63  ;;  %v2403_v63 = vld [vmem:[#allocation16 + $0x28] sm:$0xff] }
 0x477   : > { %v10757_v55 = vpop.eup %8955 }
 0x478   : > { %8127 = vmatmul.msk.f32.vlgmr.msrb.gmra.mxu3 %vm1652_vm8, %v2128_v1  ;;  %v1739_v56 = vsel %vm1370_vm2, %v10757_v55, 0.0  ;;  %v2401_v1 = vld [vmem:[#allocation16 + $0x18] sm:$0xff] }
 0x479   : > { %1740 = vadd.xlane.f32.xlu0 %v1739_v56  ;;  %2478 = vmatpush.msra.mxu3 %v2413_v50  ;;  %v2410_v50 = vld [vmem:[#allocation16 + $0x60] sm:$0xff] }
 0x47b   : > { %2479 = vmatpush.msra.mxu3 %v2411_v45  ;;  %v2408_v45 = vld [vmem:[#allocation16 + $0x50] sm:$0xff] }
 0x47d   : > { %2480 = vmatpush.msra.mxu3 %v2409_v52  ;;  %v2406_v52 = vld [vmem:[#allocation16 + $0x40] sm:$0xff] }
 0x47f   : > { %2481 = vmatpush.msra.mxu3 %v2407_v59 }
 0x480   : > { %8128 = vmatmul.msk.f32.gmra.mxu3 %vm1652_vm8, %v2130_v34 }
 0x481   : > { %2131 = vrot.lane.b32.xlu2 %v10630_v24, %s10065_s23  ;;  %2482 = vmatpush.msra.mxu3 %v2405_v61  ;;  %v2402_v61 = vld [vmem:[#allocation16 + $0x20] sm:$0xff] }
 0x483   : > { %2483 = vmatpush.msra.mxu3 %v2403_v63  ;;  %v2400_v63 = vld [vmem:[#allocation16 + $0x10] sm:$0xff] }
 0x484   : > { %v2038_v60 = vpop.xlane.xlu2 %2037 }
 0x485   : > { %v2044_v10 = vsub.f32 %v10734_v16, %v2038_v60  ;;  %2484 = vmatpush.msra.mxu3 %v2401_v1 }
 0x487   : > { %v2050_v43 = vmul.f32 1.442695, %v2044_v10 }
 0x48a   : > { %2133 = vrot.lane.b32.xlu1 %v10622_v23, %s10065_s23  ;;  %v1840_v23 = vpop.f32.mrf.mxu3 }
 0x48b   : > { %v1852_v17 = vmul.f32 0.25, %v1840_v23 }
 0x48c   : > { %v2041_v2 = vpop.xlane.xlu2 %2040 }
 0x48d   : > { %8738 = vrot.lane.b32.xlu0 %v10620_v21, %s10061_s30  ;;  %v2045_v40 = vsub.f32 %v2029_v22, %v2041_v2  ;;  %v10785_v39 = vadd.f32 %v1852_v17, %v10704_v62 }
 0x48f   : > { %v2052_v9 = vmul.f32 1.442695, %v2045_v40  ;;  %v1860_v26 = vsel %vm1370_vm2, %v10785_v39, -inf }
 0x492   : > { %8743 = vrot.lane.b32.xlu1 %v10610_v12, %s10061_s30  ;;  %v2035_v5 = vpop.xlane.xlu0 %2034  ;;  %v1843_v37 = vpop.f32.mrf.mxu3 }
 0x493   : > { %v2043_v7 = vsub.f32 %v2027_v35, %v2035_v5  ;;  %v1853_v25 = vmul.f32 0.25, %v1843_v37 }
 0x495   : > { %v2048_v24 = vmul.f32 1.442695, %v2043_v7 }
 0x49a   : > { %v1846_v27 = vpop.f32.mrf.mxu3 }
 0x49b   : > { %v1854_v30 = vmul.f32 0.25, %v1846_v27 }
 0x49d   : > { %v10799_v32 = vadd.f32 %v1854_v30, %v10718_v4 }
 0x49f   : > { %v2032_v38 = vpop.xlane.xlu1 %2031  ;;  %v1866_v46 = vsel %vm1370_vm2, %v10799_v32, -inf }
 0x4a0   : > { %v2042_v3 = vsub.f32 %v2026_v28, %v2032_v38  ;;  %v10794_v28 = vadd.f32 %v1853_v25, %v10711_v58 }
 0x4a2   : > { %v2046_v6 = vmul.f32 1.442695, %v2042_v3  ;;  %v1863_v31 = vsel %vm1370_vm2, %v10794_v28, -inf  ;;  %v1849_v33 = vpop.f32.mrf.mxu3  ;;  %v2399_v3 = vld [vmem:[#allocation16 + $0x8] sm:$0xff] }
 0x4a3   : > { %v1855_v34 = vmul.f32 0.25, %v1849_v33  ;;  %2485 = vmatpush.msra.mxu3 %v2399_v3 }
 0x4a4   : > { %8957 = vpow2.f32 %v2046_v6 }
 0x4a5   : > { %8959 = vpow2.f32 %v2052_v9  ;;  %v10804_v42 = vadd.f32 %v1855_v34, %v10725_v8  ;;  %v1526_v9 = vpop.f32.mrf.mxu0 }
 0x4a6   : > { %8961 = vpow2.f32 %v2048_v24 }
 0x4a7   : > { %8963 = vpow2.f32 %v2050_v43  ;;  %v1869_v44 = vsel %vm1370_vm2, %v10804_v42, -inf }
 0x4aa   : > { %v10771_v41 = vpop.eup %8957 }
 0x4ab   : > { %v2054_v11 = vsel %vm1370_vm2, %v10771_v41, 0.0  ;;  %v10776_v13 = vpop.eup %8959 }
 0x4ac   : > { %2055 = vadd.xlane.f32.xlu2 %v2054_v11  ;;  %v10778_v15 = vpop.eup %8961  ;;  %v2063_v36 = vsel %vm1370_vm2, %v10776_v13, 0.0  ;;  %v8919_v11 = vld [vmem:[#allocation13] ss:$0 sm:$0xff] }
 0x4ad   : > { %v2057_v16 = vsel %vm1370_vm2, %v10778_v15, 0.0  ;;  %v10787_v22 = vpop.eup %8963 }
 0x4ae   : > { %v2060_v35 = vsel %vm1370_vm2, %v10787_v22, 0.0 }
 0x4b4   : > { %2064 = vadd.xlane.f32.xlu2 %v2063_v36  ;;  %v10823_v36 = vadd.f32 %v8919_v11, %v1526_v9 }
 0x4b7   : > { %2058 = vadd.xlane.f32.xlu0 %v2057_v16 }
 0x4bc   : > { %2061 = vadd.xlane.f32.xlu1 %v2060_v35  ;;  %1861 = vmax.xlane.f32.xlu2 %v1860_v26 }
 0x4c4   : > { %1864 = vmax.xlane.f32.xlu2 %v1863_v31 }
 0x4cc   : > { %1867 = vmax.xlane.f32.xlu2 %v1866_v46 }
 0x4d4   : > { %v1732_v49 = vpop.xlane.xlu0 %1731  ;;  %1870 = vmax.xlane.f32.xlu2 %v1869_v44 }
 0x4d5   : > { %8965 = vrcp.f32 %v1732_v49  ;;  %v2412_v49 = vld [vmem:[#allocation16 + $0x70] sm:$0xff] }
 0x4db   : > { %v8966_v47 = vpop.eup %8965 }
 0x4dc   : > { %v1746_v53 = vmul.f32 %v8966_v47, %v10744_v48  ;;  %v1735_v54 = vpop.xlane.xlu2 %1734  ;;  %v2404_v47 = vld [vmem:[#allocation16 + $0x30] sm:$0xff] }
 0x4dd   : > { %8967 = vrcp.f32 %v1735_v54 }
 0x4de   : > { %8095 = vmatmul.msk.f32.vlgmr.msrb.gmra.mxu0 %vm1370_vm2, %v1746_v53 }
 0x4e3   : > { %v8968_v56 = vpop.eup %8967 }
 0x4e4   : > { %v2132_v60 = vpop.permute.xlu2 %2131  ;;  %v1738_v2 = vpop.xlane.xlu1 %1737  ;;  %v1747_v38 = vmul.f32 %v8968_v56, %v10748_v51  ;;  %v2398_v56 = vld [vmem:[#allocation16] sm:$0xff] }
 0x4e5   : > { %8969 = vrcp.f32 %v1738_v2  ;;  %8129 = vmatmul.msk.f32.gmra.mxu3 %vm1652_vm8, %v2132_v60 }
 0x4e6   : > { %8096 = vmatmul.msk.f32.gmra.mxu0 %vm1370_vm2, %v1747_v38 }
 0x4eb   : > { %v8970_v48 = vpop.eup %8969 }
 0x4ec   : > { %v1741_v40 = vpop.xlane.xlu0 %1740  ;;  %v1748_v5 = vmul.f32 %v8970_v48, %v10752_v57 }
 0x4ed   : > { %8971 = vrcp.f32 %v1741_v40 }
 0x4ee   : > { %8097 = vmatmul.msk.f32.gmra.mxu0 %vm1370_vm2, %v1748_v5 }
 0x4f3   : > { %v8972_v6 = vpop.eup %8971 }
 0x4f4   : > { %v1749_v7 = vmul.f32 %v8972_v6, %v10757_v55 }
 0x4f6   : > { %8098 = vmatmul.msk.f32.gmra.mxu0 %vm1370_vm2, %v1749_v7 }
 0x4fb   : > { %v2176_v51 = vpop.f32.mrf.mxu3 }
 0x4fc   : > { %v2188_v24 = vmul.f32 0.25, %v2176_v51  ;;  %v2134_v23 = vpop.permute.xlu1 %2133 }
 0x4fd   : > { %8130 = vmatmul.msk.f32.gmra.mxu3 %vm1652_vm8, %v2134_v23 }
 0x4fe   : > { %v10819_v10 = vadd.f32 %v2188_v24, %v10704_v62  ;;  %v1529_v62 = vpop.f32.mrf.mxu0 }
 0x4ff   : > { %v8739_v43 = vpop.permute.xlu0 %8738  ;;  %v1530_v31 = vadd.f32 %v8919_v11, %v1529_v62  ;;  %v1557_v62 = vld [vmem:[#allocation19 + $0x10] sm:$0xff] }
 0x500   : > { %v8740_v57 = vunpack.i.l.bf16 %v8739_v43  ;;  %v2196_v17 = vsel %vm1370_vm2, %v10819_v10, -inf  ;;  %v8741_v55 = vunpack.i.h.bf16 %v8739_v43 }
 0x501   : > { %2197 = vmax.xlane.f32.xlu0 %v2196_v17  ;;  %v1561_v17 = vld [vmem:[#allocation19 + $0x30] sm:$0xff] }
 0x502   : > { %2110 = vmatpush.msra.mxu0 %v8740_v57  ;;  %v1562_v57 = vld [vmem:[#allocation19 + $0x38] sm:$0xff] }
 0x503   : > { %v2179_v37 = vpop.f32.mrf.mxu3  ;;  %2377 = vmatpush.msrb.mxu2 %v1562_v57 }
 0x504   : > { %v2189_v16 = vmul.f32 0.25, %v2179_v37  ;;  %v8744_v25 = vpop.permute.xlu1 %8743  ;;  %2111 = vmatpush.msra.mxu0 %v8741_v55  ;;  %v1560_v55 = vld [vmem:[#allocation19 + $0x28] sm:$0xff]  ;;  %v1559_v37 = vld [vmem:[#allocation19 + $0x20] sm:$0xff] }
 0x505   : > { %v8745_v35 = vunpack.i.l.bf16 %v8744_v25  ;;  %8143 = vmatmul.msk.f32.vlgmr.msra.gmra.mxu3 %vm1569_vm7, %v10823_v36  ;;  %v8746_v27 = vunpack.i.h.bf16 %v8744_v25  ;;  %2378 = vmatpush.msrb.mxu2 %v1561_v17 }
 0x506   : > { %v10828_v26 = vadd.f32 %v2189_v16, %v10711_v58  ;;  %v1532_v33 = vpop.f32.mrf.mxu0 }
 0x507   : > { %2112 = vmatpush.msra.mxu0 %v8745_v35  ;;  %v1533_v34 = vadd.f32 %v8919_v11, %v1532_v33  ;;  %2379 = vmatpush.msrb.mxu2 %v1560_v55 }
 0x508   : > { %v2199_v30 = vsel %vm1370_vm2, %v10828_v26, -inf }
 0x509   : > { %2200 = vmax.xlane.f32.xlu1 %v2199_v30  ;;  %2113 = vmatpush.msra.mxu0 %v8746_v27  ;;  %v1556_v27 = vld [vmem:[#allocation19 + $0x8] sm:$0xff] }
 0x50a   : > { %2380 = vmatpush.msrb.mxu2 %v1559_v37 }
 0x50b   : > { %2449 = vmatpush.msrb.mxu0 %v2412_v49 }
 0x50d   : > { %8144 = vmatmul.msk.f32.gmra.mxu3 %vm1569_vm7, %v1530_v31  ;;  %2450 = vmatpush.msrb.mxu0 %v2410_v50 }
 0x50e   : > { %v1535_v46 = vpop.f32.mrf.mxu0 }
 0x50f   : > { %v1536_v44 = vadd.f32 %v8919_v11, %v1535_v46  ;;  %2451 = vmatpush.msrb.mxu0 %v2408_v45  ;;  %v1555_v46 = vld [vmem:[#allocation19] sm:$0xff]  ;;  %v2414_v45 = vld [vmem:[#allocation17] sm:$0x3] }
 0x511   : > { %2452 = vmatpush.msrb.mxu0 %v2406_v52 }
 0x513   : > { %2453 = vmatpush.msrb.mxu0 %v2404_v47 }
 0x515   : > { %8145 = vmatmul.msk.f32.gmra.mxu3 %vm1569_vm7, %v1533_v34  ;;  %2454 = vmatpush.msrb.mxu0 %v2402_v61 }
 0x517   : > { %2455 = vmatpush.msrb.mxu0 %v2400_v63 }
 0x519   : > { %2456 = vmatpush.msrb.mxu0 %v2398_v56 }
 0x51d   : > { %8146 = vmatmul.msk.f32.gmra.mxu3 %vm1569_vm7, %v1536_v44 }
 0x51f   : > { %v2056_v58 = vpop.xlane.xlu2 %2055 }
 0x520   : > { %8973 = vrcp.f32 %v2056_v58 }
 0x522   : > { %8748 = vrot.lane.b32.xlu1 %v10620_v21, %s10064_s5 }
 0x526   : > { %v8974_v53 = vpop.eup %8973 }
 0x527   : > { %v2070_v54 = vmul.f32 %v8974_v53, %v10771_v41  ;;  %v2065_v59 = vpop.xlane.xlu2 %2064 }
 0x529   : > { %8119 = vmatmul.msk.f32.vlgmr.msra.gmra.mxu0 %vm1370_vm2, %v2070_v54 }
 0x52a   : > { %v2059_v1 = vpop.xlane.xlu0 %2058  ;;  %8758 = vrot.lane.b32.xlu1 %v10620_v21, %s10065_s23 }
 0x52b   : > { %8975 = vrcp.f32 %v2059_v1 }
 0x52f   : > { %v1862_v60 = vpop.xlane.xlu2 %1861  ;;  %v2062_v2 = vpop.xlane.xlu1 %2061 }
 0x530   : > { %v1872_v38 = vsub.f32 %v10785_v39, %v1862_v60  ;;  %8977 = vrcp.f32 %v2062_v2 }
 0x531   : > { %v8976_v3 = vpop.eup %8975 }
 0x532   : > { %v1876_v41 = vmul.f32 1.442695, %v1872_v38  ;;  %v2071_v48 = vmul.f32 %v8976_v3, %v10778_v15 }
 0x534   : > { %8979 = vpow2.f32 %v1876_v41  ;;  %8120 = vmatmul.msk.f32.gmra.mxu0 %vm1370_vm2, %v2071_v48 }
 0x535   : > { %8981 = vrcp.f32 %v2065_v59 }
 0x536   : > { %v8978_v40 = vpop.eup %8977 }
 0x537   : > { %v2072_v21 = vmul.f32 %v8978_v40, %v10787_v22  ;;  %v1865_v15 = vpop.xlane.xlu2 %1864 }
 0x538   : > { %v1873_v16 = vsub.f32 %v10794_v28, %v1865_v15 }
 0x53a   : > { %v10844_v5 = vpop.eup %8979 }
 0x53b   : > { %v1884_v6 = vsel %vm1370_vm2, %v10844_v5, 0.0  ;;  %v8982_v39 = vpop.eup %8981 }
 0x53c   : > { %1885 = vadd.xlane.f32.xlu0 %v1884_v6  ;;  %8121 = vmatmul.msk.f32.gmra.mxu0 %vm1370_vm2, %v2072_v21  ;;  %v2073_v7 = vmul.f32 %v8982_v39, %v10776_v13 }
 0x53f   : > { %v1868_v22 = vpop.xlane.xlu2 %1867 }
 0x540   : > { %v1874_v28 = vsub.f32 %v10799_v32, %v1868_v22 }
 0x542   : > { %v1880_v50 = vmul.f32 1.442695, %v1874_v28 }
 0x544   : > { %8122 = vmatmul.msk.f32.gmra.mxu0 %vm1370_vm2, %v2073_v7 }
 0x547   : > { %v1871_v51 = vpop.xlane.xlu2 %1870 }
 0x548   : > { %v1875_v9 = vsub.f32 %v10804_v42, %v1871_v51 }
 0x54a   : > { %v1882_v11 = vmul.f32 1.442695, %v1875_v9 }
 0x54c   : > { %8139 = vmatmul.msk.f32.vlgmr.msrb.gmra.mxu0 %vm1569_vm7, %v10823_v36  ;;  %8983 = vpow2.f32 %v1882_v11 }
 0x550   : > { %8753 = vrot.lane.b32.xlu0 %v10610_v12, %s10064_s5 }
 0x552   : > { %v10865_v36 = vpop.eup %8983 }
 0x553   : > { %v1893_v42 = vsel %vm1370_vm2, %v10865_v36, 0.0 }
 0x554   : > { %8140 = vmatmul.msk.f32.gmra.mxu0 %vm1569_vm7, %v1530_v31  ;;  %v1878_v31 = vmul.f32 1.442695, %v1873_v16 }
 0x55c   : > { %8141 = vmatmul.msk.f32.gmra.mxu0 %vm1569_vm7, %v1533_v34 }
 0x564   : > { %8142 = vmatmul.msk.f32.gmra.mxu0 %vm1569_vm7, %v1536_v44  ;;  %v10871_v44 = vpop.f32.mrf.mxu0 }
 0x568   : > { %v2182_v13 = vpop.f32.mrf.mxu3 }
 0x569   : > { %v2190_v24 = vmul.f32 0.25, %v2182_v13 }
 0x56b   : > { %v10861_v23 = vadd.f32 %v2190_v24, %v10718_v4  ;;  %v1558_v4 = vld [vmem:[#allocation19 + $0x18] sm:$0xff] }
 0x56c   : > { %2381 = vmatpush.msrb.mxu2 %v1558_v4  ;;  %v10886_v59 = vpop.f32.mrf.mxu0 }
 0x56d   : > { %v2202_v43 = vsel %vm1370_vm2, %v10861_v23, -inf }
 0x56e   : > { %2203 = vmax.xlane.f32.xlu2 %v2202_v43  ;;  %2382 = vmatpush.msrb.mxu2 %v1557_v62  ;;  %v2425_v62 = vperm.slane %v2414_v45, 0 }
 0x570   : > { %2383 = vmatpush.msrb.mxu2 %v1556_v27 }
 0x572   : > { %2384 = vmatpush.msrb.mxu2 %v1555_v46 }
 0x574   : > { %v2198_v53 = vpop.xlane.xlu0 %2197  ;;  %v10896_v48 = vpop.f32.mrf.mxu0 }
 0x575   : > { %v2208_v32 = vsub.f32 %v10819_v10, %v2198_v53 }
 0x577   : > { %v2212_v1 = vmul.f32 1.442695, %v2208_v32 }
 0x57a   : > { %1894 = vadd.xlane.f32.xlu0 %v1893_v42 }
 0x57c   : > { %v2201_v25 = vpop.xlane.xlu1 %2200  ;;  %v10902_v15 = vpop.f32.mrf.mxu0 }
 0x57d   : > { %v2209_v35 = vsub.f32 %v10828_v26, %v2201_v25 }
 0x57f   : > { %v2214_v30 = vmul.f32 1.442695, %v2209_v35 }
 0x580   : > { %v2185_v33 = vpop.f32.mrf.mxu3 }
 0x581   : > { %8985 = vpow2.f32 %v2214_v30  ;;  %v2191_v34 = vmul.f32 0.25, %v2185_v33 }
 0x582   : > { %8987 = vpow2.f32 %v1878_v31 }
 0x583   : > { %v10874_v49 = vadd.f32 %v2191_v34, %v10725_v8  ;;  %v2426_v8 = vperm.slane %v2414_v45, 1  ;;  %8989 = vpow2.f32 %v1880_v50 }
 0x584   : > { %8991 = vpow2.f32 %v2212_v1 }
 0x585   : > { %v2205_v26 = vsel %vm1370_vm2, %v10874_v49, -inf }
 0x586   : > { %2206 = vmax.xlane.f32.xlu2 %v2205_v26 }
 0x587   : > { %v10879_v58 = vpop.eup %8985 }
 0x588   : > { %v2487_v52 = vpop.f32.mrf.mxu3  ;;  %v2223_v47 = vsel %vm1370_vm2, %v10879_v58, 0.0  ;;  %v10883_v54 = vpop.eup %8987 }
 0x589   : > { %2224 = vadd.xlane.f32.xlu1 %v2223_v47  ;;  %v1887_v61 = vsel %vm1370_vm2, %v10883_v54, 0.0  ;;  %v2488_v63 = vadd.f32 %v2487_v52, %v2426_v8  ;;  %v10890_v2 = vpop.eup %8989 }
 0x58a   : > { %v1890_v10 = vsel %vm1370_vm2, %v10890_v2, 0.0  ;;  %v10898_v6 = vpop.eup %8991 }
 0x58b   : > { %v2220_v39 = vsel %vm1370_vm2, %v10898_v6, 0.0 }
 0x58e   : > { %1888 = vadd.xlane.f32.xlu2 %v1887_v61 }
 0x590   : > { %v2490_v56 = vpop.f32.mrf.mxu3 }
 0x591   : > { %v2491_v60 = vadd.f32 %v2490_v56, %v2426_v8 }
 0x593   : > { %v10892_v38 = vpack.i.bf16 %v2488_v63, %v2491_v60 }
 0x594   : > { %v8749_v3 = vpop.permute.xlu1 %8748 }
 0x595   : > { %v8750_v41 = vunpack.i.l.bf16 %v8749_v3  ;;  %v8751_v40 = vunpack.i.h.bf16 %v8749_v3 }
 0x596   : > { %1891 = vadd.xlane.f32.xlu2 %v1890_v10 }
 0x597   : > { %1944 = vmatpush.msra.mxu1 %v8750_v41 }
 0x598   : > { %v2493_v21 = vpop.f32.mrf.mxu3 }
 0x599   : > { %1945 = vmatpush.msra.mxu1 %v8751_v40  ;;  %v2494_v22 = vadd.f32 %v2493_v21, %v2426_v8 }
 0x59c   : > { %v8759_v37 = vpop.permute.xlu1 %8758 }
 0x59d   : > { %v8760_v25 = vunpack.i.l.bf16 %v8759_v37  ;;  %v8761_v35 = vunpack.i.h.bf16 %v8759_v37 }
 0x59e   : > { %2221 = vadd.xlane.f32.xlu2 %v2220_v39 }
 0x5a0   : > { %v2496_v7 = vpop.f32.mrf.mxu3 }
 0x5a1   : > { %v2497_v51 = vadd.f32 %v2496_v7, %v2426_v8 }
 0x5a3   : > { %2632 = vmatpush.msra.mxu2 %v2497_v51  ;;  %v10904_v9 = vpack.i.bf16 %v2494_v22, %v2497_v51 }
 0x5a5   : > { %2633 = vmatpush.msra.mxu2 %v2494_v22 }
 0x5a6   : > { %v10906_v13 = vpop.f32.mrf.mxu0 }
 0x5a7   : > { %2634 = vmatpush.msra.mxu2 %v2491_v60 }
 0x5a9   : > { %2635 = vmatpush.msra.mxu2 %v2488_v63 }
 0x5af   : > { %v1886_v43 = vpop.xlane.xlu0 %1885 }
 0x5b0   : > { %8993 = vrcp.f32 %v1886_v43 }
 0x5b1   : > { %v10908_v24 = vpop.f32.mrf.mxu0 }
 0x5b6   : > { %8763 = vrot.lane.b32.xlu2 %v10610_v12, %s10065_s23  ;;  %v8994_v55 = vpop.eup %8993 }
 0x5b7   : > { %v1900_v16 = vmul.f32 %v8994_v55, %v10844_v5 }
 0x5b9   : > { %v10912_v11 = vpop.f32.mrf.mxu0 }
 0x5c1   : > { %v10914_v57 = vpop.f32.mrf.mxu0 }
 0x5c2   : > { %v8754_v17 = vpop.permute.xlu0 %8753 }
 0x5c3   : > { %v8755_v42 = vunpack.i.l.bf16 %v8754_v17  ;;  %v8756_v4 = vunpack.i.h.bf16 %v8754_v17 }
 0x5c5   : > { %1946 = vmatpush.msra.mxu1 %v8755_v42 }
 0x5c7   : > { %1947 = vmatpush.msra.mxu1 %v8756_v4 }
 0x5c8   : > { %8107 = vmatmul.msk.f32.vlgmr.msra.gmra.mxu1 %vm1370_vm2, %v1900_v16 }
 0x5c9   : > { %2276 = vmatpush.msrb.mxu1 %v8760_v25  ;;  %v2458_v12 = vpop.f32.mrf.mxu0 }
 0x5ca   : > { %v10927_v26 = vadd.f32 %v2458_v12, %v2425_v62 }
 0x5cb   : > { %2277 = vmatpush.msrb.mxu1 %v8761_v35 }
 0x5d1   : > { %v2461_v27 = vpop.f32.mrf.mxu0 }
 0x5d2   : > { %v10918_v30 = vadd.f32 %v2461_v27, %v2425_v62 }
 0x5d4   : > { %2659 = vrot.lane.b32.xlu1 %v10918_v30, %s10062_s1 }
 0x5d9   : > { %v2464_v31 = vpop.f32.mrf.mxu0 }
 0x5da   : > { %v10942_v32 = vadd.f32 %v2464_v31, %v2425_v62 }
 0x5e1   : > { %v2204_v33 = vpop.xlane.xlu2 %2203  ;;  %v2467_v34 = vpop.f32.mrf.mxu0 }
 0x5e2   : > { %v2210_v5 = vsub.f32 %v10861_v23, %v2204_v33  ;;  %v10923_v46 = vadd.f32 %v2467_v34, %v2425_v62 }
 0x5e4   : > { %v2216_v28 = vmul.f32 1.442695, %v2210_v5  ;;  %2663 = vrot.lane.b32.xlu1 %v10923_v46, %s10062_s1 }
 0x5e6   : > { %8995 = vpow2.f32 %v2216_v28 }
 0x5ec   : > { %v10929_v50 = vpop.eup %8995  ;;  %2657 = vrot.lane.b32.xlu1 %v10927_v26, %s10062_s1 }
 0x5ed   : > { %v2226_v45 = vsel %vm1370_vm2, %v10929_v50, 0.0  ;;  %v1895_v56 = vpop.xlane.xlu0 %1894 }
 0x5ee   : > { %2227 = vadd.xlane.f32.xlu2 %v2226_v45 }
 0x5f4   : > { %2651 = vrot.lane.b32.xlu1 %v10918_v30, %s10064_s5 }
 0x5f9   : > { %v2207_v23 = vpop.xlane.xlu2 %2206 }
 0x5fa   : > { %v2211_v52 = vsub.f32 %v10874_v49, %v2207_v23 }
 0x5fc   : > { %v2218_v47 = vmul.f32 1.442695, %v2211_v52  ;;  %2827 = vrot.lane.b32.xlu1 %v10927_v26, %s10060_s13  ;;  %v2225_v39 = vpop.xlane.xlu1 %2224 }
 0x5fe   : > { %8997 = vpow2.f32 %v2218_v47 }
 0x601   : > { %v1889_v53 = vpop.xlane.xlu2 %1888 }
 0x602   : > { %8999 = vrcp.f32 %v1889_v53 }
 0x604   : > { %v10940_v8 = vpop.eup %8997  ;;  %2999 = vrot.lane.b32.xlu1 %v10923_v46, %s10063_s3 }
 0x605   : > { %v2229_v61 = vsel %vm1370_vm2, %v10940_v8, 0.0 }
 0x606   : > { %2230 = vadd.xlane.f32.xlu0 %v2229_v61  ;;  %2661 = vrot.lane.b32.xlu2 %v10942_v32, %s10062_s1 }
 0x608   : > { %v9000_v49 = vpop.eup %8999 }
 0x609   : > { %v1892_v63 = vpop.xlane.xlu2 %1891  ;;  %v1901_v1 = vmul.f32 %v9000_v49, %v10883_v54 }
 0x60a   : > { %9001 = vrcp.f32 %v1892_v63  ;;  %v8204_v63 = vld [vmem:[%s13309_s7 + $0x28] sm:$0xff] }
 0x60b   : > { %8108 = vmatmul.msk.f32.gmra.mxu1 %vm1370_vm2, %v1901_v1  ;;  %9003 = vrcp.f32 %v1895_v56  ;;  %v8203_v1 = vld [vmem:[%s13309_s7 + $0x20] sm:$0xff] }
 0x60c   : > { %2655 = vrot.lane.b32.xlu1 %v10923_v46, %s10064_s5 }
 0x60e   : > { %2653 = vrot.lane.b32.xlu2 %v10942_v32, %s10064_s5 }
 0x610   : > { %v9002_v60 = vpop.eup %9001 }
 0x611   : > { %v2222_v3 = vpop.xlane.xlu2 %2221  ;;  %v1902_v41 = vmul.f32 %v9002_v60, %v10890_v2  ;;  %v9004_v54 = vpop.eup %9003 }
 0x612   : > { %9005 = vrcp.f32 %v2222_v3  ;;  %v1903_v40 = vmul.f32 %v9004_v54, %v10865_v36 }
 0x613   : > { %8109 = vmatmul.msk.f32.gmra.mxu1 %vm1370_vm2, %v1902_v41  ;;  %9007 = vrcp.f32 %v2225_v39 }
 0x614   : > { %2985 = vrot.lane.b32.xlu1 %v10927_v26, %s10065_s23 }
 0x616   : > { %2831 = vrot.lane.b32.xlu2 %v10942_v32, %s10060_s13 }
 0x618   : > { %v9006_v7 = vpop.eup %9005 }
 0x619   : > { %v8764_v10 = vpop.permute.xlu2 %8763  ;;  %v2236_v36 = vmul.f32 %v9006_v7, %v10898_v6  ;;  %v9008_v22 = vpop.eup %9007 }
 0x61a   : > { %v8765_v21 = vunpack.i.l.bf16 %v8764_v10  ;;  %2507 = vrot.lane.b32.xlu0 %v10942_v32, %s10059_s12  ;;  %v8766_v2 = vunpack.i.h.bf16 %v8764_v10  ;;  %v2237_v51 = vmul.f32 %v9008_v22, %v10879_v58 }
 0x61b   : > { %8110 = vmatmul.msk.f32.gmra.mxu1 %vm1370_vm2, %v1903_v40 }
 0x61c   : > { %2278 = vmatpush.msrb.mxu1 %v8765_v21  ;;  %2823 = vrot.lane.b32.xlu1 %v10942_v32, %s10061_s30 }
 0x61e   : > { %2279 = vmatpush.msrb.mxu1 %v8766_v2  ;;  %2829 = vrot.lane.b32.xlu2 %v10918_v30, %s10060_s13 }
 0x622   : > { %2505 = vrot.lane.b32.xlu0 %v10918_v30, %s10059_s12 }
 0x623   : > { %8131 = vmatmul.msk.f32.vlgmr.msrb.gmra.mxu1 %vm1370_vm2, %v2236_v36 }
 0x624   : > { %2991 = vrot.lane.b32.xlu1 %v10923_v46, %s10065_s23 }
 0x626   : > { %2993 = vrot.lane.b32.xlu2 %v10927_v26, %s10063_s3 }
 0x62a   : > { %2509 = vrot.lane.b32.xlu0 %v10923_v46, %s10059_s12 }
 0x62b   : > { %8132 = vmatmul.msk.f32.gmra.mxu1 %vm1370_vm2, %v2237_v51 }
 0x62e   : > { %2821 = vrot.lane.b32.xlu2 %v10918_v30, %s10061_s30 }
 0x632   : > { %2503 = vrot.lane.b32.xlu0 %v10927_v26, %s10059_s12 }
 0x636   : > { %2989 = vrot.lane.b32.xlu2 %v10942_v32, %s10065_s23 }
 0x63a   : > { %2649 = vrot.lane.b32.xlu0 %v10927_v26, %s10064_s5 }
 0x63e   : > { %2313 = vrot.lane.b32.xlu2 %v10906_v13, %s10060_s13 }
 0x642   : > { %2997 = vrot.lane.b32.xlu0 %v10942_v32, %s10063_s3 }
 0x645   : > { %v1949_v58 = vpop.f32.mrf.mxu1 }
 0x646   : > { %2297 = vrot.lane.b32.xlu1 %v1949_v58, %s10063_s3  ;;  %v2660_v6 = vpop.permute.xlu1 %2659 }
 0x64a   : > { %2833 = vrot.lane.b32.xlu0 %v10923_v46, %s10060_s13 }
 0x64e   : > { %2317 = vrot.lane.b32.xlu1 %v10912_v11, %s10060_s13 }
 0x652   : > { %2995 = vrot.lane.b32.xlu0 %v10918_v30, %s10063_s3 }
 0x656   : > { %v2664_v43 = vpop.permute.xlu1 %2663 }
 0x657   : > { %8159 = vmatpush.xpose.msk.msra.mxu0 %vm1652_vm8, %v2664_v43 }
 0x65a   : > { %2819 = vrot.lane.b32.xlu0 %v10927_v26, %s10061_s30 }
 0x65e   : > { %v2658_v13 = vpop.permute.xlu1 %2657 }
 0x661   : > { %v2228_v17 = vpop.xlane.xlu2 %2227 }
 0x662   : > { %9009 = vrcp.f32 %v2228_v17  ;;  %2987 = vrot.lane.b32.xlu0 %v10918_v30, %s10065_s23 }
 0x666   : > { %v2652_v55 = vpop.permute.xlu1 %2651 }
 0x668   : > { %v9010_v42 = vpop.eup %9009 }
 0x669   : > { %v2662_v37 = vpop.permute.xlu2 %2661  ;;  %v2238_v11 = vmul.f32 %v9010_v42, %v10929_v50 }
 0x66a   : > { %8160 = vmatpush.xpose.msk.msra.mxu0 %vm1652_vm8, %v2662_v37  ;;  %2825 = vrot.lane.b32.xlu0 %v10923_v46, %s10061_s30  ;;  %v1361_v37 = vld [vmem:[%s13264_s27] sm:$0xff] }
 0x66b   : > { %8133 = vmatmul.msk.f32.gmra.mxu1 %vm1370_vm2, %v2238_v11 }
 0x66e   : > { %8161 = vmatpush.xpose.msk.msra.mxu0 %vm1652_vm8, %v2660_v6  ;;  %v2828_v4 = vpop.permute.xlu1 %2827 }
 0x672   : > { %8162 = vmatpush.xpose.msk.msra.mxu0 %vm1652_vm8, %v2658_v13 }
 0x676   : > { %v3000_v16 = vpop.permute.xlu1 %2999 }
 0x677   : > { %8183 = vmatpush.xpose.msk.msrb.mxu0 %vm1652_vm8, %v3000_v16 }
 0x679   : > { %v2231_v25 = vpop.xlane.xlu0 %2230 }
 0x67a   : > { %9011 = vrcp.f32 %v2231_v25 }
 0x680   : > { %v9012_v35 = vpop.eup %9011 }
 0x681   : > { %v2239_v12 = vmul.f32 %v9012_v35, %v10940_v8  ;;  %v2656_v8 = vpop.permute.xlu1 %2655 }
 0x683   : > { %8134 = vmatmul.msk.f32.gmra.mxu1 %vm1370_vm2, %v2239_v12 }
 0x688   : > { %v1952_v62 = vpop.f32.mrf.mxu1 }
 0x689   : > { %2299 = vrot.lane.b32.xlu2 %v1952_v62, %s10063_s3  ;;  %v2986_v61 = vpop.permute.xlu1 %2985 }
 0x68c   : > { %v2508_v27 = vpop.permute.xlu0 %2507 }
 0x690   : > { %v1955_v31 = vpop.f32.mrf.mxu1 }
 0x691   : > { %2315 = vrot.lane.b32.xlu2 %v10908_v24, %s10060_s13  ;;  %v2654_v24 = vpop.permute.xlu2 %2653  ;;  %v2824_v3 = vpop.permute.xlu1 %2823 }
 0x694   : > { %v2506_v33 = vpop.permute.xlu0 %2505 }
 0x698   : > { %v1958_v34 = vpop.f32.mrf.mxu1 }
 0x699   : > { %2303 = vrot.lane.b32.xlu1 %v1958_v34, %s10063_s3  ;;  %v2832_v52 = vpop.permute.xlu2 %2831  ;;  %v2992_v54 = vpop.permute.xlu1 %2991 }
 0x69c   : > { %v2510_v5 = vpop.permute.xlu0 %2509 }
 0x69d   : > { %8147 = vmatpush.xpose.msk.msra.mxu1 %vm1652_vm8, %v2510_v5 }
 0x6a0   : > { %v2281_v28 = vpop.f32.mrf.mxu1 }
 0x6a1   : > { %8148 = vmatpush.xpose.msk.msra.mxu1 %vm1652_vm8, %v2508_v27  ;;  %2329 = vrot.lane.b32.xlu0 %v2281_v28, %s10062_s1  ;;  %v1362_v27 = vld [vmem:[%s13264_s27 + $0x8] sm:$0xff] }
 0x6a4   : > { %v2504_v50 = vpop.permute.xlu0 %2503 }
 0x6a5   : > { %8149 = vmatpush.xpose.msk.msra.mxu1 %vm1652_vm8, %v2506_v33 }
 0x6a8   : > { %v2284_v45 = vpop.f32.mrf.mxu1 }
 0x6a9   : > { %2331 = vrot.lane.b32.xlu2 %v2284_v45, %s10062_s1  ;;  %2301 = vrot.lane.b32.xlu0 %v1955_v31, %s10063_s3 }
 0x6aa   : > { %8150 = vmatpush.xpose.msk.msra.mxu1 %vm1652_vm8, %v2504_v50 }
 0x6ac   : > { %v2650_v23 = vpop.permute.xlu0 %2649 }
 0x6ad   : > { %8151 = vmatmul.msk.f32.vlgmr.msra.gmra.mxu1 %vm1652_vm8, %v10927_v26  ;;  %8163 = vmatmul.msk.f32.vlgmr.msra.gmra.mxu0 %vm1652_vm8, %v2650_v23  ;;  %v2830_v26 = vpop.permute.xlu2 %2829  ;;  %v1363_v23 = vld [vmem:[%s13264_s27 + $0x10] sm:$0xff] }
 0x6b1   : > { %2319 = vrot.lane.b32.xlu2 %v10914_v57, %s10060_s13 }
 0x6b4   : > { %v2998_v47 = vpop.permute.xlu0 %2997 }
 0x6b5   : > { %8152 = vmatmul.msk.f32.gmra.mxu1 %vm1652_vm8, %v10918_v30  ;;  %8164 = vmatmul.msk.f32.gmra.mxu0 %vm1652_vm8, %v2652_v55  ;;  %v2994_v30 = vpop.permute.xlu2 %2993 }
 0x6b6   : > { %8184 = vmatpush.xpose.msk.msrb.mxu0 %vm1652_vm8, %v2998_v47 }
 0x6b8   : > { %v2298_v7 = vpop.permute.xlu1 %2297 }
 0x6b9   : > { %v2341_v36 = vsel %vm1652_vm8, %v10871_v44, %v2298_v7 }
 0x6bc   : > { %v2834_v53 = vpop.permute.xlu0 %2833 }
 0x6bd   : > { %8153 = vmatmul.msk.f32.gmra.mxu1 %vm1652_vm8, %v10942_v32  ;;  %8165 = vmatmul.msk.f32.gmra.mxu0 %vm1652_vm8, %v2654_v24  ;;  %v8206_v32 = vld [vmem:[%s13309_s7 + $0x38] sm:$0xff]  ;;  %v2822_v56 = vpop.permute.xlu2 %2821 }
 0x6be   : > { %8171 = vmatpush.xpose.msk.msrb.mxu1 %vm1652_vm8, %v2834_v53 }
 0x6c2   : > { %8172 = vmatpush.xpose.msk.msrb.mxu1 %vm1652_vm8, %v2832_v52 }
 0x6c4   : > { %v2996_v57 = vpop.permute.xlu0 %2995 }
 0x6c5   : > { %8154 = vmatmul.msk.f32.gmra.mxu1 %vm1652_vm8, %v10923_v46  ;;  %8166 = vmatmul.msk.f32.gmra.mxu0 %vm1652_vm8, %v2656_v8  ;;  %v8205_v46 = vld [vmem:[%s13309_s7 + $0x30] sm:$0xff]  ;;  %v2990_v41 = vpop.permute.xlu2 %2989 }
 0x6c6   : > { %8173 = vmatpush.xpose.msk.msrb.mxu1 %vm1652_vm8, %v2830_v26  ;;  %8185 = vmatpush.xpose.msk.msrb.mxu0 %vm1652_vm8, %v2996_v57 }
 0x6ca   : > { %8174 = vmatpush.xpose.msk.msrb.mxu1 %vm1652_vm8, %v2828_v4  ;;  %8186 = vmatpush.xpose.msk.msrb.mxu0 %vm1652_vm8, %v2994_v30 }
 0x6cc   : > { %v2820_v49 = vpop.permute.xlu0 %2819 }
 0x6cd   : > { %8175 = vmatmul.msk.f32.vlgmr.msrb.gmra.mxu1 %vm1652_vm8, %v2820_v49  ;;  %8187 = vmatmul.msk.f32.vlgmr.msrb.gmra.mxu0 %vm1652_vm8, %v2986_v61  ;;  %v2314_v21 = vpop.permute.xlu2 %2313 }
 0x6ce   : > { %3435 = vmatpush.msra.mxu0 %v8206_v32  ;;  %v2345_v51 = vsel %vm1370_vm2, %v2341_v36, %v2314_v21 }
 0x6d0   : > { %3436 = vmatpush.msra.mxu0 %v8205_v46  ;;  %v11120_v46 = vld [vmem:[%s13264_s27 + $0x18] sm:$0xff] }
 0x6d2   : > { %3437 = vmatpush.msra.mxu0 %v8204_v63 }
 0x6d4   : > { %3438 = vmatpush.msra.mxu0 %v8203_v1  ;;  %v2988_v60 = vpop.permute.xlu0 %2987 }
 0x6d5   : > { %8176 = vmatmul.msk.f32.gmra.mxu1 %vm1652_vm8, %v2822_v56  ;;  %8188 = vmatmul.msk.f32.gmra.mxu0 %vm1652_vm8, %v2988_v60 }
 0x6dc   : > { %v2826_v10 = vpop.permute.xlu0 %2825 }
 0x6dd   : > { %8177 = vmatmul.msk.f32.gmra.mxu1 %vm1652_vm8, %v2824_v3  ;;  %8189 = vmatmul.msk.f32.gmra.mxu0 %vm1652_vm8, %v2990_v41 }
 0x6e3   : > { %v2300_v39 = vpop.permute.xlu2 %2299 }
 0x6e4   : > { %v2342_v13 = vsel %vm1652_vm8, %v10886_v59, %v2300_v39 }
 0x6e5   : > { %8178 = vmatmul.msk.f32.gmra.mxu1 %vm1652_vm8, %v2826_v10  ;;  %8190 = vmatmul.msk.f32.gmra.mxu0 %vm1652_vm8, %v2992_v54 }
 0x6e8   : > { %v2287_v40 = vpop.f32.mrf.mxu1 }
 0x6e9   : > { %2333 = vrot.lane.b32.xlu0 %v2287_v40, %s10062_s1 }
 0x6eb   : > { %v2316_v22 = vpop.permute.xlu2 %2315 }
 0x6ec   : > { %v2346_v17 = vsel %vm1370_vm2, %v2342_v13, %v2316_v22 }
 0x6ed   : > { %8207 = vmatmul.msk.f32.vlgmr.msra.gmra.mxu0 %vm1370_vm2, %v10490_v29 }
 0x6f1   : > { %8768 = vrot.lane.b32.xlu0 %v10904_v9, %s10064_s5 }
 0x700   : > { %v2290_v2 = vpop.f32.mrf.mxu1 }
 0x701   : > { %2335 = vrot.lane.b32.xlu2 %v2290_v2, %s10062_s1 }
 0x703   : > { %v2332_v43 = vpop.permute.xlu2 %2331 }
 0x704   : > { %v2351_v55 = vsel %vm2349_vm9, %v2346_v17, %v2332_v43 }
 0x713   : > { %v2330_v58 = vpop.permute.xlu0 %2329 }
 0x714   : > { %v2350_v6 = vsel %vm2349_vm9, %v2345_v51, %v2330_v58 }
 0x715   : > { %8135 = vmatmul.msk.f32.vlgmr.msrb.gmra.mxu2 %vm1569_vm7, %v2350_v6  ;;  %v2318_v6 = vpop.permute.xlu1 %2317 }
 0x71b   : > { %v2302_v22 = vpop.permute.xlu0 %2301 }
 0x71d   : > { %8136 = vmatmul.msk.f32.gmra.mxu2 %vm1569_vm7, %v2351_v55 }
 0x72a   : > { %v2544_v44 = vpop.f32.mrf.mxu1  ;;  %v2698_v42 = vpop.f32.mrf.mxu0 }
 0x72b   : > { %v2556_v11 = vmul.f32 0.25, %v2544_v44  ;;  %v2710_v4 = vmul.f32 0.25, %v2698_v42  ;;  %v2343_v44 = vsel %vm1652_vm8, %v10896_v48, %v2302_v22  ;;  %v2320_v42 = vpop.permute.xlu2 %2319 }
 0x72d   : > { %v11087_v16 = vadd.f32 %v2556_v11, %v1361_v37  ;;  %v11089_v25 = vadd.f32 %v2710_v4, %v1361_v37 }
 0x72f   : > { %v2564_v59 = vsel %vm1370_vm2, %v11087_v16, -inf  ;;  %v2718_v35 = vsel %vm1370_vm2, %v11089_v25, -inf }
 0x730   : > { %2565 = vmax.xlane.f32.xlu2 %v2564_v59  ;;  %2719 = vmax.xlane.f32.xlu0 %v2718_v35 }
 0x732   : > { %v2547_v12 = vpop.f32.mrf.mxu1  ;;  %v2701_v62 = vpop.f32.mrf.mxu0 }
 0x733   : > { %v2557_v31 = vmul.f32 0.25, %v2547_v12  ;;  %v2711_v33 = vmul.f32 0.25, %v2701_v62  ;;  %v2347_v12 = vsel %vm1370_vm2, %v2343_v44, %v2318_v6 }
 0x735   : > { %v11098_v34 = vadd.f32 %v2557_v31, %v1362_v27  ;;  %v11100_v5 = vadd.f32 %v2711_v33, %v1362_v27 }
 0x737   : > { %v2567_v28 = vsel %vm1370_vm2, %v11098_v34, -inf  ;;  %v2721_v50 = vsel %vm1370_vm2, %v11100_v5, -inf }
 0x738   : > { %2568 = vmax.xlane.f32.xlu1 %v2567_v28  ;;  %2722 = vmax.xlane.f32.xlu2 %v2721_v50 }
 0x73a   : > { %v2550_v45 = vpop.f32.mrf.mxu1  ;;  %v2704_v24 = vpop.f32.mrf.mxu0 }
 0x73b   : > { %v2558_v52 = vmul.f32 0.25, %v2550_v45  ;;  %v2712_v47 = vmul.f32 0.25, %v2704_v24 }
 0x73d   : > { %v11109_v53 = vadd.f32 %v2558_v52, %v1363_v23  ;;  %v11111_v26 = vadd.f32 %v2712_v47, %v1363_v23 }
 0x73f   : > { %v2570_v8 = vsel %vm1370_vm2, %v11109_v53, -inf  ;;  %v2724_v57 = vsel %vm1370_vm2, %v11111_v26, -inf }
 0x740   : > { %2571 = vmax.xlane.f32.xlu0 %v2570_v8  ;;  %2725 = vmax.xlane.f32.xlu1 %v2724_v57 }
 0x742   : > { %v2553_v30 = vpop.f32.mrf.mxu1  ;;  %v2707_v32 = vpop.f32.mrf.mxu0 }
 0x743   : > { %v2559_v61 = vmul.f32 0.25, %v2553_v30  ;;  %v2713_v49 = vmul.f32 0.25, %v2707_v32 }
 0x745   : > { %v11123_v63 = vadd.f32 %v2559_v61, %v11120_v46  ;;  %v11126_v1 = vadd.f32 %v2713_v49, %v11120_v46 }
 0x747   : > { %v2573_v56 = vsel %vm1370_vm2, %v11123_v63, -inf  ;;  %v2727_v60 = vsel %vm1370_vm2, %v11126_v1, -inf }
 0x748   : > { %2574 = vmax.xlane.f32.xlu2 %v2573_v56  ;;  %2728 = vmax.xlane.f32.xlu0 %v2727_v60 }
 0x74a   : > { %v2868_v3 = vpop.f32.mrf.mxu1  ;;  %v3034_v41 = vpop.f32.mrf.mxu0 }
 0x74b   : > { %v2880_v54 = vmul.f32 0.25, %v2868_v3  ;;  %v3046_v10 = vmul.f32 0.25, %v3034_v41 }
 0x74d   : > { %v11132_v40 = vadd.f32 %v3046_v10, %v1361_v37  ;;  %v11134_v21 = vadd.f32 %v2880_v54, %v1361_v37 }
 0x74f   : > { %v3054_v2 = vsel %vm1370_vm2, %v11132_v40, -inf  ;;  %v2888_v39 = vsel %vm1370_vm2, %v11134_v21, -inf }
 0x750   : > { %3055 = vmax.xlane.f32.xlu0 %v3054_v2  ;;  %2889 = vmax.xlane.f32.xlu1 %v2888_v39 }
 0x752   : > { %v2871_v7 = vpop.f32.mrf.mxu1  ;;  %v3037_v36 = vpop.f32.mrf.mxu0 }
 0x753   : > { %v2881_v51 = vmul.f32 0.25, %v2871_v7  ;;  %v3047_v58 = vmul.f32 0.25, %v3037_v36 }
 0x755   : > { %v11140_v43 = vadd.f32 %v2881_v51, %v1362_v27  ;;  %v11142_v13 = vadd.f32 %v3047_v58, %v1362_v27  ;;  %v2304_v27 = vpop.permute.xlu1 %2303 }
 0x756   : > { %v2344_v50 = vsel %vm1652_vm8, %v10902_v15, %v2304_v27 }
 0x757   : > { %v2891_v17 = vsel %vm1370_vm2, %v11140_v43, -inf  ;;  %v3057_v55 = vsel %vm1370_vm2, %v11142_v13, -inf  ;;  %v2348_v8 = vsel %vm1370_vm2, %v2344_v50, %v2320_v42 }
 0x758   : > { %2892 = vmax.xlane.f32.xlu2 %v2891_v17  ;;  %3058 = vmax.xlane.f32.xlu1 %v3057_v55 }
 0x75a   : > { %v2874_v37 = vpop.f32.mrf.mxu1  ;;  %v3040_v11 = vpop.f32.mrf.mxu0 }
 0x75b   : > { %v2882_v4 = vmul.f32 0.25, %v2874_v37  ;;  %v3048_v59 = vmul.f32 0.25, %v3040_v11  ;;  %v2334_v35 = vpop.permute.xlu0 %2333  ;;  %v2336_v45 = vpop.permute.xlu2 %2335 }
 0x75c   : > { %v2352_v62 = vsel %vm2349_vm9, %v2347_v12, %v2334_v35  ;;  %v2353_v30 = vsel %vm2349_vm9, %v2348_v8, %v2336_v45 }
 0x75d   : > { %8137 = vmatmul.msk.f32.gmra.mxu2 %vm1569_vm7, %v2352_v62  ;;  %v11153_v31 = vadd.f32 %v2882_v4, %v1363_v23  ;;  %v11155_v33 = vadd.f32 %v3048_v59, %v1363_v23 }
 0x75f   : > { %v2894_v48 = vsel %vm1370_vm2, %v11153_v31, -inf  ;;  %v3060_v28 = vsel %vm1370_vm2, %v11155_v33, -inf }
 0x760   : > { %2895 = vmax.xlane.f32.xlu2 %v2894_v48  ;;  %3061 = vmax.xlane.f32.xlu0 %v3060_v28 }
 0x762   : > { %v2877_v24 = vpop.f32.mrf.mxu1  ;;  %v3043_v57 = vpop.f32.mrf.mxu0 }
 0x763   : > { %v2883_v52 = vmul.f32 0.25, %v2877_v24  ;;  %v8769_v47 = vpop.permute.xlu0 %8768  ;;  %v3049_v15 = vmul.f32 0.25, %v3043_v57 }
 0x764   : > { %v8770_v23 = vunpack.i.l.bf16 %v8769_v47  ;;  %v8771_v61 = vunpack.i.h.bf16 %v8769_v47 }
 0x765   : > { %8138 = vmatmul.msk.f32.gmra.mxu2 %vm1569_vm7, %v2353_v30  ;;  %v11167_v32 = vadd.f32 %v2883_v52, %v11120_v46  ;;  %v11172_v56 = vadd.f32 %v3049_v15, %v11120_v46 }
 0x766   : > { %2802 = vmatpush.msrb.mxu3 %v8770_v23 }
 0x767   : > { %v2897_v49 = vsel %vm1370_vm2, %v11167_v32, -inf  ;;  %v3063_v60 = vsel %vm1370_vm2, %v11172_v56, -inf }
 0x768   : > { %2898 = vmax.xlane.f32.xlu1 %v2897_v49  ;;  %2803 = vmatpush.msrb.mxu3 %v8771_v61 }
 0x770   : > { %3064 = vmax.xlane.f32.xlu1 %v3063_v60 }
 0x7a3   : > { %v2566_v3 = vpop.xlane.xlu2 %2565  ;;  %v2720_v41 = vpop.xlane.xlu0 %2719 }
 0x7a4   : > { %v2576_v54 = vsub.f32 %v11087_v16, %v2566_v3  ;;  %v2730_v10 = vsub.f32 %v11089_v25, %v2720_v41 }
 0x7a6   : > { %v2580_v2 = vmul.f32 1.442695, %v2576_v54  ;;  %v2734_v39 = vmul.f32 1.442695, %v2730_v10 }
 0x7a8   : > { %9013 = vpow2.f32 %v2580_v2 }
 0x7a9   : > { %9015 = vpow2.f32 %v2734_v39 }
 0x7ab   : > { %v2569_v7 = vpop.xlane.xlu1 %2568  ;;  %v2723_v36 = vpop.xlane.xlu2 %2722 }
 0x7ac   : > { %v2577_v22 = vsub.f32 %v11098_v34, %v2569_v7  ;;  %v2731_v46 = vsub.f32 %v11100_v5, %v2723_v36 }
 0x7ae   : > { %v11180_v51 = vpop.eup %9013  ;;  %v2582_v58 = vmul.f32 1.442695, %v2577_v22  ;;  %v2736_v6 = vmul.f32 1.442695, %v2731_v46 }
 0x7af   : > { %v11182_v17 = vpop.eup %9015  ;;  %v2588_v16 = vsel %vm1370_vm2, %v11180_v51, 0.0 }
 0x7b0   : > { %9017 = vpow2.f32 %v2582_v58  ;;  %2589 = vadd.xlane.f32.xlu1 %v2588_v16  ;;  %v2742_v25 = vsel %vm1370_vm2, %v11182_v17, 0.0 }
 0x7b1   : > { %9019 = vpow2.f32 %v2736_v6  ;;  %2743 = vadd.xlane.f32.xlu2 %v2742_v25 }
 0x7b3   : > { %v2572_v55 = vpop.xlane.xlu0 %2571  ;;  %v2726_v5 = vpop.xlane.xlu1 %2725 }
 0x7b4   : > { %v2578_v34 = vsub.f32 %v11109_v53, %v2572_v55  ;;  %v2732_v11 = vsub.f32 %v11111_v26, %v2726_v5 }
 0x7b6   : > { %v11189_v44 = vpop.eup %9017  ;;  %v2584_v42 = vmul.f32 1.442695, %v2578_v34  ;;  %v2738_v35 = vmul.f32 1.442695, %v2732_v11 }
 0x7b7   : > { %v11191_v37 = vpop.eup %9019  ;;  %v2591_v4 = vsel %vm1370_vm2, %v11189_v44, 0.0 }
 0x7b8   : > { %9021 = vpow2.f32 %v2584_v42  ;;  %2592 = vadd.xlane.f32.xlu0 %v2591_v4  ;;  %v2745_v59 = vsel %vm1370_vm2, %v11191_v37, 0.0 }
 0x7b9   : > { %2746 = vadd.xlane.f32.xlu2 %v2745_v59  ;;  %9023 = vpow2.f32 %v2738_v35 }
 0x7bb   : > { %v2575_v27 = vpop.xlane.xlu2 %2574  ;;  %v2729_v61 = vpop.xlane.xlu0 %2728 }
 0x7bc   : > { %v2579_v48 = vsub.f32 %v11123_v63, %v2575_v27 }
 0x7be   : > { %v11198_v12 = vpop.eup %9021  ;;  %v2586_v45 = vmul.f32 1.442695, %v2579_v48 }
 0x7bf   : > { %v2594_v53 = vsel %vm1370_vm2, %v11198_v12, 0.0  ;;  %v11202_v62 = vpop.eup %9023 }
 0x7c0   : > { %v2748_v26 = vsel %vm1370_vm2, %v11202_v62, 0.0  ;;  %9025 = vpow2.f32 %v2586_v45 }
 0x7c1   : > { %2595 = vadd.xlane.f32.xlu2 %v2594_v53 }
 0x7c3   : > { %v2890_v28 = vpop.xlane.xlu1 %2889  ;;  %v3056_v54 = vpop.xlane.xlu0 %3055 }
 0x7c4   : > { %v2900_v52 = vsub.f32 %v11134_v21, %v2890_v28  ;;  %v2733_v21 = vsub.f32 %v11126_v1, %v2729_v61  ;;  %v3066_v1 = vsub.f32 %v11132_v40, %v3056_v54 }
 0x7c6   : > { %v11217_v23 = vpop.eup %9025  ;;  %v2904_v30 = vmul.f32 1.442695, %v2900_v52  ;;  %v2740_v41 = vmul.f32 1.442695, %v2733_v21  ;;  %v3070_v22 = vmul.f32 1.442695, %v3066_v1 }
 0x7c9   : > { %8773 = vrot.lane.b32.xlu1 %v10892_v38, %s10064_s5  ;;  %2749 = vadd.xlane.f32.xlu2 %v2748_v26 }
 0x7cb   : > { %v2893_v50 = vpop.xlane.xlu2 %2892  ;;  %v3059_v47 = vpop.xlane.xlu1 %3058 }
 0x7cc   : > { %8778 = vrot.lane.b32.xlu0 %v10904_v9, %s10061_s30  ;;  %v2901_v24 = vsub.f32 %v11140_v43, %v2893_v50  ;;  %v3067_v16 = vsub.f32 %v11142_v13, %v3059_v47 }
 0x7ce   : > { %v2906_v8 = vmul.f32 1.442695, %v2901_v24  ;;  %v3072_v25 = vmul.f32 1.442695, %v3067_v16 }
 0x7d0   : > { %9027 = vpow2.f32 %v2906_v8 }
 0x7d1   : > { %9029 = vpow2.f32 %v2904_v30 }
 0x7d3   : > { %v2896_v57 = vpop.xlane.xlu2 %2895  ;;  %v3062_v4 = vpop.xlane.xlu0 %3061 }
 0x7d4   : > { %8788 = vrot.lane.b32.xlu0 %v10892_v38, %s10061_s30  ;;  %v2902_v63 = vsub.f32 %v11153_v31, %v2896_v57  ;;  %v3068_v26 = vsub.f32 %v11155_v33, %v3062_v4 }
 0x7d6   : > { %v2908_v49 = vmul.f32 1.442695, %v2902_v63  ;;  %v11222_v43 = vpop.eup %9027  ;;  %v3074_v28 = vmul.f32 1.442695, %v3068_v26 }
 0x7d7   : > { %v11226_v3 = vpop.eup %9029  ;;  %v2915_v31 = vsel %vm1370_vm2, %v11222_v43, 0.0 }
 0x7d8   : > { %9031 = vpow2.f32 %v2908_v49  ;;  %v2912_v2 = vsel %vm1370_vm2, %v11226_v3, 0.0 }
 0x7d9   : > { %9033 = vpow2.f32 %v2740_v41 }
 0x7db   : > { %v2899_v15 = vpop.xlane.xlu1 %2898 }
 0x7dc   : > { %v2903_v60 = vsub.f32 %v11167_v32, %v2899_v15 }
 0x7de   : > { %v2910_v10 = vmul.f32 1.442695, %v2903_v60  ;;  %v11232_v7 = vpop.eup %9031 }
 0x7df   : > { %v2918_v36 = vsel %vm1370_vm2, %v11232_v7, 0.0  ;;  %v11238_v58 = vpop.eup %9033 }
 0x7e0   : > { %9035 = vpow2.f32 %v2910_v10  ;;  %v2751_v40 = vsel %vm1370_vm2, %v11238_v58, 0.0 }
 0x7e1   : > { %8783 = vrot.lane.b32.xlu2 %v10904_v9, %s10065_s23  ;;  %v2597_v9 = vsel %vm1370_vm2, %v11217_v23, 0.0  ;;  %9037 = vpow2.f32 %v3070_v22 }
 0x7e3   : > { %v3065_v39 = vpop.xlane.xlu1 %3064 }
 0x7e4   : > { %v3069_v32 = vsub.f32 %v11172_v56, %v3065_v39 }
 0x7e6   : > { %v3076_v46 = vmul.f32 1.442695, %v3069_v32  ;;  %v11240_v6 = vpop.eup %9035 }
 0x7e7   : > { %v2921_v56 = vsel %vm1370_vm2, %v11240_v6, 0.0  ;;  %v11247_v55 = vpop.eup %9037 }
 0x7e8   : > { %9039 = vpow2.f32 %v3076_v46  ;;  %v3078_v5 = vsel %vm1370_vm2, %v11247_v55, 0.0 }
 0x7e9   : > { %9041 = vpow2.f32 %v3072_v25 }
 0x7ee   : > { %v11249_v34 = vpop.eup %9039 }
 0x7ef   : > { %v3087_v13 = vsel %vm1370_vm2, %v11249_v34, 0.0  ;;  %v11257_v42 = vpop.eup %9041 }
 0x7f0   : > { %v3081_v11 = vsel %vm1370_vm2, %v11257_v42, 0.0 }
 0x7f3   : > { %2598 = vadd.xlane.f32.xlu1 %v2597_v9 }
 0x7fb   : > { %2916 = vadd.xlane.f32.xlu1 %v2915_v31 }
 0x7fe   : > { %2913 = vadd.xlane.f32.xlu0 %v2912_v2 }
 0x803   : > { %2919 = vadd.xlane.f32.xlu1 %v2918_v36 }
 0x80a   : > { %2752 = vadd.xlane.f32.xlu2 %v2751_v40 }
 0x80b   : > { %2922 = vadd.xlane.f32.xlu1 %v2921_v56 }
 0x812   : > { %8793 = vrot.lane.b32.xlu0 %v10892_v38, %s10065_s23  ;;  %3079 = vadd.xlane.f32.xlu2 %v3078_v5 }
 0x813   : > { %3088 = vadd.xlane.f32.xlu1 %v3087_v13 }
 0x81a   : > { %3082 = vadd.xlane.f32.xlu2 %v3081_v11 }
 0x823   : > { %v2590_v59 = vpop.xlane.xlu1 %2589 }
 0x824   : > { %9043 = vrcp.f32 %v2590_v59  ;;  %v2744_v35 = vpop.xlane.xlu2 %2743 }
 0x82a   : > { %v9044_v53 = vpop.eup %9043 }
 0x82b   : > { %v2604_v38 = vmul.f32 %v9044_v53, %v11180_v51  ;;  %v2593_v27 = vpop.xlane.xlu0 %2592 }
 0x82c   : > { %9045 = vrcp.f32 %v2593_v27  ;;  %v2747_v48 = vpop.xlane.xlu2 %2746 }
 0x82d   : > { %8155 = vmatmul.msk.f32.vlgmr.msra.gmra.mxu2 %vm1370_vm2, %v2604_v38  ;;  %9047 = vpow2.f32 %v3074_v28 }
 0x832   : > { %v9046_v50 = vpop.eup %9045 }
 0x833   : > { %v2605_v45 = vmul.f32 %v9046_v50, %v11189_v44  ;;  %v11266_v52 = vpop.eup %9047 }
 0x834   : > { %v2596_v24 = vpop.xlane.xlu2 %2595  ;;  %v3084_v51 = vsel %vm1370_vm2, %v11266_v52, 0.0 }
 0x835   : > { %9049 = vrcp.f32 %v2596_v24  ;;  %8156 = vmatmul.msk.f32.gmra.mxu2 %vm1370_vm2, %v2605_v45  ;;  %v11294_v24 = vpop.f32.mrf.mxu2 }
 0x836   : > { %9051 = vrcp.f32 %v2744_v35 }
 0x837   : > { %9053 = vrcp.f32 %v2747_v48 }
 0x83b   : > { %v9050_v33 = vpop.eup %9049  ;;  %v8774_v47 = vpop.permute.xlu1 %8773 }
 0x83c   : > { %v9052_v8 = vpop.eup %9051  ;;  %v8775_v57 = vunpack.i.l.bf16 %v8774_v47  ;;  %v2750_v30 = vpop.xlane.xlu2 %2749  ;;  %3085 = vadd.xlane.f32.xlu0 %v3084_v51  ;;  %v2606_v63 = vmul.f32 %v9050_v33, %v11198_v12  ;;  %v8776_v44 = vunpack.i.h.bf16 %v8774_v47 }
 0x83d   : > { %v2758_v61 = vmul.f32 %v9052_v8, %v11182_v17  ;;  %v9054_v21 = vpop.eup %9053  ;;  %9055 = vrcp.f32 %v2750_v30  ;;  %v11299_v47 = vpop.f32.mrf.mxu2 }
 0x83e   : > { %8157 = vmatmul.msk.f32.gmra.mxu2 %vm1370_vm2, %v2606_v63  ;;  %v8779_v9 = vpop.permute.xlu0 %8778  ;;  %2804 = vmatpush.msrb.mxu3 %v8775_v57  ;;  %v2759_v54 = vmul.f32 %v9054_v21, %v11191_v37 }
 0x83f   : > { %v8780_v15 = vunpack.i.l.bf16 %v8779_v9  ;;  %v8781_v49 = vunpack.i.h.bf16 %v8779_v9 }
 0x840   : > { %2805 = vmatpush.msrb.mxu3 %v8776_v44 }
 0x841   : > { %8167 = vmatmul.msk.f32.vlgmr.msrb.gmra.mxu3 %vm1370_vm2, %v2758_v61  ;;  %2968 = vmatpush.msrb.mxu2 %v8780_v15 }
 0x843   : > { %2969 = vmatpush.msrb.mxu2 %v8781_v49  ;;  %v9056_v17 = vpop.eup %9055 }
 0x844   : > { %v8784_v60 = vpop.permute.xlu2 %8783  ;;  %v2760_v39 = vmul.f32 %v9056_v17, %v11202_v62  ;;  %v2419_v17 = vld [vmem:[#allocation22 + $0x20] sm:$0xff] }
 0x845   : > { %v8785_v31 = vunpack.i.l.bf16 %v8784_v60  ;;  %v8786_v10 = vunpack.i.h.bf16 %v8784_v60  ;;  %v11303_v51 = vpop.f32.mrf.mxu2 }
 0x846   : > { %v8789_v12 = vpop.permute.xlu0 %8788 }
 0x847   : > { %v8790_v41 = vunpack.i.l.bf16 %v8789_v12  ;;  %3134 = vmatpush.msra.mxu3 %v8785_v31  ;;  %v8791_v2 = vunpack.i.h.bf16 %v8789_v12 }
 0x849   : > { %8168 = vmatmul.msk.f32.gmra.mxu3 %vm1370_vm2, %v2759_v54  ;;  %2970 = vmatpush.msrb.mxu2 %v8790_v41  ;;  %v2422_v54 = vld [vmem:[#allocation22 + $0x38] sm:$0xff] }
 0x84a   : > { %3135 = vmatpush.msra.mxu3 %v8786_v10  ;;  %3234 = vmatpush.msra.mxu1 %v2422_v54  ;;  %v2421_v10 = vld [vmem:[#allocation22 + $0x30] sm:$0xff] }
 0x84b   : > { %2971 = vmatpush.msrb.mxu2 %v8791_v2  ;;  %v2420_v2 = vld [vmem:[#allocation22 + $0x28] sm:$0xff] }
 0x84c   : > { %3235 = vmatpush.msra.mxu1 %v2421_v10 }
 0x84d   : > { %v11306_v57 = vpop.f32.mrf.mxu2 }
 0x84e   : > { %3236 = vmatpush.msra.mxu1 %v2420_v2 }
 0x850   : > { %3237 = vmatpush.msra.mxu1 %v2419_v17  ;;  %v3481_v17 = vld [vmem:[#allocation8 + $0x38] sm:$0xff] }
 0x851   : > { %8169 = vmatmul.msk.f32.gmra.mxu3 %vm1370_vm2, %v2760_v39  ;;  %v2418_v39 = vld [vmem:[#allocation22 + $0x18] sm:$0xff]  ;;  %3511 = vmatpush.msrb.mxu0 %v3481_v17  ;;  %v3422_v17 = vld [vmem:[#allocation7 + $0x1] sm:$0x1] }
 0x852   : > { %3238 = vmatpush.msra.mxu1 %v2418_v39 }
 0x866   : > { %v2599_v1 = vpop.xlane.xlu1 %2598 }
 0x867   : > { %9057 = vrcp.f32 %v2599_v1  ;;  %v2417_v1 = vld [vmem:[#allocation22 + $0x10] sm:$0xff] }
 0x868   : > { %3239 = vmatpush.msra.mxu1 %v2417_v1 }
 0x86d   : > { %v9058_v32 = vpop.eup %9057 }
 0x86e   : > { %v2607_v36 = vmul.f32 %v9058_v32, %v11217_v23  ;;  %v2917_v37 = vpop.xlane.xlu1 %2916  ;;  %v2416_v32 = vld [vmem:[#allocation22 + $0x8] sm:$0xff] }
 0x86f   : > { %3240 = vmatpush.msra.mxu1 %v2416_v32  ;;  %v3480_v32 = vld [vmem:[#allocation8 + $0x30] sm:$0xff] }
 0x870   : > { %8158 = vmatmul.msk.f32.gmra.mxu2 %vm1370_vm2, %v2607_v36  ;;  %v2415_v36 = vld [vmem:[#allocation22] sm:$0xff]  ;;  %3512 = vmatpush.msrb.mxu0 %v3480_v32 }
 0x871   : > { %v2914_v22 = vpop.xlane.xlu0 %2913  ;;  %3241 = vmatpush.msra.mxu1 %v2415_v36 }
 0x872   : > { %9059 = vrcp.f32 %v2914_v22 }
 0x873   : > { %9061 = vrcp.f32 %v2917_v37 }
 0x876   : > { %v2920_v40 = vpop.xlane.xlu1 %2919 }
 0x878   : > { %v9060_v46 = vpop.eup %9059 }
 0x879   : > { %v2928_v16 = vmul.f32 %v9060_v46, %v11226_v3  ;;  %v9062_v56 = vpop.eup %9061 }
 0x87a   : > { %v2929_v25 = vmul.f32 %v9062_v56, %v11222_v43 }
 0x87b   : > { %8179 = vmatmul.msk.f32.vlgmr.msrb.gmra.mxu2 %vm1370_vm2, %v2928_v16 }
 0x87d   : > { %v2753_v62 = vpop.xlane.xlu2 %2752 }
 0x87e   : > { %9063 = vrcp.f32 %v2753_v62  ;;  %v2923_v13 = vpop.xlane.xlu1 %2922 }
 0x87f   : > { %9065 = vrcp.f32 %v2920_v40 }
 0x883   : > { %8180 = vmatmul.msk.f32.gmra.mxu2 %vm1370_vm2, %v2929_v25 }
 0x884   : > { %v9064_v23 = vpop.eup %9063  ;;  %v8794_v5 = vpop.permute.xlu0 %8793 }
 0x885   : > { %v8795_v11 = vunpack.i.l.bf16 %v8794_v5  ;;  %v3080_v4 = vpop.xlane.xlu2 %3079  ;;  %v2761_v59 = vmul.f32 %v9064_v23, %v11238_v58  ;;  %v9066_v35 = vpop.eup %9065  ;;  %v8796_v3 = vunpack.i.h.bf16 %v8794_v5 }
 0x886   : > { %9067 = vrcp.f32 %v3080_v4  ;;  %v2930_v53 = vmul.f32 %v9066_v35, %v11232_v7  ;;  %v3089_v50 = vpop.xlane.xlu1 %3088 }
 0x887   : > { %8170 = vmatmul.msk.f32.gmra.mxu3 %vm1370_vm2, %v2761_v59  ;;  %9069 = vrcp.f32 %v2923_v13 }
 0x888   : > { %3136 = vmatpush.msra.mxu3 %v8795_v11 }
 0x88a   : > { %3137 = vmatpush.msra.mxu3 %v8796_v3 }
 0x88b   : > { %8181 = vmatmul.msk.f32.gmra.mxu2 %vm1370_vm2, %v2930_v53 }
 0x88c   : > { %v9068_v43 = vpop.eup %9067 }
 0x88d   : > { %v3094_v26 = vmul.f32 %v9068_v43, %v11247_v55  ;;  %v3083_v38 = vpop.xlane.xlu2 %3082  ;;  %v9070_v27 = vpop.eup %9069 }
 0x88e   : > { %9071 = vrcp.f32 %v3083_v38  ;;  %v2931_v58 = vmul.f32 %v9070_v27, %v11240_v6 }
 0x88f   : > { %8191 = vmatmul.msk.f32.vlgmr.msra.gmra.mxu3 %vm1370_vm2, %v3094_v26 }
 0x893   : > { %8182 = vmatmul.msk.f32.gmra.mxu2 %vm1370_vm2, %v2931_v58 }
 0x894   : > { %v9072_v48 = vpop.eup %9071 }
 0x895   : > { %v3095_v28 = vmul.f32 %v9072_v48, %v11257_v42 }
 0x897   : > { %8192 = vmatmul.msk.f32.gmra.mxu3 %vm1370_vm2, %v3095_v28 }
 0x8af   : > { %v3086_v7 = vpop.xlane.xlu0 %3085 }
 0x8b0   : > { %9073 = vrcp.f32 %v3086_v7 }
 0x8b1   : > { %9075 = vrcp.f32 %v3089_v50 }
 0x8b6   : > { %v9074_v45 = vpop.eup %9073 }
 0x8b7   : > { %v3096_v55 = vmul.f32 %v9074_v45, %v11266_v52  ;;  %v9076_v33 = vpop.eup %9075  ;;  %v2637_v52 = vpop.f32.mrf.mxu2 }
 0x8b8   : > { %v3097_v6 = vmul.f32 %v9076_v33, %v11249_v34 }
 0x8b9   : > { %8193 = vmatmul.msk.f32.gmra.mxu3 %vm1370_vm2, %v3096_v55  ;;  %v8921_v55 = vld [vmem:[#allocation23] ss:$0 sm:$0xff] }
 0x8bf   : > { %v2640_v30 = vpop.f32.mrf.mxu2 }
 0x8c1   : > { %8194 = vmatmul.msk.f32.gmra.mxu3 %vm1370_vm2, %v3097_v6 }
 0x8c4   : > { %v2807_v42 = vpop.f32.mrf.mxu3 }
 0x8c5   : > { %3155 = vrot.lane.b32.xlu1 %v2807_v42, %s10063_s3 }
 0x8c7   : > { %v2643_v63 = vpop.f32.mrf.mxu2 }
 0x8cc   : > { %v2810_v8 = vpop.f32.mrf.mxu3 }
 0x8cd   : > { %3157 = vrot.lane.b32.xlu1 %v2810_v8, %s10063_s3 }
 0x8d4   : > { %v2813_v34 = vpop.f32.mrf.mxu3 }
 0x8f3   : > { %v2646_v44 = vpop.f32.mrf.mxu2 }
 0x8fe   : > { %v2973_v9 = vpop.f32.mrf.mxu2 }
 0x8ff   : > { %3171 = vrot.lane.b32.xlu2 %v2973_v9, %s10060_s13  ;;  %v1356_v9 = vld [vmem:[#allocation29 + $0x18] sm:$0xff] }
 0x906   : > { %v2976_v61 = vpop.f32.mrf.mxu2 }
 0x907   : > { %3173 = vrot.lane.b32.xlu1 %v2976_v61, %s10060_s13 }
 0x90a   : > { %v2816_v15 = vpop.f32.mrf.mxu3 }
 0x90e   : > { %v2979_v21 = vpop.f32.mrf.mxu2 }
 0x90f   : > { %3159 = vrot.lane.b32.xlu1 %v2813_v34, %s10063_s3  ;;  %v8920_v34 = vld [vmem:[#allocation20] ss:$0 sm:$0xff] }
 0x910   : > { %v2387_v61 = vadd.f32 %v8920_v34, %v11294_v24  ;;  %v2393_v39 = vadd.f32 %v8920_v34, %v11303_v51 }
 0x912   : > { %v3139_v49 = vpop.f32.mrf.mxu3 }
 0x913   : > { %3187 = vrot.lane.b32.xlu0 %v3139_v49, %s10062_s1 }
 0x916   : > { %v2982_v31 = vpop.f32.mrf.mxu2 }
 0x917   : > { %3161 = vrot.lane.b32.xlu1 %v2816_v15, %s10063_s3 }
 0x91a   : > { %v3142_v60 = vpop.f32.mrf.mxu3 }
 0x91b   : > { %3175 = vrot.lane.b32.xlu0 %v2979_v21, %s10060_s13  ;;  %3189 = vrot.lane.b32.xlu2 %v3142_v60, %s10062_s1 }
 0x923   : > { %3177 = vrot.lane.b32.xlu0 %v2982_v31, %s10060_s13  ;;  %v2390_v31 = vadd.f32 %v8920_v34, %v11299_v47 }
 0x937   : > { %v3156_v37 = vpop.permute.xlu1 %3155 }
 0x938   : > { %v3199_v16 = vsel %vm1652_vm8, %v2637_v52, %v3156_v37 }
 0x93c   : > { %v3145_v12 = vpop.f32.mrf.mxu3 }
 0x93d   : > { %3191 = vrot.lane.b32.xlu2 %v3145_v12, %s10062_s1 }
 0x93f   : > { %v3158_v22 = vpop.permute.xlu1 %3157 }
 0x940   : > { %v3200_v23 = vsel %vm1652_vm8, %v2640_v30, %v3158_v22  ;;  %v1353_v30 = vld [vmem:[#allocation29] sm:$0xff] }
 0x944   : > { %v3148_v41 = vpop.f32.mrf.mxu3 }
 0x945   : > { %3193 = vrot.lane.b32.xlu2 %v3148_v41, %s10062_s1 }
 0x959   : > { %v3172_v46 = vpop.permute.xlu2 %3171 }
 0x95a   : > { %v3203_v40 = vsel %vm1370_vm2, %v3199_v16, %v3172_v46  ;;  %v3479_v16 = vld [vmem:[#allocation8 + $0x28] sm:$0xff] }
 0x95b   : > { %3513 = vmatpush.msrb.mxu0 %v3479_v16 }
 0x975   : > { %v3190_v13 = vpop.permute.xlu2 %3189 }
 0x979   : > { %v3174_v25 = vpop.permute.xlu1 %3173 }
 0x97a   : > { %v3204_v5 = vsel %vm1370_vm2, %v3200_v23, %v3174_v25 }
 0x97b   : > { %v3208_v11 = vsel %vm2349_vm9, %v3204_v5, %v3190_v13  ;;  %v2396_v13 = vadd.f32 %v8920_v34, %v11306_v57 }
 0x981   : > { %v3160_v4 = vpop.permute.xlu1 %3159 }
 0x982   : > { %v3201_v35 = vsel %vm1652_vm8, %v2643_v63, %v3160_v4  ;;  %v1354_v63 = vld [vmem:[#allocation29 + $0x8] sm:$0xff] }
 0x985   : > { %v3188_v62 = vpop.permute.xlu0 %3187 }
 0x986   : > { %v3207_v56 = vsel %vm2349_vm9, %v3203_v40, %v3188_v62 }
 0x987   : > { %8195 = vmatmul.msk.f32.vlgmr.msra.gmra.mxu1 %vm1569_vm7, %v3207_v56  ;;  %v3478_v56 = vld [vmem:[#allocation8 + $0x20] sm:$0xff] }
 0x988   : > { %3514 = vmatpush.msrb.mxu0 %v3478_v56 }
 0x989   : > { %v3162_v26 = vpop.permute.xlu1 %3161 }
 0x98a   : > { %v3202_v27 = vsel %vm1652_vm8, %v2646_v44, %v3162_v26  ;;  %v1355_v44 = vld [vmem:[#allocation29 + $0x10] sm:$0xff] }
 0x98d   : > { %v3176_v59 = vpop.permute.xlu0 %3175 }
 0x98e   : > { %v3205_v3 = vsel %vm1370_vm2, %v3201_v35, %v3176_v59 }
 0x98f   : > { %8196 = vmatmul.msk.f32.gmra.mxu1 %vm1569_vm7, %v3208_v11 }
 0x995   : > { %v3178_v38 = vpop.permute.xlu0 %3177 }
 0x996   : > { %v3206_v58 = vsel %vm1370_vm2, %v3202_v27, %v3178_v38 }
 0x997   : > { %v3192_v53 = vpop.permute.xlu2 %3191 }
 0x998   : > { %v3209_v43 = vsel %vm2349_vm9, %v3205_v3, %v3192_v53 }
 0x999   : > { %8197 = vmatmul.msk.f32.gmra.mxu1 %vm1569_vm7, %v3209_v43 }
 0x99f   : > { %v3194_v48 = vpop.permute.xlu2 %3193 }
 0x9a0   : > { %v3210_v28 = vsel %vm2349_vm9, %v3206_v58, %v3194_v48 }
 0x9a1   : > { %8198 = vmatmul.msk.f32.gmra.mxu1 %vm1569_vm7, %v3210_v28 }
 0xa04   : > { %v3243_v7 = vpop.f32.mrf.mxu1 }
 0xa05   : > { %v3244_v52 = vadd.f32 %v8921_v55, %v3243_v7 }
 0xa0c   : > { %v3246_v50 = vpop.f32.mrf.mxu1 }
 0xa0d   : > { %v3247_v8 = vadd.f32 %v8921_v55, %v3246_v50 }
 0xa16   : > { %v3249_v45 = vpop.f32.mrf.mxu1 }
 0xa17   : > { %v3250_v42 = vadd.f32 %v8921_v55, %v3249_v45 }
 0xa1e   : > { %v3252_v33 = vpop.f32.mrf.mxu1 }
 0xa1f   : > { %v3253_v6 = vadd.f32 %v8921_v55, %v3252_v33 }
 0xa21   : > { %3279 = vmatpush.msra.mxu2 %v3253_v6 }
 0xa23   : > { %3280 = vmatpush.msra.mxu2 %v3250_v42 }
 0xa25   : > { %3281 = vmatpush.msra.mxu2 %v3247_v8 }
 0xa27   : > { %3282 = vmatpush.msra.mxu2 %v3244_v52 }
 0xa28   : > { %8199 = vmatmul.msk.f32.vlgmr.msra.gmra.mxu2 %vm1370_vm2, %v1353_v30 }
 0xa30   : > { %8200 = vmatmul.msk.f32.gmra.mxu2 %vm1370_vm2, %v1354_v63 }
 0xa38   : > { %8201 = vmatmul.msk.f32.gmra.mxu2 %vm1370_vm2, %v1355_v44 }
 0xa40   : > { %8202 = vmatmul.msk.f32.gmra.mxu2 %vm1370_vm2, %v1356_v9 }
 0xaab   : > { %v3284_v15 = vpop.f32.mrf.mxu2 }
 0xaac   : > { %v11339_v49 = vadd.f32 %v3284_v15, %v2387_v61 }
 0xaae   : > { %v11342_v21 = vmul.f32 0.70710677, %v11339_v49 }
 0xab0   : > { %v3316_v60 = vand.u32 2147483647, %v11342_v21  ;;  %vm3308_vm10 = vcmp.lt.f32.partialorder %v11342_v21, 0.0 }
 0xab2   : > { %v3320_v12 = vmul.f32 0.3275911, %v3316_v60  ;;  %v3368_v37 = vsub.f32 0.0, %v3316_v60 }
 0xab3   : > { %v3287_v41 = vpop.f32.mrf.mxu2 }
 0xab4   : > { %v3324_v54 = vadd.f32 1.0, %v3320_v12  ;;  %v11346_v10 = vadd.f32 %v3287_v41, %v2390_v31  ;;  %v3372_v51 = vmul.f32 %v3368_v37, %v3316_v60  ;;  %v3300_v37 = vmul.f32 0.5, %v11339_v49 }
 0xab6   : > { %9077 = vrcp.f32 %v3324_v54  ;;  %v11349_v2 = vmul.f32 0.70710677, %v11346_v10  ;;  %v3376_v3 = vmul.f32 1.442695, %v3372_v51 }
 0xab8   : > { %v3317_v24 = vand.u32 2147483647, %v11349_v2  ;;  %vm3309_vm11 = vcmp.lt.f32.partialorder %v11349_v2, 0.0 }
 0xaba   : > { %v3321_v1 = vmul.f32 0.3275911, %v3317_v24  ;;  %v3369_v53 = vsub.f32 0.0, %v3317_v24 }
 0xabb   : > { %v3290_v36 = vpop.f32.mrf.mxu2 }
 0xabc   : > { %v9078_v47 = vpop.eup %9077  ;;  %v3325_v22 = vadd.f32 1.0, %v3321_v1  ;;  %v11353_v46 = vadd.f32 %v3290_v36, %v2393_v39  ;;  %v3373_v7 = vmul.f32 %v3369_v53, %v3317_v24  ;;  %v3312_v24 = vsel %vm3308_vm10, -1.0, %v10058_v0  ;;  %v3440_v39 = vpop.f32.mrf.mxu0 }
 0xabd   : > { %v3332_v40 = vmul.f32 1.0614054, %v9078_v47 }
 0xabe   : > { %9079 = vrcp.f32 %v3325_v22  ;;  %v11356_v62 = vmul.f32 0.70710677, %v11353_v46  ;;  %v3378_v8 = vmul.f32 1.442695, %v3373_v7  ;;  %v3301_v7 = vmul.f32 0.5, %v11346_v10 }
 0xabf   : > { %v3336_v25 = vadd.f32 -1.4531521, %v3332_v40 }
 0xac0   : > { %v3318_v23 = vand.u32 2147483647, %v11356_v62  ;;  %vm3310_vm12 = vcmp.lt.f32.partialorder %v11356_v62, 0.0 }
 0xac1   : > { %v3340_v5 = vmul.f32 %v9078_v47, %v3336_v25 }
 0xac2   : > { %v3322_v11 = vmul.f32 0.3275911, %v3318_v23  ;;  %v3370_v52 = vsub.f32 0.0, %v3318_v23 }
 0xac3   : > { %v3344_v4 = vadd.f32 1.4214138, %v3340_v5  ;;  %v3293_v59 = vpop.f32.mrf.mxu2 }
 0xac4   : > { %v9080_v35 = vpop.eup %9079  ;;  %v3326_v43 = vadd.f32 1.0, %v3322_v11  ;;  %v11360_v26 = vadd.f32 %v3293_v59, %v2396_v13  ;;  %v3374_v31 = vmul.f32 %v3370_v52, %v3318_v23  ;;  %v3441_v23 = vadd.f32 %v3440_v39, %v3422_v17 }
 0xac5   : > { %v3348_v38 = vmul.f32 %v9078_v47, %v3344_v4  ;;  %v3333_v27 = vmul.f32 1.0614054, %v9080_v35 }
 0xac6   : > { %9081 = vrcp.f32 %v3326_v43  ;;  %v11363_v58 = vmul.f32 0.70710677, %v11360_v26  ;;  %v3380_v22 = vmul.f32 1.442695, %v3374_v31  ;;  %v3303_v39 = vmul.f32 0.5, %v11360_v26  ;;  %v8230_v26 = vld [vmem:[%s13311_s11 + $0xd0] sm:$0xff] }
 0xac7   : > { %v3352_v48 = vadd.f32 -0.28449672, %v3348_v38  ;;  %v3337_v28 = vadd.f32 -1.4531521, %v3333_v27  ;;  %9083 = vpow2.f32 %v3376_v3  ;;  %v3313_v38 = vsel %vm3309_vm11, -1.0, %v10058_v0 }
 0xac8   : > { %v3319_v57 = vand.u32 2147483647, %v11363_v58  ;;  %vm3311_vm13 = vcmp.lt.f32.partialorder %v11363_v58, 0.0  ;;  %v8234_v58 = vld [vmem:[%s13311_s11 + $0xf0] sm:$0xff]  ;;  %vm7773_vm11 = vcmask 7168  }
 0xac9   : > { %v3356_v50 = vmul.f32 %v9078_v47, %v3352_v48  ;;  %v3341_v45 = vmul.f32 %v9080_v35, %v3337_v28  ;;  %3634 = vmatpush.msrb.mxu2 %v8234_v58 }
 0xaca   : > { %v3323_v55 = vmul.f32 0.3275911, %v3319_v57  ;;  %v3371_v21 = vsub.f32 0.0, %v3319_v57 }
 0xacb   : > { %v3360_v33 = vadd.f32 0.2548296, %v3356_v50  ;;  %v3345_v6 = vadd.f32 1.4214138, %v3341_v45 }
 0xacc   : > { %v9082_v42 = vpop.eup %9081  ;;  %v3327_v30 = vadd.f32 1.0, %v3323_v55  ;;  %v3375_v59 = vmul.f32 %v3371_v21, %v3319_v57 }
 0xacd   : > { %v3364_v63 = vmul.f32 %v9078_v47, %v3360_v33  ;;  %v3349_v44 = vmul.f32 %v9080_v35, %v3345_v6  ;;  %v3334_v9 = vmul.f32 1.0614054, %v9082_v42  ;;  %v9084_v34 = vpop.eup %9083 }
 0xace   : > { %9085 = vrcp.f32 %v3327_v30  ;;  %v3382_v50 = vmul.f32 1.442695, %v3375_v59  ;;  %v9415_v59 = vld [vmem:[#allocation28 + $0x10] sm:$0xff] }
 0xacf   : > { %v3384_v61 = vmul.f32 %v9084_v34, %v3364_v63  ;;  %v3353_v15 = vadd.f32 -0.28449672, %v3349_v44  ;;  %v3338_v60 = vadd.f32 -1.4531521, %v3334_v9  ;;  %9087 = vpow2.f32 %v3378_v8 }
 0xad0   : > { %9089 = vpow2.f32 %v3380_v22  ;;  %v3314_v44 = vsel %vm3310_vm12, -1.0, %v10058_v0 }
 0xad1   : > { %v3388_v12 = vsub.f32 1.0, %v3384_v61  ;;  %v3357_v41 = vmul.f32 %v9080_v35, %v3353_v15  ;;  %v3342_v54 = vmul.f32 %v9082_v42, %v3338_v60  ;;  %9091 = vpow2.f32 %v3382_v50 }
 0xad2   : > { %v3302_v61 = vmul.f32 0.5, %v11353_v46 }
 0xad3   : > { %v3392_v1 = vmul.f32 %v3388_v12, %v3312_v24  ;;  %v3361_v32 = vadd.f32 0.2548296, %v3357_v41  ;;  %v3346_v36 = vadd.f32 1.4214138, %v3342_v54  ;;  %v3315_v24 = vsel %vm3311_vm13, -1.0, %v10058_v0 }
 0xad4   : > { %v9086_v47 = vpop.eup %9085 }
 0xad5   : > { %v3396_v16 = vadd.f32 1.0, %v3392_v1  ;;  %v3365_v40 = vmul.f32 %v9080_v35, %v3361_v32  ;;  %v3350_v56 = vmul.f32 %v9082_v42, %v3346_v36  ;;  %v3335_v25 = vmul.f32 1.0614054, %v9086_v47  ;;  %v9088_v51 = vpop.eup %9087  ;;  %v8232_v36 = vld [vmem:[%s13311_s11 + $0xe0] sm:$0xff] }
 0xad6   : > { %v3443_v35 = vperm.slane %v3441_v23, 0  ;;  %3635 = vmatpush.msrb.mxu2 %v8232_v36  ;;  %v8229_v23 = vld [vmem:[%s13311_s11 + $0xc8] sm:$0xff] }
 0xad7   : > { %v11370_v5 = vmul.f32 %v3396_v16, %v3300_v37  ;;  %v3385_v13 = vmul.f32 %v9088_v51, %v3365_v40  ;;  %v3354_v11 = vadd.f32 -0.28449672, %v3350_v56  ;;  %v3339_v4 = vadd.f32 -1.4531521, %v3335_v25  ;;  %v8228_v37 = vld [vmem:[%s13311_s11 + $0xc0] sm:$0xff]  ;;  %v8226_v16 = vld [vmem:[%s13311_s11 + $0xb0] sm:$0xff] }
 0xad8   : > { %3636 = vmatpush.msrb.mxu2 %v8230_v26  ;;  %v8235_v40 = vld [vmem:[%s13311_s11 + $0xf8] sm:$0xff]  ;;  %v9413_v56 = vld [vmem:[#allocation28] sm:$0xff] }
 0xad9   : > { %v3404_v49 = vadd.f32 %v11370_v5, %v10538_v20  ;;  %v3389_v3 = vsub.f32 1.0, %v3385_v13  ;;  %v3358_v53 = vmul.f32 %v9082_v42, %v3354_v11  ;;  %v3343_v43 = vmul.f32 %v9086_v47, %v3339_v4  ;;  %v9090_v20 = vpop.eup %9089  ;;  %v8233_v25 = vld [vmem:[%s13311_s11 + $0xe8] sm:$0xff]  ;;  %v8231_v51 = vld [vmem:[%s13311_s11 + $0xd8] sm:$0xff] }
 0xada   : > { %v9092_v31 = vpop.eup %9091  ;;  %3637 = vmatpush.msrb.mxu2 %v8228_v37  ;;  %v8227_v13 = vld [vmem:[%s13311_s11 + $0xb8] sm:$0xff]  ;;  %v8225_v4 = vld [vmem:[%s13311_s11 + $0xa8] sm:$0xff] }
 0xadb   : > { %v11375_v27 = vmul.f32 0.70710677, %v3404_v49  ;;  %v3393_v48 = vmul.f32 %v3389_v3, %v3313_v38  ;;  %v3362_v2 = vadd.f32 0.2548296, %v3358_v53  ;;  %v3347_v28 = vadd.f32 1.4214138, %v3343_v43 }
 0xadc   : > { %3638 = vmatpush.msrb.mxu2 %v8226_v16  ;;  %v9414_v11 = vld [vmem:[#allocation28 + $0x8] sm:$0xff]  ;;  %v9416_v49 = vld [vmem:[#allocation28 + $0x18] sm:$0xff]  ;;  %v8922_v38 = vld [vmem:[#allocation10 + $0x1] ss:$0 sm:$0xff] }
 0xadd   : > { %v3444_v45 = vadd.f32 %v3443_v35, %v11375_v27  ;;  %v3397_v57 = vadd.f32 1.0, %v3393_v48  ;;  %v3366_v55 = vmul.f32 %v9082_v42, %v3362_v2  ;;  %v3351_v33 = vmul.f32 %v9086_v47, %v3347_v28  ;;  %v8222_v3 = vld [vmem:[%s13311_s11 + $0x90] sm:$0xff]  ;;  %v8223_v53 = vld [vmem:[%s13311_s11 + $0x98] sm:$0xff]  ;;  %v8220_v43 = vld [vmem:[%s13311_s11 + $0x80] sm:$0xff] }
 0xadf   : > { %v11379_v6 = vmul.f32 %v3397_v57, %v3301_v7  ;;  %v3386_v8 = vmul.f32 %v9090_v20, %v3366_v55  ;;  %v3355_v52 = vadd.f32 -0.28449672, %v3351_v33  ;;  %8212 = vmatmul.msk.f32.vlgmr.msrb.gmra.mxu0 %vm1370_vm2, %v3444_v45 }
 0xae1   : > { %v3405_v30 = vadd.f32 %v11379_v6, %v10535_v19  ;;  %v3390_v10 = vsub.f32 1.0, %v3386_v8  ;;  %v3359_v63 = vmul.f32 %v9086_v47, %v3355_v52  ;;  %v3532_v52 = vld [vmem:[#allocation11 + $0x38] sm:$0xff] }
 0xae2   : > { %3562 = vmatpush.msrb.mxu1 %v3532_v52 }
 0xae3   : > { %v11386_v9 = vmul.f32 0.70710677, %v3405_v30  ;;  %v3394_v42 = vmul.f32 %v3390_v10, %v3314_v44  ;;  %v3363_v34 = vadd.f32 0.2548296, %v3359_v63  ;;  %v3531_v30 = vld [vmem:[#allocation11 + $0x30] sm:$0xff]  ;;  %v3530_v10 = vld [vmem:[#allocation11 + $0x28] sm:$0xff] }
 0xae4   : > { %3563 = vmatpush.msrb.mxu1 %v3531_v30  ;;  %v3529_v44 = vld [vmem:[#allocation11 + $0x20] sm:$0xff] }
 0xae5   : > { %v3398_v15 = vadd.f32 1.0, %v3394_v42  ;;  %v3367_v62 = vmul.f32 %v9086_v47, %v3363_v34  ;;  %v3445_v60 = vadd.f32 %v3443_v35, %v11386_v9  ;;  %v11564_v30 = vld [vmem:[%s13263_s26 + $0x8] sm:$0xff] }
 0xae6   : > { %3564 = vmatpush.msrb.mxu1 %v3530_v10 }
 0xae7   : > { %v11390_v12 = vmul.f32 %v3398_v15, %v3302_v61  ;;  %v3387_v19 = vmul.f32 %v9092_v31, %v3367_v62  ;;  %8213 = vmatmul.msk.f32.gmra.mxu0 %vm1370_vm2, %v3445_v60  ;;  %v3597_v61 = vld [vmem:[#allocation14 + $0x2] sm:$0x3] }
 0xae8   : > { %3565 = vmatpush.msrb.mxu1 %v3529_v44  ;;  %v3611_v15 = vperm.slane %v3597_v61, 1  ;;  %v3610_v62 = vperm.slane %v3597_v61, 0 }
 0xae9   : > { %v3406_v41 = vadd.f32 %v11390_v12, %v10532_v18  ;;  %v3391_v54 = vsub.f32 1.0, %v3387_v19 }
 0xaeb   : > { %v11397_v17 = vmul.f32 0.70710677, %v3406_v41  ;;  %v3395_v46 = vmul.f32 %v3391_v54, %v3315_v24 }
 0xaed   : > { %v3399_v1 = vadd.f32 1.0, %v3395_v46  ;;  %v3446_v32 = vadd.f32 %v3443_v35, %v11397_v17 }
 0xaef   : > { %v11407_v18 = vmul.f32 %v3399_v1, %v3303_v39  ;;  %8214 = vmatmul.msk.f32.gmra.mxu0 %vm1370_vm2, %v3446_v32 }
 0xaf1   : > { %v3407_v47 = vadd.f32 %v11407_v18, %v10529_v14  ;;  %v8224_v14 = vld [vmem:[%s13311_s11 + $0xa0] sm:$0xff] }
 0xaf2   : > { %3639 = vmatpush.msrb.mxu2 %v8224_v14 }
 0xaf3   : > { %v11418_v22 = vmul.f32 0.70710677, %v3407_v47 }
 0xaf4   : > { %3640 = vmatpush.msrb.mxu2 %v8222_v3 }
 0xaf5   : > { %v3447_v21 = vadd.f32 %v3443_v35, %v11418_v22  ;;  %v8221_v35 = vld [vmem:[%s13311_s11 + $0x88] sm:$0xff] }
 0xaf6   : > { %3641 = vmatpush.msrb.mxu2 %v8220_v43 }
 0xaf7   : > { %3460 = vmatpush.msrb.mxu3 %v3447_v21  ;;  %8215 = vmatmul.msk.f32.gmra.mxu0 %vm1370_vm2, %v3447_v21 }
 0xaf9   : > { %3461 = vmatpush.msrb.mxu3 %v3446_v32 }
 0xafb   : > { %3462 = vmatpush.msrb.mxu3 %v3445_v60 }
 0xafd   : > { %3463 = vmatpush.msrb.mxu3 %v3444_v45 }
 0xafe   : > { %8208 = vmatmul.msk.f32.vlgmr.msrb.gmra.mxu3 %vm1370_vm2, %v9413_v56 }
 0xaff   : > { %3663 = vmatpush.msra.mxu3 %v8235_v40 }
 0xb01   : > { %3664 = vmatpush.msra.mxu3 %v8233_v25 }
 0xb03   : > { %3665 = vmatpush.msra.mxu3 %v8231_v51 }
 0xb05   : > { %3666 = vmatpush.msra.mxu3 %v8229_v23 }
 0xb06   : > { %8209 = vmatmul.msk.f32.gmra.mxu3 %vm1370_vm2, %v9414_v11 }
 0xb07   : > { %3667 = vmatpush.msra.mxu3 %v8227_v13 }
 0xb09   : > { %3668 = vmatpush.msra.mxu3 %v8225_v4 }
 0xb0b   : > { %3669 = vmatpush.msra.mxu3 %v8223_v53 }
 0xb0d   : > { %3670 = vmatpush.msra.mxu3 %v8221_v35 }
 0xb0e   : > { %8210 = vmatmul.msk.f32.gmra.mxu3 %vm1370_vm2, %v9415_v59 }
 0xb16   : > { %8211 = vmatmul.msk.f32.gmra.mxu3 %vm1370_vm2, %v9416_v49 }
 0xb5c   : > { %v3516_v48 = vpop.f32.mrf.mxu0 }
 0xb5d   : > { %v3517_v2 = vadd.f32 %v8922_v38, %v3516_v48 }
 0xb5f   : > { %8236 = vmatmul.msk.f32.vlgmr.msrb.gmra.mxu2 %vm1569_vm7, %v3517_v2  ;;  %8240 = vmatmul.msk.f32.vlgmr.msra.gmra.mxu3 %vm1569_vm7, %v3517_v2 }
 0xb64   : > { %v3519_v28 = vpop.f32.mrf.mxu0 }
 0xb65   : > { %v3520_v7 = vadd.f32 %v8922_v38, %v3519_v28 }
 0xb67   : > { %8237 = vmatmul.msk.f32.gmra.mxu2 %vm1569_vm7, %v3520_v7  ;;  %8241 = vmatmul.msk.f32.gmra.mxu3 %vm1569_vm7, %v3520_v7 }
 0xb6c   : > { %v3522_v50 = vpop.f32.mrf.mxu0 }
 0xb6d   : > { %v3523_v45 = vadd.f32 %v8922_v38, %v3522_v50 }
 0xb6f   : > { %8238 = vmatmul.msk.f32.gmra.mxu2 %vm1569_vm7, %v3523_v45  ;;  %8242 = vmatmul.msk.f32.gmra.mxu3 %vm1569_vm7, %v3523_v45 }
 0xb74   : > { %v3525_v57 = vpop.f32.mrf.mxu0 }
 0xb75   : > { %v3526_v55 = vadd.f32 %v8922_v38, %v3525_v57 }
 0xb77   : > { %8239 = vmatmul.msk.f32.gmra.mxu2 %vm1569_vm7, %v3526_v55  ;;  %8243 = vmatmul.msk.f32.gmra.mxu3 %vm1569_vm7, %v3526_v55  ;;  %v11557_v55 = vld [vmem:[%s13263_s26] sm:$0xff] }
 0xb81   : > { %v3465_v33 = vpop.f32.mrf.mxu3 }
 0xb82   : > { %8216 = vmatmul.msk.f32.vlgmr.msrb.gmra.mxu1 %vm1370_vm2, %v3465_v33 }
 0xb89   : > { %v3468_v20 = vpop.f32.mrf.mxu3 }
 0xb8a   : > { %8217 = vmatmul.msk.f32.gmra.mxu1 %vm1370_vm2, %v3468_v20 }
 0xb91   : > { %v3471_v8 = vpop.f32.mrf.mxu3 }
 0xb92   : > { %8218 = vmatmul.msk.f32.gmra.mxu1 %vm1370_vm2, %v3471_v8 }
 0xb99   : > { %v3474_v63 = vpop.f32.mrf.mxu3 }
 0xb9a   : > { %8219 = vmatmul.msk.f32.gmra.mxu1 %vm1370_vm2, %v3474_v63 }
 0xbe2   : > { %v3643_v42 = vpop.f32.mrf.mxu2  ;;  %v3672_v34 = vpop.f32.mrf.mxu3 }
 0xbe3   : > { %v3673_v19 = vadd.f32 %v3672_v34, %v3611_v15  ;;  %v3644_v36 = vadd.f32 %v3643_v42, %v3610_v62  ;;  %v11571_v34 = vld [vmem:[%s13263_s26 + $0x10] sm:$0xff] }
 0xbea   : > { %v3646_v60 = vpop.f32.mrf.mxu2  ;;  %v3675_v31 = vpop.f32.mrf.mxu3 }
 0xbeb   : > { %v11472_v41 = vadd.f32 %v3646_v60, %v3610_v62  ;;  %v3676_v54 = vadd.f32 %v3675_v31, %v3611_v15  ;;  %v11578_v31 = vld [vmem:[%s13263_s26 + $0x18] sm:$0xff] }
 0xbed   : > { %3690 = vrot.lane.b32.xlu2 %v11472_v41, %s10059_s12  ;;  %v11477_v24 = vpack.i.bf16 %v3673_v19, %v3676_v54 }
 0xbf2   : > { %v3649_v46 = vpop.f32.mrf.mxu2  ;;  %v3678_v39 = vpop.f32.mrf.mxu3 }
 0xbf3   : > { %v11479_v1 = vadd.f32 %v3649_v46, %v3610_v62  ;;  %v3679_v26 = vadd.f32 %v3678_v39, %v3611_v15 }
 0xbf5   : > { %3692 = vrot.lane.b32.xlu0 %v11479_v1, %s10059_s12  ;;  %4016 = vrot.lane.b32.xlu2 %v11479_v1, %s10060_s13 }
 0xbfa   : > { %v3652_v32 = vpop.f32.mrf.mxu2  ;;  %v3681_v58 = vpop.f32.mrf.mxu3 }
 0xbfb   : > { %v11486_v47 = vadd.f32 %v3652_v32, %v3610_v62  ;;  %v3682_v37 = vadd.f32 %v3681_v58, %v3611_v15 }
 0xbfd   : > { %4004 = vrot.lane.b32.xlu2 %v3644_v36, %s10061_s30  ;;  %4018 = vrot.lane.b32.xlu0 %v11486_v47, %s10060_s13  ;;  %v11491_v21 = vpack.i.bf16 %v3679_v26, %v3682_v37 }
 0xbfe   : > { %3694 = vrot.lane.b32.xlu1 %v11486_v47, %s10059_s12  ;;  %3817 = vmatpush.msra.mxu1 %v3682_v37 }
 0xc00   : > { %3818 = vmatpush.msra.mxu1 %v3679_v26 }
 0xc02   : > { %3819 = vmatpush.msra.mxu1 %v3676_v54 }
 0xc04   : > { %3820 = vmatpush.msra.mxu1 %v3673_v19 }
 0xc05   : > { %4010 = vrot.lane.b32.xlu2 %v11486_v47, %s10061_s30  ;;  %4012 = vrot.lane.b32.xlu0 %v3644_v36, %s10060_s13 }
 0xc06   : > { %3688 = vrot.lane.b32.xlu1 %v3644_v36, %s10059_s12 }
 0xc0d   : > { %3842 = vrot.lane.b32.xlu2 %v3644_v36, %s10062_s1  ;;  %4008 = vrot.lane.b32.xlu0 %v11479_v1, %s10061_s30 }
 0xc0e   : > { %4014 = vrot.lane.b32.xlu1 %v11472_v41, %s10060_s13 }
 0xc15   : > { %3838 = vrot.lane.b32.xlu2 %v11479_v1, %s10064_s5  ;;  %3844 = vrot.lane.b32.xlu0 %v11472_v41, %s10062_s1 }
 0xc16   : > { %4006 = vrot.lane.b32.xlu1 %v11472_v41, %s10061_s30 }
 0xc1d   : > { %3848 = vrot.lane.b32.xlu2 %v11486_v47, %s10062_s1  ;;  %3834 = vrot.lane.b32.xlu0 %v3644_v36, %s10064_s5 }
 0xc1e   : > { %3846 = vrot.lane.b32.xlu1 %v11479_v1, %s10062_s1 }
 0xc25   : > { %4184 = vrot.lane.b32.xlu2 %v11486_v47, %s10063_s3  ;;  %3836 = vrot.lane.b32.xlu0 %v11472_v41, %s10064_s5 }
 0xc26   : > { %4182 = vrot.lane.b32.xlu1 %v11479_v1, %s10063_s3 }
 0xc2d   : > { %4178 = vrot.lane.b32.xlu2 %v3644_v36, %s10063_s3  ;;  %3840 = vrot.lane.b32.xlu0 %v11486_v47, %s10064_s5 }
 0xc35   : > { %4170 = vrot.lane.b32.xlu2 %v3644_v36, %s10065_s23 }
 0xc47   : > { %v3691_v16 = vpop.permute.xlu2 %3690 }
 0xc4f   : > { %v4017_v14 = vpop.permute.xlu2 %4016 }
 0xc57   : > { %v4005_v40 = vpop.permute.xlu2 %4004 }
 0xc5f   : > { %v4011_v56 = vpop.permute.xlu2 %4010 }
 0xc67   : > { %v3693_v25 = vpop.permute.xlu0 %3692  ;;  %v3843_v51 = vpop.permute.xlu2 %3842 }
 0xc6f   : > { %v3839_v23 = vpop.permute.xlu2 %3838  ;;  %v4019_v11 = vpop.permute.xlu0 %4018 }
 0xc70   : > { %v3695_v13 = vpop.permute.xlu1 %3694 }
 0xc71   : > { %8244 = vmatpush.xpose.msk.msra.mxu0 %vm1652_vm8, %v3695_v13 }
 0xc75   : > { %8245 = vmatpush.xpose.msk.msra.mxu0 %vm1652_vm8, %v3693_v25 }
 0xc77   : > { %v3849_v4 = vpop.permute.xlu2 %3848  ;;  %v4013_v49 = vpop.permute.xlu0 %4012 }
 0xc78   : > { %v3689_v59 = vpop.permute.xlu1 %3688  ;;  %8256 = vmatpush.xpose.msk.msra.mxu2 %vm1652_vm8, %v3849_v4 }
 0xc79   : > { %8246 = vmatpush.xpose.msk.msra.mxu0 %vm1652_vm8, %v3691_v16 }
 0xc7d   : > { %8247 = vmatpush.xpose.msk.msra.mxu0 %vm1652_vm8, %v3689_v59 }
 0xc7f   : > { %v4009_v53 = vpop.permute.xlu0 %4008  ;;  %v4185_v48 = vpop.permute.xlu2 %4184 }
 0xc80   : > { %8248 = vmatmul.msk.f32.vlgmr.msra.gmra.mxu0 %vm1652_vm8, %v3644_v36  ;;  %v4015_v3 = vpop.permute.xlu1 %4014 }
 0xc81   : > { %8268 = vmatpush.xpose.msk.msrb.mxu0 %vm1652_vm8, %v4019_v11 }
 0xc85   : > { %8269 = vmatpush.xpose.msk.msrb.mxu0 %vm1652_vm8, %v4017_v14 }
 0xc87   : > { %v3845_v35 = vpop.permute.xlu0 %3844  ;;  %v4179_v4 = vpop.permute.xlu2 %4178 }
 0xc88   : > { %8249 = vmatmul.msk.f32.gmra.mxu0 %vm1652_vm8, %v11472_v41  ;;  %v4007_v43 = vpop.permute.xlu1 %4006 }
 0xc89   : > { %8270 = vmatpush.xpose.msk.msrb.mxu0 %vm1652_vm8, %v4015_v3 }
 0xc8d   : > { %8271 = vmatpush.xpose.msk.msrb.mxu0 %vm1652_vm8, %v4013_v49 }
 0xc8f   : > { %v3835_v2 = vpop.permute.xlu0 %3834 }
 0xc90   : > { %8250 = vmatmul.msk.f32.gmra.mxu0 %vm1652_vm8, %v11479_v1  ;;  %v3847_v38 = vpop.permute.xlu1 %3846 }
 0xc91   : > { %8257 = vmatpush.xpose.msk.msra.mxu2 %vm1652_vm8, %v3847_v38 }
 0xc95   : > { %8258 = vmatpush.xpose.msk.msra.mxu2 %vm1652_vm8, %v3845_v35 }
 0xc97   : > { %v3837_v7 = vpop.permute.xlu0 %3836 }
 0xc98   : > { %8251 = vmatmul.msk.f32.gmra.mxu0 %vm1652_vm8, %v11486_v47  ;;  %v4183_v28 = vpop.permute.xlu1 %4182 }
 0xc99   : > { %8259 = vmatpush.xpose.msk.msra.mxu2 %vm1652_vm8, %v3843_v51 }
 0xc9c   : > { %8260 = vmatmul.msk.f32.vlgmr.msra.gmra.mxu2 %vm1652_vm8, %v3835_v2 }
 0xc9d   : > { %8280 = vmatpush.xpose.msk.msrb.mxu2 %vm1652_vm8, %v4185_v48 }
 0xc9f   : > { %v3841_v50 = vpop.permute.xlu0 %3840 }
 0xca0   : > { %8272 = vmatmul.msk.f32.vlgmr.msrb.gmra.mxu0 %vm1652_vm8, %v4005_v40 }
 0xca1   : > { %8281 = vmatpush.xpose.msk.msrb.mxu2 %vm1652_vm8, %v4183_v28 }
 0xca4   : > { %8261 = vmatmul.msk.f32.gmra.mxu2 %vm1652_vm8, %v3837_v7 }
 0xca8   : > { %8273 = vmatmul.msk.f32.gmra.mxu0 %vm1652_vm8, %v4007_v43 }
 0xcac   : > { %8262 = vmatmul.msk.f32.gmra.mxu2 %vm1652_vm8, %v3839_v23 }
 0xcb0   : > { %8274 = vmatmul.msk.f32.gmra.mxu0 %vm1652_vm8, %v4009_v53 }
 0xcb4   : > { %8263 = vmatmul.msk.f32.gmra.mxu2 %vm1652_vm8, %v3841_v50 }
 0xcb8   : > { %8275 = vmatmul.msk.f32.gmra.mxu0 %vm1652_vm8, %v4011_v56 }
 0xcfd   : > { %v3729_v45 = vpop.f32.mrf.mxu0 }
 0xcfe   : > { %v3741_v57 = vmul.f32 0.25, %v3729_v45 }
 0xd00   : > { %v3745_v33 = vadd.f32 %v11557_v55, %v3741_v57 }
 0xd02   : > { %v3749_v20 = vsel %vm1370_vm2, %v3745_v33, -inf }
 0xd03   : > { %3750 = vmax.xlane.f32.xlu1 %v3749_v20 }
 0xd05   : > { %v3732_v8 = vpop.f32.mrf.mxu0 }
 0xd06   : > { %v3742_v52 = vmul.f32 0.25, %v3732_v8 }
 0xd08   : > { %v3746_v10 = vadd.f32 %v11564_v30, %v3742_v52 }
 0xd0a   : > { %v3752_v63 = vsel %vm1370_vm2, %v3746_v10, -inf }
 0xd0b   : > { %3753 = vmax.xlane.f32.xlu0 %v3752_v63 }
 0xd0d   : > { %v3735_v44 = vpop.f32.mrf.mxu0 }
 0xd0e   : > { %v3743_v42 = vmul.f32 0.25, %v3735_v44 }
 0xd10   : > { %v3747_v61 = vadd.f32 %v11571_v34, %v3743_v42 }
 0xd12   : > { %v3755_v15 = vsel %vm1370_vm2, %v3747_v61, -inf }
 0xd13   : > { %3756 = vmax.xlane.f32.xlu2 %v3755_v15 }
 0xd15   : > { %v3738_v62 = vpop.f32.mrf.mxu0 }
 0xd16   : > { %v3744_v60 = vmul.f32 0.25, %v3738_v62 }
 0xd18   : > { %v3748_v19 = vadd.f32 %v11578_v31, %v3744_v60 }
 0xd1a   : > { %v3758_v54 = vsel %vm1370_vm2, %v3748_v19, -inf }
 0xd1b   : > { %3759 = vmax.xlane.f32.xlu2 %v3758_v54 }
 0xd1c   : > { %4180 = vrot.lane.b32.xlu1 %v11472_v41, %s10063_s3 }
 0xd1d   : > { %v4053_v46 = vpop.f32.mrf.mxu0 }
 0xd1e   : > { %v4065_v40 = vmul.f32 0.25, %v4053_v46 }
 0xd1f   : > { %v3883_v15 = vpop.f32.mrf.mxu2 }
 0xd20   : > { %v4069_v56 = vadd.f32 %v11557_v55, %v4065_v40 }
 0xd22   : > { %v4073_v23 = vsel %vm1370_vm2, %v4069_v56, -inf }
 0xd25   : > { %v4056_v39 = vpop.f32.mrf.mxu0 }
 0xd26   : > { %v4066_v32 = vmul.f32 0.25, %v4056_v39 }
 0xd28   : > { %v11585_v58 = vadd.f32 %v11564_v30, %v4066_v32 }
 0xd2a   : > { %v4076_v36 = vsel %vm1370_vm2, %v11585_v58, -inf }
 0xd2b   : > { %4077 = vmax.xlane.f32.xlu0 %v4076_v36  ;;  %v3886_v36 = vpop.f32.mrf.mxu2 }
 0xd2d   : > { %v4059_v26 = vpop.f32.mrf.mxu0 }
 0xd2e   : > { %v4067_v37 = vmul.f32 0.25, %v4059_v26 }
 0xd30   : > { %v11590_v16 = vadd.f32 %v11571_v34, %v4067_v37 }
 0xd32   : > { %v4079_v14 = vsel %vm1370_vm2, %v11590_v16, -inf }
 0xd33   : > { %4080 = vmax.xlane.f32.xlu2 %v4079_v14  ;;  %v3895_v14 = vmul.f32 0.25, %v3883_v15 }
 0xd35   : > { %v4062_v25 = vpop.f32.mrf.mxu0 }
 0xd36   : > { %v4068_v51 = vmul.f32 0.25, %v4062_v25  ;;  %v11640_v25 = vadd.f32 %v11557_v55, %v3895_v14 }
 0xd38   : > { %v4072_v13 = vadd.f32 %v11578_v31, %v4068_v51  ;;  %v3889_v51 = vpop.f32.mrf.mxu2 }
 0xd3a   : > { %v4082_v11 = vsel %vm1370_vm2, %v4072_v13, -inf }
 0xd3f   : > { %4174 = vrot.lane.b32.xlu0 %v11479_v1, %s10065_s23  ;;  %v4171_v1 = vpop.permute.xlu2 %4170 }
 0xd46   : > { %4074 = vmax.xlane.f32.xlu1 %v4073_v23 }
 0xd4e   : > { %4083 = vmax.xlane.f32.xlu1 %v4082_v11  ;;  %v3896_v11 = vmul.f32 0.25, %v3886_v36 }
 0xd67   : > { %4172 = vrot.lane.b32.xlu1 %v11472_v41, %s10065_s23 }
 0xd76   : > { %v3751_v59 = vpop.xlane.xlu1 %3750 }
 0xd77   : > { %v3761_v49 = vsub.f32 %v3745_v33, %v3751_v59 }
 0xd79   : > { %v3765_v3 = vmul.f32 1.442695, %v3761_v49 }
 0xd7b   : > { %9093 = vpow2.f32 %v3765_v3  ;;  %v3897_v3 = vmul.f32 0.25, %v3889_v51 }
 0xd7e   : > { %v3754_v53 = vpop.xlane.xlu0 %3753 }
 0xd7f   : > { %v3762_v43 = vsub.f32 %v3746_v10, %v3754_v53 }
 0xd81   : > { %v11602_v35 = vpop.eup %9093  ;;  %v3767_v38 = vmul.f32 1.442695, %v3762_v43 }
 0xd82   : > { %v3773_v48 = vsel %vm1370_vm2, %v11602_v35, 0.0 }
 0xd83   : > { %9095 = vpow2.f32 %v3767_v38  ;;  %3774 = vadd.xlane.f32.xlu0 %v3773_v48 }
 0xd86   : > { %v3757_v2 = vpop.xlane.xlu2 %3756 }
 0xd87   : > { %v3763_v28 = vsub.f32 %v3747_v61, %v3757_v2  ;;  %v11657_v2 = vadd.f32 %v11571_v34, %v3897_v3 }
 0xd89   : > { %v11606_v7 = vpop.eup %9095  ;;  %v3769_v41 = vmul.f32 1.442695, %v3763_v28 }
 0xd8a   : > { %v3776_v50 = vsel %vm1370_vm2, %v11606_v7, 0.0 }
 0xd8b   : > { %9097 = vpow2.f32 %v3769_v41  ;;  %3777 = vadd.xlane.f32.xlu0 %v3776_v50  ;;  %v3909_v41 = vsel %vm1370_vm2, %v11657_v2, -inf  ;;  %v4456_v50 = vld [vmem:[#allocation16 + $0xf8] sm:$0xff] }
 0xd8e   : > { %v3760_v45 = vpop.xlane.xlu2 %3759  ;;  %v4181_v57 = vpop.permute.xlu1 %4180 }
 0xd8f   : > { %v3764_v33 = vsub.f32 %v3748_v19, %v3760_v45  ;;  %8282 = vmatpush.xpose.msk.msrb.mxu2 %vm1652_vm8, %v4181_v57  ;;  %v4454_v57 = vld [vmem:[#allocation16 + $0xe8] sm:$0xff] }
 0xd91   : > { %v11611_v20 = vpop.eup %9097  ;;  %v3771_v8 = vmul.f32 1.442695, %v3764_v33  ;;  %v4452_v33 = vld [vmem:[#allocation16 + $0xd8] sm:$0xff] }
 0xd92   : > { %v3779_v52 = vsel %vm1370_vm2, %v11611_v20, 0.0 }
 0xd93   : > { %9099 = vpow2.f32 %v3771_v8  ;;  %3780 = vadd.xlane.f32.xlu2 %v3779_v52  ;;  %8283 = vmatpush.xpose.msk.msrb.mxu2 %vm1652_vm8, %v4179_v4  ;;  %v3903_v4 = vsel %vm1370_vm2, %v11640_v25, -inf  ;;  %v4450_v8 = vld [vmem:[#allocation16 + $0xc8] sm:$0xff]  ;;  %v4448_v52 = vld [vmem:[#allocation16 + $0xb8] sm:$0xff] }
 0xd96   : > { %8284 = vmatmul.msk.f32.vlgmr.msrb.gmra.mxu2 %vm1652_vm8, %v4171_v1  ;;  %v3892_v1 = vpop.f32.mrf.mxu2 }
 0xd97   : > { %v3898_v43 = vmul.f32 0.25, %v3892_v1  ;;  %4524 = vmatpush.msra.mxu2 %v4456_v50 }
 0xd99   : > { %v11617_v10 = vpop.eup %9099  ;;  %v11661_v28 = vadd.f32 %v11578_v31, %v3898_v43  ;;  %4525 = vmatpush.msra.mxu2 %v4454_v57 }
 0xd9a   : > { %v3782_v63 = vsel %vm1370_vm2, %v11617_v10, 0.0 }
 0xd9b   : > { %3783 = vadd.xlane.f32.xlu0 %v3782_v63  ;;  %v3912_v45 = vsel %vm1370_vm2, %v11661_v28, -inf  ;;  %4526 = vmatpush.msra.mxu2 %v4452_v33  ;;  %v4446_v63 = vld [vmem:[#allocation16 + $0xa8] sm:$0xff] }
 0xd9d   : > { %4527 = vmatpush.msra.mxu2 %v4450_v8  ;;  %v4455_v8 = vld [vmem:[#allocation16 + $0xf0] sm:$0xff] }
 0xd9e   : > { %v4078_v37 = vpop.xlane.xlu0 %4077 }
 0xd9f   : > { %4528 = vmatpush.msra.mxu2 %v4448_v52  ;;  %v4453_v52 = vld [vmem:[#allocation16 + $0xe0] sm:$0xff] }
 0xda1   : > { %4529 = vmatpush.msra.mxu2 %v4446_v63 }
 0xda6   : > { %v4081_v62 = vpop.xlane.xlu2 %4080 }
 0xda7   : > { %v4087_v19 = vsub.f32 %v11590_v16, %v4081_v62  ;;  %v4086_v16 = vsub.f32 %v11585_v58, %v4078_v37  ;;  %v11647_v58 = vadd.f32 %v11564_v30, %v3896_v11 }
 0xda9   : > { %v4093_v32 = vmul.f32 1.442695, %v4087_v19  ;;  %v4091_v23 = vmul.f32 1.442695, %v4086_v16  ;;  %v3906_v53 = vsel %vm1370_vm2, %v11647_v58, -inf }
 0xdab   : > { %4176 = vrot.lane.b32.xlu2 %v11486_v47, %s10065_s23 }
 0xdaf   : > { %8798 = vrot.lane.b32.xlu0 %v11491_v21, %s10061_s30 }
 0xdb1   : > { %v4175_v48 = vpop.permute.xlu0 %4174 }
 0xdb7   : > { %8803 = vrot.lane.b32.xlu0 %v11477_v24, %s10061_s30 }
 0xdb9   : > { %v4075_v44 = vpop.xlane.xlu1 %4074 }
 0xdba   : > { %v4085_v42 = vsub.f32 %v4069_v56, %v4075_v44  ;;  %v4444_v44 = vld [vmem:[#allocation16 + $0x98] sm:$0xff] }
 0xdbb   : > { %4530 = vmatpush.msra.mxu2 %v4444_v44 }
 0xdbc   : > { %v4089_v61 = vmul.f32 1.442695, %v4085_v42  ;;  %v4442_v42 = vld [vmem:[#allocation16 + $0x88] sm:$0xff] }
 0xdbd   : > { %4531 = vmatpush.msra.mxu2 %v4442_v42  ;;  %v4451_v42 = vld [vmem:[#allocation16 + $0xd0] sm:$0xff] }
 0xdbe   : > { %9101 = vpow2.f32 %v4089_v61 }
 0xdc1   : > { %v4084_v60 = vpop.xlane.xlu1 %4083 }
 0xdc2   : > { %v4088_v54 = vsub.f32 %v4072_v13, %v4084_v60 }
 0xdc4   : > { %v11628_v46 = vpop.eup %9101  ;;  %v4095_v39 = vmul.f32 1.442695, %v4088_v54 }
 0xdc5   : > { %v4097_v47 = vsel %vm1370_vm2, %v11628_v46, 0.0 }
 0xdc6   : > { %9103 = vpow2.f32 %v4095_v39  ;;  %4098 = vadd.xlane.f32.xlu1 %v4097_v47  ;;  %v3567_v47 = vpop.f32.mrf.mxu1 }
 0xdc7   : > { %9105 = vpow2.f32 %v4093_v32 }
 0xdc8   : > { %9107 = vpow2.f32 %v4091_v23 }
 0xdcc   : > { %v11632_v26 = vpop.eup %9103 }
 0xdcd   : > { %v4106_v40 = vsel %vm1370_vm2, %v11632_v26, 0.0  ;;  %v11637_v56 = vpop.eup %9105 }
 0xdce   : > { %4107 = vadd.xlane.f32.xlu1 %v4106_v40  ;;  %v4103_v13 = vsel %vm1370_vm2, %v11637_v56, 0.0  ;;  %v11650_v49 = vpop.eup %9107  ;;  %v3570_v16 = vpop.f32.mrf.mxu1 }
 0xdcf   : > { %v4100_v38 = vsel %vm1370_vm2, %v11650_v49, 0.0 }
 0xdd4   : > { %4104 = vadd.xlane.f32.xlu2 %v4103_v13 }
 0xdd6   : > { %3904 = vmax.xlane.f32.xlu1 %v3903_v4 }
 0xdd9   : > { %v4173_v59 = vpop.permute.xlu1 %4172 }
 0xdda   : > { %8285 = vmatmul.msk.f32.gmra.mxu2 %vm1652_vm8, %v4173_v59  ;;  %v3573_v59 = vpop.f32.mrf.mxu1 }
 0xdde   : > { %3907 = vmax.xlane.f32.xlu1 %v3906_v53 }
 0xde1   : > { %4101 = vadd.xlane.f32.xlu0 %v4100_v38 }
 0xde2   : > { %8286 = vmatmul.msk.f32.gmra.mxu2 %vm1652_vm8, %v4175_v48 }
 0xde6   : > { %3910 = vmax.xlane.f32.xlu1 %v3909_v41 }
 0xde9   : > { %3913 = vmax.xlane.f32.xlu0 %v3912_v45 }
 0xdf6   : > { %v3775_v61 = vpop.xlane.xlu0 %3774 }
 0xdf7   : > { %9109 = vrcp.f32 %v3775_v61  ;;  %v4449_v61 = vld [vmem:[#allocation16 + $0xc0] sm:$0xff] }
 0xdfd   : > { %v9110_v15 = vpop.eup %9109 }
 0xdfe   : > { %v3789_v62 = vmul.f32 %v9110_v15, %v11602_v35  ;;  %v3778_v60 = vpop.xlane.xlu0 %3777  ;;  %v8923_v35 = vld [vmem:[#allocation13 + $0x1] ss:$0 sm:$0xff] }
 0xdff   : > { %9111 = vrcp.f32 %v3778_v60  ;;  %v11674_v40 = vadd.f32 %v8923_v35, %v3567_v47  ;;  %v11689_v1 = vadd.f32 %v8923_v35, %v3573_v59  ;;  %v4445_v60 = vld [vmem:[#allocation16 + $0xa0] sm:$0xff] }
 0xe00   : > { %8252 = vmatmul.msk.f32.vlgmr.msra.gmra.mxu1 %vm1370_vm2, %v3789_v62  ;;  %v4447_v62 = vld [vmem:[#allocation16 + $0xb0] sm:$0xff] }
 0xe05   : > { %v9112_v19 = vpop.eup %9111 }
 0xe06   : > { %v3781_v54 = vpop.xlane.xlu2 %3780  ;;  %v3790_v39 = vmul.f32 %v9112_v19, %v11606_v7  ;;  %v4441_v19 = vld [vmem:[#allocation16 + $0x80] sm:$0xff] }
 0xe07   : > { %9113 = vrcp.f32 %v3781_v54 }
 0xe08   : > { %8253 = vmatmul.msk.f32.gmra.mxu1 %vm1370_vm2, %v3790_v39 }
 0xe0d   : > { %v9114_v32 = vpop.eup %9113 }
 0xe0e   : > { %v4177_v36 = vpop.permute.xlu2 %4176  ;;  %v3784_v37 = vpop.xlane.xlu0 %3783  ;;  %v3791_v14 = vmul.f32 %v9114_v32, %v11611_v20  ;;  %v11680_v20 = vadd.f32 %v8923_v35, %v3570_v16 }
 0xe0f   : > { %9115 = vrcp.f32 %v3784_v37  ;;  %8287 = vmatmul.msk.f32.gmra.mxu2 %vm1652_vm8, %v4177_v36 }
 0xe10   : > { %8254 = vmatmul.msk.f32.gmra.mxu1 %vm1370_vm2, %v3791_v14 }
 0xe15   : > { %v9116_v51 = vpop.eup %9115 }
 0xe16   : > { %v3792_v7 = vmul.f32 %v9116_v51, %v11617_v10 }
 0xe17   : > { %8300 = vmatmul.msk.f32.vlgmr.msra.gmra.mxu2 %vm1569_vm7, %v11674_v40 }
 0xe18   : > { %8255 = vmatmul.msk.f32.gmra.mxu1 %vm1370_vm2, %v3792_v7 }
 0xe19   : > { %v4219_v23 = vpop.f32.mrf.mxu2 }
 0xe1a   : > { %v4231_v13 = vmul.f32 0.25, %v4219_v23 }
 0xe1c   : > { %v11683_v11 = vadd.f32 %v11557_v55, %v4231_v13  ;;  %v3576_v55 = vpop.f32.mrf.mxu1 }
 0xe1d   : > { %v11693_v48 = vadd.f32 %v8923_v35, %v3576_v55 }
 0xe1e   : > { %v4239_v4 = vsel %vm1370_vm2, %v11683_v11, -inf }
 0xe1f   : > { %4240 = vmax.xlane.f32.xlu2 %v4239_v4  ;;  %8301 = vmatmul.msk.f32.gmra.mxu2 %vm1569_vm7, %v11680_v20 }
 0xe21   : > { %v8799_v10 = vpop.permute.xlu0 %8798 }
 0xe22   : > { %v8800_v3 = vunpack.i.l.bf16 %v8799_v10  ;;  %v8801_v53 = vunpack.i.h.bf16 %v8799_v10 }
 0xe24   : > { %4153 = vmatpush.msrb.mxu1 %v8800_v3  ;;  %v3603_v3 = vld [vmem:[#allocation19 + $0x60] sm:$0xff] }
 0xe26   : > { %4154 = vmatpush.msrb.mxu1 %v8801_v53  ;;  %v3602_v53 = vld [vmem:[#allocation19 + $0x58] sm:$0xff] }
 0xe27   : > { %8302 = vmatmul.msk.f32.gmra.mxu2 %vm1569_vm7, %v11689_v1 }
 0xe29   : > { %v8804_v43 = vpop.permute.xlu0 %8803 }
 0xe2a   : > { %v8805_v38 = vunpack.i.l.bf16 %v8804_v43  ;;  %v8806_v41 = vunpack.i.h.bf16 %v8804_v43 }
 0xe2c   : > { %4155 = vmatpush.msrb.mxu1 %v8805_v38 }
 0xe2e   : > { %4156 = vmatpush.msrb.mxu1 %v8806_v41 }
 0xe2f   : > { %8303 = vmatmul.msk.f32.gmra.mxu2 %vm1569_vm7, %v11693_v48 }
 0xe30   : > { %4495 = vmatpush.msra.mxu1 %v4455_v8 }
 0xe32   : > { %4496 = vmatpush.msra.mxu1 %v4453_v52  ;;  %v11742_v52 = vld [vmem:[#allocation17 + $0x2] sm:$0x3] }
 0xe34   : > { %4497 = vmatpush.msra.mxu1 %v4451_v42 }
 0xe36   : > { %4498 = vmatpush.msra.mxu1 %v4449_v61 }
 0xe38   : > { %4499 = vmatpush.msra.mxu1 %v4447_v62 }
 0xe39   : > { %v4099_v50 = vpop.xlane.xlu1 %4098 }
 0xe3a   : > { %9117 = vrcp.f32 %v4099_v50  ;;  %4500 = vmatpush.msra.mxu1 %v4445_v60  ;;  %v3599_v50 = vld [vmem:[#allocation19 + $0x40] sm:$0xff] }
 0xe40   : > { %v9118_v45 = vpop.eup %9117 }
 0xe41   : > { %v4113_v57 = vmul.f32 %v9118_v45, %v11628_v46  ;;  %v4108_v33 = vpop.xlane.xlu1 %4107  ;;  %v4443_v46 = vld [vmem:[#allocation16 + $0x90] sm:$0xff] }
 0xe42   : > { %4501 = vmatpush.msra.mxu1 %v4443_v46 }
 0xe43   : > { %8276 = vmatmul.msk.f32.vlgmr.msrb.gmra.mxu1 %vm1370_vm2, %v4113_v57 }
 0xe44   : > { %4502 = vmatpush.msra.mxu1 %v4441_v19 }
 0xe47   : > { %v4105_v47 = vpop.xlane.xlu2 %4104 }
 0xe49   : > { %v3905_v63 = vpop.xlane.xlu1 %3904 }
 0xe4a   : > { %v3915_v44 = vsub.f32 %v11640_v25, %v3905_v63 }
 0xe4c   : > { %v3919_v15 = vmul.f32 1.442695, %v3915_v44 }
 0xe4e   : > { %9119 = vpow2.f32 %v3919_v15 }
 0xe51   : > { %v3908_v10 = vpop.xlane.xlu1 %3907 }
 0xe52   : > { %v3916_v55 = vsub.f32 %v11647_v58, %v3908_v10 }
 0xe54   : > { %v11700_v54 = vpop.eup %9119  ;;  %v4102_v39 = vpop.xlane.xlu0 %4101  ;;  %v3921_v43 = vmul.f32 1.442695, %v3916_v55 }
 0xe55   : > { %9121 = vrcp.f32 %v4102_v39  ;;  %v3927_v25 = vsel %vm1370_vm2, %v11700_v54, 0.0 }
 0xe56   : > { %3928 = vadd.xlane.f32.xlu2 %v3927_v25  ;;  %9123 = vrcp.f32 %v4105_v47 }
 0xe57   : > { %9125 = vrcp.f32 %v4108_v33 }
 0xe58   : > { %9127 = vpow2.f32 %v3921_v43 }
 0xe59   : > { %v3911_v38 = vpop.xlane.xlu1 %3910 }
 0xe5a   : > { %v3917_v58 = vsub.f32 %v11657_v2, %v3911_v38 }
 0xe5b   : > { %v9122_v32 = vpop.eup %9121 }
 0xe5c   : > { %v4114_v36 = vmul.f32 %v9122_v32, %v11650_v49  ;;  %v9124_v16 = vpop.eup %9123  ;;  %v3923_v8 = vmul.f32 1.442695, %v3917_v58 }
 0xe5d   : > { %v4222_v37 = vpop.f32.mrf.mxu2  ;;  %v4115_v7 = vmul.f32 %v9124_v16, %v11637_v56  ;;  %v9126_v4 = vpop.eup %9125  ;;  %v3604_v56 = vld [vmem:[#allocation19 + $0x68] sm:$0xff] }
 0xe5e   : > { %v4232_v14 = vmul.f32 0.25, %v4222_v37  ;;  %8277 = vmatmul.msk.f32.gmra.mxu1 %vm1370_vm2, %v4114_v36  ;;  %v4116_v59 = vmul.f32 %v9126_v4, %v11632_v26  ;;  %v3605_v26 = vld [vmem:[#allocation19 + $0x70] sm:$0xff]  ;;  %v11744_v42 = vpop.eup %9127 }
 0xe5f   : > { %v3930_v2 = vsel %vm1370_vm2, %v11744_v42, 0.0 }
 0xe60   : > { %v11707_v35 = vadd.f32 %v11564_v30, %v4232_v14 }
 0xe62   : > { %v4242_v51 = vsel %vm1370_vm2, %v11707_v35, -inf }
 0xe63   : > { %4243 = vmax.xlane.f32.xlu1 %v4242_v51 }
 0xe65   : > { %v4225_v23 = vpop.f32.mrf.mxu2 }
 0xe66   : > { %v4233_v13 = vmul.f32 0.25, %v4225_v23  ;;  %8278 = vmatmul.msk.f32.gmra.mxu1 %vm1370_vm2, %v4115_v7 }
 0xe68   : > { %v11714_v49 = vadd.f32 %v11571_v34, %v4233_v13  ;;  %v3606_v34 = vld [vmem:[#allocation19 + $0x78] sm:$0xff] }
 0xe69   : > { %4419 = vmatpush.msra.mxu0 %v3606_v34 }
 0xe6a   : > { %v4245_v30 = vsel %vm1370_vm2, %v11714_v49, -inf }
 0xe6b   : > { %4246 = vmax.xlane.f32.xlu0 %v4245_v30  ;;  %4420 = vmatpush.msra.mxu0 %v3605_v26 }
 0xe6d   : > { %4421 = vmatpush.msra.mxu0 %v3604_v56 }
 0xe6e   : > { %8813 = vrot.lane.b32.xlu2 %v11477_v24, %s10064_s5  ;;  %8279 = vmatmul.msk.f32.gmra.mxu1 %vm1370_vm2, %v4116_v59 }
 0xe6f   : > { %4422 = vmatpush.msra.mxu0 %v3603_v3 }
 0xe71   : > { %4423 = vmatpush.msra.mxu0 %v3602_v53 }
 0xe76   : > { %8818 = vrot.lane.b32.xlu2 %v11491_v21, %s10065_s23  ;;  %8296 = vmatmul.msk.f32.vlgmr.msra.gmra.mxu1 %vm1569_vm7, %v11674_v40  ;;  %v3601_v40 = vld [vmem:[#allocation19 + $0x50] sm:$0xff] }
 0xe77   : > { %4424 = vmatpush.msra.mxu0 %v3601_v40 }
 0xe7c   : > { %8808 = vrot.lane.b32.xlu1 %v11491_v21, %s10064_s5  ;;  %v3600_v21 = vld [vmem:[#allocation19 + $0x48] sm:$0xff] }
 0xe7d   : > { %4425 = vmatpush.msra.mxu0 %v3600_v21  ;;  %v11762_v36 = vpop.f32.mrf.mxu1 }
 0xe7e   : > { %8297 = vmatmul.msk.f32.gmra.mxu1 %vm1569_vm7, %v11680_v20  ;;  %v3914_v20 = vpop.xlane.xlu0 %3913 }
 0xe7f   : > { %v3918_v45 = vsub.f32 %v11661_v28, %v3914_v20  ;;  %4426 = vmatpush.msra.mxu0 %v3599_v50  ;;  %v4472_v28 = vperm.slane %v11742_v52, 1 }
 0xe81   : > { %v3925_v33 = vmul.f32 1.442695, %v3918_v45 }
 0xe83   : > { %9129 = vpow2.f32 %v3925_v33 }
 0xe84   : > { %9131 = vpow2.f32 %v3923_v8 }
 0xe85   : > { %v11768_v23 = vpop.f32.mrf.mxu1 }
 0xe86   : > { %8298 = vmatmul.msk.f32.gmra.mxu1 %vm1569_vm7, %v11689_v1 }
 0xe89   : > { %v11750_v15 = vpop.eup %9129 }
 0xe8a   : > { %v11752_v19 = vpop.eup %9131  ;;  %v3936_v39 = vsel %vm1370_vm2, %v11750_v15, 0.0 }
 0xe8d   : > { %v11770_v13 = vpop.f32.mrf.mxu1 }
 0xe8e   : > { %8299 = vmatmul.msk.f32.gmra.mxu1 %vm1569_vm7, %v11693_v48 }
 0xe92   : > { %v4228_v1 = vpop.f32.mrf.mxu2  ;;  %v4241_v44 = vpop.xlane.xlu2 %4240 }
 0xe93   : > { %v4234_v41 = vmul.f32 0.25, %v4228_v1 }
 0xe95   : > { %v11737_v57 = vadd.f32 %v11578_v31, %v4234_v41  ;;  %v4251_v31 = vsub.f32 %v11683_v11, %v4241_v44  ;;  %v3933_v11 = vsel %vm1370_vm2, %v11752_v19, 0.0  ;;  %v11774_v4 = vpop.f32.mrf.mxu1 }
 0xe97   : > { %v4248_v48 = vsel %vm1370_vm2, %v11737_v57, -inf  ;;  %v4255_v62 = vmul.f32 1.442695, %v4251_v31 }
 0xe98   : > { %4249 = vmax.xlane.f32.xlu0 %v4248_v48 }
 0xe99   : > { %9133 = vpow2.f32 %v4255_v62 }
 0xe9a   : > { %v4533_v63 = vpop.f32.mrf.mxu2 }
 0xe9b   : > { %v4534_v61 = vadd.f32 %v4533_v63, %v4472_v28 }
 0xe9f   : > { %v11760_v32 = vpop.eup %9133 }
 0xea0   : > { %3931 = vadd.xlane.f32.xlu0 %v3930_v2  ;;  %v4263_v37 = vsel %vm1370_vm2, %v11760_v32, 0.0 }
 0xea2   : > { %v4536_v60 = vpop.f32.mrf.mxu2 }
 0xea3   : > { %v4537_v46 = vadd.f32 %v4536_v60, %v4472_v28 }
 0xea5   : > { %v11756_v25 = vpack.i.bf16 %v4534_v61, %v4537_v46 }
 0xea6   : > { %3937 = vadd.xlane.f32.xlu1 %v3936_v39 }
 0xea8   : > { %3934 = vadd.xlane.f32.xlu0 %v3933_v11 }
 0xeaa   : > { %v4539_v47 = vpop.f32.mrf.mxu2 }
 0xeab   : > { %v4540_v14 = vadd.f32 %v4539_v47, %v4472_v28 }
 0xeb0   : > { %4264 = vadd.xlane.f32.xlu0 %v4263_v37 }
 0xeb2   : > { %v4542_v16 = vpop.f32.mrf.mxu2 }
 0xeb3   : > { %v4543_v51 = vadd.f32 %v4542_v16, %v4472_v28  ;;  %v4471_v28 = vperm.slane %v11742_v52, 0 }
 0xeb5   : > { %4678 = vmatpush.msrb.mxu0 %v4543_v51  ;;  %v11766_v7 = vpack.i.bf16 %v4540_v14, %v4543_v51 }
 0xeb7   : > { %4679 = vmatpush.msrb.mxu0 %v4540_v14 }
 0xeb9   : > { %4680 = vmatpush.msrb.mxu0 %v4537_v46 }
 0xebb   : > { %4681 = vmatpush.msrb.mxu0 %v4534_v61 }
 0xec0   : > { %v11776_v30 = vpop.f32.mrf.mxu1 }
 0xec4   : > { %8823 = vrot.lane.b32.xlu0 %v11477_v24, %s10065_s23 }
 0xec9   : > { %v3929_v53 = vpop.xlane.xlu2 %3928 }
 0xed6   : > { %v4244_v59 = vpop.xlane.xlu1 %4243 }
 0xed7   : > { %v4252_v34 = vsub.f32 %v11707_v35, %v4244_v59  ;;  %v8814_v35 = vpop.permute.xlu2 %8813 }
 0xed8   : > { %v8815_v45 = vunpack.i.l.bf16 %v8814_v35  ;;  %v8816_v33 = vunpack.i.h.bf16 %v8814_v35 }
 0xed9   : > { %v4257_v26 = vmul.f32 1.442695, %v4252_v34 }
 0xedb   : > { %9135 = vpow2.f32 %v4257_v26  ;;  %v11779_v56 = vpop.f32.mrf.mxu1 }
 0xede   : > { %v4247_v10 = vpop.xlane.xlu0 %4246 }
 0xedf   : > { %v4253_v3 = vsub.f32 %v11714_v49, %v4247_v10  ;;  %v8819_v48 = vpop.permute.xlu2 %8818 }
 0xee0   : > { %v8820_v63 = vunpack.i.l.bf16 %v8819_v48  ;;  %v8821_v44 = vunpack.i.h.bf16 %v8819_v48 }
 0xee1   : > { %v11782_v40 = vpop.eup %9135  ;;  %v4259_v55 = vmul.f32 1.442695, %v4253_v3 }
 0xee2   : > { %v4266_v24 = vsel %vm1370_vm2, %v11782_v40, 0.0 }
 0xee3   : > { %4267 = vadd.xlane.f32.xlu2 %v4266_v24  ;;  %v11786_v21 = vpop.f32.mrf.mxu1  ;;  %9137 = vpow2.f32 %v4259_v55 }
 0xee4   : > { %9139 = vrcp.f32 %v3929_v53 }
 0xee9   : > { %v11788_v20 = vpop.eup %9137 }
 0xeea   : > { %v4269_v49 = vsel %vm1370_vm2, %v11788_v20, 0.0  ;;  %v9140_v50 = vpop.eup %9139 }
 0xeeb   : > { %v11790_v43 = vpop.f32.mrf.mxu1  ;;  %v3943_v8 = vmul.f32 %v9140_v50, %v11700_v54 }
 0xeee   : > { %v8809_v1 = vpop.permute.xlu1 %8808  ;;  %4270 = vadd.xlane.f32.xlu0 %v4269_v49 }
 0xeef   : > { %v8810_v38 = vunpack.i.l.bf16 %v8809_v1  ;;  %v8811_v41 = vunpack.i.h.bf16 %v8809_v1 }
 0xef1   : > { %3987 = vmatpush.msrb.mxu3 %v8810_v38 }
 0xef3   : > { %3988 = vmatpush.msrb.mxu3 %v8811_v41  ;;  %v4504_v58 = vpop.f32.mrf.mxu1 }
 0xef4   : > { %v11805_v46 = vadd.f32 %v4504_v58, %v4471_v28 }
 0xef5   : > { %3989 = vmatpush.msrb.mxu3 %v8815_v45 }
 0xef7   : > { %3990 = vmatpush.msrb.mxu3 %v8816_v33 }
 0xef8   : > { %8264 = vmatmul.msk.f32.vlgmr.msrb.gmra.mxu3 %vm1370_vm2, %v3943_v8 }
 0xef9   : > { %4319 = vmatpush.msra.mxu3 %v8820_v63 }
 0xefb   : > { %4320 = vmatpush.msra.mxu3 %v8821_v44  ;;  %v4507_v31 = vpop.f32.mrf.mxu1 }
 0xefc   : > { %v11797_v2 = vadd.f32 %v4507_v31, %v4471_v28 }
 0xefe   : > { %4551 = vrot.lane.b32.xlu2 %v11797_v2, %s10059_s12 }
 0xf03   : > { %v4510_v61 = vpop.f32.mrf.mxu1 }
 0xf04   : > { %v11801_v62 = vadd.f32 %v4510_v61, %v4471_v28 }
 0xf06   : > { %4553 = vrot.lane.b32.xlu0 %v11801_v62, %s10059_s12 }
 0xf0b   : > { %v4250_v54 = vpop.xlane.xlu0 %4249  ;;  %v4513_v60 = vpop.f32.mrf.mxu1 }
 0xf0c   : > { %v4254_v39 = vsub.f32 %v11737_v57, %v4250_v54  ;;  %v11808_v52 = vadd.f32 %v4513_v60, %v4471_v28 }
 0xf0e   : > { %v4261_v11 = vmul.f32 1.442695, %v4254_v39  ;;  %4703 = vrot.lane.b32.xlu0 %v11805_v46, %s10062_s1  ;;  %4709 = vrot.lane.b32.xlu2 %v11808_v52, %s10062_s1 }
 0xf10   : > { %9141 = vpow2.f32 %v4261_v11 }
 0xf13   : > { %v3932_v47 = vpop.xlane.xlu0 %3931 }
 0xf14   : > { %9143 = vrcp.f32 %v3932_v47 }
 0xf16   : > { %v11814_v37 = vpop.eup %9141  ;;  %4699 = vrot.lane.b32.xlu0 %v11801_v62, %s10064_s5  ;;  %4549 = vrot.lane.b32.xlu2 %v11805_v46, %s10059_s12 }
 0xf17   : > { %v4272_v57 = vsel %vm1370_vm2, %v11814_v37, 0.0 }
 0xf18   : > { %4273 = vadd.xlane.f32.xlu1 %v4272_v57 }
 0xf19   : > { %v3938_v59 = vpop.xlane.xlu1 %3937 }
 0xf1a   : > { %v9144_v14 = vpop.eup %9143 }
 0xf1b   : > { %v3935_v16 = vpop.xlane.xlu0 %3934  ;;  %v3944_v51 = vmul.f32 %v9144_v14, %v11744_v42 }
 0xf1c   : > { %9145 = vrcp.f32 %v3935_v16 }
 0xf1d   : > { %8265 = vmatmul.msk.f32.gmra.mxu3 %vm1370_vm2, %v3944_v51  ;;  %9147 = vrcp.f32 %v3938_v59 }
 0xf1e   : > { %4877 = vrot.lane.b32.xlu0 %v11801_v62, %s10060_s13  ;;  %4697 = vrot.lane.b32.xlu2 %v11797_v2, %s10064_s5 }
 0xf22   : > { %v9146_v34 = vpop.eup %9145 }
 0xf23   : > { %v3945_v26 = vmul.f32 %v9146_v34, %v11752_v19  ;;  %v9148_v42 = vpop.eup %9147  ;;  %v4265_v3 = vpop.xlane.xlu0 %4264 }
 0xf24   : > { %v3946_v10 = vmul.f32 %v9148_v42, %v11750_v15  ;;  %9149 = vrcp.f32 %v4265_v3  ;;  %v8360_v42 = vld [vmem:[%s13309_s7 + $0x40] sm:$0xff] }
 0xf25   : > { %8266 = vmatmul.msk.f32.gmra.mxu3 %vm1370_vm2, %v3945_v26  ;;  %v8361_v26 = vld [vmem:[%s13309_s7 + $0x48] sm:$0xff] }
 0xf26   : > { %4875 = vrot.lane.b32.xlu0 %v11797_v2, %s10060_s13  ;;  %4873 = vrot.lane.b32.xlu2 %v11805_v46, %s10060_s13 }
 0xf2a   : > { %v9150_v15 = vpop.eup %9149 }
 0xf2b   : > { %v4279_v24 = vmul.f32 %v9150_v15, %v11760_v32 }
 0xf2d   : > { %8267 = vmatmul.msk.f32.gmra.mxu3 %vm1370_vm2, %v3946_v10 }
 0xf2e   : > { %5039 = vrot.lane.b32.xlu0 %v11805_v46, %s10063_s3  ;;  %5045 = vrot.lane.b32.xlu2 %v11808_v52, %s10063_s3 }
 0xf31   : > { %4707 = vrot.lane.b32.xlu1 %v11801_v62, %s10062_s1 }
 0xf36   : > { %v8824_v19 = vpop.permute.xlu0 %8823  ;;  %4867 = vrot.lane.b32.xlu0 %v11797_v2, %s10061_s30  ;;  %4701 = vrot.lane.b32.xlu2 %v11808_v52, %s10064_s5 }
 0xf37   : > { %v8825_v53 = vunpack.i.l.bf16 %v8824_v19  ;;  %v8826_v55 = vunpack.i.h.bf16 %v8824_v19 }
 0xf39   : > { %4321 = vmatpush.msra.mxu3 %v8825_v53  ;;  %4555 = vrot.lane.b32.xlu1 %v11808_v52, %s10059_s12 }
 0xf3b   : > { %4322 = vmatpush.msra.mxu3 %v8826_v55 }
 0xf3c   : > { %8288 = vmatmul.msk.f32.vlgmr.msra.gmra.mxu3 %vm1370_vm2, %v4279_v24 }
 0xf3e   : > { %5035 = vrot.lane.b32.xlu0 %v11801_v62, %s10065_s23  ;;  %5031 = vrot.lane.b32.xlu2 %v11805_v46, %s10065_s23 }
 0xf41   : > { %4705 = vrot.lane.b32.xlu1 %v11797_v2, %s10062_s1 }
 0xf46   : > { %4869 = vrot.lane.b32.xlu2 %v11801_v62, %s10061_s30 }
 0xf49   : > { %4695 = vrot.lane.b32.xlu1 %v11805_v46, %s10064_s5 }
 0xf51   : > { %5043 = vrot.lane.b32.xlu1 %v11801_v62, %s10063_s3 }
 0xf56   : > { %v4268_v32 = vpop.xlane.xlu2 %4267 }
 0xf57   : > { %9151 = vrcp.f32 %v4268_v32 }
 0xf59   : > { %4879 = vrot.lane.b32.xlu1 %v11808_v52, %s10060_s13 }
 0xf5d   : > { %v9152_v35 = vpop.eup %9151 }
 0xf5e   : > { %v4280_v49 = vmul.f32 %v9152_v35, %v11782_v40  ;;  %v4552_v1 = vpop.permute.xlu2 %4551 }
 0xf60   : > { %8289 = vmatmul.msk.f32.gmra.mxu3 %vm1370_vm2, %v4280_v49 }
 0xf61   : > { %v4271_v38 = vpop.xlane.xlu0 %4270  ;;  %5041 = vrot.lane.b32.xlu1 %v11797_v2, %s10063_s3 }
 0xf62   : > { %9153 = vrcp.f32 %v4271_v38 }
 0xf68   : > { %v9154_v41 = vpop.eup %9153  ;;  %v4710_v50 = vpop.permute.xlu2 %4709 }
 0xf69   : > { %8316 = vmatpush.xpose.msk.msrb.mxu1 %vm1652_vm8, %v4710_v50  ;;  %4865 = vrot.lane.b32.xlu1 %v11805_v46, %s10061_s30  ;;  %v4281_v45 = vmul.f32 %v9154_v41, %v11788_v20 }
 0xf6b   : > { %8290 = vmatmul.msk.f32.gmra.mxu3 %vm1370_vm2, %v4281_v45 }
 0xf70   : > { %v4550_v33 = vpop.permute.xlu2 %4549 }
 0xf71   : > { %5033 = vrot.lane.b32.xlu1 %v11797_v2, %s10065_s23 }
 0xf78   : > { %v4698_v44 = vpop.permute.xlu2 %4697  ;;  %v4554_v28 = vpop.permute.xlu0 %4553 }
 0xf79   : > { %4871 = vrot.lane.b32.xlu1 %v11808_v52, %s10061_s30 }
 0xf7b   : > { %v3992_v40 = vpop.f32.mrf.mxu3 }
 0xf7c   : > { %4340 = vrot.lane.b32.xlu2 %v3992_v40, %s10063_s3 }
 0xf80   : > { %v4874_v61 = vpop.permute.xlu2 %4873  ;;  %v4704_v54 = vpop.permute.xlu0 %4703 }
 0xf81   : > { %4356 = vrot.lane.b32.xlu1 %v11776_v30, %s10060_s13 }
 0xf84   : > { %5037 = vrot.lane.b32.xlu2 %v11808_v52, %s10065_s23 }
 0xf88   : > { %v5046_v11 = vpop.permute.xlu2 %5045 }
 0xf8b   : > { %v4274_v58 = vpop.xlane.xlu1 %4273 }
 0xf8c   : > { %9155 = vrcp.f32 %v4274_v58 }
 0xf90   : > { %v4702_v16 = vpop.permute.xlu2 %4701 }
 0xf92   : > { %v9156_v20 = vpop.eup %9155 }
 0xf93   : > { %v4282_v48 = vmul.f32 %v9156_v20, %v11814_v37 }
 0xf95   : > { %8291 = vmatmul.msk.f32.gmra.mxu3 %vm1370_vm2, %v4282_v48 }
 0xfa0   : > { %v3995_v8 = vpop.f32.mrf.mxu3 }
 0xfa1   : > { %4342 = vrot.lane.b32.xlu1 %v3995_v8, %s10063_s3 }
 0xfa3   : > { %v4708_v63 = vpop.permute.xlu1 %4707 }
 0xfa4   : > { %8317 = vmatpush.xpose.msk.msrb.mxu1 %vm1652_vm8, %v4708_v63 }
 0xfa8   : > { %v3998_v30 = vpop.f32.mrf.mxu3 }
 0xfa9   : > { %4344 = vrot.lane.b32.xlu2 %v3998_v30, %s10063_s3  ;;  %4358 = vrot.lane.b32.xlu1 %v11779_v56, %s10060_s13  ;;  %v4700_v56 = vpop.permute.xlu0 %4699 }
 0xfab   : > { %v4556_v31 = vpop.permute.xlu1 %4555 }
 0xfac   : > { %8304 = vmatpush.xpose.msk.msrb.mxu3 %vm1652_vm8, %v4556_v31 }
 0xfb0   : > { %8305 = vmatpush.xpose.msk.msrb.mxu3 %vm1652_vm8, %v4554_v28  ;;  %v4001_v39 = vpop.f32.mrf.mxu3 }
 0xfb1   : > { %v4878_v14 = vpop.permute.xlu0 %4877 }
 0xfb3   : > { %v4706_v60 = vpop.permute.xlu1 %4705 }
 0xfb4   : > { %8306 = vmatpush.xpose.msk.msrb.mxu3 %vm1652_vm8, %v4552_v1  ;;  %8318 = vmatpush.xpose.msk.msrb.mxu1 %vm1652_vm8, %v4706_v60 }
 0xfb8   : > { %8307 = vmatpush.xpose.msk.msrb.mxu3 %vm1652_vm8, %v4550_v33  ;;  %8319 = vmatpush.xpose.msk.msrb.mxu1 %vm1652_vm8, %v4704_v54  ;;  %v11975_v54 = vld [vmem:[%s13264_s27 + $0x8] sm:$0xff] }
 0xfb9   : > { %v4876_v51 = vpop.permute.xlu0 %4875 }
 0xfbb   : > { %8308 = vmatmul.msk.f32.vlgmr.msrb.gmra.mxu3 %vm1652_vm8, %v11805_v46  ;;  %v4696_v47 = vpop.permute.xlu1 %4695 }
 0xfbc   : > { %8340 = vmatpush.xpose.msk.msra.mxu1 %vm1652_vm8, %v5046_v11 }
 0xfbd   : > { %8320 = vmatmul.msk.f32.vlgmr.msrb.gmra.mxu1 %vm1652_vm8, %v4696_v47 }
 0xfbf   : > { %v4324_v37 = vpop.f32.mrf.mxu3 }
 0xfc0   : > { %4372 = vrot.lane.b32.xlu0 %v4324_v37, %s10062_s1 }
 0xfc1   : > { %v5040_v59 = vpop.permute.xlu0 %5039 }
 0xfc3   : > { %8309 = vmatmul.msk.f32.gmra.mxu3 %vm1652_vm8, %v11797_v2  ;;  %v5044_v57 = vpop.permute.xlu1 %5043 }
 0xfc4   : > { %8341 = vmatpush.xpose.msk.msra.mxu1 %vm1652_vm8, %v5044_v57 }
 0xfc5   : > { %8321 = vmatmul.msk.f32.gmra.mxu1 %vm1652_vm8, %v4698_v44 }
 0xfc8   : > { %4360 = vrot.lane.b32.xlu0 %v11786_v21, %s10060_s13  ;;  %v8363_v21 = vld [vmem:[%s13309_s7 + $0x58] sm:$0xff] }
 0xfc9   : > { %v4868_v3 = vpop.permute.xlu0 %4867 }
 0xfcb   : > { %8310 = vmatmul.msk.f32.gmra.mxu3 %vm1652_vm8, %v11801_v62  ;;  %v4880_v46 = vpop.permute.xlu1 %4879  ;;  %v5032_v62 = vpop.permute.xlu2 %5031 }
 0xfcc   : > { %8328 = vmatpush.xpose.msk.msra.mxu3 %vm1652_vm8, %v4880_v46 }
 0xfcd   : > { %8322 = vmatmul.msk.f32.gmra.mxu1 %vm1652_vm8, %v4700_v56 }
 0xfd0   : > { %8828 = vrot.lane.b32.xlu0 %v11766_v7, %s10064_s5  ;;  %8329 = vmatpush.xpose.msk.msra.mxu3 %vm1652_vm8, %v4878_v14 }
 0xfd1   : > { %v5036_v55 = vpop.permute.xlu0 %5035 }
 0xfd3   : > { %8311 = vmatmul.msk.f32.gmra.mxu3 %vm1652_vm8, %v11808_v52  ;;  %v5042_v2 = vpop.permute.xlu1 %5041  ;;  %v8362_v52 = vld [vmem:[%s13309_s7 + $0x50] sm:$0xff]  ;;  %v4870_v10 = vpop.permute.xlu2 %4869 }
 0xfd4   : > { %8330 = vmatpush.xpose.msk.msra.mxu3 %vm1652_vm8, %v4876_v51  ;;  %8342 = vmatpush.xpose.msk.msra.mxu1 %vm1652_vm8, %v5042_v2  ;;  %v11990_v2 = vld [vmem:[%s13264_s27 + $0x10] sm:$0xff] }
 0xfd5   : > { %8323 = vmatmul.msk.f32.gmra.mxu1 %vm1652_vm8, %v4702_v16 }
 0xfd8   : > { %8833 = vrot.lane.b32.xlu0 %v11756_v25, %s10064_s5  ;;  %8331 = vmatpush.xpose.msk.msra.mxu3 %vm1652_vm8, %v4874_v61 }
 0xfd9   : > { %8343 = vmatpush.xpose.msk.msra.mxu1 %vm1652_vm8, %v5040_v59 }
 0xfdb   : > { %v4866_v34 = vpop.permute.xlu1 %4865  ;;  %v4341_v53 = vpop.permute.xlu2 %4340 }
 0xfdc   : > { %8332 = vmatmul.msk.f32.vlgmr.msra.gmra.mxu3 %vm1652_vm8, %v4866_v34  ;;  %v4384_v38 = vsel %vm1652_vm8, %v11762_v36, %v4341_v53  ;;  %v12005_v53 = vld [vmem:[%s13264_s27 + $0x18] sm:$0xff] }
 0xfdd   : > { %5469 = vmatpush.msrb.mxu1 %v8363_v21 }
 0xfde   : > { %8344 = vmatmul.msk.f32.vlgmr.msra.gmra.mxu1 %vm1652_vm8, %v5032_v62 }
 0xfdf   : > { %5470 = vmatpush.msrb.mxu1 %v8362_v52 }
 0xfe1   : > { %5471 = vmatpush.msrb.mxu1 %v8361_v26 }
 0xfe3   : > { %5472 = vmatpush.msrb.mxu1 %v8360_v42  ;;  %v4327_v19 = vpop.f32.mrf.mxu3  ;;  %v5034_v15 = vpop.permute.xlu1 %5033 }
 0xfe4   : > { %4374 = vrot.lane.b32.xlu1 %v4327_v19, %s10062_s1  ;;  %8333 = vmatmul.msk.f32.gmra.mxu3 %vm1652_vm8, %v4868_v3  ;;  %v5038_v35 = vpop.permute.xlu2 %5037 }
 0xfe6   : > { %8345 = vmatmul.msk.f32.gmra.mxu1 %vm1652_vm8, %v5034_v15 }
 0xfeb   : > { %v4872_v32 = vpop.permute.xlu1 %4871 }
 0xfec   : > { %4346 = vrot.lane.b32.xlu1 %v4001_v39, %s10063_s3  ;;  %8334 = vmatmul.msk.f32.gmra.mxu3 %vm1652_vm8, %v4870_v10 }
 0xfee   : > { %8346 = vmatmul.msk.f32.gmra.mxu1 %vm1652_vm8, %v5036_v55  ;;  %v4330_v24 = vpop.f32.mrf.mxu3 }
 0xfef   : > { %4376 = vrot.lane.b32.xlu2 %v4330_v24, %s10062_s1 }
 0xff3   : > { %v4357_v1 = vpop.permute.xlu1 %4356 }
 0xff4   : > { %4362 = vrot.lane.b32.xlu1 %v11790_v43, %s10060_s13  ;;  %8335 = vmatmul.msk.f32.gmra.mxu3 %vm1652_vm8, %v4872_v32  ;;  %v4388_v41 = vsel %vm1370_vm2, %v4384_v38, %v4357_v1 }
 0xff6   : > { %8347 = vmatmul.msk.f32.gmra.mxu1 %vm1652_vm8, %v5038_v35 }
 0xffe   : > { %8364 = vmatmul.msk.f32.vlgmr.msrb.gmra.mxu1 %vm1370_vm2, %v10490_v29  ;;  %v11960_v29 = vld [vmem:[%s13264_s27] sm:$0xff] }
0x1003   : > { %v4345_v15 = vpop.permute.xlu2 %4344 }
0x1013   : > { %v4343_v61 = vpop.permute.xlu1 %4342 }
0x1014   : > { %v4385_v24 = vsel %vm1652_vm8, %v11768_v23, %v4343_v61 }
0x1018   : > { %v4333_v49 = vpop.f32.mrf.mxu3 }
0x1019   : > { %4378 = vrot.lane.b32.xlu2 %v4333_v49, %s10062_s1 }
0x101b   : > { %v4359_v59 = vpop.permute.xlu1 %4358 }
0x101c   : > { %v4389_v32 = vsel %vm1370_vm2, %v4385_v24, %v4359_v59 }
0x1032   : > { %v4373_v50 = vpop.permute.xlu0 %4372 }
0x1033   : > { %v4392_v45 = vsel %vm2349_vm9, %v4388_v41, %v4373_v50 }
0x1034   : > { %8292 = vmatmul.msk.f32.vlgmr.msra.gmra.mxu0 %vm1569_vm7, %v4392_v45 }
0x103a   : > { %v4744_v43 = vpop.f32.mrf.mxu1  ;;  %v11955_v58 = vpop.permute.xlu0 %4360 }
0x103b   : > { %v4756_v40 = vmul.f32 0.25, %v4744_v43 }
0x103d   : > { %v11963_v20 = vadd.f32 %v11960_v29, %v4756_v40 }
0x103e   : > { %v4590_v36 = vpop.f32.mrf.mxu3 }
0x103f   : > { %v4764_v48 = vsel %vm1370_vm2, %v11963_v20, -inf  ;;  %v4602_v33 = vmul.f32 0.25, %v4590_v36 }
0x1040   : > { %4765 = vmax.xlane.f32.xlu0 %v4764_v48  ;;  %v4386_v48 = vsel %vm1652_vm8, %v11770_v13, %v4345_v15 }
0x1041   : > { %v11968_v63 = vadd.f32 %v11960_v29, %v4602_v33  ;;  %v4390_v33 = vsel %vm1370_vm2, %v4386_v48, %v11955_v58 }
0x1042   : > { %v4747_v8 = vpop.f32.mrf.mxu1  ;;  %v8829_v28 = vpop.permute.xlu0 %8828 }
0x1043   : > { %v4757_v44 = vmul.f32 0.25, %v4747_v8  ;;  %v8830_v30 = vunpack.i.l.bf16 %v8829_v28  ;;  %v4610_v31 = vsel %vm1370_vm2, %v11968_v63, -inf  ;;  %v8831_v39 = vunpack.i.h.bf16 %v8829_v28 }
0x1044   : > { %4611 = vmax.xlane.f32.xlu1 %v4610_v31 }
0x1045   : > { %v11978_v60 = vadd.f32 %v11975_v54, %v4757_v44  ;;  %4848 = vmatpush.msrb.mxu2 %v8830_v30 }
0x1046   : > { %v4593_v11 = vpop.f32.mrf.mxu3 }
0x1047   : > { %v4767_v56 = vsel %vm1370_vm2, %v11978_v60, -inf  ;;  %v4603_v47 = vmul.f32 0.25, %v4593_v11  ;;  %4849 = vmatpush.msrb.mxu2 %v8831_v39 }
0x1048   : > { %4768 = vmax.xlane.f32.xlu2 %v4767_v56 }
0x1049   : > { %v11983_v57 = vadd.f32 %v11975_v54, %v4603_v47  ;;  %v4377_v40 = vpop.permute.xlu2 %4376 }
0x104a   : > { %v4750_v37 = vpop.f32.mrf.mxu1  ;;  %v8834_v46 = vpop.permute.xlu0 %8833  ;;  %v4394_v44 = vsel %vm2349_vm9, %v4390_v33, %v4377_v40 }
0x104b   : > { %v4758_v14 = vmul.f32 0.25, %v4750_v37  ;;  %v8835_v16 = vunpack.i.l.bf16 %v8834_v46  ;;  %v4613_v51 = vsel %vm1370_vm2, %v11983_v57, -inf  ;;  %v8836_v62 = vunpack.i.h.bf16 %v8834_v46 }
0x104c   : > { %4614 = vmax.xlane.f32.xlu0 %v4613_v51 }
0x104d   : > { %v11993_v21 = vadd.f32 %v11990_v2, %v4758_v14  ;;  %4850 = vmatpush.msrb.mxu2 %v8835_v16 }
0x104e   : > { %v4596_v52 = vpop.f32.mrf.mxu3 }
0x104f   : > { %v4770_v34 = vsel %vm1370_vm2, %v11993_v21, -inf  ;;  %v4604_v26 = vmul.f32 0.25, %v4596_v52  ;;  %4851 = vmatpush.msrb.mxu2 %v8836_v62 }
0x1050   : > { %4771 = vmax.xlane.f32.xlu1 %v4770_v34 }
0x1051   : > { %v11998_v10 = vadd.f32 %v11990_v2, %v4604_v26 }
0x1052   : > { %v4753_v42 = vpop.f32.mrf.mxu1 }
0x1053   : > { %v4759_v3 = vmul.f32 0.25, %v4753_v42  ;;  %v4616_v19 = vsel %vm1370_vm2, %v11998_v10, -inf }
0x1054   : > { %4617 = vmax.xlane.f32.xlu2 %v4616_v19 }
0x1055   : > { %v12008_v55 = vadd.f32 %v12005_v53, %v4759_v3 }
0x1056   : > { %v4599_v35 = vpop.f32.mrf.mxu3  ;;  %v4375_v49 = vpop.permute.xlu1 %4374 }
0x1057   : > { %v4773_v1 = vsel %vm1370_vm2, %v12008_v55, -inf  ;;  %v4605_v38 = vmul.f32 0.25, %v4599_v35  ;;  %v4393_v41 = vsel %vm2349_vm9, %v4389_v32, %v4375_v49 }
0x1058   : > { %4774 = vmax.xlane.f32.xlu0 %v4773_v1  ;;  %8293 = vmatmul.msk.f32.gmra.mxu0 %vm1569_vm7, %v4393_v41 }
0x1059   : > { %v12018_v45 = vadd.f32 %v12005_v53, %v4605_v38 }
0x105b   : > { %v5080_v50 = vpop.f32.mrf.mxu1  ;;  %v4619_v23 = vsel %vm1370_vm2, %v12018_v45, -inf }
0x105c   : > { %v5092_v43 = vmul.f32 0.25, %v5080_v50  ;;  %4620 = vmax.xlane.f32.xlu1 %v4619_v23 }
0x105e   : > { %v12023_v36 = vadd.f32 %v11960_v29, %v5092_v43  ;;  %v4347_v11 = vpop.permute.xlu1 %4346 }
0x105f   : > { %v4914_v28 = vpop.f32.mrf.mxu3  ;;  %v4387_v26 = vsel %vm1652_vm8, %v11774_v4, %v4347_v11 }
0x1060   : > { %v5100_v8 = vsel %vm1370_vm2, %v12023_v36, -inf  ;;  %v4926_v30 = vmul.f32 0.25, %v4914_v28  ;;  %8294 = vmatmul.msk.f32.gmra.mxu0 %vm1569_vm7, %v4394_v44 }
0x1061   : > { %5101 = vmax.xlane.f32.xlu0 %v5100_v8 }
0x1062   : > { %v12034_v61 = vadd.f32 %v11960_v29, %v4926_v30 }
0x1063   : > { %v5083_v31 = vpop.f32.mrf.mxu1 }
0x1064   : > { %v5093_v39 = vmul.f32 0.25, %v5083_v31  ;;  %v4934_v13 = vsel %vm1370_vm2, %v12034_v61, -inf }
0x1065   : > { %4935 = vmax.xlane.f32.xlu2 %v4934_v13 }
0x1066   : > { %v12039_v58 = vadd.f32 %v11975_v54, %v5093_v39  ;;  %v4363_v52 = vpop.permute.xlu1 %4362 }
0x1067   : > { %v4917_v56 = vpop.f32.mrf.mxu3  ;;  %v4391_v3 = vsel %vm1370_vm2, %v4387_v26, %v4363_v52 }
0x1068   : > { %v5103_v47 = vsel %vm1370_vm2, %v12039_v58, -inf  ;;  %v4927_v37 = vmul.f32 0.25, %v4917_v56 }
0x1069   : > { %5104 = vmax.xlane.f32.xlu0 %v5103_v47 }
0x106a   : > { %v12044_v46 = vadd.f32 %v11975_v54, %v4927_v37 }
0x106b   : > { %v5086_v14 = vpop.f32.mrf.mxu1 }
0x106c   : > { %v5094_v29 = vmul.f32 0.25, %v5086_v14  ;;  %v4937_v16 = vsel %vm1370_vm2, %v12044_v46, -inf }
0x106d   : > { %4938 = vmax.xlane.f32.xlu1 %v4937_v16 }
0x106e   : > { %v12049_v51 = vadd.f32 %v11990_v2, %v5094_v29 }
0x106f   : > { %v4920_v62 = vpop.f32.mrf.mxu3 }
0x1070   : > { %v5106_v59 = vsel %vm1370_vm2, %v12049_v51, -inf  ;;  %v4928_v34 = vmul.f32 0.25, %v4920_v62 }
0x1071   : > { %5107 = vmax.xlane.f32.xlu0 %v5106_v59 }
0x1072   : > { %v12056_v42 = vadd.f32 %v11990_v2, %v4928_v34 }
0x1073   : > { %v5089_v54 = vpop.f32.mrf.mxu1  ;;  %v4379_v15 = vpop.permute.xlu2 %4378 }
0x1074   : > { %v5095_v19 = vmul.f32 0.25, %v5089_v54  ;;  %v4395_v24 = vsel %vm2349_vm9, %v4391_v3, %v4379_v15  ;;  %v4940_v32 = vsel %vm1370_vm2, %v12056_v42, -inf }
0x1075   : > { %4941 = vmax.xlane.f32.xlu2 %v4940_v32  ;;  %8295 = vmatmul.msk.f32.gmra.mxu0 %vm1569_vm7, %v4395_v24 }
0x1076   : > { %v12064_v35 = vadd.f32 %v12005_v53, %v5095_v19 }
0x1077   : > { %v4923_v2 = vpop.f32.mrf.mxu3 }
0x1078   : > { %v5109_v4 = vsel %vm1370_vm2, %v12064_v35, -inf  ;;  %v4929_v49 = vmul.f32 0.25, %v4923_v2 }
0x1079   : > { %5110 = vmax.xlane.f32.xlu0 %v5109_v4 }
0x107a   : > { %v12069_v1 = vadd.f32 %v12005_v53, %v4929_v49 }
0x107c   : > { %v4943_v38 = vsel %vm1370_vm2, %v12069_v1, -inf }
0x1081   : > { %4944 = vmax.xlane.f32.xlu0 %v4943_v38 }
0x1095   : > { %8848 = vrot.lane.b32.xlu0 %v11766_v7, %s10061_s30 }
0x10b3   : > { %v4766_v41 = vpop.xlane.xlu0 %4765 }
0x10b4   : > { %v4776_v50 = vsub.f32 %v11963_v20, %v4766_v41 }
0x10b6   : > { %v4780_v43 = vmul.f32 1.442695, %v4776_v50 }
0x10b7   : > { %v4612_v23 = vpop.xlane.xlu1 %4611 }
0x10b8   : > { %9157 = vpow2.f32 %v4780_v43  ;;  %v4622_v40 = vsub.f32 %v11968_v63, %v4612_v23 }
0x10ba   : > { %v4626_v48 = vmul.f32 1.442695, %v4622_v40 }
0x10bb   : > { %v4769_v33 = vpop.xlane.xlu2 %4768 }
0x10bc   : > { %v4777_v53 = vsub.f32 %v11978_v60, %v4769_v33  ;;  %9159 = vpow2.f32 %v4626_v48 }
0x10be   : > { %v12078_v8 = vpop.eup %9157  ;;  %v4782_v44 = vmul.f32 1.442695, %v4777_v53 }
0x10bf   : > { %v4788_v28 = vsel %vm1370_vm2, %v12078_v8, 0.0  ;;  %v4615_v30 = vpop.xlane.xlu0 %4614 }
0x10c0   : > { %9161 = vpow2.f32 %v4782_v44  ;;  %4789 = vadd.xlane.f32.xlu1 %v4788_v28  ;;  %v4623_v20 = vsub.f32 %v11983_v57, %v4615_v30 }
0x10c2   : > { %v4628_v31 = vmul.f32 1.442695, %v4623_v20  ;;  %v12083_v13 = vpop.eup %9159 }
0x10c3   : > { %v4772_v39 = vpop.xlane.xlu1 %4771  ;;  %v4634_v56 = vsel %vm1370_vm2, %v12083_v13, 0.0 }
0x10c4   : > { %9163 = vpow2.f32 %v4628_v31  ;;  %v4778_v60 = vsub.f32 %v11993_v21, %v4772_v39 }
0x10c6   : > { %v12085_v63 = vpop.eup %9161  ;;  %v4784_v47 = vmul.f32 1.442695, %v4778_v60 }
0x10c7   : > { %v4791_v11 = vsel %vm1370_vm2, %v12085_v63, 0.0  ;;  %v4618_v37 = vpop.xlane.xlu2 %4617 }
0x10c8   : > { %4792 = vadd.xlane.f32.xlu2 %v4791_v11  ;;  %4635 = vadd.xlane.f32.xlu1 %v4634_v56  ;;  %9165 = vpow2.f32 %v4784_v47  ;;  %v4624_v16 = vsub.f32 %v11998_v10, %v4618_v37 }
0x10ca   : > { %v12092_v14 = vpop.eup %9163  ;;  %v4630_v59 = vmul.f32 1.442695, %v4624_v16 }
0x10cb   : > { %v4775_v57 = vpop.xlane.xlu0 %4774  ;;  %v4637_v21 = vsel %vm1370_vm2, %v12092_v14, 0.0 }
0x10cc   : > { %v4779_v29 = vsub.f32 %v12008_v55, %v4775_v57 }
0x10ce   : > { %v4786_v62 = vmul.f32 1.442695, %v4779_v29  ;;  %v12098_v26 = vpop.eup %9165 }
0x10cf   : > { %v4621_v52 = vpop.xlane.xlu1 %4620  ;;  %v4794_v10 = vsel %vm1370_vm2, %v12098_v26, 0.0 }
0x10d0   : > { %9167 = vpow2.f32 %v4786_v62  ;;  %4638 = vadd.xlane.f32.xlu1 %v4637_v21  ;;  %v4625_v54 = vsub.f32 %v12018_v45, %v4621_v52 }
0x10d1   : > { %9169 = vpow2.f32 %v4630_v59 }
0x10d2   : > { %v4632_v19 = vmul.f32 1.442695, %v4625_v54 }
0x10d4   : > { %v5102_v34 = vpop.xlane.xlu0 %5101  ;;  %9171 = vpow2.f32 %v4632_v19 }
0x10d6   : > { %v12101_v3 = vpop.eup %9167 }
0x10d7   : > { %v4797_v55 = vsel %vm1370_vm2, %v12101_v3, 0.0  ;;  %v12108_v32 = vpop.eup %9169 }
0x10d8   : > { %4798 = vadd.xlane.f32.xlu2 %v4797_v55  ;;  %4795 = vadd.xlane.f32.xlu1 %v4794_v10  ;;  %v4936_v15 = vpop.xlane.xlu2 %4935  ;;  %v4640_v45 = vsel %vm1370_vm2, %v12108_v32, 0.0 }
0x10d9   : > { %v4946_v24 = vsub.f32 %v12034_v61, %v4936_v15 }
0x10da   : > { %v12113_v41 = vpop.eup %9171 }
0x10db   : > { %v4950_v4 = vmul.f32 1.442695, %v4946_v24  ;;  %v4643_v40 = vsel %vm1370_vm2, %v12113_v41, 0.0 }
0x10dc   : > { %v5105_v2 = vpop.xlane.xlu0 %5104 }
0x10dd   : > { %9173 = vpow2.f32 %v4950_v4  ;;  %v5113_v37 = vsub.f32 %v12039_v58, %v5105_v2 }
0x10df   : > { %v5118_v57 = vmul.f32 1.442695, %v5113_v37 }
0x10e0   : > { %4641 = vadd.xlane.f32.xlu1 %v4640_v45  ;;  %v4939_v49 = vpop.xlane.xlu1 %4938 }
0x10e1   : > { %v4947_v38 = vsub.f32 %v12044_v46, %v4939_v49 }
0x10e3   : > { %v12115_v50 = vpop.eup %9173  ;;  %v4952_v43 = vmul.f32 1.442695, %v4947_v38 }
0x10e4   : > { %v12117_v23 = vpop.xlane.xlu0 %5107  ;;  %v4958_v61 = vsel %vm1370_vm2, %v12115_v50, 0.0 }
0x10e5   : > { %9175 = vpow2.f32 %v4952_v43  ;;  %4959 = vadd.xlane.f32.xlu0 %v4958_v61 }
0x10e8   : > { %4644 = vadd.xlane.f32.xlu1 %v4643_v40  ;;  %v4942_v29 = vpop.xlane.xlu2 %4941 }
0x10eb   : > { %v12123_v48 = vpop.eup %9175 }
0x10ec   : > { %v5111_v33 = vpop.xlane.xlu0 %5110  ;;  %v4961_v53 = vsel %vm1370_vm2, %v12123_v48, 0.0 }
0x10ed   : > { %v5115_v46 = vsub.f32 %v12064_v35, %v5111_v33  ;;  %4962 = vadd.xlane.f32.xlu0 %v4961_v53  ;;  %v5112_v35 = vsub.f32 %v12023_v36, %v5102_v34 }
0x10ef   : > { %v5122_v44 = vmul.f32 1.442695, %v5115_v46  ;;  %v5116_v11 = vmul.f32 1.442695, %v5112_v35 }
0x10f0   : > { %8843 = vrot.lane.b32.xlu2 %v11756_v25, %s10065_s23 }
0x10f1   : > { %9177 = vpow2.f32 %v5122_v44 }
0x10f2   : > { %9179 = vpow2.f32 %v5116_v11 }
0x10f3   : > { %9181 = vpow2.f32 %v5118_v57 }
0x10f4   : > { %v4945_v20 = vpop.xlane.xlu0 %4944 }
0x10f5   : > { %v4949_v62 = vsub.f32 %v12069_v1, %v4945_v20 }
0x10f7   : > { %v12130_v28 = vpop.eup %9177  ;;  %v4956_v59 = vmul.f32 1.442695, %v4949_v62 }
0x10f8   : > { %v5133_v30 = vsel %vm1370_vm2, %v12130_v28, 0.0  ;;  %v12137_v56 = vpop.eup %9179 }
0x10f9   : > { %5134 = vadd.xlane.f32.xlu0 %v5133_v30  ;;  %v5124_v47 = vsel %vm1370_vm2, %v12137_v56, 0.0  ;;  %v12143_v16 = vpop.eup %9181 }
0x10fa   : > { %v5127_v21 = vsel %vm1370_vm2, %v12143_v16, 0.0 }
0x1101   : > { %8838 = vrot.lane.b32.xlu1 %v11766_v7, %s10065_s23  ;;  %v4948_v7 = vsub.f32 %v12056_v42, %v4942_v29 }
0x1103   : > { %v4954_v36 = vmul.f32 1.442695, %v4948_v7 }
0x1105   : > { %9183 = vpow2.f32 %v4954_v36 }
0x1106   : > { %9185 = vpow2.f32 %v4956_v59 }
0x1107   : > { %v8849_v31 = vpop.permute.xlu0 %8848 }
0x1108   : > { %v8850_v39 = vunpack.i.l.bf16 %v8849_v31  ;;  %v8851_v60 = vunpack.i.h.bf16 %v8849_v31 }
0x110a   : > { %5014 = vmatpush.msra.mxu0 %v8850_v39 }
0x110b   : > { %v12148_v52 = vpop.eup %9183 }
0x110c   : > { %5015 = vmatpush.msra.mxu0 %v8851_v60  ;;  %v4964_v58 = vsel %vm1370_vm2, %v12148_v52, 0.0  ;;  %v12154_v34 = vpop.eup %9185 }
0x110d   : > { %v4967_v54 = vsel %vm1370_vm2, %v12154_v34, 0.0 }
0x1119   : > { %5125 = vadd.xlane.f32.xlu2 %v5124_v47 }
0x112b   : > { %5128 = vadd.xlane.f32.xlu1 %v5127_v21 }
0x1131   : > { %8853 = vrot.lane.b32.xlu2 %v11756_v25, %s10061_s30 }
0x1133   : > { %4965 = vadd.xlane.f32.xlu1 %v4964_v58  ;;  %v4790_v42 = vpop.xlane.xlu1 %4789 }
0x1134   : > { %9187 = vrcp.f32 %v4790_v42 }
0x113a   : > { %v9188_v1 = vpop.eup %9187 }
0x113b   : > { %v4804_v55 = vmul.f32 %v9188_v1, %v12078_v8  ;;  %v4793_v10 = vpop.xlane.xlu2 %4792  ;;  %4968 = vadd.xlane.f32.xlu1 %v4967_v54  ;;  %v4636_v19 = vpop.xlane.xlu1 %4635  ;;  %v5114_v8 = vsub.f32 %v12049_v51, %v12117_v23 }
0x113c   : > { %9189 = vrcp.f32 %v4793_v10 }
0x113d   : > { %9191 = vrcp.f32 %v4636_v19  ;;  %8324 = vmatmul.msk.f32.vlgmr.msrb.gmra.mxu2 %vm1370_vm2, %v4804_v55  ;;  %v5120_v43 = vmul.f32 1.442695, %v5114_v8 }
0x1142   : > { %v9190_v25 = vpop.eup %9189 }
0x1143   : > { %v9192_v15 = vpop.eup %9191  ;;  %v4639_v24 = vpop.xlane.xlu1 %4638  ;;  %v4805_v4 = vmul.f32 %v9190_v25, %v12085_v63 }
0x1144   : > { %v4650_v2 = vmul.f32 %v9192_v15, %v12083_v13  ;;  %9193 = vrcp.f32 %v4639_v24 }
0x1145   : > { %8325 = vmatmul.msk.f32.gmra.mxu2 %vm1370_vm2, %v4805_v4 }
0x1146   : > { %8312 = vmatmul.msk.f32.vlgmr.msrb.gmra.mxu0 %vm1370_vm2, %v4650_v2 }
0x114a   : > { %v9194_v45 = vpop.eup %9193 }
0x114b   : > { %v4796_v49 = vpop.xlane.xlu1 %4795  ;;  %v4651_v38 = vmul.f32 %v9194_v45, %v12092_v14  ;;  %v4799_v63 = vpop.xlane.xlu2 %4798 }
0x114c   : > { %9195 = vrcp.f32 %v4796_v49 }
0x114d   : > { %9197 = vpow2.f32 %v5120_v43 }
0x114e   : > { %8313 = vmatmul.msk.f32.gmra.mxu0 %vm1370_vm2, %v4651_v38  ;;  %9199 = vrcp.f32 %v4799_v63 }
0x1152   : > { %v9196_v61 = vpop.eup %9195 }
0x1153   : > { %v4642_v13 = vpop.xlane.xlu1 %4641  ;;  %v4806_v40 = vmul.f32 %v9196_v61, %v12098_v26  ;;  %v12169_v33 = vpop.eup %9197 }
0x1154   : > { %9201 = vrcp.f32 %v4642_v13  ;;  %v9200_v51 = vpop.eup %9199  ;;  %v5130_v14 = vsel %vm1370_vm2, %v12169_v33, 0.0  ;;  %v8844_v31 = vpop.permute.xlu2 %8843 }
0x1155   : > { %8326 = vmatmul.msk.f32.gmra.mxu2 %vm1370_vm2, %v4806_v40  ;;  %v4807_v44 = vmul.f32 %v9200_v51, %v12101_v3  ;;  %v8845_v60 = vunpack.i.l.bf16 %v8844_v31 }
0x1158   : > { %v4960_v3 = vpop.xlane.xlu0 %4959 }
0x115a   : > { %v9202_v23 = vpop.eup %9201  ;;  %5131 = vadd.xlane.f32.xlu2 %v5130_v14 }
0x115b   : > { %v4645_v46 = vpop.xlane.xlu1 %4644  ;;  %v4652_v53 = vmul.f32 %v9202_v23, %v12108_v32  ;;  %v8846_v32 = vunpack.i.h.bf16 %v8844_v31 }
0x115c   : > { %9203 = vrcp.f32 %v4645_v46 }
0x115d   : > { %8314 = vmatmul.msk.f32.gmra.mxu0 %vm1370_vm2, %v4652_v53  ;;  %8327 = vmatmul.msk.f32.gmra.mxu2 %vm1370_vm2, %v4807_v44  ;;  %v4467_v44 = vld [vmem:[#allocation22 + $0x78] sm:$0xff] }
0x115e   : > { %5280 = vmatpush.msrb.mxu3 %v4467_v44 }
0x1160   : > { %v4963_v37 = vpop.xlane.xlu0 %4962 }
0x1162   : > { %v9204_v26 = vpop.eup %9203 }
0x1163   : > { %v4653_v30 = vmul.f32 %v9204_v26, %v12113_v41  ;;  %v4466_v26 = vld [vmem:[#allocation22 + $0x70] sm:$0xff] }
0x1164   : > { %5281 = vmatpush.msrb.mxu3 %v4466_v26 }
0x1165   : > { %8315 = vmatmul.msk.f32.gmra.mxu0 %vm1370_vm2, %v4653_v30  ;;  %v4465_v30 = vld [vmem:[#allocation22 + $0x68] sm:$0xff] }
0x1166   : > { %5282 = vmatpush.msrb.mxu3 %v4465_v30 }
0x116c   : > { %v5135_v15 = vpop.xlane.xlu0 %5134 }
0x1173   : > { %v8839_v20 = vpop.permute.xlu1 %8838 }
0x1174   : > { %v8840_v35 = vunpack.i.l.bf16 %v8839_v20  ;;  %v8841_v39 = vunpack.i.h.bf16 %v8839_v20  ;;  %v4464_v20 = vld [vmem:[#allocation22 + $0x60] sm:$0xff] }
0x1175   : > { %5283 = vmatpush.msrb.mxu3 %v4464_v20 }
0x1176   : > { %5180 = vmatpush.msra.mxu2 %v8840_v35  ;;  %v4463_v35 = vld [vmem:[#allocation22 + $0x58] sm:$0xff] }
0x1177   : > { %5284 = vmatpush.msrb.mxu3 %v4463_v35 }
0x1178   : > { %5181 = vmatpush.msra.mxu2 %v8841_v39  ;;  %v4462_v39 = vld [vmem:[#allocation22 + $0x50] sm:$0xff] }
0x1179   : > { %5285 = vmatpush.msrb.mxu3 %v4462_v39 }
0x117a   : > { %5182 = vmatpush.msra.mxu2 %v8845_v60  ;;  %v4461_v60 = vld [vmem:[#allocation22 + $0x48] sm:$0xff] }
0x117b   : > { %5286 = vmatpush.msrb.mxu3 %v4461_v60  ;;  %v5515_v60 = vld [vmem:[#allocation8 + $0x58] sm:$0xff] }
0x117c   : > { %5183 = vmatpush.msra.mxu2 %v8846_v32  ;;  %v4460_v32 = vld [vmem:[#allocation22 + $0x40] sm:$0xff]  ;;  %5545 = vmatpush.msra.mxu1 %v5515_v60 }
0x117d   : > { %5287 = vmatpush.msrb.mxu3 %v4460_v32 }
0x118c   : > { %v5126_v11 = vpop.xlane.xlu2 %5125 }
0x118d   : > { %9205 = vrcp.f32 %v5126_v11 }
0x118e   : > { %9207 = vrcp.f32 %v4960_v3 }
0x118f   : > { %9209 = vrcp.f32 %v4963_v37 }
0x1193   : > { %v9206_v47 = vpop.eup %9205 }
0x1194   : > { %v5140_v41 = vmul.f32 %v9206_v47, %v12137_v56  ;;  %v8854_v57 = vpop.permute.xlu2 %8853  ;;  %v9208_v29 = vpop.eup %9207 }
0x1195   : > { %v8855_v7 = vunpack.i.l.bf16 %v8854_v57  ;;  %v8856_v36 = vunpack.i.h.bf16 %v8854_v57  ;;  %v4974_v62 = vmul.f32 %v9208_v29, %v12115_v50  ;;  %v9210_v21 = vpop.eup %9209 }
0x1196   : > { %8348 = vmatmul.msk.f32.vlgmr.msra.gmra.mxu2 %vm1370_vm2, %v5140_v41  ;;  %v4975_v58 = vmul.f32 %v9210_v21, %v12123_v48 }
0x1197   : > { %5016 = vmatpush.msra.mxu0 %v8855_v7 }
0x1199   : > { %5017 = vmatpush.msra.mxu0 %v8856_v36 }
0x119a   : > { %8336 = vmatmul.msk.f32.vlgmr.msra.gmra.mxu0 %vm1370_vm2, %v4974_v62 }
0x119e   : > { %v5129_v59 = vpop.xlane.xlu1 %5128 }
0x119f   : > { %9211 = vrcp.f32 %v5129_v59 }
0x11a2   : > { %8337 = vmatmul.msk.f32.gmra.mxu0 %vm1370_vm2, %v4975_v58 }
0x11a5   : > { %v9212_v56 = vpop.eup %9211 }
0x11a6   : > { %v4966_v42 = vpop.xlane.xlu1 %4965  ;;  %v5141_v1 = vmul.f32 %v9212_v56, %v12143_v16  ;;  %v12193_v16 = vpop.f32.mrf.mxu0 }
0x11a7   : > { %9213 = vrcp.f32 %v4966_v42 }
0x11a8   : > { %8349 = vmatmul.msk.f32.gmra.mxu2 %vm1370_vm2, %v5141_v1 }
0x11ad   : > { %v9214_v54 = vpop.eup %9213 }
0x11ae   : > { %v4969_v55 = vpop.xlane.xlu1 %4968  ;;  %v4976_v50 = vmul.f32 %v9214_v54, %v12148_v52  ;;  %v12197_v4 = vpop.f32.mrf.mxu0 }
0x11af   : > { %9215 = vrcp.f32 %v4969_v55 }
0x11b0   : > { %8338 = vmatmul.msk.f32.gmra.mxu0 %vm1370_vm2, %v4976_v50 }
0x11b5   : > { %v9216_v10 = vpop.eup %9215 }
0x11b6   : > { %v4977_v19 = vmul.f32 %v9216_v10, %v12154_v34  ;;  %v12201_v8 = vpop.f32.mrf.mxu0 }
0x11b8   : > { %8339 = vmatmul.msk.f32.gmra.mxu0 %vm1370_vm2, %v4977_v19 }
0x11be   : > { %v12203_v45 = vpop.f32.mrf.mxu0 }
0x11c0   : > { %v4853_v48 = vpop.f32.mrf.mxu2 }
0x11c1   : > { %5201 = vrot.lane.b32.xlu2 %v4853_v48, %s10063_s3 }
0x11c6   : > { %v4683_v49 = vpop.f32.mrf.mxu0 }
0x11c8   : > { %v4856_v43 = vpop.f32.mrf.mxu2 }
0x11cd   : > { %v5132_v25 = vpop.xlane.xlu2 %5131 }
0x11ce   : > { %9217 = vrcp.f32 %v5132_v25  ;;  %v4686_v38 = vpop.f32.mrf.mxu0 }
0x11cf   : > { %9219 = vrcp.f32 %v5135_v15 }
0x11d4   : > { %v9218_v24 = vpop.eup %9217 }
0x11d5   : > { %v5142_v52 = vmul.f32 %v9218_v24, %v12169_v33  ;;  %v9220_v2 = vpop.eup %9219 }
0x11d6   : > { %v5143_v34 = vmul.f32 %v9220_v2, %v12130_v28 }
0x11d7   : > { %8350 = vmatmul.msk.f32.gmra.mxu2 %vm1370_vm2, %v5142_v52 }
0x11d8   : > { %v4859_v61 = vpop.f32.mrf.mxu2 }
0x11da   : > { %v4689_v63 = vpop.f32.mrf.mxu0 }
0x11df   : > { %8351 = vmatmul.msk.f32.gmra.mxu2 %vm1370_vm2, %v5143_v34  ;;  %v8925_v34 = vld [vmem:[#allocation23 + $0x1] ss:$0 sm:$0xff] }
0x11e0   : > { %v4862_v40 = vpop.f32.mrf.mxu2 }
0x11e2   : > { %v4692_v13 = vpop.f32.mrf.mxu0 }
0x1217   : > { %v5019_v33 = vpop.f32.mrf.mxu0 }
0x1218   : > { %5217 = vrot.lane.b32.xlu0 %v5019_v33, %s10060_s13  ;;  %v9427_v33 = vld [vmem:[#allocation29 + $0x10] sm:$0xff] }
0x1219   : > { %v5185_v51 = vpop.f32.mrf.mxu2 }
0x121a   : > { %5233 = vrot.lane.b32.xlu1 %v5185_v51, %s10062_s1  ;;  %v9428_v51 = vld [vmem:[#allocation29 + $0x18] sm:$0xff] }
0x121b   : > { %v5202_v3 = vpop.permute.xlu2 %5201 }
0x121c   : > { %v5245_v11 = vsel %vm1652_vm8, %v4683_v49, %v5202_v3 }
0x121f   : > { %v5022_v28 = vpop.f32.mrf.mxu0 }
0x1220   : > { %5203 = vrot.lane.b32.xlu0 %v4856_v43, %s10063_s3  ;;  %5219 = vrot.lane.b32.xlu2 %v5022_v28, %s10060_s13  ;;  %v8924_v28 = vld [vmem:[#allocation20 + $0x1] ss:$0 sm:$0xff] }
0x1221   : > { %v4432_v26 = vadd.f32 %v8924_v28, %v12197_v4  ;;  %v4435_v32 = vadd.f32 %v8924_v28, %v12201_v8 }
0x1228   : > { %5205 = vrot.lane.b32.xlu0 %v4859_v61, %s10063_s3 }
0x122b   : > { %v5188_v14 = vpop.f32.mrf.mxu2 }
0x122c   : > { %5235 = vrot.lane.b32.xlu1 %v5188_v14, %s10062_s1  ;;  %v4429_v14 = vadd.f32 %v8924_v28, %v12193_v16 }
0x122d   : > { %v5025_v23 = vpop.f32.mrf.mxu0 }
0x122e   : > { %5221 = vrot.lane.b32.xlu2 %v5025_v23, %s10060_s13 }
0x1230   : > { %5207 = vrot.lane.b32.xlu0 %v4862_v40, %s10063_s3  ;;  %v9426_v40 = vld [vmem:[#allocation29 + $0x8] sm:$0xff] }
0x1235   : > { %v5028_v46 = vpop.f32.mrf.mxu0 }
0x1236   : > { %5223 = vrot.lane.b32.xlu2 %v5028_v46, %s10060_s13 }
0x125a   : > { %v5191_v53 = vpop.f32.mrf.mxu2 }
0x125b   : > { %5237 = vrot.lane.b32.xlu1 %v5191_v53, %s10062_s1 }
0x1262   : > { %v5194_v31 = vpop.f32.mrf.mxu2 }
0x1263   : > { %5239 = vrot.lane.b32.xlu1 %v5194_v31, %s10062_s1 }
0x127a   : > { %v5220_v36 = vpop.permute.xlu2 %5219 }
0x1288   : > { %v5222_v56 = vpop.permute.xlu2 %5221 }
0x128a   : > { %v5218_v47 = vpop.permute.xlu0 %5217 }
0x128b   : > { %v5249_v37 = vsel %vm1370_vm2, %v5245_v11, %v5218_v47  ;;  %v5514_v11 = vld [vmem:[#allocation8 + $0x50] sm:$0xff] }
0x128c   : > { %v5234_v41 = vpop.permute.xlu1 %5233  ;;  %5546 = vmatpush.msra.mxu1 %v5514_v11  ;;  %v5456_v11 = vld [vmem:[#allocation7 + $0x2] sm:$0x1] }
0x128d   : > { %v5253_v57 = vsel %vm2349_vm9, %v5249_v37, %v5234_v41 }
0x128e   : > { %8352 = vmatmul.msk.f32.vlgmr.msrb.gmra.mxu3 %vm1569_vm7, %v5253_v57 }
0x1290   : > { %v5224_v19 = vpop.permute.xlu2 %5223 }
0x1292   : > { %v5204_v29 = vpop.permute.xlu0 %5203 }
0x1293   : > { %v5246_v7 = vsel %vm1652_vm8, %v4686_v38, %v5204_v29  ;;  %v5513_v29 = vld [vmem:[#allocation8 + $0x48] sm:$0xff] }
0x1294   : > { %v5250_v62 = vsel %vm1370_vm2, %v5246_v7, %v5220_v36  ;;  %5547 = vmatpush.msra.mxu1 %v5513_v29 }
0x129a   : > { %v5206_v58 = vpop.permute.xlu0 %5205 }
0x129b   : > { %v5247_v42 = vsel %vm1652_vm8, %v4689_v63, %v5206_v58 }
0x129c   : > { %v5251_v1 = vsel %vm1370_vm2, %v5247_v42, %v5222_v56  ;;  %v4438_v56 = vadd.f32 %v8924_v28, %v12203_v45 }
0x129e   : > { %v5236_v21 = vpop.permute.xlu1 %5235 }
0x129f   : > { %v5254_v59 = vsel %vm2349_vm9, %v5250_v62, %v5236_v21  ;;  %v5512_v62 = vld [vmem:[#allocation8 + $0x40] sm:$0xff] }
0x12a0   : > { %8353 = vmatmul.msk.f32.gmra.mxu3 %vm1569_vm7, %v5254_v59  ;;  %5548 = vmatpush.msra.mxu1 %v5512_v62 }
0x12a2   : > { %v5208_v50 = vpop.permute.xlu0 %5207 }
0x12a3   : > { %v5248_v10 = vsel %vm1652_vm8, %v4692_v13, %v5208_v50  ;;  %v9425_v13 = vld [vmem:[#allocation29] sm:$0xff] }
0x12a4   : > { %v5252_v48 = vsel %vm1370_vm2, %v5248_v10, %v5224_v19 }
0x12cd   : > { %v5238_v54 = vpop.permute.xlu1 %5237 }
0x12ce   : > { %v5255_v55 = vsel %vm2349_vm9, %v5251_v1, %v5238_v54 }
0x12cf   : > { %8354 = vmatmul.msk.f32.gmra.mxu3 %vm1569_vm7, %v5255_v55 }
0x12d5   : > { %v5240_v25 = vpop.permute.xlu1 %5239 }
0x12d6   : > { %v5256_v15 = vsel %vm2349_vm9, %v5252_v48, %v5240_v25 }
0x12d7   : > { %8355 = vmatmul.msk.f32.gmra.mxu3 %vm1569_vm7, %v5256_v15 }
0x1311   : > { %v5289_v24 = vpop.f32.mrf.mxu3 }
0x1312   : > { %v5290_v61 = vadd.f32 %v8925_v34, %v5289_v24 }
0x1323   : > { %v5292_v52 = vpop.f32.mrf.mxu3 }
0x1324   : > { %v5293_v63 = vadd.f32 %v8925_v34, %v5292_v52 }
0x1352   : > { %v5295_v2 = vpop.f32.mrf.mxu3 }
0x1353   : > { %v5296_v43 = vadd.f32 %v8925_v34, %v5295_v2 }
0x135a   : > { %v5298_v49 = vpop.f32.mrf.mxu3 }
0x135b   : > { %v5299_v38 = vadd.f32 %v8925_v34, %v5298_v49 }
0x135d   : > { %5313 = vmatpush.msrb.mxu0 %v5299_v38 }
0x135f   : > { %5314 = vmatpush.msrb.mxu0 %v5296_v43 }
0x1361   : > { %5315 = vmatpush.msrb.mxu0 %v5293_v63 }
0x1363   : > { %5316 = vmatpush.msrb.mxu0 %v5290_v61 }
0x1364   : > { %8356 = vmatmul.msk.f32.vlgmr.msrb.gmra.mxu0 %vm1370_vm2, %v9425_v13 }
0x136c   : > { %8357 = vmatmul.msk.f32.gmra.mxu0 %vm1370_vm2, %v9426_v40 }
0x1374   : > { %8358 = vmatmul.msk.f32.gmra.mxu0 %vm1370_vm2, %v9427_v33 }
0x137c   : > { %8359 = vmatmul.msk.f32.gmra.mxu0 %vm1370_vm2, %v9428_v51 }
0x13e1   : > { %v5318_v23 = vpop.f32.mrf.mxu0 }
0x13e2   : > { %v12237_v46 = vadd.f32 %v5318_v23, %v4429_v14 }
0x13e4   : > { %v12240_v53 = vmul.f32 0.70710677, %v12237_v46 }
0x13e6   : > { %v5350_v44 = vand.u32 2147483647, %v12240_v53  ;;  %vm5342_vm14 = vcmp.lt.f32.partialorder %v12240_v53, 0.0 }
0x13e8   : > { %v5354_v30 = vmul.f32 0.3275911, %v5350_v44  ;;  %v5402_v37 = vsub.f32 0.0, %v5350_v44 }
0x13e9   : > { %v5321_v20 = vpop.f32.mrf.mxu0 }
0x13ea   : > { %v5358_v35 = vadd.f32 1.0, %v5354_v30  ;;  %v12244_v31 = vadd.f32 %v5321_v20, %v4432_v26  ;;  %v5406_v8 = vmul.f32 %v5402_v37, %v5350_v44 }
0x13ec   : > { %9221 = vrcp.f32 %v5358_v35  ;;  %v12247_v39 = vmul.f32 0.70710677, %v12244_v31  ;;  %v5410_v50 = vmul.f32 1.442695, %v5406_v8 }
0x13ee   : > { %v5351_v16 = vand.u32 2147483647, %v12247_v39  ;;  %vm5343_vm15 = vcmp.lt.f32.partialorder %v12247_v39, 0.0  ;;  %v5335_v39 = vmul.f32 0.5, %v12244_v31 }
0x13f0   : > { %v5355_v3 = vmul.f32 0.3275911, %v5351_v16  ;;  %v5403_v10 = vsub.f32 0.0, %v5351_v16 }
0x13f1   : > { %v5324_v47 = vpop.f32.mrf.mxu0 }
0x13f2   : > { %v9222_v4 = vpop.eup %9221  ;;  %v5359_v41 = vadd.f32 1.0, %v5355_v3  ;;  %v12251_v57 = vadd.f32 %v5324_v47, %v4435_v32  ;;  %v5407_v34 = vmul.f32 %v5403_v10, %v5351_v16  ;;  %v5346_v3 = vsel %vm5342_vm14, -1.0, %v10058_v0  ;;  %v5474_v47 = vpop.f32.mrf.mxu1 }
0x13f3   : > { %v5366_v7 = vmul.f32 1.0614054, %v9222_v4 }
0x13f4   : > { %9223 = vrcp.f32 %v5359_v41  ;;  %v12254_v36 = vmul.f32 0.70710677, %v12251_v57  ;;  %v5412_v40 = vmul.f32 1.442695, %v5407_v34 }
0x13f5   : > { %v5370_v21 = vadd.f32 -1.4531521, %v5366_v7  ;;  %v5334_v7 = vmul.f32 0.5, %v12237_v46 }
0x13f6   : > { %v5352_v59 = vand.u32 2147483647, %v12254_v36  ;;  %vm5344_vm0 = vcmp.lt.f32.partialorder %v12254_v36, 0.0 }
0x13f7   : > { %v5374_v58 = vmul.f32 %v9222_v4, %v5370_v21  ;;  %v5348_v31 = vsel %vm5344_vm0, -1.0, %v10058_v0 }
0x13f8   : > { %v5356_v42 = vmul.f32 0.3275911, %v5352_v59  ;;  %v5404_v33 = vsub.f32 0.0, %v5352_v59 }
0x13f9   : > { %v5378_v1 = vadd.f32 1.4214138, %v5374_v58  ;;  %v5327_v54 = vpop.f32.mrf.mxu0 }
0x13fa   : > { %v9224_v55 = vpop.eup %9223  ;;  %v5360_v19 = vadd.f32 1.0, %v5356_v42  ;;  %v12258_v48 = vadd.f32 %v5327_v54, %v4438_v56  ;;  %v5408_v35 = vmul.f32 %v5404_v33, %v5352_v59  ;;  %v5475_v42 = vadd.f32 %v5474_v47, %v5456_v11 }
0x13fb   : > { %v5382_v25 = vmul.f32 %v9222_v4, %v5378_v1  ;;  %v5367_v15 = vmul.f32 1.0614054, %v9224_v55 }
0x13fc   : > { %9225 = vrcp.f32 %v5360_v19  ;;  %v12261_v24 = vmul.f32 0.70710677, %v12258_v48  ;;  %v5414_v62 = vmul.f32 1.442695, %v5408_v35  ;;  %v5336_v35 = vmul.f32 0.5, %v12251_v57 }
0x13fd   : > { %v5386_v52 = vadd.f32 -0.28449672, %v5382_v25  ;;  %v5371_v2 = vadd.f32 -1.4531521, %v5367_v15  ;;  %9227 = vpow2.f32 %v5410_v50 }
0x13fe   : > { %v5353_v45 = vand.u32 2147483647, %v12261_v24  ;;  %vm5345_vm1 = vcmp.lt.f32.partialorder %v12261_v24, 0.0  ;;  %v8389_v24 = vld [vmem:[%s13311_s11 + $0x160] sm:$0xff] }
0x13ff   : > { %v5390_v49 = vmul.f32 %v9222_v4, %v5386_v52  ;;  %v5375_v38 = vmul.f32 %v9224_v55, %v5371_v2  ;;  %v5477_v2 = vperm.slane %v5475_v42, 0  ;;  %v9429_v42 = vld [vmem:[#allocation28] sm:$0xff] }
0x1400   : > { %v5357_v43 = vmul.f32 0.3275911, %v5353_v45  ;;  %v5405_v53 = vsub.f32 0.0, %v5353_v45 }
0x1401   : > { %v5394_v63 = vadd.f32 0.2548296, %v5390_v49  ;;  %v5379_v61 = vadd.f32 1.4214138, %v5375_v38 }
0x1402   : > { %v9226_v13 = vpop.eup %9225  ;;  %v5361_v51 = vadd.f32 1.0, %v5357_v43  ;;  %v5409_v15 = vmul.f32 %v5405_v53, %v5353_v45  ;;  %v8387_v53 = vld [vmem:[%s13311_s11 + $0x150] sm:$0xff] }
0x1403   : > { %v5398_v28 = vmul.f32 %v9222_v4, %v5394_v63  ;;  %v5383_v14 = vmul.f32 %v9224_v55, %v5379_v61  ;;  %v5368_v23 = vmul.f32 1.0614054, %v9226_v13  ;;  %v9228_v44 = vpop.eup %9227 }
0x1404   : > { %9229 = vrcp.f32 %v5361_v51  ;;  %v5416_v33 = vmul.f32 1.442695, %v5409_v15  ;;  %v9431_v15 = vld [vmem:[#allocation28 + $0x10] sm:$0xff] }
0x1405   : > { %v5418_v26 = vmul.f32 %v9228_v44, %v5398_v28  ;;  %v5387_v30 = vadd.f32 -0.28449672, %v5383_v14  ;;  %v5372_v20 = vadd.f32 -1.4531521, %v5368_v23  ;;  %9231 = vpow2.f32 %v5412_v40 }
0x1406   : > { %9233 = vpow2.f32 %v5414_v62  ;;  %v8391_v62 = vld [vmem:[%s13311_s11 + $0x170] sm:$0xff] }
0x1407   : > { %v5422_v16 = vsub.f32 1.0, %v5418_v26  ;;  %v5391_v60 = vmul.f32 %v9224_v55, %v5387_v30  ;;  %v5376_v32 = vmul.f32 %v9226_v13, %v5372_v20  ;;  %9235 = vpow2.f32 %v5416_v33  ;;  %5668 = vmatpush.msra.mxu0 %v8391_v62 }
0x1409   : > { %v5426_v37 = vmul.f32 %v5422_v16, %v5346_v3  ;;  %v5395_v4 = vadd.f32 0.2548296, %v5391_v60  ;;  %v5380_v41 = vadd.f32 1.4214138, %v5376_v32  ;;  %5669 = vmatpush.msra.mxu0 %v8389_v24 }
0x140a   : > { %v9230_v29 = vpop.eup %9229 }
0x140b   : > { %v5430_v21 = vadd.f32 1.0, %v5426_v37  ;;  %v5399_v8 = vmul.f32 %v9224_v55, %v5395_v4  ;;  %v5384_v58 = vmul.f32 %v9226_v13, %v5380_v41  ;;  %v5369_v56 = vmul.f32 1.0614054, %v9230_v29  ;;  %v9232_v59 = vpop.eup %9231  ;;  %5670 = vmatpush.msra.mxu0 %v8387_v53 }
0x140c   : > { %v5347_v55 = vsel %vm5343_vm15, -1.0, %v10058_v0  ;;  %v9234_v51 = vpop.eup %9233  ;;  %v5349_v4 = vsel %vm5345_vm1, -1.0, %v10058_v0 }
0x140d   : > { %v12268_v1 = vmul.f32 %v5430_v21, %v5334_v7  ;;  %v5419_v54 = vmul.f32 %v9232_v59, %v5399_v8  ;;  %v5388_v50 = vadd.f32 -0.28449672, %v5384_v58  ;;  %v5373_v10 = vadd.f32 -1.4531521, %v5369_v56  ;;  %v9236_v32 = vpop.eup %9235  ;;  %v8385_v21 = vld [vmem:[%s13311_s11 + $0x140] sm:$0xff]  ;;  %v8383_v56 = vld [vmem:[%s13311_s11 + $0x130] sm:$0xff] }
0x140e   : > { %v5337_v7 = vmul.f32 0.5, %v12258_v48  ;;  %5671 = vmatpush.msra.mxu0 %v8385_v21  ;;  %v8392_v59 = vld [vmem:[%s13311_s11 + $0x178] sm:$0xff] }
0x140f   : > { %v5438_v19 = vadd.f32 %v12268_v1, %v11375_v27  ;;  %v5423_v46 = vsub.f32 1.0, %v5419_v54  ;;  %v5392_v25 = vmul.f32 %v9226_v13, %v5388_v50  ;;  %v5377_v52 = vmul.f32 %v9230_v29, %v5373_v10  ;;  %v8390_v54 = vld [vmem:[%s13311_s11 + $0x168] sm:$0xff]  ;;  %v8388_v50 = vld [vmem:[%s13311_s11 + $0x158] sm:$0xff] }
0x1410   : > { %5672 = vmatpush.msra.mxu0 %v8383_v56  ;;  %v8386_v10 = vld [vmem:[%s13311_s11 + $0x148] sm:$0xff] }
0x1411   : > { %v5442_v34 = vmul.f32 0.70710677, %v5438_v19  ;;  %v5427_v49 = vmul.f32 %v5423_v46, %v5347_v55  ;;  %v5396_v38 = vadd.f32 0.2548296, %v5392_v25  ;;  %v5381_v43 = vadd.f32 1.4214138, %v5377_v52 }
0x1412   : > { %v8384_v19 = vld [vmem:[%s13311_s11 + $0x138] sm:$0xff]  ;;  %v8382_v25 = vld [vmem:[%s13311_s11 + $0x128] sm:$0xff]  ;;  %v8379_v52 = vld [vmem:[%s13311_s11 + $0x110] sm:$0xff] }
0x1413   : > { %v5478_v63 = vadd.f32 %v5477_v2, %v5442_v34  ;;  %v5431_v61 = vadd.f32 1.0, %v5427_v49  ;;  %v5400_v40 = vmul.f32 %v9226_v13, %v5396_v38  ;;  %v5385_v28 = vmul.f32 %v9230_v29, %v5381_v43  ;;  %v9430_v46 = vld [vmem:[#allocation28 + $0x8] sm:$0xff]  ;;  %v9432_v55 = vld [vmem:[#allocation28 + $0x18] sm:$0xff]  ;;  %v8926_v38 = vld [vmem:[#allocation10 + $0x2] ss:$0 sm:$0xff] }
0x1414   : > { %v8377_v34 = vld [vmem:[%s13311_s11 + $0x100] sm:$0xff]  ;;  %v8378_v49 = vld [vmem:[%s13311_s11 + $0x108] sm:$0xff] }
0x1415   : > { %v12274_v27 = vmul.f32 %v5431_v61, %v5335_v39  ;;  %v5420_v45 = vmul.f32 %v9234_v51, %v5400_v40  ;;  %8369 = vmatmul.msk.f32.vlgmr.msra.gmra.mxu1 %vm1370_vm2, %v5478_v63  ;;  %v5389_v14 = vadd.f32 -0.28449672, %v5385_v28 }
0x1417   : > { %v5439_v23 = vadd.f32 %v12274_v27, %v11386_v9  ;;  %v5424_v44 = vsub.f32 1.0, %v5420_v45  ;;  %v5393_v26 = vmul.f32 %v9230_v29, %v5389_v14 }
0x1419   : > { %v5443_v13 = vmul.f32 0.70710677, %v5439_v23  ;;  %v5428_v30 = vmul.f32 %v5424_v44, %v5348_v31  ;;  %v5397_v20 = vadd.f32 0.2548296, %v5393_v26  ;;  %v5566_v44 = vld [vmem:[#allocation11 + $0x58] sm:$0xff]  ;;  %v5565_v26 = vld [vmem:[#allocation11 + $0x50] sm:$0xff] }
0x141a   : > { %5596 = vmatpush.msra.mxu3 %v5566_v44 }
0x141b   : > { %v5432_v16 = vadd.f32 1.0, %v5428_v30  ;;  %v5479_v60 = vadd.f32 %v5477_v2, %v5443_v13  ;;  %v5401_v36 = vmul.f32 %v9230_v29, %v5397_v20  ;;  %v5564_v13 = vld [vmem:[#allocation11 + $0x48] sm:$0xff]  ;;  %v5563_v20 = vld [vmem:[#allocation11 + $0x40] sm:$0xff] }
0x141c   : > { %5597 = vmatpush.msra.mxu3 %v5565_v26 }
0x141d   : > { %v12282_v3 = vmul.f32 %v5432_v16, %v5336_v35  ;;  %8370 = vmatmul.msk.f32.gmra.mxu1 %vm1370_vm2, %v5479_v60  ;;  %v5421_v9 = vmul.f32 %v9236_v32, %v5401_v36  ;;  %v5631_v35 = vld [vmem:[#allocation14 + $0x4] sm:$0x3] }
0x141e   : > { %5598 = vmatpush.msra.mxu3 %v5564_v13 }
0x141f   : > { %v5440_v11 = vadd.f32 %v12282_v3, %v11397_v17  ;;  %v5425_v47 = vsub.f32 1.0, %v5421_v9  ;;  %v5645_v9 = vperm.slane %v5631_v35, 1 }
0x1420   : > { %5599 = vmatpush.msra.mxu3 %v5563_v20 }
0x1421   : > { %v5444_v37 = vmul.f32 0.70710677, %v5440_v11  ;;  %v5429_v41 = vmul.f32 %v5425_v47, %v5349_v4 }
0x1423   : > { %v5480_v57 = vadd.f32 %v5477_v2, %v5444_v37  ;;  %v5433_v29 = vadd.f32 1.0, %v5429_v41 }
0x1425   : > { %8371 = vmatmul.msk.f32.gmra.mxu1 %vm1370_vm2, %v5480_v57  ;;  %v12297_v17 = vmul.f32 %v5433_v29, %v5337_v7 }
0x1427   : > { %v5441_v48 = vadd.f32 %v12297_v17, %v11418_v22  ;;  %v8381_v22 = vld [vmem:[%s13311_s11 + $0x120] sm:$0xff] }
0x1428   : > { %5673 = vmatpush.msra.mxu0 %v8381_v22 }
0x1429   : > { %v5445_v8 = vmul.f32 0.70710677, %v5441_v48 }
0x142a   : > { %5674 = vmatpush.msra.mxu0 %v8379_v52 }
0x142b   : > { %v5481_v58 = vadd.f32 %v5477_v2, %v5445_v8  ;;  %v8380_v2 = vld [vmem:[%s13311_s11 + $0x118] sm:$0xff] }
0x142c   : > { %5675 = vmatpush.msra.mxu0 %v8377_v34 }
0x142d   : > { %5494 = vmatpush.msrb.mxu2 %v5481_v58  ;;  %8372 = vmatmul.msk.f32.gmra.mxu1 %vm1370_vm2, %v5481_v58 }
0x142f   : > { %5495 = vmatpush.msrb.mxu2 %v5480_v57 }
0x1431   : > { %5496 = vmatpush.msrb.mxu2 %v5479_v60  ;;  %v5644_v60 = vperm.slane %v5631_v35, 0 }
0x1433   : > { %5497 = vmatpush.msrb.mxu2 %v5478_v63 }
0x1434   : > { %8365 = vmatmul.msk.f32.vlgmr.msrb.gmra.mxu2 %vm1370_vm2, %v9429_v42 }
0x1435   : > { %5697 = vmatpush.msra.mxu2 %v8392_v59 }
0x1437   : > { %5698 = vmatpush.msra.mxu2 %v8390_v54 }
0x1439   : > { %5699 = vmatpush.msra.mxu2 %v8388_v50 }
0x143b   : > { %5700 = vmatpush.msra.mxu2 %v8386_v10 }
0x143c   : > { %8366 = vmatmul.msk.f32.gmra.mxu2 %vm1370_vm2, %v9430_v46 }
0x143d   : > { %5701 = vmatpush.msra.mxu2 %v8384_v19 }
0x143f   : > { %5702 = vmatpush.msra.mxu2 %v8382_v25 }
0x1441   : > { %5703 = vmatpush.msra.mxu2 %v8380_v2 }
0x1443   : > { %5704 = vmatpush.msra.mxu2 %v8378_v49 }
0x1444   : > { %8367 = vmatmul.msk.f32.gmra.mxu2 %vm1370_vm2, %v9431_v15 }
0x144c   : > { %8368 = vmatmul.msk.f32.gmra.mxu2 %vm1370_vm2, %v9432_v55 }
0x1492   : > { %v5550_v39 = vpop.f32.mrf.mxu1 }
0x1493   : > { %v5551_v43 = vadd.f32 %v8926_v38, %v5550_v39 }
0x1495   : > { %8393 = vmatmul.msk.f32.vlgmr.msra.gmra.mxu0 %vm1569_vm7, %v5551_v43  ;;  %8397 = vmatmul.msk.f32.vlgmr.msra.gmra.mxu2 %vm1569_vm7, %v5551_v43 }
0x149a   : > { %v5553_v63 = vpop.f32.mrf.mxu1 }
0x149b   : > { %v5554_v61 = vadd.f32 %v8926_v38, %v5553_v63 }
0x149d   : > { %8394 = vmatmul.msk.f32.gmra.mxu0 %vm1569_vm7, %v5554_v61  ;;  %8398 = vmatmul.msk.f32.gmra.mxu2 %vm1569_vm7, %v5554_v61 }
0x14a2   : > { %v5556_v40 = vpop.f32.mrf.mxu1 }
0x14a3   : > { %v5557_v33 = vadd.f32 %v8926_v38, %v5556_v40 }
0x14a5   : > { %8395 = vmatmul.msk.f32.gmra.mxu0 %vm1569_vm7, %v5557_v33  ;;  %8399 = vmatmul.msk.f32.gmra.mxu2 %vm1569_vm7, %v5557_v33  ;;  %v12446_v33 = vld [vmem:[%s13263_s26] sm:$0xff] }
0x14aa   : > { %v5559_v51 = vpop.f32.mrf.mxu1 }
0x14ab   : > { %v5560_v28 = vadd.f32 %v8926_v38, %v5559_v51 }
0x14ad   : > { %8396 = vmatmul.msk.f32.gmra.mxu0 %vm1569_vm7, %v5560_v28  ;;  %8400 = vmatmul.msk.f32.gmra.mxu2 %vm1569_vm7, %v5560_v28 }
0x14b7   : > { %v5499_v45 = vpop.f32.mrf.mxu2 }
0x14b8   : > { %8373 = vmatmul.msk.f32.vlgmr.msra.gmra.mxu3 %vm1370_vm2, %v5499_v45 }
0x14bf   : > { %v5502_v14 = vpop.f32.mrf.mxu2 }
0x14c0   : > { %8374 = vmatmul.msk.f32.gmra.mxu3 %vm1370_vm2, %v5502_v14 }
0x14c7   : > { %v5505_v23 = vpop.f32.mrf.mxu2 }
0x14c8   : > { %8375 = vmatmul.msk.f32.gmra.mxu3 %vm1370_vm2, %v5505_v23  ;;  %v12453_v23 = vld [vmem:[%s13263_s26 + $0x8] sm:$0xff] }
0x14cf   : > { %v5508_v31 = vpop.f32.mrf.mxu2 }
0x14d0   : > { %8376 = vmatmul.msk.f32.gmra.mxu3 %vm1370_vm2, %v5508_v31 }
0x1512   : > { %v5677_v30 = vpop.f32.mrf.mxu0 }
0x1513   : > { %v12371_v29 = vadd.f32 %v5677_v30, %v5644_v60  ;;  %v12460_v30 = vld [vmem:[%s13263_s26 + $0x10] sm:$0xff] }
0x1518   : > { %v5706_v16 = vpop.f32.mrf.mxu2 }
0x1519   : > { %v5707_v47 = vadd.f32 %v5706_v16, %v5645_v9 }
0x151a   : > { %v5680_v36 = vpop.f32.mrf.mxu0 }
0x151b   : > { %v12357_v32 = vadd.f32 %v5680_v36, %v5644_v60 }
0x151d   : > { %5724 = vrot.lane.b32.xlu1 %v12357_v32, %s10059_s12 }
0x1520   : > { %v5709_v11 = vpop.f32.mrf.mxu2 }
0x1521   : > { %v5710_v37 = vadd.f32 %v5709_v11, %v5645_v9 }
0x1522   : > { %v5683_v4 = vpop.f32.mrf.mxu0 }
0x1523   : > { %v12362_v41 = vadd.f32 %v5683_v4, %v5644_v60  ;;  %v12364_v57 = vpack.i.bf16 %v5707_v47, %v5710_v37  ;;  %v12482_v4 = vld [vmem:[%s13263_s26 + $0x18] sm:$0xff] }
0x1525   : > { %5726 = vrot.lane.b32.xlu2 %v12362_v41, %s10059_s12  ;;  %6050 = vrot.lane.b32.xlu1 %v12362_v41, %s10060_s13 }
0x1528   : > { %v5712_v7 = vpop.f32.mrf.mxu2 }
0x1529   : > { %v5713_v48 = vadd.f32 %v5712_v7, %v5645_v9 }
0x152a   : > { %v5686_v62 = vpop.f32.mrf.mxu0 }
0x152b   : > { %v12373_v24 = vadd.f32 %v5686_v62, %v5644_v60 }
0x152d   : > { %6038 = vrot.lane.b32.xlu1 %v12371_v29, %s10061_s30  ;;  %6052 = vrot.lane.b32.xlu2 %v12373_v24, %s10060_s13 }
0x152e   : > { %5728 = vrot.lane.b32.xlu0 %v12373_v24, %s10059_s12 }
0x1530   : > { %v5715_v53 = vpop.f32.mrf.mxu2 }
0x1531   : > { %v5716_v21 = vadd.f32 %v5715_v53, %v5645_v9 }
0x1533   : > { %5851 = vmatpush.msrb.mxu3 %v5716_v21  ;;  %v12382_v8 = vpack.i.bf16 %v5713_v48, %v5716_v21 }
0x1535   : > { %6044 = vrot.lane.b32.xlu1 %v12373_v24, %s10061_s30  ;;  %6046 = vrot.lane.b32.xlu2 %v12371_v29, %s10060_s13 }
0x1536   : > { %5722 = vrot.lane.b32.xlu0 %v12371_v29, %s10059_s12  ;;  %5852 = vmatpush.msrb.mxu3 %v5713_v48 }
0x1538   : > { %5853 = vmatpush.msrb.mxu3 %v5710_v37 }
0x153a   : > { %5854 = vmatpush.msrb.mxu3 %v5707_v47 }
0x153d   : > { %5880 = vrot.lane.b32.xlu1 %v12362_v41, %s10062_s1  ;;  %6042 = vrot.lane.b32.xlu2 %v12362_v41, %s10061_s30 }
0x153e   : > { %6048 = vrot.lane.b32.xlu0 %v12357_v32, %s10060_s13 }
0x1545   : > { %6218 = vrot.lane.b32.xlu1 %v12373_v24, %s10063_s3  ;;  %5876 = vrot.lane.b32.xlu2 %v12371_v29, %s10062_s1 }
0x1546   : > { %6040 = vrot.lane.b32.xlu0 %v12357_v32, %s10061_s30 }
0x154d   : > { %5868 = vrot.lane.b32.xlu2 %v12371_v29, %s10064_s5 }
0x154e   : > { %5878 = vrot.lane.b32.xlu0 %v12357_v32, %s10062_s1 }
0x1555   : > { %5870 = vrot.lane.b32.xlu2 %v12357_v32, %s10064_s5 }
0x1556   : > { %5872 = vrot.lane.b32.xlu0 %v12362_v41, %s10064_s5 }
0x155d   : > { %5882 = vrot.lane.b32.xlu2 %v12373_v24, %s10062_s1 }
0x155e   : > { %6216 = vrot.lane.b32.xlu0 %v12362_v41, %s10063_s3 }
0x157f   : > { %v5727_v58 = vpop.permute.xlu2 %5726 }
0x1587   : > { %v6053_v56 = vpop.permute.xlu2 %6052 }
0x158f   : > { %v6047_v22 = vpop.permute.xlu2 %6046  ;;  %v5725_v59 = vpop.permute.xlu1 %5724 }
0x1597   : > { %v6043_v42 = vpop.permute.xlu2 %6042  ;;  %v6051_v54 = vpop.permute.xlu1 %6050 }
0x159f   : > { %v5877_v50 = vpop.permute.xlu2 %5876  ;;  %v6039_v19 = vpop.permute.xlu1 %6038 }
0x15a0   : > { %v5729_v10 = vpop.permute.xlu0 %5728 }
0x15a1   : > { %8401 = vmatpush.xpose.msk.msrb.mxu1 %vm1652_vm8, %v5729_v10 }
0x15a5   : > { %8402 = vmatpush.xpose.msk.msrb.mxu1 %vm1652_vm8, %v5727_v58 }
0x15a7   : > { %v5869_v46 = vpop.permute.xlu2 %5868  ;;  %v6045_v52 = vpop.permute.xlu1 %6044 }
0x15a8   : > { %v5723_v25 = vpop.permute.xlu0 %5722 }
0x15a9   : > { %8403 = vmatpush.xpose.msk.msrb.mxu1 %vm1652_vm8, %v5725_v59 }
0x15ad   : > { %8404 = vmatpush.xpose.msk.msrb.mxu1 %vm1652_vm8, %v5723_v25 }
0x15af   : > { %v5871_v15 = vpop.permute.xlu2 %5870  ;;  %v5881_v49 = vpop.permute.xlu1 %5880 }
0x15b0   : > { %8405 = vmatmul.msk.f32.vlgmr.msrb.gmra.mxu1 %vm1652_vm8, %v12371_v29  ;;  %v6049_v55 = vpop.permute.xlu0 %6048 }
0x15b1   : > { %8425 = vmatpush.xpose.msk.msra.mxu1 %vm1652_vm8, %v6053_v56 }
0x15b5   : > { %8426 = vmatpush.xpose.msk.msra.mxu1 %vm1652_vm8, %v6051_v54 }
0x15b7   : > { %v5883_v2 = vpop.permute.xlu2 %5882  ;;  %v6219_v39 = vpop.permute.xlu1 %6218 }
0x15b8   : > { %8406 = vmatmul.msk.f32.gmra.mxu1 %vm1652_vm8, %v12357_v32  ;;  %v6041_v34 = vpop.permute.xlu0 %6040  ;;  %8413 = vmatpush.xpose.msk.msrb.mxu0 %vm1652_vm8, %v5883_v2 }
0x15b9   : > { %8427 = vmatpush.xpose.msk.msra.mxu1 %vm1652_vm8, %v6049_v55 }
0x15bc   : > { %8414 = vmatpush.xpose.msk.msrb.mxu0 %vm1652_vm8, %v5881_v49 }
0x15bd   : > { %8428 = vmatpush.xpose.msk.msra.mxu1 %vm1652_vm8, %v6047_v22 }
0x15c0   : > { %8407 = vmatmul.msk.f32.gmra.mxu1 %vm1652_vm8, %v12362_v41  ;;  %v5879_v38 = vpop.permute.xlu0 %5878 }
0x15c1   : > { %8415 = vmatpush.xpose.msk.msrb.mxu0 %vm1652_vm8, %v5879_v38 }
0x15c5   : > { %8416 = vmatpush.xpose.msk.msrb.mxu0 %vm1652_vm8, %v5877_v50 }
0x15c8   : > { %8408 = vmatmul.msk.f32.gmra.mxu1 %vm1652_vm8, %v12373_v24  ;;  %8417 = vmatmul.msk.f32.vlgmr.msrb.gmra.mxu0 %vm1652_vm8, %v5869_v46  ;;  %v5873_v43 = vpop.permute.xlu0 %5872 }
0x15c9   : > { %8437 = vmatpush.xpose.msk.msra.mxu0 %vm1652_vm8, %v6219_v39 }
0x15d0   : > { %8418 = vmatmul.msk.f32.gmra.mxu0 %vm1652_vm8, %v5871_v15  ;;  %8429 = vmatmul.msk.f32.vlgmr.msra.gmra.mxu1 %vm1652_vm8, %v6039_v19  ;;  %v6217_v63 = vpop.permute.xlu0 %6216 }
0x15d1   : > { %8438 = vmatpush.xpose.msk.msra.mxu0 %vm1652_vm8, %v6217_v63 }
0x15d8   : > { %8419 = vmatmul.msk.f32.gmra.mxu0 %vm1652_vm8, %v5873_v43  ;;  %8430 = vmatmul.msk.f32.gmra.mxu1 %vm1652_vm8, %v6041_v34 }
0x15e0   : > { %8431 = vmatmul.msk.f32.gmra.mxu1 %vm1652_vm8, %v6043_v42 }
0x15e8   : > { %8432 = vmatmul.msk.f32.gmra.mxu1 %vm1652_vm8, %v6045_v52 }
0x162d   : > { %v5763_v61 = vpop.f32.mrf.mxu1 }
0x162e   : > { %v5775_v40 = vmul.f32 0.25, %v5763_v61 }
0x1630   : > { %v5779_v51 = vadd.f32 %v12446_v33, %v5775_v40 }
0x1632   : > { %v5783_v28 = vsel %vm1370_vm2, %v5779_v51, -inf }
0x1633   : > { %5784 = vmax.xlane.f32.xlu0 %v5783_v28 }
0x1635   : > { %v5766_v45 = vpop.f32.mrf.mxu1 }
0x1636   : > { %v5776_v14 = vmul.f32 0.25, %v5766_v45 }
0x1638   : > { %v5780_v44 = vadd.f32 %v12453_v23, %v5776_v14 }
0x163a   : > { %v5786_v31 = vsel %vm1370_vm2, %v5780_v44, -inf }
0x163b   : > { %5787 = vmax.xlane.f32.xlu2 %v5786_v31 }
0x163d   : > { %v5769_v26 = vpop.f32.mrf.mxu1 }
0x163e   : > { %v5777_v13 = vmul.f32 0.25, %v5769_v26 }
0x1640   : > { %v5781_v20 = vadd.f32 %v12460_v30, %v5777_v13 }
0x1642   : > { %v5789_v35 = vsel %vm1370_vm2, %v5781_v20, -inf }
0x1643   : > { %5790 = vmax.xlane.f32.xlu1 %v5789_v35 }
0x1645   : > { %v5772_v16 = vpop.f32.mrf.mxu1 }
0x1646   : > { %v5778_v37 = vmul.f32 0.25, %v5772_v16 }
0x1647   : > { %6214 = vrot.lane.b32.xlu0 %v12357_v32, %s10063_s3 }
0x1648   : > { %v5782_v7 = vadd.f32 %v12482_v4, %v5778_v37 }
0x164d   : > { %v6087_v60 = vpop.f32.mrf.mxu1 }
0x164e   : > { %v6099_v62 = vmul.f32 0.25, %v6087_v60 }
0x164f   : > { %6212 = vrot.lane.b32.xlu0 %v12371_v29, %s10063_s3 }
0x1650   : > { %v6103_v53 = vadd.f32 %v12446_v33, %v6099_v62 }
0x1652   : > { %v6107_v58 = vsel %vm1370_vm2, %v6103_v53, -inf }
0x1653   : > { %5874 = vrot.lane.b32.xlu2 %v12373_v24, %s10064_s5 }
0x1655   : > { %v6090_v36 = vpop.f32.mrf.mxu1 }
0x1656   : > { %v6100_v9 = vmul.f32 0.25, %v6090_v36 }
0x1657   : > { %6204 = vrot.lane.b32.xlu0 %v12371_v29, %s10065_s23  ;;  %v5792_v29 = vsel %vm1370_vm2, %v5782_v7, -inf }
0x1658   : > { %v12473_v11 = vadd.f32 %v12453_v23, %v6100_v9 }
0x165a   : > { %v6110_v47 = vsel %vm1370_vm2, %v12473_v11, -inf }
0x165b   : > { %6111 = vmax.xlane.f32.xlu1 %v6110_v47 }
0x165d   : > { %v6093_v48 = vpop.f32.mrf.mxu1 }
0x165e   : > { %v6101_v21 = vmul.f32 0.25, %v6093_v48 }
0x1660   : > { %v12489_v56 = vadd.f32 %v12460_v30, %v6101_v21 }
0x1662   : > { %v6113_v22 = vsel %vm1370_vm2, %v12489_v56, -inf }
0x1665   : > { %v6096_v59 = vpop.f32.mrf.mxu1 }
0x1666   : > { %v6102_v42 = vmul.f32 0.25, %v6096_v59 }
0x1668   : > { %v12494_v54 = vadd.f32 %v12482_v4, %v6102_v42 }
0x166a   : > { %v6116_v50 = vsel %vm1370_vm2, %v12494_v54, -inf }
0x1674   : > { %8858 = vrot.lane.b32.xlu1 %v12382_v8, %s10061_s30 }
0x1681   : > { %5793 = vmax.xlane.f32.xlu0 %v5792_v29 }
0x1689   : > { %6108 = vmax.xlane.f32.xlu0 %v6107_v58 }
0x1691   : > { %6114 = vmax.xlane.f32.xlu0 %v6113_v22 }
0x169e   : > { %6117 = vmax.xlane.f32.xlu1 %v6116_v50 }
0x16a5   : > { %6206 = vrot.lane.b32.xlu0 %v12357_v32, %s10065_s23 }
0x16a6   : > { %v5785_v10 = vpop.xlane.xlu0 %5784 }
0x16a7   : > { %v5795_v19 = vsub.f32 %v5779_v51, %v5785_v10 }
0x16a9   : > { %v5799_v46 = vmul.f32 1.442695, %v5795_v19 }
0x16ab   : > { %9237 = vpow2.f32 %v5799_v46 }
0x16ae   : > { %v5788_v25 = vpop.xlane.xlu2 %5787 }
0x16af   : > { %v5796_v15 = vsub.f32 %v5780_v44, %v5788_v25 }
0x16b1   : > { %v12500_v55 = vpop.eup %9237  ;;  %v5801_v52 = vmul.f32 1.442695, %v5796_v15 }
0x16b2   : > { %v5807_v2 = vsel %vm1370_vm2, %v12500_v55, 0.0 }
0x16b3   : > { %9239 = vpow2.f32 %v5801_v52  ;;  %5808 = vadd.xlane.f32.xlu2 %v5807_v2 }
0x16b6   : > { %v5875_v34 = vpop.permute.xlu2 %5874  ;;  %v5791_v49 = vpop.xlane.xlu1 %5790 }
0x16b7   : > { %v5797_v38 = vsub.f32 %v5781_v20, %v5791_v49  ;;  %8420 = vmatmul.msk.f32.gmra.mxu0 %vm1652_vm8, %v5875_v34 }
0x16b9   : > { %v12505_v32 = vpop.eup %9239  ;;  %v5803_v39 = vmul.f32 1.442695, %v5797_v38  ;;  %v6215_v43 = vpop.permute.xlu0 %6214 }
0x16ba   : > { %8439 = vmatpush.xpose.msk.msra.mxu0 %vm1652_vm8, %v6215_v43  ;;  %v5810_v63 = vsel %vm1370_vm2, %v12505_v32, 0.0 }
0x16bb   : > { %9241 = vpow2.f32 %v5803_v39  ;;  %5811 = vadd.xlane.f32.xlu2 %v5810_v63 }
0x16c1   : > { %v12510_v61 = vpop.eup %9241  ;;  %v6213_v40 = vpop.permute.xlu0 %6212 }
0x16c2   : > { %8440 = vmatpush.xpose.msk.msra.mxu0 %vm1652_vm8, %v6213_v40  ;;  %v5813_v51 = vsel %vm1370_vm2, %v12510_v61, 0.0 }
0x16c3   : > { %5814 = vadd.xlane.f32.xlu1 %v5813_v51 }
0x16c9   : > { %v6205_v28 = vpop.permute.xlu0 %6204 }
0x16ca   : > { %8441 = vmatmul.msk.f32.vlgmr.msra.gmra.mxu0 %vm1652_vm8, %v6205_v28 }
0x16ce   : > { %v6112_v45 = vpop.xlane.xlu1 %6111 }
0x16cf   : > { %v6120_v36 = vsub.f32 %v12473_v11, %v6112_v45 }
0x16d1   : > { %v6125_v37 = vmul.f32 1.442695, %v6120_v36 }
0x16dc   : > { %8863 = vrot.lane.b32.xlu1 %v12364_v57, %s10061_s30 }
0x16e4   : > { %6210 = vrot.lane.b32.xlu1 %v12373_v24, %s10065_s23  ;;  %v5917_v24 = vpop.f32.mrf.mxu0 }
0x16e5   : > { %v5929_v62 = vmul.f32 0.25, %v5917_v24 }
0x16e6   : > { %v8859_v14 = vpop.permute.xlu1 %8858 }
0x16e7   : > { %v8860_v44 = vunpack.i.l.bf16 %v8859_v14  ;;  %v8861_v31 = vunpack.i.h.bf16 %v8859_v14 }
0x16e9   : > { %6187 = vmatpush.msra.mxu3 %v8860_v44 }
0x16eb   : > { %6188 = vmatpush.msra.mxu3 %v8861_v31 }
0x16ec   : > { %v5920_v10 = vpop.f32.mrf.mxu0 }
0x16ed   : > { %v5930_v46 = vmul.f32 0.25, %v5920_v10 }
0x16ef   : > { %v12547_v15 = vadd.f32 %v12453_v23, %v5930_v46 }
0x16f1   : > { %v5940_v2 = vsel %vm1370_vm2, %v12547_v15, -inf }
0x16f4   : > { %v5794_v26 = vpop.xlane.xlu0 %5793 }
0x16f5   : > { %v5798_v13 = vsub.f32 %v5782_v7, %v5794_v26 }
0x16f7   : > { %v5805_v20 = vmul.f32 1.442695, %v5798_v13 }
0x16f9   : > { %9243 = vpow2.f32 %v5805_v20 }
0x16fc   : > { %v6109_v35 = vpop.xlane.xlu0 %6108 }
0x16fd   : > { %v6119_v16 = vsub.f32 %v6103_v53, %v6109_v35  ;;  %v12530_v53 = vadd.f32 %v12446_v33, %v5929_v62  ;;  %v6486_v62 = vld [vmem:[#allocation16 + $0x158] sm:$0xff] }
0x16ff   : > { %v12520_v60 = vpop.eup %9243  ;;  %v6123_v9 = vmul.f32 1.442695, %v6119_v16  ;;  %v5937_v48 = vsel %vm1370_vm2, %v12530_v53, -inf }
0x1700   : > { %v5816_v47 = vsel %vm1370_vm2, %v12520_v60, 0.0 }
0x1701   : > { %9245 = vpow2.f32 %v6123_v9  ;;  %5817 = vadd.xlane.f32.xlu2 %v5816_v47 }
0x1702   : > { %9247 = vpow2.f32 %v6125_v37  ;;  %v6488_v37 = vld [vmem:[#allocation16 + $0x168] sm:$0xff] }
0x1704   : > { %v6115_v21 = vpop.xlane.xlu0 %6114 }
0x1705   : > { %v6121_v63 = vsub.f32 %v12489_v56, %v6115_v21  ;;  %v6478_v21 = vld [vmem:[#allocation16 + $0x118] sm:$0xff] }
0x1707   : > { %v12525_v29 = vpop.eup %9245  ;;  %v6127_v40 = vmul.f32 1.442695, %v6121_v63 }
0x1708   : > { %v6131_v7 = vsel %vm1370_vm2, %v12525_v29, 0.0  ;;  %v12532_v11 = vpop.eup %9247 }
0x1709   : > { %6132 = vadd.xlane.f32.xlu0 %v6131_v7  ;;  %v6134_v58 = vsel %vm1370_vm2, %v12532_v11, 0.0  ;;  %v6484_v7 = vld [vmem:[#allocation16 + $0x148] sm:$0xff] }
0x170e   : > { %5938 = vmax.xlane.f32.xlu1 %v5937_v48  ;;  %v6482_v48 = vld [vmem:[#allocation16 + $0x138] sm:$0xff] }
0x1711   : > { %6135 = vadd.xlane.f32.xlu0 %v6134_v58  ;;  %v6118_v22 = vpop.xlane.xlu1 %6117  ;;  %v6476_v58 = vld [vmem:[#allocation16 + $0x108] sm:$0xff] }
0x1712   : > { %v6122_v59 = vsub.f32 %v12494_v54, %v6118_v22  ;;  %v5923_v54 = vpop.f32.mrf.mxu0 }
0x1713   : > { %v5931_v52 = vmul.f32 0.25, %v5923_v54  ;;  %v5601_v54 = vpop.f32.mrf.mxu3 }
0x1714   : > { %v6129_v42 = vmul.f32 1.442695, %v6122_v59 }
0x1716   : > { %9249 = vpow2.f32 %v6129_v42 }
0x1717   : > { %v6207_v50 = vpop.permute.xlu0 %6206 }
0x1718   : > { %8442 = vmatmul.msk.f32.gmra.mxu0 %vm1652_vm8, %v6207_v50 }
0x1719   : > { %6208 = vrot.lane.b32.xlu2 %v12362_v41, %s10065_s23  ;;  %v12552_v41 = vadd.f32 %v12460_v30, %v5931_v52 }
0x171b   : > { %v5943_v38 = vsel %vm1370_vm2, %v12552_v41, -inf }
0x171c   : > { %v12542_v19 = vpop.eup %9249 }
0x171d   : > { %v6140_v25 = vsel %vm1370_vm2, %v12542_v19, 0.0 }
0x171e   : > { %6141 = vadd.xlane.f32.xlu0 %v6140_v25 }
0x1726   : > { %v5809_v34 = vpop.xlane.xlu2 %5808  ;;  %5941 = vmax.xlane.f32.xlu0 %v5940_v2 }
0x1727   : > { %9251 = vrcp.f32 %v5809_v34 }
0x172d   : > { %v9252_v49 = vpop.eup %9251 }
0x172e   : > { %v5823_v39 = vmul.f32 %v9252_v49, %v12500_v55  ;;  %v5812_v43 = vpop.xlane.xlu2 %5811  ;;  %5944 = vmax.xlane.f32.xlu0 %v5943_v38 }
0x172f   : > { %9253 = vrcp.f32 %v5812_v43 }
0x1730   : > { %8409 = vmatmul.msk.f32.vlgmr.msrb.gmra.mxu3 %vm1370_vm2, %v5823_v39 }
0x1734   : > { %v5926_v51 = vpop.f32.mrf.mxu0 }
0x1735   : > { %v9254_v28 = vpop.eup %9253  ;;  %v5932_v45 = vmul.f32 0.25, %v5926_v51 }
0x1736   : > { %v5815_v14 = vpop.xlane.xlu1 %5814  ;;  %v5824_v44 = vmul.f32 %v9254_v28, %v12505_v32 }
0x1737   : > { %v12561_v31 = vadd.f32 %v12482_v4, %v5932_v45  ;;  %9255 = vrcp.f32 %v5815_v14 }
0x1738   : > { %9257 = vpow2.f32 %v6127_v40  ;;  %8410 = vmatmul.msk.f32.gmra.mxu3 %vm1370_vm2, %v5824_v44  ;;  %v5604_v40 = vpop.f32.mrf.mxu3 }
0x1739   : > { %v5946_v55 = vsel %vm1370_vm2, %v12561_v31, -inf }
0x173a   : > { %5947 = vmax.xlane.f32.xlu0 %v5946_v55 }
0x173d   : > { %v9256_v56 = vpop.eup %9255 }
0x173e   : > { %v12566_v26 = vpop.eup %9257  ;;  %v5825_v13 = vmul.f32 %v9256_v56, %v12510_v61  ;;  %v6490_v61 = vld [vmem:[#allocation16 + $0x178] sm:$0xff] }
0x173f   : > { %v6137_v32 = vsel %vm1370_vm2, %v12566_v26, 0.0  ;;  %6558 = vmatpush.msrb.mxu0 %v6490_v61  ;;  %v6475_v61 = vld [vmem:[#allocation16 + $0x100] sm:$0xff] }
0x1740   : > { %8411 = vmatmul.msk.f32.gmra.mxu3 %vm1370_vm2, %v5825_v13  ;;  %v5607_v45 = vpop.f32.mrf.mxu3  ;;  %v6489_v13 = vld [vmem:[#allocation16 + $0x170] sm:$0xff] }
0x1741   : > { %6559 = vmatpush.msrb.mxu0 %v6488_v37 }
0x1742   : > { %6138 = vadd.xlane.f32.xlu2 %v6137_v32  ;;  %v6487_v32 = vld [vmem:[#allocation16 + $0x160] sm:$0xff] }
0x1743   : > { %6560 = vmatpush.msrb.mxu0 %v6486_v62 }
0x1745   : > { %6561 = vmatpush.msrb.mxu0 %v6484_v7 }
0x1747   : > { %v6253_v20 = vpop.f32.mrf.mxu0  ;;  %6562 = vmatpush.msrb.mxu0 %v6482_v48 }
0x1748   : > { %v6265_v35 = vmul.f32 0.25, %v6253_v20  ;;  %v5610_v56 = vpop.f32.mrf.mxu3 }
0x174a   : > { %v12573_v16 = vadd.f32 %v12446_v33, %v6265_v35  ;;  %v6480_v33 = vld [vmem:[#allocation16 + $0x128] sm:$0xff]  ;;  %v6485_v35 = vld [vmem:[#allocation16 + $0x150] sm:$0xff] }
0x174b   : > { %6563 = vmatpush.msrb.mxu0 %v6480_v33 }
0x174c   : > { %v6273_v36 = vsel %vm1370_vm2, %v12573_v16, -inf }
0x174d   : > { %6274 = vmax.xlane.f32.xlu0 %v6273_v36  ;;  %6564 = vmatpush.msrb.mxu0 %v6478_v21  ;;  %v6483_v36 = vld [vmem:[#allocation16 + $0x140] sm:$0xff] }
0x174e   : > { %v8864_v9 = vpop.permute.xlu1 %8863 }
0x174f   : > { %v8865_v47 = vunpack.i.l.bf16 %v8864_v9  ;;  %v8866_v24 = vunpack.i.h.bf16 %v8864_v9  ;;  %6565 = vmatpush.msrb.mxu0 %v6476_v58 }
0x1751   : > { %6189 = vmatpush.msra.mxu3 %v8865_v47  ;;  %v6479_v47 = vld [vmem:[#allocation16 + $0x120] sm:$0xff] }
0x1753   : > { %6190 = vmatpush.msra.mxu3 %v8866_v24  ;;  %v6477_v24 = vld [vmem:[#allocation16 + $0x110] sm:$0xff] }
0x1755   : > { %6529 = vmatpush.msrb.mxu3 %v6489_v13 }
0x1756   : > { %v6211_v59 = vpop.permute.xlu1 %6210 }
0x1757   : > { %6530 = vmatpush.msrb.mxu3 %v6487_v32 }
0x1759   : > { %6531 = vmatpush.msrb.mxu3 %v6485_v35 }
0x175b   : > { %6532 = vmatpush.msrb.mxu3 %v6483_v36 }
0x1774   : > { %v5818_v22 = vpop.xlane.xlu2 %5817 }
0x1775   : > { %9259 = vrcp.f32 %v5818_v22 }
0x177b   : > { %v9260_v42 = vpop.eup %9259 }
0x177c   : > { %v6209_v50 = vpop.permute.xlu2 %6208  ;;  %v6133_v10 = vpop.xlane.xlu0 %6132  ;;  %v5826_v46 = vmul.f32 %v9260_v42, %v12520_v60  ;;  %v8927_v60 = vld [vmem:[#allocation13 + $0x2] ss:$0 sm:$0xff] }
0x177d   : > { %9261 = vrcp.f32 %v6133_v10  ;;  %8443 = vmatmul.msk.f32.gmra.mxu0 %vm1652_vm8, %v6209_v50  ;;  %v5602_v43 = vadd.f32 %v8927_v60, %v5601_v54  ;;  %v5608_v55 = vadd.f32 %v8927_v60, %v5607_v45  ;;  %v5611_v20 = vadd.f32 %v8927_v60, %v5610_v56  ;;  %v5638_v10 = vld [vmem:[#allocation19 + $0xa8] sm:$0xff]  ;;  %v5636_v54 = vld [vmem:[#allocation19 + $0x98] sm:$0xff] }
0x177e   : > { %8412 = vmatmul.msk.f32.gmra.mxu3 %vm1370_vm2, %v5826_v46 }
0x1781   : > { %v5939_v25 = vpop.xlane.xlu1 %5938 }
0x1782   : > { %v5949_v52 = vsub.f32 %v12530_v53, %v5939_v25  ;;  %v5605_v53 = vadd.f32 %v8927_v60, %v5604_v40  ;;  %v5637_v25 = vld [vmem:[#allocation19 + $0xa0] sm:$0xff] }
0x1783   : > { %v9262_v2 = vpop.eup %9261  ;;  %v5633_v40 = vld [vmem:[#allocation19 + $0x80] sm:$0xff] }
0x1784   : > { %v6147_v34 = vmul.f32 %v9262_v2, %v12525_v29  ;;  %v5953_v49 = vmul.f32 1.442695, %v5949_v52  ;;  %v6136_v38 = vpop.xlane.xlu0 %6135 }
0x1785   : > { %9263 = vrcp.f32 %v6136_v38  ;;  %8444 = vmatmul.msk.f32.gmra.mxu0 %vm1652_vm8, %v6211_v59 }
0x1786   : > { %9265 = vpow2.f32 %v5953_v49  ;;  %8433 = vmatmul.msk.f32.vlgmr.msra.gmra.mxu3 %vm1370_vm2, %v6147_v34  ;;  %v5635_v34 = vld [vmem:[#allocation19 + $0x90] sm:$0xff] }
0x178b   : > { %v9264_v39 = vpop.eup %9263 }
0x178c   : > { %v12584_v63 = vpop.eup %9265  ;;  %v6148_v51 = vmul.f32 %v9264_v39, %v12532_v11  ;;  %v5634_v39 = vld [vmem:[#allocation19 + $0x88] sm:$0xff] }
0x178d   : > { %8457 = vmatmul.msk.f32.vlgmr.msrb.gmra.mxu0 %vm1569_vm7, %v5602_v43  ;;  %v5961_v29 = vsel %vm1370_vm2, %v12584_v63, 0.0 }
0x178e   : > { %5962 = vadd.xlane.f32.xlu1 %v5961_v29  ;;  %8434 = vmatmul.msk.f32.gmra.mxu3 %vm1370_vm2, %v6148_v51 }
0x1791   : > { %v6142_v9 = vpop.xlane.xlu0 %6141 }
0x1795   : > { %v6256_v28 = vpop.f32.mrf.mxu0  ;;  %8458 = vmatmul.msk.f32.gmra.mxu0 %vm1569_vm7, %v5605_v53 }
0x1796   : > { %v6266_v14 = vmul.f32 0.25, %v6256_v28 }
0x1798   : > { %v12593_v44 = vadd.f32 %v12453_v23, %v6266_v14  ;;  %v6481_v23 = vld [vmem:[#allocation16 + $0x130] sm:$0xff] }
0x1799   : > { %6533 = vmatpush.msrb.mxu3 %v6481_v23  ;;  %v5942_v37 = vpop.xlane.xlu0 %5941 }
0x179a   : > { %v6276_v11 = vsel %vm1370_vm2, %v12593_v44, -inf  ;;  %v5950_v2 = vsub.f32 %v12547_v15, %v5942_v37 }
0x179b   : > { %6277 = vmax.xlane.f32.xlu0 %v6276_v11  ;;  %6534 = vmatpush.msrb.mxu3 %v6479_v47  ;;  %v6492_v11 = vld [vmem:[#allocation17 + $0x4] sm:$0x3] }
0x179c   : > { %v5955_v38 = vmul.f32 1.442695, %v5950_v2  ;;  %v6506_v56 = vperm.slane %v6492_v11, 1 }
0x179d   : > { %8459 = vmatmul.msk.f32.gmra.mxu0 %vm1569_vm7, %v5608_v55  ;;  %6535 = vmatpush.msrb.mxu3 %v6477_v24 }
0x179f   : > { %6536 = vmatpush.msrb.mxu3 %v6475_v61 }
0x17a1   : > { %v5945_v48 = vpop.xlane.xlu0 %5944 }
0x17a5   : > { %8460 = vmatmul.msk.f32.gmra.mxu0 %vm1569_vm7, %v5611_v20 }
0x17a7   : > { %8873 = vrot.lane.b32.xlu1 %v12364_v57, %s10064_s5 }
0x17ad   : > { %v5948_v58 = vpop.xlane.xlu0 %5947 }
0x17ae   : > { %v5952_v59 = vsub.f32 %v12561_v31, %v5948_v58  ;;  %v5639_v31 = vld [vmem:[#allocation19 + $0xb0] sm:$0xff] }
0x17af   : > { %8868 = vrot.lane.b32.xlu0 %v12382_v8, %s10064_s5  ;;  %8878 = vrot.lane.b32.xlu1 %v12382_v8, %s10065_s23 }
0x17b0   : > { %v5959_v8 = vmul.f32 1.442695, %v5952_v59 }
0x17b3   : > { %v12630_v28 = vpop.f32.mrf.mxu3 }
0x17b5   : > { %v6139_v62 = vpop.xlane.xlu2 %6138 }
0x17b6   : > { %9267 = vrcp.f32 %v6139_v62 }
0x17b7   : > { %9269 = vrcp.f32 %v6142_v9 }
0x17b8   : > { %9271 = vpow2.f32 %v5959_v8 }
0x17b9   : > { %9273 = vpow2.f32 %v5955_v38 }
0x17bb   : > { %v12640_v47 = vpop.f32.mrf.mxu3 }
0x17bc   : > { %v9268_v7 = vpop.eup %9267 }
0x17bd   : > { %v6149_v33 = vmul.f32 %v9268_v7, %v12566_v26  ;;  %v9270_v21 = vpop.eup %9269 }
0x17be   : > { %v6150_v22 = vmul.f32 %v9270_v21, %v12542_v19  ;;  %v12611_v42 = vpop.eup %9271  ;;  %v5640_v19 = vld [vmem:[#allocation19 + $0xb8] sm:$0xff] }
0x17bf   : > { %8435 = vmatmul.msk.f32.gmra.mxu3 %vm1370_vm2, %v6149_v33  ;;  %v5970_v26 = vsel %vm1370_vm2, %v12611_v42, 0.0  ;;  %6453 = vmatpush.msrb.mxu1 %v5640_v19  ;;  %v12632_v14 = vpop.eup %9273 }
0x17c0   : > { %v6275_v15 = vpop.xlane.xlu0 %6274 }
0x17c1   : > { %6454 = vmatpush.msrb.mxu1 %v5639_v31 }
0x17c3   : > { %6455 = vmatpush.msrb.mxu1 %v5638_v10  ;;  %v12652_v33 = vpop.f32.mrf.mxu3 }
0x17c5   : > { %6456 = vmatpush.msrb.mxu1 %v5637_v25 }
0x17c7   : > { %8436 = vmatmul.msk.f32.gmra.mxu3 %vm1370_vm2, %v6150_v22  ;;  %6457 = vmatpush.msrb.mxu1 %v5636_v54 }
0x17c9   : > { %6458 = vmatpush.msrb.mxu1 %v5635_v34 }
0x17cb   : > { %6459 = vmatpush.msrb.mxu1 %v5634_v39 }
0x17cd   : > { %6460 = vmatpush.msrb.mxu1 %v5633_v40  ;;  %v6505_v40 = vperm.slane %v6492_v11, 0 }
0x17cf   : > { %8453 = vmatmul.msk.f32.vlgmr.msrb.gmra.mxu3 %vm1569_vm7, %v5602_v43 }
0x17d7   : > { %8454 = vmatmul.msk.f32.gmra.mxu3 %vm1569_vm7, %v5605_v53 }
0x17d9   : > { %5971 = vadd.xlane.f32.xlu0 %v5970_v26 }
0x17df   : > { %8455 = vmatmul.msk.f32.gmra.mxu3 %vm1569_vm7, %v5608_v55 }
0x17e7   : > { %8456 = vmatmul.msk.f32.gmra.mxu3 %vm1569_vm7, %v5611_v20 }
0x17fa   : > { %v6259_v50 = vpop.f32.mrf.mxu0 }
0x17fb   : > { %v6267_v46 = vmul.f32 0.25, %v6259_v50 }
0x17fd   : > { %v12619_v52 = vadd.f32 %v12460_v30, %v6267_v46  ;;  %v5951_v30 = vsub.f32 %v12552_v41, %v5945_v48  ;;  %v5964_v41 = vsel %vm1370_vm2, %v12632_v14, 0.0 }
0x17ff   : > { %v6279_v49 = vsel %vm1370_vm2, %v12619_v52, -inf  ;;  %v5957_v53 = vmul.f32 1.442695, %v5951_v30 }
0x1800   : > { %6280 = vmax.xlane.f32.xlu2 %v6279_v49 }
0x1801   : > { %9275 = vpow2.f32 %v5957_v53  ;;  %v5963_v24 = vpop.xlane.xlu1 %5962  ;;  %v12658_v10 = vpop.f32.mrf.mxu3 }
0x1802   : > { %v6262_v60 = vpop.f32.mrf.mxu0 }
0x1803   : > { %v6268_v43 = vmul.f32 0.25, %v6262_v60 }
0x1805   : > { %v12625_v51 = vadd.f32 %v12482_v4, %v6268_v43  ;;  %v6285_v4 = vsub.f32 %v12573_v16, %v6275_v15 }
0x1807   : > { %v6282_v29 = vsel %vm1370_vm2, %v12625_v51, -inf  ;;  %v6289_v20 = vmul.f32 1.442695, %v6285_v4  ;;  %v12638_v9 = vpop.eup %9275 }
0x1808   : > { %6283 = vmax.xlane.f32.xlu2 %v6282_v29 }
0x1809   : > { %v12662_v38 = vpop.f32.mrf.mxu3 }
0x180a   : > { %v6567_v45 = vpop.f32.mrf.mxu0 }
0x180b   : > { %v6568_v36 = vadd.f32 %v6567_v45, %v6506_v56 }
0x180e   : > { %v6278_v55 = vpop.xlane.xlu0 %6277 }
0x180f   : > { %v6286_v13 = vsub.f32 %v12593_v44, %v6278_v55  ;;  %v5967_v44 = vsel %vm1370_vm2, %v12638_v9, 0.0 }
0x1810   : > { %5965 = vadd.xlane.f32.xlu2 %v5964_v41 }
0x1811   : > { %v6291_v32 = vmul.f32 1.442695, %v6286_v13  ;;  %v12666_v60 = vpop.f32.mrf.mxu3 }
0x1812   : > { %v6570_v35 = vpop.f32.mrf.mxu0 }
0x1813   : > { %9277 = vpow2.f32 %v6291_v32  ;;  %v6571_v23 = vadd.f32 %v6570_v35, %v6506_v56 }
0x1814   : > { %9279 = vpow2.f32 %v6289_v20 }
0x1815   : > { %v12642_v16 = vpack.i.bf16 %v6568_v36, %v6571_v23  ;;  %9281 = vrcp.f32 %v5963_v24 }
0x1818   : > { %5968 = vadd.xlane.f32.xlu2 %v5967_v44 }
0x1819   : > { %v12646_v61 = vpop.eup %9277  ;;  %v8874_v48 = vpop.permute.xlu1 %8873 }
0x181a   : > { %v6573_v37 = vpop.f32.mrf.mxu0  ;;  %v6300_v62 = vsel %vm1370_vm2, %v12646_v61, 0.0  ;;  %v12650_v7 = vpop.eup %9279  ;;  %v8875_v46 = vunpack.i.l.bf16 %v8874_v48  ;;  %v8876_v54 = vunpack.i.h.bf16 %v8874_v48 }
0x181b   : > { %6301 = vadd.xlane.f32.xlu1 %v6300_v62  ;;  %v6297_v21 = vsel %vm1370_vm2, %v12650_v7, 0.0  ;;  %v6574_v8 = vadd.f32 %v6573_v37, %v6506_v56  ;;  %v9282_v50 = vpop.eup %9281 }
0x181c   : > { %v5977_v2 = vmul.f32 %v9282_v50, %v12584_v63 }
0x1820   : > { %6298 = vadd.xlane.f32.xlu2 %v6297_v21 }
0x1821   : > { %v8869_v58 = vpop.permute.xlu0 %8868  ;;  %v8879_v25 = vpop.permute.xlu1 %8878 }
0x1822   : > { %v8870_v22 = vunpack.i.l.bf16 %v8869_v58  ;;  %v6576_v59 = vpop.f32.mrf.mxu0  ;;  %v8871_v19 = vunpack.i.h.bf16 %v8869_v58  ;;  %v8880_v34 = vunpack.i.l.bf16 %v8879_v25  ;;  %v8881_v49 = vunpack.i.h.bf16 %v8879_v25 }
0x1823   : > { %v6577_v26 = vadd.f32 %v6576_v59, %v6506_v56 }
0x1824   : > { %6021 = vmatpush.msrb.mxu2 %v8870_v22 }
0x1825   : > { %6712 = vmatpush.msra.mxu1 %v6577_v26  ;;  %v12656_v31 = vpack.i.bf16 %v6574_v8, %v6577_v26 }
0x1826   : > { %6022 = vmatpush.msrb.mxu2 %v8871_v19 }
0x1827   : > { %6713 = vmatpush.msra.mxu1 %v6574_v8 }
0x1828   : > { %6023 = vmatpush.msrb.mxu2 %v8875_v46 }
0x1829   : > { %6714 = vmatpush.msra.mxu1 %v6571_v23 }
0x182a   : > { %6024 = vmatpush.msrb.mxu2 %v8876_v54 }
0x182b   : > { %8421 = vmatmul.msk.f32.vlgmr.msrb.gmra.mxu2 %vm1370_vm2, %v5977_v2  ;;  %6715 = vmatpush.msra.mxu1 %v6568_v36 }
0x182c   : > { %6353 = vmatpush.msra.mxu2 %v8880_v34 }
0x182e   : > { %6354 = vmatpush.msra.mxu2 %v8881_v49 }
0x1838   : > { %8883 = vrot.lane.b32.xlu2 %v12364_v57, %s10065_s23 }
0x1842   : > { %v12668_v39 = vpop.f32.mrf.mxu3 }
0x184a   : > { %v12670_v43 = vpop.f32.mrf.mxu3 }
0x184c   : > { %v5972_v44 = vpop.xlane.xlu0 %5971 }
0x1852   : > { %v6538_v63 = vpop.f32.mrf.mxu3 }
0x1853   : > { %v12680_v57 = vadd.f32 %v6538_v63, %v6505_v40 }
0x185a   : > { %v6541_v30 = vpop.f32.mrf.mxu3 }
0x185b   : > { %v12672_v15 = vadd.f32 %v6541_v30, %v6505_v40 }
0x185d   : > { %6739 = vrot.lane.b32.xlu1 %v12672_v15, %s10062_s1 }
0x1862   : > { %v6544_v29 = vpop.f32.mrf.mxu3 }
0x1863   : > { %v12706_v21 = vadd.f32 %v6544_v29, %v6505_v40 }
0x186a   : > { %v6547_v53 = vpop.f32.mrf.mxu3 }
0x186b   : > { %v12676_v45 = vadd.f32 %v6547_v53, %v6505_v40 }
0x186d   : > { %6743 = vrot.lane.b32.xlu1 %v12676_v45, %s10062_s1 }
0x1873   : > { %v6281_v4 = vpop.xlane.xlu2 %6280 }
0x1874   : > { %v6287_v55 = vsub.f32 %v12619_v52, %v6281_v4 }
0x1875   : > { %6737 = vrot.lane.b32.xlu1 %v12680_v57, %s10062_s1 }
0x1876   : > { %v6293_v11 = vmul.f32 1.442695, %v6287_v55 }
0x1878   : > { %9283 = vpow2.f32 %v6293_v11 }
0x187b   : > { %v6284_v56 = vpop.xlane.xlu2 %6283 }
0x187c   : > { %v6288_v13 = vsub.f32 %v12625_v51, %v6284_v56 }
0x187d   : > { %6731 = vrot.lane.b32.xlu1 %v12672_v15, %s10064_s5 }
0x187e   : > { %v12688_v41 = vpop.eup %9283  ;;  %v6295_v32 = vmul.f32 1.442695, %v6288_v13 }
0x187f   : > { %v6303_v20 = vsel %vm1370_vm2, %v12688_v41, 0.0 }
0x1880   : > { %9285 = vpow2.f32 %v6295_v32  ;;  %6304 = vadd.xlane.f32.xlu2 %v6303_v20 }
0x1883   : > { %v5966_v52 = vpop.xlane.xlu2 %5965 }
0x1884   : > { %9287 = vrcp.f32 %v5966_v52 }
0x1885   : > { %6907 = vrot.lane.b32.xlu1 %v12680_v57, %s10060_s13 }
0x1886   : > { %v12694_v35 = vpop.eup %9285 }
0x1887   : > { %v6306_v51 = vsel %vm1370_vm2, %v12694_v35, 0.0 }
0x1888   : > { %6307 = vadd.xlane.f32.xlu0 %v6306_v51 }
0x188a   : > { %v9288_v36 = vpop.eup %9287 }
0x188b   : > { %v5969_v23 = vpop.xlane.xlu2 %5968  ;;  %v5978_v24 = vmul.f32 %v9288_v36, %v12632_v14 }
0x188c   : > { %9289 = vrcp.f32 %v5969_v23 }
0x188d   : > { %8422 = vmatmul.msk.f32.gmra.mxu2 %vm1370_vm2, %v5978_v24  ;;  %7079 = vrot.lane.b32.xlu1 %v12676_v45, %s10063_s3  ;;  %9291 = vrcp.f32 %v5972_v44 }
0x188e   : > { %v6302_v8 = vpop.xlane.xlu1 %6301 }
0x1892   : > { %v9290_v37 = vpop.eup %9289 }
0x1893   : > { %v6299_v62 = vpop.xlane.xlu2 %6298  ;;  %v5979_v48 = vmul.f32 %v9290_v37, %v12638_v9  ;;  %v9292_v14 = vpop.eup %9291 }
0x1894   : > { %9293 = vrcp.f32 %v6299_v62  ;;  %v5980_v22 = vmul.f32 %v9292_v14, %v12611_v42 }
0x1895   : > { %8423 = vmatmul.msk.f32.gmra.mxu2 %vm1370_vm2, %v5979_v48  ;;  %6735 = vrot.lane.b32.xlu1 %v12676_v45, %s10064_s5  ;;  %9295 = vrcp.f32 %v6302_v8 }
0x1898   : > { %6741 = vrot.lane.b32.xlu2 %v12706_v21, %s10062_s1 }
0x189a   : > { %v9294_v26 = vpop.eup %9293 }
0x189b   : > { %v8884_v58 = vpop.permute.xlu2 %8883  ;;  %v6313_v42 = vmul.f32 %v9294_v26, %v12650_v7  ;;  %v9296_v19 = vpop.eup %9295 }
0x189c   : > { %v8885_v59 = vunpack.i.l.bf16 %v8884_v58  ;;  %6587 = vrot.lane.b32.xlu0 %v12706_v21, %s10059_s12  ;;  %v8886_v9 = vunpack.i.h.bf16 %v8884_v58  ;;  %v6314_v50 = vmul.f32 %v9296_v19, %v12646_v61 }
0x189d   : > { %8424 = vmatmul.msk.f32.gmra.mxu2 %vm1370_vm2, %v5980_v22  ;;  %7065 = vrot.lane.b32.xlu1 %v12680_v57, %s10065_s23 }
0x189e   : > { %6355 = vmatpush.msra.mxu2 %v8885_v59 }
0x18a0   : > { %6356 = vmatpush.msra.mxu2 %v8886_v9  ;;  %6733 = vrot.lane.b32.xlu2 %v12706_v21, %s10064_s5 }
0x18a4   : > { %6585 = vrot.lane.b32.xlu0 %v12672_v15, %s10059_s12 }
0x18a5   : > { %8445 = vmatmul.msk.f32.vlgmr.msra.gmra.mxu2 %vm1370_vm2, %v6313_v42  ;;  %6903 = vrot.lane.b32.xlu1 %v12706_v21, %s10061_s30 }
0x18a8   : > { %6911 = vrot.lane.b32.xlu2 %v12706_v21, %s10060_s13 }
0x18ac   : > { %6589 = vrot.lane.b32.xlu0 %v12676_v45, %s10059_s12 }
0x18ad   : > { %8446 = vmatmul.msk.f32.gmra.mxu2 %vm1370_vm2, %v6314_v50  ;;  %7071 = vrot.lane.b32.xlu1 %v12676_v45, %s10065_s23 }
0x18ae   : > { %v6026_v7 = vpop.f32.mrf.mxu2 }
0x18b0   : > { %6909 = vrot.lane.b32.xlu2 %v12672_v15, %s10060_s13 }
0x18b4   : > { %6583 = vrot.lane.b32.xlu0 %v12680_v57, %s10059_s12 }
0x18b5   : > { %6374 = vrot.lane.b32.xlu1 %v6026_v7, %s10063_s3 }
0x18b8   : > { %7073 = vrot.lane.b32.xlu2 %v12680_v57, %s10063_s3 }
0x18bc   : > { %6729 = vrot.lane.b32.xlu0 %v12680_v57, %s10064_s5 }
0x18c0   : > { %6901 = vrot.lane.b32.xlu2 %v12672_v15, %s10061_s30 }
0x18c4   : > { %7077 = vrot.lane.b32.xlu0 %v12706_v21, %s10063_s3 }
0x18c8   : > { %7069 = vrot.lane.b32.xlu2 %v12706_v21, %s10065_s23 }
0x18cc   : > { %6913 = vrot.lane.b32.xlu0 %v12676_v45, %s10060_s13 }
0x18cf   : > { %v6740_v61 = vpop.permute.xlu1 %6739 }
0x18d0   : > { %6390 = vrot.lane.b32.xlu2 %v12662_v38, %s10060_s13 }
0x18d4   : > { %7075 = vrot.lane.b32.xlu0 %v12672_v15, %s10063_s3 }
0x18dc   : > { %6899 = vrot.lane.b32.xlu0 %v12680_v57, %s10061_s30 }
0x18df   : > { %v6744_v46 = vpop.permute.xlu1 %6743 }
0x18e0   : > { %8473 = vmatpush.xpose.msk.msra.mxu3 %vm1652_vm8, %v6744_v46 }
0x18e4   : > { %7067 = vrot.lane.b32.xlu0 %v12672_v15, %s10065_s23 }
0x18e7   : > { %v6738_v25 = vpop.permute.xlu1 %6737 }
0x18ec   : > { %6905 = vrot.lane.b32.xlu0 %v12676_v45, %s10061_s30 }
0x18ef   : > { %v6732_v54 = vpop.permute.xlu1 %6731 }
0x18f3   : > { %v6305_v2 = vpop.xlane.xlu2 %6304 }
0x18f4   : > { %9297 = vrcp.f32 %v6305_v2 }
0x18f7   : > { %v6908_v49 = vpop.permute.xlu1 %6907 }
0x18fa   : > { %v9298_v34 = vpop.eup %9297 }
0x18fb   : > { %v6308_v38 = vpop.xlane.xlu0 %6307  ;;  %v6742_v63 = vpop.permute.xlu2 %6741  ;;  %v6315_v40 = vmul.f32 %v9298_v34, %v12688_v41 }
0x18fc   : > { %9299 = vrcp.f32 %v6308_v38  ;;  %8474 = vmatpush.xpose.msk.msra.mxu3 %vm1652_vm8, %v6742_v63 }
0x18fd   : > { %8447 = vmatmul.msk.f32.gmra.mxu2 %vm1370_vm2, %v6315_v40 }
0x18ff   : > { %v7080_v53 = vpop.permute.xlu1 %7079 }
0x1900   : > { %8475 = vmatpush.xpose.msk.msra.mxu3 %vm1652_vm8, %v6740_v61 }
0x1902   : > { %v9300_v30 = vpop.eup %9299 }
0x1903   : > { %v6316_v29 = vmul.f32 %v9300_v30, %v12694_v35  ;;  %v6734_v52 = vpop.permute.xlu2 %6733 }
0x1904   : > { %8476 = vmatpush.xpose.msk.msra.mxu3 %vm1652_vm8, %v6738_v25 }
0x1905   : > { %8448 = vmatmul.msk.f32.gmra.mxu2 %vm1370_vm2, %v6316_v29 }
0x1908   : > { %8497 = vmatpush.xpose.msk.msrb.mxu3 %vm1652_vm8, %v7080_v53 }
0x190b   : > { %v6912_v51 = vpop.permute.xlu2 %6911 }
0x190e   : > { %v6588_v4 = vpop.permute.xlu0 %6587 }
0x1910   : > { %v6029_v55 = vpop.f32.mrf.mxu2 }
0x1911   : > { %6376 = vrot.lane.b32.xlu2 %v6029_v55, %s10063_s3 }
0x1916   : > { %v6586_v11 = vpop.permute.xlu0 %6585 }
0x1918   : > { %v6032_v56 = vpop.f32.mrf.mxu2 }
0x1919   : > { %6392 = vrot.lane.b32.xlu2 %v12666_v60, %s10060_s13  ;;  %6378 = vrot.lane.b32.xlu1 %v6032_v56, %s10063_s3  ;;  %v9438_v56 = vld [vmem:[%s13264_s27 + $0x8] sm:$0xff] }
0x191e   : > { %v6590_v13 = vpop.permute.xlu0 %6589 }
0x191f   : > { %8461 = vmatpush.xpose.msk.msrb.mxu2 %vm1652_vm8, %v6590_v13 }
0x1920   : > { %v6035_v41 = vpop.f32.mrf.mxu2 }
0x1923   : > { %8462 = vmatpush.xpose.msk.msrb.mxu2 %vm1652_vm8, %v6588_v4 }
0x1926   : > { %v6584_v32 = vpop.permute.xlu0 %6583 }
0x1927   : > { %8463 = vmatpush.xpose.msk.msrb.mxu2 %vm1652_vm8, %v6586_v11 }
0x1928   : > { %v6358_v20 = vpop.f32.mrf.mxu2 }
0x1929   : > { %6406 = vrot.lane.b32.xlu0 %v6358_v20, %s10062_s1 }
0x192b   : > { %8464 = vmatpush.xpose.msk.msrb.mxu2 %vm1652_vm8, %v6584_v32 }
0x192e   : > { %8465 = vmatmul.msk.f32.vlgmr.msrb.gmra.mxu2 %vm1652_vm8, %v12680_v57  ;;  %v6730_v60 = vpop.permute.xlu0 %6729 }
0x192f   : > { %8477 = vmatmul.msk.f32.vlgmr.msra.gmra.mxu3 %vm1652_vm8, %v6730_v60 }
0x1930   : > { %v6361_v35 = vpop.f32.mrf.mxu2 }
0x1931   : > { %6408 = vrot.lane.b32.xlu2 %v6361_v35, %s10062_s1  ;;  %6394 = vrot.lane.b32.xlu0 %v12668_v39, %s10060_s13  ;;  %v6910_v39 = vpop.permute.xlu2 %6909 }
0x1936   : > { %8466 = vmatmul.msk.f32.gmra.mxu2 %vm1652_vm8, %v12672_v15  ;;  %v7078_v36 = vpop.permute.xlu0 %7077  ;;  %v6736_v15 = vpop.permute.xlu1 %6735 }
0x1937   : > { %8478 = vmatmul.msk.f32.gmra.mxu3 %vm1652_vm8, %v6732_v54 }
0x1938   : > { %8498 = vmatpush.xpose.msk.msrb.mxu3 %vm1652_vm8, %v7078_v36 }
0x1939   : > { %8888 = vrot.lane.b32.xlu0 %v12656_v31, %s10064_s5  ;;  %v7074_v24 = vpop.permute.xlu2 %7073 }
0x193e   : > { %8467 = vmatmul.msk.f32.gmra.mxu2 %vm1652_vm8, %v12706_v21  ;;  %v6914_v57 = vpop.permute.xlu0 %6913  ;;  %v7066_v44 = vpop.permute.xlu1 %7065 }
0x193f   : > { %8479 = vmatmul.msk.f32.gmra.mxu3 %vm1652_vm8, %v6734_v52  ;;  %8485 = vmatpush.xpose.msk.msra.mxu2 %vm1652_vm8, %v6914_v57  ;;  %v9439_v57 = vld [vmem:[%s13264_s27 + $0x10] sm:$0xff] }
0x1941   : > { %v6902_v62 = vpop.permute.xlu2 %6901 }
0x1943   : > { %8486 = vmatpush.xpose.msk.msra.mxu2 %vm1652_vm8, %v6912_v51 }
0x1946   : > { %8468 = vmatmul.msk.f32.gmra.mxu2 %vm1652_vm8, %v12676_v45  ;;  %v7076_v23 = vpop.permute.xlu0 %7075  ;;  %v6904_v48 = vpop.permute.xlu1 %6903 }
0x1947   : > { %8480 = vmatmul.msk.f32.gmra.mxu3 %vm1652_vm8, %v6736_v15  ;;  %8487 = vmatpush.xpose.msk.msra.mxu2 %vm1652_vm8, %v6910_v39 }
0x1948   : > { %8499 = vmatpush.xpose.msk.msrb.mxu3 %vm1652_vm8, %v7076_v23 }
0x1949   : > { %v7070_v21 = vpop.permute.xlu2 %7069 }
0x194b   : > { %8488 = vmatpush.xpose.msk.msra.mxu2 %vm1652_vm8, %v6908_v49 }
0x194c   : > { %8500 = vmatpush.xpose.msk.msrb.mxu3 %vm1652_vm8, %v7074_v24 }
0x194e   : > { %v6900_v37 = vpop.permute.xlu0 %6899  ;;  %v7072_v14 = vpop.permute.xlu1 %7071 }
0x194f   : > { %8489 = vmatmul.msk.f32.vlgmr.msra.gmra.mxu2 %vm1652_vm8, %v6900_v37  ;;  %8501 = vmatmul.msk.f32.vlgmr.msrb.gmra.mxu3 %vm1652_vm8, %v7066_v44 }
0x1951   : > { %v6391_v59 = vpop.permute.xlu2 %6390 }
0x1956   : > { %v7068_v45 = vpop.permute.xlu0 %7067  ;;  %v6375_v26 = vpop.permute.xlu1 %6374 }
0x1957   : > { %8490 = vmatmul.msk.f32.gmra.mxu2 %vm1652_vm8, %v6902_v62  ;;  %8502 = vmatmul.msk.f32.gmra.mxu3 %vm1652_vm8, %v7068_v45  ;;  %v6418_v19 = vsel %vm1652_vm8, %v12630_v28, %v6375_v26 }
0x1958   : > { %v6422_v50 = vsel %vm1370_vm2, %v6418_v19, %v6391_v59 }
0x195e   : > { %v6906_v58 = vpop.permute.xlu0 %6905 }
0x195f   : > { %8491 = vmatmul.msk.f32.gmra.mxu2 %vm1652_vm8, %v6904_v48  ;;  %8503 = vmatmul.msk.f32.gmra.mxu3 %vm1652_vm8, %v7070_v21 }
0x1967   : > { %8492 = vmatmul.msk.f32.gmra.mxu2 %vm1652_vm8, %v6906_v58  ;;  %8504 = vmatmul.msk.f32.gmra.mxu3 %vm1652_vm8, %v7072_v14  ;;  %v9440_v14 = vld [vmem:[%s13264_s27 + $0x18] sm:$0xff] }
0x196b   : > { %v6377_v8 = vpop.permute.xlu2 %6376 }
0x1973   : > { %v6393_v42 = vpop.permute.xlu2 %6392 }
0x1980   : > { %v6364_v22 = vpop.f32.mrf.mxu2 }
0x1981   : > { %6410 = vrot.lane.b32.xlu2 %v6364_v22, %s10062_s1 }
0x1988   : > { %v6367_v9 = vpop.f32.mrf.mxu2 }
0x1989   : > { %6380 = vrot.lane.b32.xlu2 %v6035_v41, %s10063_s3  ;;  %6412 = vrot.lane.b32.xlu1 %v6367_v9, %s10062_s1 }
0x198b   : > { %v6409_v46 = vpop.permute.xlu2 %6408 }
0x1991   : > { %6396 = vrot.lane.b32.xlu2 %v12670_v43, %s10060_s13  ;;  %8898 = vrot.lane.b32.xlu1 %v12656_v31, %s10061_s30  ;;  %v6419_v43 = vsel %vm1652_vm8, %v12640_v47, %v6377_v8  ;;  %v9437_v47 = vld [vmem:[%s13264_s27] sm:$0xff] }
0x1992   : > { %v6423_v25 = vsel %vm1370_vm2, %v6419_v43, %v6393_v42 }
0x1993   : > { %v6427_v2 = vsel %vm2349_vm9, %v6423_v25, %v6409_v46 }
0x1999   : > { %8893 = vrot.lane.b32.xlu2 %v12642_v16, %s10064_s5 }
0x199b   : > { %v6407_v7 = vpop.permute.xlu0 %6406 }
0x199c   : > { %v6426_v61 = vsel %vm2349_vm9, %v6422_v50, %v6407_v7 }
0x199d   : > { %8449 = vmatmul.msk.f32.vlgmr.msrb.gmra.mxu1 %vm1569_vm7, %v6426_v61  ;;  %v6379_v61 = vpop.permute.xlu1 %6378 }
0x199e   : > { %v6420_v25 = vsel %vm1652_vm8, %v12652_v33, %v6379_v61 }
0x19a3   : > { %v12826_v54 = vpop.permute.xlu0 %6394 }
0x19a5   : > { %8450 = vmatmul.msk.f32.gmra.mxu1 %vm1569_vm7, %v6427_v2 }
0x19ab   : > { %v8889_v28 = vpop.permute.xlu0 %8888 }
0x19ac   : > { %v8890_v34 = vunpack.i.l.bf16 %v8889_v28  ;;  %v8891_v49 = vunpack.i.h.bf16 %v8889_v28 }
0x19ae   : > { %6882 = vmatpush.msra.mxu0 %v8890_v34  ;;  %v6424_v34 = vsel %vm1370_vm2, %v6420_v25, %v12826_v54 }
0x19b0   : > { %6883 = vmatpush.msra.mxu0 %v8891_v49 }
0x19b1   : > { %v6624_v38 = vpop.f32.mrf.mxu2 }
0x19b2   : > { %v6778_v63 = vpop.f32.mrf.mxu3  ;;  %v6636_v53 = vmul.f32 0.25, %v6624_v38 }
0x19b3   : > { %v6790_v40 = vmul.f32 0.25, %v6778_v63 }
0x19b4   : > { %v12842_v41 = vadd.f32 %v9437_v47, %v6636_v53 }
0x19b5   : > { %v12833_v30 = vadd.f32 %v9437_v47, %v6790_v40 }
0x19b6   : > { %v6644_v60 = vsel %vm1370_vm2, %v12842_v41, -inf }
0x19b7   : > { %v6798_v29 = vsel %vm1370_vm2, %v12833_v30, -inf }
0x19b8   : > { %6799 = vmax.xlane.f32.xlu0 %v6798_v29 }
0x19b9   : > { %v6627_v4 = vpop.f32.mrf.mxu2 }
0x19ba   : > { %v6637_v55 = vmul.f32 0.25, %v6627_v4  ;;  %v6781_v11 = vpop.f32.mrf.mxu3 }
0x19bb   : > { %v6791_v20 = vmul.f32 0.25, %v6781_v11 }
0x19bc   : > { %v12840_v13 = vadd.f32 %v9438_v56, %v6637_v55 }
0x19bd   : > { %v12853_v15 = vadd.f32 %v9438_v56, %v6791_v20 }
0x19be   : > { %v6647_v32 = vsel %vm1370_vm2, %v12840_v13, -inf }
0x19bf   : > { %6648 = vmax.xlane.f32.xlu1 %v6647_v32  ;;  %v6801_v62 = vsel %vm1370_vm2, %v12853_v15, -inf }
0x19c1   : > { %v6630_v52 = vpop.f32.mrf.mxu2 }
0x19c2   : > { %v6638_v35 = vmul.f32 0.25, %v6630_v52  ;;  %6645 = vmax.xlane.f32.xlu2 %v6644_v60  ;;  %v6784_v51 = vpop.f32.mrf.mxu3 }
0x19c3   : > { %v6792_v36 = vmul.f32 0.25, %v6784_v51 }
0x19c4   : > { %v12851_v39 = vadd.f32 %v9439_v57, %v6638_v35 }
0x19c5   : > { %v12855_v23 = vadd.f32 %v9439_v57, %v6792_v36 }
0x19c6   : > { %v6650_v24 = vsel %vm1370_vm2, %v12851_v39, -inf }
0x19c7   : > { %6651 = vmax.xlane.f32.xlu0 %v6650_v24  ;;  %v6804_v44 = vsel %vm1370_vm2, %v12855_v23, -inf }
0x19c8   : > { %6805 = vmax.xlane.f32.xlu1 %v6804_v44 }
0x19c9   : > { %v6633_v37 = vpop.f32.mrf.mxu2 }
0x19ca   : > { %v6639_v45 = vmul.f32 0.25, %v6633_v37  ;;  %6802 = vmax.xlane.f32.xlu2 %v6801_v62  ;;  %v6787_v48 = vpop.f32.mrf.mxu3 }
0x19cb   : > { %v6793_v21 = vmul.f32 0.25, %v6787_v48 }
0x19cc   : > { %v12866_v58 = vadd.f32 %v9440_v14, %v6639_v45 }
0x19cd   : > { %v12868_v22 = vadd.f32 %v9440_v14, %v6793_v21 }
0x19ce   : > { %v6653_v9 = vsel %vm1370_vm2, %v12866_v58, -inf }
0x19cf   : > { %v6807_v59 = vsel %vm1370_vm2, %v12868_v22, -inf }
0x19d0   : > { %6808 = vmax.xlane.f32.xlu0 %v6807_v59 }
0x19d2   : > { %6654 = vmax.xlane.f32.xlu2 %v6653_v9  ;;  %v6948_v8 = vpop.f32.mrf.mxu2  ;;  %v7114_v26 = vpop.f32.mrf.mxu3 }
0x19d3   : > { %v6960_v42 = vmul.f32 0.25, %v6948_v8  ;;  %v7126_v19 = vmul.f32 0.25, %v7114_v26 }
0x19d5   : > { %v12874_v50 = vadd.f32 %v9437_v47, %v6960_v42  ;;  %v12876_v7 = vadd.f32 %v9437_v47, %v7126_v19 }
0x19d7   : > { %v7134_v46 = vsel %vm1370_vm2, %v12876_v7, -inf  ;;  %v6968_v43 = vsel %vm1370_vm2, %v12874_v50, -inf }
0x19d8   : > { %7135 = vmax.xlane.f32.xlu1 %v7134_v46  ;;  %6969 = vmax.xlane.f32.xlu0 %v6968_v43 }
0x19da   : > { %v6951_v2 = vpop.f32.mrf.mxu2  ;;  %v7117_v28 = vpop.f32.mrf.mxu3 }
0x19db   : > { %v6961_v49 = vmul.f32 0.25, %v6951_v2  ;;  %v7127_v38 = vmul.f32 0.25, %v7117_v28  ;;  %v6411_v63 = vpop.permute.xlu2 %6410 }
0x19dc   : > { %v6428_v40 = vsel %vm2349_vm9, %v6424_v34, %v6411_v63 }
0x19dd   : > { %v12887_v47 = vadd.f32 %v9438_v56, %v6961_v49  ;;  %v12889_v29 = vadd.f32 %v9438_v56, %v7127_v38  ;;  %8451 = vmatmul.msk.f32.gmra.mxu1 %vm1569_vm7, %v6428_v40 }
0x19df   : > { %v6971_v53 = vsel %vm1370_vm2, %v12887_v47, -inf  ;;  %v7137_v33 = vsel %vm1370_vm2, %v12889_v29, -inf }
0x19e0   : > { %6972 = vmax.xlane.f32.xlu2 %v6971_v53  ;;  %7138 = vmax.xlane.f32.xlu0 %v7137_v33 }
0x19e2   : > { %v6954_v54 = vpop.f32.mrf.mxu2  ;;  %v7120_v4 = vpop.f32.mrf.mxu3 }
0x19e3   : > { %v6962_v55 = vmul.f32 0.25, %v6954_v54  ;;  %v7128_v11 = vmul.f32 0.25, %v7120_v4  ;;  %v6381_v32 = vpop.permute.xlu2 %6380 }
0x19e4   : > { %v6421_v9 = vsel %vm1652_vm8, %v12658_v10, %v6381_v32 }
0x19e5   : > { %v12896_v20 = vadd.f32 %v9439_v57, %v6962_v55  ;;  %v12898_v52 = vadd.f32 %v9439_v57, %v7128_v11 }
0x19e7   : > { %v6974_v56 = vsel %vm1370_vm2, %v12896_v20, -inf  ;;  %v7140_v60 = vsel %vm1370_vm2, %v12898_v52, -inf }
0x19e8   : > { %6975 = vmax.xlane.f32.xlu1 %v6974_v56  ;;  %7141 = vmax.xlane.f32.xlu0 %v7140_v60 }
0x19ea   : > { %v6957_v35 = vpop.f32.mrf.mxu2  ;;  %v7123_v51 = vpop.f32.mrf.mxu3 }
0x19eb   : > { %v6963_v36 = vmul.f32 0.25, %v6957_v35  ;;  %v7129_v24 = vmul.f32 0.25, %v7123_v51  ;;  %v6397_v44 = vpop.permute.xlu2 %6396 }
0x19ec   : > { %v6425_v8 = vsel %vm1370_vm2, %v6421_v9, %v6397_v44 }
0x19ed   : > { %v12904_v37 = vadd.f32 %v9440_v14, %v6963_v36  ;;  %v12906_v62 = vadd.f32 %v9440_v14, %v7129_v24 }
0x19ef   : > { %v7143_v57 = vsel %vm1370_vm2, %v12906_v62, -inf  ;;  %v6977_v45 = vsel %vm1370_vm2, %v12904_v37, -inf }
0x19f0   : > { %7144 = vmax.xlane.f32.xlu0 %v7143_v57  ;;  %6978 = vmax.xlane.f32.xlu1 %v6977_v45 }
0x19f3   : > { %v8894_v48 = vpop.permute.xlu2 %8893 }
0x19f4   : > { %v8895_v21 = vunpack.i.l.bf16 %v8894_v48  ;;  %v8896_v59 = vunpack.i.h.bf16 %v8894_v48 }
0x19f6   : > { %6884 = vmatpush.msra.mxu0 %v8895_v21 }
0x19f8   : > { %6885 = vmatpush.msra.mxu0 %v8896_v59 }
0x19fb   : > { %v6413_v14 = vpop.permute.xlu1 %6412 }
0x19fc   : > { %v6429_v26 = vsel %vm2349_vm9, %v6425_v8, %v6413_v14 }
0x19fd   : > { %8452 = vmatmul.msk.f32.gmra.mxu1 %vm1569_vm7, %v6429_v26 }
0x1a03   : > { %v8899_v42 = vpop.permute.xlu1 %8898 }
0x1a04   : > { %v8900_v19 = vunpack.i.l.bf16 %v8899_v42  ;;  %v8901_v61 = vunpack.i.h.bf16 %v8899_v42 }
0x1a06   : > { %7048 = vmatpush.msrb.mxu1 %v8900_v19 }
0x1a08   : > { %7049 = vmatpush.msrb.mxu1 %v8901_v61 }
0x1a2b   : > { %v6800_v46 = vpop.xlane.xlu0 %6799 }
0x1a2c   : > { %v6810_v43 = vsub.f32 %v12833_v30, %v6800_v46 }
0x1a2e   : > { %v6814_v25 = vmul.f32 1.442695, %v6810_v43 }
0x1a30   : > { %9301 = vpow2.f32 %v6814_v25 }
0x1a32   : > { %v6649_v2 = vpop.xlane.xlu1 %6648 }
0x1a33   : > { %v6657_v38 = vsub.f32 %v12840_v13, %v6649_v2 }
0x1a35   : > { %v6646_v28 = vpop.xlane.xlu2 %6645  ;;  %v6662_v53 = vmul.f32 1.442695, %v6657_v38 }
0x1a36   : > { %v12918_v10 = vpop.eup %9301  ;;  %v6656_v34 = vsub.f32 %v12842_v41, %v6646_v28 }
0x1a37   : > { %v6822_v49 = vsel %vm1370_vm2, %v12918_v10, 0.0 }
0x1a38   : > { %v6660_v63 = vmul.f32 1.442695, %v6656_v34  ;;  %6823 = vadd.xlane.f32.xlu0 %v6822_v49 }
0x1a3a   : > { %9303 = vpow2.f32 %v6660_v63  ;;  %v6652_v40 = vpop.xlane.xlu0 %6651 }
0x1a3b   : > { %9305 = vpow2.f32 %v6662_v53  ;;  %v6658_v4 = vsub.f32 %v12851_v39, %v6652_v40 }
0x1a3d   : > { %v6803_v33 = vpop.xlane.xlu2 %6802  ;;  %v6664_v11 = vmul.f32 1.442695, %v6658_v4 }
0x1a3e   : > { %v6811_v30 = vsub.f32 %v12853_v15, %v6803_v33 }
0x1a40   : > { %v12925_v54 = vpop.eup %9303  ;;  %v6816_v55 = vmul.f32 1.442695, %v6811_v30 }
0x1a41   : > { %v6668_v41 = vsel %vm1370_vm2, %v12925_v54, 0.0  ;;  %v12930_v56 = vpop.eup %9305 }
0x1a42   : > { %9307 = vpow2.f32 %v6816_v55  ;;  %6669 = vadd.xlane.f32.xlu2 %v6668_v41  ;;  %v6671_v39 = vsel %vm1370_vm2, %v12930_v56, 0.0 }
0x1a43   : > { %v6809_v13 = vpop.xlane.xlu0 %6808  ;;  %9309 = vpow2.f32 %v6664_v11 }
0x1a44   : > { %v6813_v8 = vsub.f32 %v12868_v22, %v6809_v13 }
0x1a45   : > { %v6655_v32 = vpop.xlane.xlu2 %6654 }
0x1a46   : > { %v6659_v60 = vsub.f32 %v12866_v58, %v6655_v32  ;;  %v6820_v14 = vmul.f32 1.442695, %v6813_v8 }
0x1a48   : > { %v12933_v35 = vpop.eup %9307  ;;  %v6666_v15 = vmul.f32 1.442695, %v6659_v60 }
0x1a49   : > { %v6825_v51 = vsel %vm1370_vm2, %v12933_v35, 0.0  ;;  %v12942_v58 = vpop.eup %9309 }
0x1a4a   : > { %9311 = vpow2.f32 %v6666_v15  ;;  %6672 = vadd.xlane.f32.xlu2 %v6671_v39  ;;  %6826 = vadd.xlane.f32.xlu1 %v6825_v51  ;;  %v6674_v48 = vsel %vm1370_vm2, %v12942_v58, 0.0 }
0x1a4b   : > { %v6970_v36 = vpop.xlane.xlu0 %6969 }
0x1a4c   : > { %v6980_v24 = vsub.f32 %v12874_v50, %v6970_v36  ;;  %8903 = vrot.lane.b32.xlu0 %v12656_v31, %s10065_s23  ;;  %v6806_v31 = vpop.xlane.xlu1 %6805 }
0x1a4d   : > { %v6812_v59 = vsub.f32 %v12855_v23, %v6806_v31 }
0x1a4e   : > { %v6984_v44 = vmul.f32 1.442695, %v6980_v24 }
0x1a4f   : > { %v6818_v9 = vmul.f32 1.442695, %v6812_v59 }
0x1a50   : > { %v12944_v57 = vpop.eup %9311  ;;  %9313 = vpow2.f32 %v6984_v44 }
0x1a51   : > { %v6677_v45 = vsel %vm1370_vm2, %v12944_v57, 0.0  ;;  %9315 = vpow2.f32 %v6818_v9 }
0x1a52   : > { %6678 = vadd.xlane.f32.xlu1 %v6677_v45  ;;  %6675 = vadd.xlane.f32.xlu2 %v6674_v48  ;;  %9317 = vpow2.f32 %v6820_v14 }
0x1a53   : > { %v7139_v61 = vpop.xlane.xlu0 %7138  ;;  %v6973_v43 = vpop.xlane.xlu2 %6972 }
0x1a54   : > { %v7136_v26 = vpop.xlane.xlu1 %7135  ;;  %v6981_v22 = vsub.f32 %v12887_v47, %v6973_v43  ;;  %v7147_v30 = vsub.f32 %v12889_v29, %v7139_v61 }
0x1a55   : > { %v7146_v19 = vsub.f32 %v12876_v7, %v7136_v26 }
0x1a56   : > { %v12950_v21 = vpop.eup %9313  ;;  %v7152_v55 = vmul.f32 1.442695, %v7147_v30 }
0x1a57   : > { %v6992_v50 = vsel %vm1370_vm2, %v12950_v21, 0.0  ;;  %v12958_v42 = vpop.eup %9315  ;;  %v7150_v46 = vmul.f32 1.442695, %v7146_v19 }
0x1a58   : > { %v6828_v23 = vsel %vm1370_vm2, %v12958_v42, 0.0  ;;  %v12965_v25 = vpop.eup %9317 }
0x1a59   : > { %9319 = vpow2.f32 %v7150_v46  ;;  %v6831_v2 = vsel %vm1370_vm2, %v12965_v25, 0.0 }
0x1a5a   : > { %6993 = vadd.xlane.f32.xlu1 %v6992_v50 }
0x1a5b   : > { %v7142_v34 = vpop.xlane.xlu0 %7141 }
0x1a5c   : > { %v6976_v28 = vpop.xlane.xlu1 %6975  ;;  %v7148_v38 = vsub.f32 %v12898_v52, %v7142_v34 }
0x1a5d   : > { %v6982_v7 = vsub.f32 %v12896_v20, %v6976_v28 }
0x1a5e   : > { %v7154_v47 = vmul.f32 1.442695, %v7148_v38 }
0x1a5f   : > { %v12971_v49 = vpop.eup %9319  ;;  %v6988_v63 = vmul.f32 1.442695, %v6982_v7 }
0x1a60   : > { %v7158_v40 = vsel %vm1370_vm2, %v12971_v49, 0.0 }
0x1a63   : > { %v7145_v13 = vpop.xlane.xlu0 %7144 }
0x1a64   : > { %v6979_v53 = vpop.xlane.xlu1 %6978  ;;  %v7149_v29 = vsub.f32 %v12906_v62, %v7145_v13 }
0x1a65   : > { %v6983_v20 = vsub.f32 %v12904_v37, %v6979_v53 }
0x1a66   : > { %v7156_v60 = vmul.f32 1.442695, %v7149_v29 }
0x1a67   : > { %v6990_v41 = vmul.f32 1.442695, %v6983_v20 }
0x1a6a   : > { %8908 = vrot.lane.b32.xlu2 %v12642_v16, %s10061_s30 }
0x1a73   : > { %8913 = vrot.lane.b32.xlu1 %v12642_v16, %s10065_s23  ;;  %v6986_v16 = vmul.f32 1.442695, %v6981_v22 }
0x1a75   : > { %9321 = vpow2.f32 %v6986_v16 }
0x1a76   : > { %6829 = vadd.xlane.f32.xlu0 %v6828_v23  ;;  %9323 = vpow2.f32 %v6988_v63 }
0x1a77   : > { %9325 = vpow2.f32 %v7154_v47 }
0x1a78   : > { %9327 = vpow2.f32 %v7152_v55 }
0x1a79   : > { %9329 = vpow2.f32 %v6990_v41 }
0x1a7a   : > { %9331 = vpow2.f32 %v7156_v60 }
0x1a7b   : > { %v12976_v33 = vpop.eup %9321 }
0x1a7c   : > { %v6995_v4 = vsel %vm1370_vm2, %v12976_v33, 0.0  ;;  %v12982_v52 = vpop.eup %9323 }
0x1a7d   : > { %v12984_v11 = vpop.eup %9325  ;;  %v6998_v32 = vsel %vm1370_vm2, %v12982_v52, 0.0 }
0x1a7e   : > { %6832 = vadd.xlane.f32.xlu0 %v6831_v2  ;;  %v7164_v37 = vsel %vm1370_vm2, %v12984_v11, 0.0  ;;  %v12991_v15 = vpop.eup %9327 }
0x1a7f   : > { %v12993_v39 = vpop.eup %9329  ;;  %v7161_v51 = vsel %vm1370_vm2, %v12991_v15, 0.0 }
0x1a80   : > { %v7001_v36 = vsel %vm1370_vm2, %v12993_v39, 0.0  ;;  %v12999_v62 = vpop.eup %9331 }
0x1a81   : > { %v7167_v24 = vsel %vm1370_vm2, %v12999_v62, 0.0 }
0x1a86   : > { %7159 = vadd.xlane.f32.xlu0 %v7158_v40 }
0x1a8e   : > { %6996 = vadd.xlane.f32.xlu0 %v6995_v4 }
0x1a93   : > { %6999 = vadd.xlane.f32.xlu2 %v6998_v32 }
0x1a96   : > { %7165 = vadd.xlane.f32.xlu0 %v7164_v37 }
0x1a9d   : > { %7162 = vadd.xlane.f32.xlu1 %v7161_v51 }
0x1a9e   : > { %7002 = vadd.xlane.f32.xlu0 %v7001_v36 }
0x1aa5   : > { %7168 = vadd.xlane.f32.xlu1 %v7167_v24 }
0x1aab   : > { %v6824_v44 = vpop.xlane.xlu0 %6823 }
0x1aac   : > { %9333 = vrcp.f32 %v6824_v44 }
0x1ab2   : > { %v9334_v45 = vpop.eup %9333 }
0x1ab3   : > { %v6838_v48 = vmul.f32 %v9334_v45, %v12918_v10 }
0x1ab5   : > { %v6670_v50 = vpop.xlane.xlu2 %6669  ;;  %8481 = vmatmul.msk.f32.vlgmr.msra.gmra.mxu0 %vm1370_vm2, %v6838_v48 }
0x1ab6   : > { %9335 = vrcp.f32 %v6670_v50  ;;  %v13029_v50 = vpop.f32.mrf.mxu1 }
0x1abc   : > { %v9336_v31 = vpop.eup %9335 }
0x1abd   : > { %v6684_v59 = vmul.f32 %v9336_v31, %v12925_v54  ;;  %v6673_v9 = vpop.xlane.xlu2 %6672  ;;  %v6827_v8 = vpop.xlane.xlu1 %6826 }
0x1abe   : > { %9337 = vrcp.f32 %v6673_v9  ;;  %v8904_v14 = vpop.permute.xlu0 %8903 }
0x1abf   : > { %9339 = vrcp.f32 %v6827_v8  ;;  %v8905_v26 = vunpack.i.l.bf16 %v8904_v14  ;;  %8469 = vmatmul.msk.f32.vlgmr.msra.gmra.mxu1 %vm1370_vm2, %v6684_v59  ;;  %v8906_v19 = vunpack.i.h.bf16 %v8904_v14  ;;  %v13035_v59 = vpop.f32.mrf.mxu1 }
0x1ac1   : > { %7214 = vmatpush.msrb.mxu0 %v8905_v26 }
0x1ac3   : > { %7215 = vmatpush.msrb.mxu0 %v8906_v19 }
0x1ac4   : > { %v9338_v23 = vpop.eup %9337 }
0x1ac5   : > { %v9340_v10 = vpop.eup %9339  ;;  %v6676_v61 = vpop.xlane.xlu2 %6675  ;;  %v6685_v46 = vmul.f32 %v9338_v23, %v12930_v56 }
0x1ac6   : > { %v6839_v43 = vmul.f32 %v9340_v10, %v12933_v35  ;;  %9341 = vrcp.f32 %v6676_v61  ;;  %v6679_v54 = vpop.xlane.xlu1 %6678 }
0x1ac7   : > { %8470 = vmatmul.msk.f32.gmra.mxu1 %vm1370_vm2, %v6685_v46  ;;  %9343 = vrcp.f32 %v6679_v54 }
0x1ac8   : > { %8482 = vmatmul.msk.f32.gmra.mxu0 %vm1370_vm2, %v6839_v43 }
0x1acc   : > { %v9342_v22 = vpop.eup %9341 }
0x1acd   : > { %v8909_v2 = vpop.permute.xlu2 %8908  ;;  %v6686_v16 = vmul.f32 %v9342_v22, %v12942_v58  ;;  %v9344_v56 = vpop.eup %9343 }
0x1ace   : > { %v8910_v28 = vunpack.i.l.bf16 %v8909_v2  ;;  %v8911_v7 = vunpack.i.h.bf16 %v8909_v2  ;;  %v6994_v34 = vpop.xlane.xlu1 %6993  ;;  %v6687_v35 = vmul.f32 %v9344_v56, %v12944_v57  ;;  %v6500_v56 = vld [vmem:[#allocation22 + $0xb0] sm:$0xff] }
0x1acf   : > { %8471 = vmatmul.msk.f32.gmra.mxu1 %vm1370_vm2, %v6686_v16  ;;  %9345 = vrcp.f32 %v6994_v34  ;;  %v6501_v16 = vld [vmem:[#allocation22 + $0xb8] sm:$0xff] }
0x1ad0   : > { %7050 = vmatpush.msrb.mxu1 %v8910_v28  ;;  %7314 = vmatpush.msrb.mxu2 %v6501_v16 }
0x1ad2   : > { %7051 = vmatpush.msrb.mxu1 %v8911_v7  ;;  %7315 = vmatpush.msrb.mxu2 %v6500_v56 }
0x1ad5   : > { %v9346_v38 = vpop.eup %9345 }
0x1ad6   : > { %v7008_v63 = vmul.f32 %v9346_v38, %v12950_v21  ;;  %v6498_v38 = vld [vmem:[#allocation22 + $0xa0] sm:$0xff] }
0x1ad7   : > { %8472 = vmatmul.msk.f32.gmra.mxu1 %vm1370_vm2, %v6687_v35  ;;  %v6499_v35 = vld [vmem:[#allocation22 + $0xa8] sm:$0xff] }
0x1ad8   : > { %7316 = vmatpush.msrb.mxu2 %v6499_v35 }
0x1ada   : > { %7317 = vmatpush.msrb.mxu2 %v6498_v38 }
0x1adf   : > { %8493 = vmatmul.msk.f32.vlgmr.msrb.gmra.mxu1 %vm1370_vm2, %v7008_v63  ;;  %v6497_v63 = vld [vmem:[#allocation22 + $0x98] sm:$0xff] }
0x1ae0   : > { %7318 = vmatpush.msrb.mxu2 %v6497_v63 }
0x1ae5   : > { %v8914_v40 = vpop.permute.xlu1 %8913 }
0x1ae6   : > { %v8915_v47 = vunpack.i.l.bf16 %v8914_v40  ;;  %v8916_v58 = vunpack.i.h.bf16 %v8914_v40  ;;  %v6496_v40 = vld [vmem:[#allocation22 + $0x90] sm:$0xff] }
0x1ae7   : > { %7319 = vmatpush.msrb.mxu2 %v6496_v40 }
0x1ae8   : > { %7216 = vmatpush.msrb.mxu0 %v8915_v47  ;;  %v6495_v47 = vld [vmem:[#allocation22 + $0x88] sm:$0xff] }
0x1ae9   : > { %v6830_v53 = vpop.xlane.xlu0 %6829  ;;  %7320 = vmatpush.msrb.mxu2 %v6495_v47 }
0x1aea   : > { %9347 = vrcp.f32 %v6830_v53  ;;  %7217 = vmatpush.msrb.mxu0 %v8916_v58  ;;  %v6494_v58 = vld [vmem:[#allocation22 + $0x80] sm:$0xff] }
0x1aeb   : > { %7321 = vmatpush.msrb.mxu2 %v6494_v58 }
0x1af0   : > { %v9348_v30 = vpop.eup %9347 }
0x1af1   : > { %v6833_v20 = vpop.xlane.xlu0 %6832  ;;  %v6840_v4 = vmul.f32 %v9348_v30, %v12958_v42 }
0x1af2   : > { %9349 = vrcp.f32 %v6833_v20 }
0x1af3   : > { %8483 = vmatmul.msk.f32.gmra.mxu0 %vm1370_vm2, %v6840_v4 }
0x1af8   : > { %v9350_v57 = vpop.eup %9349 }
0x1af9   : > { %v7160_v55 = vpop.xlane.xlu0 %7159  ;;  %v6841_v21 = vmul.f32 %v9350_v57, %v12965_v25 }
0x1afa   : > { %9351 = vrcp.f32 %v7160_v55 }
0x1afb   : > { %8484 = vmatmul.msk.f32.gmra.mxu0 %vm1370_vm2, %v6841_v21 }
0x1b00   : > { %v9352_v41 = vpop.eup %9351 }
0x1b01   : > { %v7174_v13 = vmul.f32 %v9352_v41, %v12971_v49  ;;  %v6997_v32 = vpop.xlane.xlu0 %6996 }
0x1b02   : > { %9353 = vrcp.f32 %v6997_v32 }
0x1b03   : > { %8505 = vmatmul.msk.f32.vlgmr.msrb.gmra.mxu0 %vm1370_vm2, %v7174_v13 }
0x1b06   : > { %v7000_v29 = vpop.xlane.xlu2 %6999 }
0x1b07   : > { %9355 = vrcp.f32 %v7000_v29 }
0x1b08   : > { %v9354_v37 = vpop.eup %9353 }
0x1b09   : > { %v7166_v42 = vpop.xlane.xlu0 %7165  ;;  %v7009_v60 = vmul.f32 %v9354_v37, %v12976_v33 }
0x1b0b   : > { %8494 = vmatmul.msk.f32.gmra.mxu1 %vm1370_vm2, %v7009_v60 }
0x1b0d   : > { %v9356_v51 = vpop.eup %9355 }
0x1b0e   : > { %v7010_v24 = vmul.f32 %v9356_v51, %v12982_v52 }
0x1b10   : > { %v7163_v25 = vpop.xlane.xlu1 %7162 }
0x1b11   : > { %9357 = vrcp.f32 %v7163_v25  ;;  %v7003_v36 = vpop.xlane.xlu0 %7002 }
0x1b12   : > { %9359 = vrcp.f32 %v7003_v36 }
0x1b13   : > { %8495 = vmatmul.msk.f32.gmra.mxu1 %vm1370_vm2, %v7010_v24  ;;  %9361 = vrcp.f32 %v7166_v42 }
0x1b17   : > { %v9358_v49 = vpop.eup %9357 }
0x1b18   : > { %v9360_v44 = vpop.eup %9359  ;;  %v7175_v45 = vmul.f32 %v9358_v49, %v12991_v15  ;;  %v7169_v33 = vpop.xlane.xlu1 %7168 }
0x1b19   : > { %v7011_v48 = vmul.f32 %v9360_v44, %v12993_v39  ;;  %v9362_v31 = vpop.eup %9361  ;;  %9363 = vrcp.f32 %v7169_v33  ;;  %v13039_v39 = vpop.f32.mrf.mxu1 }
0x1b1a   : > { %8506 = vmatmul.msk.f32.gmra.mxu0 %vm1370_vm2, %v7175_v45  ;;  %v7176_v52 = vmul.f32 %v9362_v31, %v12984_v11 }
0x1b1b   : > { %8496 = vmatmul.msk.f32.gmra.mxu1 %vm1370_vm2, %v7011_v48 }
0x1b1f   : > { %v9364_v9 = vpop.eup %9363 }
0x1b20   : > { %v7177_v15 = vmul.f32 %v9364_v9, %v12999_v62 }
0x1b21   : > { %v13042_v14 = vpop.f32.mrf.mxu1 }
0x1b22   : > { %8507 = vmatmul.msk.f32.gmra.mxu0 %vm1370_vm2, %v7176_v52 }
0x1b2a   : > { %8508 = vmatmul.msk.f32.gmra.mxu0 %vm1370_vm2, %v7177_v15 }
0x1b32   : > { %v6887_v8 = vpop.f32.mrf.mxu0 }
0x1b33   : > { %7235 = vrot.lane.b32.xlu0 %v6887_v8, %s10063_s3  ;;  %v8929_v8 = vld [vmem:[#allocation23 + $0x2] ss:$0 sm:$0xff] }
0x1b3c   : > { %v6717_v26 = vpop.f32.mrf.mxu1 }
0x1b44   : > { %v6720_v19 = vpop.f32.mrf.mxu1 }
0x1b45   : > { %v6890_v23 = vpop.f32.mrf.mxu0 }
0x1b46   : > { %7237 = vrot.lane.b32.xlu0 %v6890_v23, %s10063_s3 }
0x1b4c   : > { %v6723_v11 = vpop.f32.mrf.mxu1 }
0x1b54   : > { %v6726_v10 = vpop.f32.mrf.mxu1 }
0x1b5c   : > { %v7053_v61 = vpop.f32.mrf.mxu1 }
0x1b5d   : > { %7251 = vrot.lane.b32.xlu1 %v7053_v61, %s10060_s13 }
0x1b70   : > { %v6893_v62 = vpop.f32.mrf.mxu0 }
0x1b71   : > { %7239 = vrot.lane.b32.xlu0 %v6893_v62, %s10063_s3  ;;  %v9442_v62 = vld [vmem:[#allocation29 + $0x8] sm:$0xff] }
0x1b78   : > { %v6896_v46 = vpop.f32.mrf.mxu0 }
0x1b79   : > { %7241 = vrot.lane.b32.xlu0 %v6896_v46, %s10063_s3  ;;  %v9443_v46 = vld [vmem:[#allocation29 + $0x10] sm:$0xff]  ;;  %s13312_s3 = sld [smem:[#allocation57_spill]] }
0x1b80   : > { %v7219_v43 = vpop.f32.mrf.mxu0 }
0x1b81   : > { %7267 = vrot.lane.b32.xlu2 %v7219_v43, %s10062_s1  ;;  %v9444_v43 = vld [vmem:[#allocation29 + $0x18] sm:$0xff] }
0x1b88   : > { %v7056_v54 = vpop.f32.mrf.mxu1 }
0x1b89   : > { %7253 = vrot.lane.b32.xlu1 %v7056_v54, %s10060_s13  ;;  %v8928_v54 = vld [vmem:[#allocation20 + $0x2] ss:$0 sm:$0xff] }
0x1b8a   : > { %v6469_v47 = vadd.f32 %v8928_v54, %v13039_v39 }
0x1b90   : > { %v7059_v22 = vpop.f32.mrf.mxu1 }
0x1b91   : > { %7255 = vrot.lane.b32.xlu1 %v7059_v22, %s10060_s13  ;;  %v6463_v22 = vadd.f32 %v8928_v54, %v13029_v50 }
0x1b97   : > { %v7222_v2 = vpop.f32.mrf.mxu0 }
0x1b98   : > { %v7062_v28 = vpop.f32.mrf.mxu1  ;;  %7269 = vrot.lane.b32.xlu2 %v7222_v2, %s10062_s1 }
0x1b99   : > { %7257 = vrot.lane.b32.xlu1 %v7062_v28, %s10060_s13 }
0x1b9f   : > { %v7225_v7 = vpop.f32.mrf.mxu0 }
0x1ba0   : > { %7271 = vrot.lane.b32.xlu2 %v7225_v7, %s10062_s1 }
0x1ba5   : > { %v7236_v53 = vpop.permute.xlu0 %7235 }
0x1ba6   : > { %v7279_v20 = vsel %vm1652_vm8, %v6717_v26, %v7236_v53 }
0x1ba7   : > { %v7228_v34 = vpop.f32.mrf.mxu0 }
0x1ba8   : > { %7273 = vrot.lane.b32.xlu2 %v7228_v34, %s10062_s1  ;;  %v6466_v34 = vadd.f32 %v8928_v54, %v13035_v59 }
0x1bb8   : > { %v7238_v21 = vpop.permute.xlu0 %7237 }
0x1bb9   : > { %v7280_v13 = vsel %vm1652_vm8, %v6720_v19, %v7238_v21 }
0x1bcf   : > { %v7252_v30 = vpop.permute.xlu1 %7251 }
0x1bd0   : > { %v7283_v4 = vsel %vm1370_vm2, %v7279_v20, %v7252_v30 }
0x1bdb   : > { %v7268_v57 = vpop.permute.xlu2 %7267 }
0x1bdc   : > { %v7287_v55 = vsel %vm2349_vm9, %v7283_v4, %v7268_v57 }
0x1bdd   : > { %8509 = vmatmul.msk.f32.vlgmr.msrb.gmra.mxu2 %vm1569_vm7, %v7287_v55 }
0x1be3   : > { %v7240_v42 = vpop.permute.xlu0 %7239 }
0x1be4   : > { %v7281_v51 = vsel %vm1652_vm8, %v6723_v11, %v7240_v42 }
0x1beb   : > { %v7242_v49 = vpop.permute.xlu0 %7241 }
0x1bec   : > { %v7282_v44 = vsel %vm1652_vm8, %v6726_v10, %v7242_v49  ;;  %v9441_v10 = vld [vmem:[#allocation29] sm:$0xff] }
0x1bf2   : > { %v7270_v41 = vpop.permute.xlu2 %7269 }
0x1bfa   : > { %v7272_v60 = vpop.permute.xlu2 %7271 }
0x1bfb   : > { %v7254_v32 = vpop.permute.xlu1 %7253 }
0x1bfc   : > { %v7284_v29 = vsel %vm1370_vm2, %v7280_v13, %v7254_v32 }
0x1bfd   : > { %v7288_v37 = vsel %vm2349_vm9, %v7284_v29, %v7270_v41  ;;  %v6472_v29 = vadd.f32 %v8928_v54, %v13042_v14 }
0x1bfe   : > { %8510 = vmatmul.msk.f32.gmra.mxu2 %vm1569_vm7, %v7288_v37 }
0x1c02   : > { %v7274_v48 = vpop.permute.xlu2 %7273 }
0x1c03   : > { %v7256_v25 = vpop.permute.xlu1 %7255 }
0x1c04   : > { %v7285_v36 = vsel %vm1370_vm2, %v7281_v51, %v7256_v25 }
0x1c05   : > { %v7289_v24 = vsel %vm2349_vm9, %v7285_v36, %v7272_v60 }
0x1c06   : > { %8511 = vmatmul.msk.f32.gmra.mxu2 %vm1569_vm7, %v7289_v24 }
0x1c0b   : > { %v7258_v45 = vpop.permute.xlu1 %7257 }
0x1c0c   : > { %v7286_v33 = vsel %vm1370_vm2, %v7282_v44, %v7258_v45 }
0x1c0d   : > { %v7290_v31 = vsel %vm2349_vm9, %v7286_v33, %v7274_v48 }
0x1c0e   : > { %8512 = vmatmul.msk.f32.gmra.mxu2 %vm1569_vm7, %v7290_v31 }
0x1c60   : > { %v7323_v52 = vpop.f32.mrf.mxu2 }
0x1c61   : > { %v7324_v61 = vadd.f32 %v8929_v8, %v7323_v52 }
0x1c81   : > { %v7326_v9 = vpop.f32.mrf.mxu2 }
0x1c82   : > { %v7327_v11 = vadd.f32 %v8929_v8, %v7326_v9 }
0x1c89   : > { %v7329_v15 = vpop.f32.mrf.mxu2 }
0x1c8a   : > { %v7330_v23 = vadd.f32 %v8929_v8, %v7329_v15 }
0x1c91   : > { %v7332_v26 = vpop.f32.mrf.mxu2 }
0x1c92   : > { %v7333_v19 = vadd.f32 %v8929_v8, %v7332_v26 }
0x1c94   : > { %7347 = vmatpush.msra.mxu1 %v7333_v19 }
0x1c96   : > { %7348 = vmatpush.msra.mxu1 %v7330_v23 }
0x1c98   : > { %7349 = vmatpush.msra.mxu1 %v7327_v11 }
0x1c9a   : > { %7350 = vmatpush.msra.mxu1 %v7324_v61 }
0x1c9b   : > { %8513 = vmatmul.msk.f32.vlgmr.msra.gmra.mxu1 %vm1370_vm2, %v9441_v10 }
0x1ca3   : > { %8514 = vmatmul.msk.f32.gmra.mxu1 %vm1370_vm2, %v9442_v62 }
0x1cab   : > { %8515 = vmatmul.msk.f32.gmra.mxu1 %vm1370_vm2, %v9443_v46 }
0x1cb3   : > { %8516 = vmatmul.msk.f32.gmra.mxu1 %vm1370_vm2, %v9444_v43 }
0x1d18   : > { %v7352_v2 = vpop.f32.mrf.mxu1 }
0x1d19   : > { %v13076_v28 = vadd.f32 %v7352_v2, %v6463_v22 }
0x1d1b   : > { %v13079_v16 = vmul.f32 0.70710677, %v13076_v28 }
0x1d1d   : > { %v7384_v7 = vand.u32 2147483647, %v13079_v16  ;;  %vm7376_vm3 = vcmp.lt.f32.partialorder %v13079_v16, 0.0 }
0x1d1f   : > { %v7388_v56 = vmul.f32 0.3275911, %v7384_v7  ;;  %v7436_v20 = vsub.f32 0.0, %v7384_v7 }
0x1d20   : > { %v7355_v35 = vpop.f32.mrf.mxu1 }
0x1d21   : > { %v7392_v38 = vadd.f32 1.0, %v7388_v56  ;;  %v13083_v63 = vadd.f32 %v7355_v35, %v6466_v34  ;;  %v7440_v41 = vmul.f32 %v7436_v20, %v7384_v7 }
0x1d23   : > { %9365 = vrcp.f32 %v7392_v38  ;;  %v13086_v40 = vmul.f32 0.70710677, %v13083_v63  ;;  %v7444_v51 = vmul.f32 1.442695, %v7440_v41  ;;  %v7380_v38 = vsel %vm7376_vm3, -1.0, %v10058_v0 }
0x1d25   : > { %v7385_v50 = vand.u32 2147483647, %v13086_v40  ;;  %vm7377_vm4 = vcmp.lt.f32.partialorder %v13086_v40, 0.0 }
0x1d27   : > { %v7389_v58 = vmul.f32 0.3275911, %v7385_v50  ;;  %v7437_v25 = vsub.f32 0.0, %v7385_v50 }
0x1d28   : > { %v7358_v53 = vpop.f32.mrf.mxu1 }
0x1d29   : > { %v9366_v30 = vpop.eup %9365  ;;  %v7393_v4 = vadd.f32 1.0, %v7389_v58  ;;  %v13090_v57 = vadd.f32 %v7358_v53, %v6469_v47  ;;  %v7441_v31 = vmul.f32 %v7437_v25, %v7385_v50 }
0x1d2a   : > { %v7400_v59 = vmul.f32 1.0614054, %v9366_v30 }
0x1d2b   : > { %9367 = vrcp.f32 %v7393_v4  ;;  %v13093_v55 = vmul.f32 0.70710677, %v13090_v57  ;;  %v7446_v23 = vmul.f32 1.442695, %v7441_v31 }
0x1d2c   : > { %v7404_v21 = vadd.f32 -1.4531521, %v7400_v59 }
0x1d2d   : > { %v7386_v13 = vand.u32 2147483647, %v13093_v55  ;;  %vm7378_vm5 = vcmp.lt.f32.partialorder %v13093_v55, 0.0 }
0x1d2e   : > { %v7408_v32 = vmul.f32 %v9366_v30, %v7404_v21 }
0x1d2f   : > { %v7390_v39 = vmul.f32 0.3275911, %v7386_v13  ;;  %v7438_v11 = vsub.f32 0.0, %v7386_v13 }
0x1d30   : > { %v7412_v37 = vadd.f32 1.4214138, %v7408_v32  ;;  %v7361_v42 = vpop.f32.mrf.mxu1 }
0x1d31   : > { %v9368_v60 = vpop.eup %9367  ;;  %v7394_v36 = vadd.f32 1.0, %v7390_v39  ;;  %v13097_v24 = vadd.f32 %v7361_v42, %v6472_v29  ;;  %v7442_v7 = vmul.f32 %v7438_v11, %v7386_v13  ;;  %v5446_v13 = vadd.f32 %v12268_v1, %v11370_v5 }
0x1d32   : > { %v7416_v49 = vmul.f32 %v9366_v30, %v7412_v37  ;;  %v7401_v44 = vmul.f32 1.0614054, %v9368_v60  ;;  %v7369_v5 = vmul.f32 0.5, %v13083_v63  ;;  %v7382_v63 = vsel %vm7378_vm5, -1.0, %v10058_v0 }
0x1d33   : > { %9369 = vrcp.f32 %v7394_v36  ;;  %v13100_v45 = vmul.f32 0.70710677, %v13097_v24  ;;  %v7448_v20 = vmul.f32 1.442695, %v7442_v7 }
0x1d34   : > { %v7420_v48 = vadd.f32 -0.28449672, %v7416_v49  ;;  %v7405_v33 = vadd.f32 -1.4531521, %v7401_v44  ;;  %9371 = vpow2.f32 %v7444_v51 }
0x1d35   : > { %v7387_v14 = vand.u32 2147483647, %v13100_v45  ;;  %vm7379_vm6 = vcmp.lt.f32.partialorder %v13100_v45, 0.0  ;;  %v7483_v45 = vld [vmem:[%s13312_s3 + $0x18] sm:$0xff] }
0x1d36   : > { %v7424_v52 = vmul.f32 %v9366_v30, %v7420_v48  ;;  %v7409_v9 = vmul.f32 %v9368_v60, %v7405_v33  ;;  %7520 = vmatpush.msra.mxu3 %v7483_v45 }
0x1d37   : > { %v7391_v15 = vmul.f32 0.3275911, %v7387_v14  ;;  %v7439_v4 = vsub.f32 0.0, %v7387_v14 }
0x1d38   : > { %v7428_v8 = vadd.f32 0.2548296, %v7424_v52  ;;  %v7413_v26 = vadd.f32 1.4214138, %v7409_v9 }
0x1d39   : > { %v9370_v19 = vpop.eup %9369  ;;  %v7395_v61 = vadd.f32 1.0, %v7391_v15  ;;  %v7443_v51 = vmul.f32 %v7439_v4, %v7387_v14  ;;  %v5447_v14 = vadd.f32 %v12274_v27, %v11379_v6  ;;  %v5448_v27 = vadd.f32 %v12282_v3, %v11390_v12 }
0x1d3a   : > { %v7432_v10 = vmul.f32 %v9366_v30, %v7428_v8  ;;  %v7417_v62 = vmul.f32 %v9368_v60, %v7413_v26  ;;  %v7402_v46 = vmul.f32 1.0614054, %v9370_v19  ;;  %v9372_v43 = vpop.eup %9371  ;;  %v7368_v30 = vmul.f32 0.5, %v13076_v28 }
0x1d3b   : > { %9373 = vrcp.f32 %v7395_v61  ;;  %v7450_v52 = vmul.f32 1.442695, %v7443_v51 }
0x1d3c   : > { %v7452_v54 = vmul.f32 %v9372_v43, %v7432_v10  ;;  %v7421_v22 = vadd.f32 -0.28449672, %v7417_v62  ;;  %v7406_v2 = vadd.f32 -1.4531521, %v7402_v46  ;;  %9375 = vpow2.f32 %v7446_v23 }
0x1d3d   : > { %9377 = vpow2.f32 %v7448_v20  ;;  %v7370_v43 = vmul.f32 0.5, %v13090_v57  ;;  %v7371_v57 = vmul.f32 0.5, %v13097_v24  ;;  %v7481_v24 = vld [vmem:[%s13312_s3 + $0x8] sm:$0xff] }
0x1d3e   : > { %v7456_v34 = vsub.f32 1.0, %v7452_v54  ;;  %v7425_v56 = vmul.f32 %v9368_v60, %v7421_v22  ;;  %v7410_v35 = vmul.f32 %v9370_v19, %v7406_v2  ;;  %9379 = vpow2.f32 %v7450_v52 }
0x1d40   : > { %v7460_v50 = vmul.f32 %v7456_v34, %v7380_v38  ;;  %v7429_v47 = vadd.f32 0.2548296, %v7425_v56  ;;  %v7414_v58 = vadd.f32 1.4214138, %v7410_v35  ;;  %v7383_v56 = vsel %vm7379_vm6, -1.0, %v10058_v0 }
0x1d41   : > { %v9374_v53 = vpop.eup %9373 }
0x1d42   : > { %v7464_v59 = vadd.f32 1.0, %v7460_v50  ;;  %v7433_v16 = vmul.f32 %v9368_v60, %v7429_v47  ;;  %v7418_v21 = vmul.f32 %v9370_v19, %v7414_v58  ;;  %v7403_v41 = vmul.f32 1.0614054, %v9374_v53  ;;  %v9376_v32 = vpop.eup %9375 }
0x1d43   : > { %v7381_v60 = vsel %vm7377_vm4, -1.0, %v10058_v0  ;;  %v9378_v15 = vpop.eup %9377  ;;  %v5449_v47 = vadd.f32 %v12297_v17, %v11407_v18  ;;  %v7480_v18 = vld [vmem:[%s13312_s3] sm:$0xff] }
0x1d44   : > { %v7468_v29 = vmul.f32 %v7464_v59, %v7368_v30  ;;  %v7453_v39 = vmul.f32 %v9376_v32, %v7433_v16  ;;  %v7422_v37 = vadd.f32 -0.28449672, %v7418_v21  ;;  %v7407_v42 = vadd.f32 -1.4531521, %v7403_v41  ;;  %v9380_v6 = vpop.eup %9379  ;;  %v8930_v59 = vld [vmem:[#allocation25] ss:$0 sm:$0xff] }
0x1d46   : > { %v7472_v25 = vadd.f32 %v7468_v29, %v5446_v13  ;;  %v7457_v28 = vsub.f32 1.0, %v7453_v39  ;;  %v7426_v36 = vmul.f32 %v9370_v19, %v7422_v37  ;;  %v7411_v49 = vmul.f32 %v9374_v53, %v7407_v42 }
0x1d48   : > { %v7476_v44 = vmul.f32 0.70710677, %v7472_v25  ;;  %v7461_v48 = vmul.f32 %v7457_v28, %v7381_v60  ;;  %v7430_v33 = vadd.f32 0.2548296, %v7426_v36  ;;  %v7415_v31 = vadd.f32 1.4214138, %v7411_v49 }
0x1d4a   : > { %v7465_v1 = vadd.f32 1.0, %v7461_v48  ;;  %v7434_v40 = vmul.f32 %v9370_v19, %v7430_v33  ;;  %v7419_v9 = vmul.f32 %v9374_v53, %v7415_v31  ;;  %7492 = vrot.lane.b32.xlu0 %v7476_v44, %s10061_s30 }
0x1d4c   : > { %v7469_v8 = vmul.f32 %v7465_v1, %v7369_v5  ;;  %v7454_v26 = vmul.f32 %v9378_v15, %v7434_v40  ;;  %v7423_v23 = vadd.f32 -0.28449672, %v7419_v9 }
0x1d4e   : > { %v7473_v11 = vadd.f32 %v7469_v8, %v5447_v14  ;;  %v7458_v61 = vsub.f32 1.0, %v7454_v26  ;;  %v7427_v10 = vmul.f32 %v9374_v53, %v7423_v23 }
0x1d50   : > { %v7477_v62 = vmul.f32 0.70710677, %v7473_v11  ;;  %v7462_v19 = vmul.f32 %v7458_v61, %v7382_v63  ;;  %v7431_v46 = vadd.f32 0.2548296, %v7427_v10 }
0x1d52   : > { %v7466_v54 = vadd.f32 1.0, %v7462_v19  ;;  %v7435_v22 = vmul.f32 %v9374_v53, %v7431_v46  ;;  %7494 = vrot.lane.b32.xlu1 %v7477_v62, %s10061_s30  ;;  %v7482_v53 = vld [vmem:[%s13312_s3 + $0x10] sm:$0xff] }
0x1d53   : > { %7521 = vmatpush.msra.mxu3 %v7482_v53 }
0x1d54   : > { %v7470_v55 = vmul.f32 %v7466_v54, %v7370_v43  ;;  %v7455_v2 = vmul.f32 %v9380_v6, %v7435_v22 }
0x1d55   : > { %7522 = vmatpush.msra.mxu3 %v7481_v24 }
0x1d56   : > { %v7474_v7 = vadd.f32 %v7470_v55, %v5448_v27  ;;  %v7459_v34 = vsub.f32 1.0, %v7455_v2 }
0x1d57   : > { %7523 = vmatpush.msra.mxu3 %v7480_v18 }
0x1d58   : > { %v7478_v35 = vmul.f32 0.70710677, %v7474_v7  ;;  %v7463_v38 = vmul.f32 %v7459_v34, %v7383_v56 }
0x1d5a   : > { %v7467_v50 = vadd.f32 1.0, %v7463_v38  ;;  %7496 = vrot.lane.b32.xlu2 %v7478_v35, %s10061_s30 }
0x1d5c   : > { %v7471_v58 = vmul.f32 %v7467_v50, %v7371_v57 }
0x1d5e   : > { %v7475_v12 = vadd.f32 %v7471_v58, %v5449_v47 }
0x1d60   : > { %v7479_v3 = vmul.f32 0.70710677, %v7475_v12 }
0x1d62   : > { %7498 = vrot.lane.b32.xlu0 %v7479_v3, %s10061_s30 }
0x1db4   : > { %v7497_v20 = vpop.permute.xlu2 %7496 }
0x1dbc   : > { %v7493_v17 = vpop.permute.xlu0 %7492 }
0x1dbd   : > { %8517 = vmatmul.msk.f32.vlgmr.msra.gmra.mxu3 %vm1370_vm2, %v7493_v17 }
0x1dc4   : > { %v7495_v30 = vpop.permute.xlu1 %7494 }
0x1dc5   : > { %8518 = vmatmul.msk.f32.gmra.mxu3 %vm1370_vm2, %v7495_v30 }
0x1dcd   : > { %8519 = vmatmul.msk.f32.gmra.mxu3 %vm1370_vm2, %v7497_v20 }
0x1dd4   : > { %v7499_v4 = vpop.permute.xlu0 %7498 }
0x1dd5   : > { %8520 = vmatmul.msk.f32.gmra.mxu3 %vm1370_vm2, %v7499_v4 }
0x1e40   : > { %v7525_v16 = vpop.f32.mrf.mxu3 }
0x1e41   : > { %v13143_v21 = vadd.f32 %v8930_v59, %v7525_v16 }
0x1e43   : > { %v13146_v41 = vmul.f32 0.70710677, %v13143_v21 }
0x1e45   : > { %v7553_v32 = vand.u32 2147483647, %v13146_v41  ;;  %vm7545_vm7 = vcmp.lt.f32.partialorder %v13146_v41, 0.0 }
0x1e46   : > { %v7549_v18 = vsel %vm7545_vm7, -1.0, %v10058_v0 }
0x1e47   : > { %v7557_v13 = vmul.f32 0.3275911, %v7553_v32  ;;  %v7605_v49 = vsub.f32 0.0, %v7553_v32 }
0x1e48   : > { %v7528_v29 = vpop.f32.mrf.mxu3 }
0x1e49   : > { %v7561_v39 = vadd.f32 1.0, %v7557_v13  ;;  %v13149_v37 = vadd.f32 %v8930_v59, %v7528_v29  ;;  %v7609_v52 = vmul.f32 %v7605_v49, %v7553_v32 }
0x1e4b   : > { %9381 = vrcp.f32 %v7561_v39  ;;  %v13152_v42 = vmul.f32 0.70710677, %v13149_v37  ;;  %v7613_v8 = vmul.f32 1.442695, %v7609_v52 }
0x1e4d   : > { %v7554_v51 = vand.u32 2147483647, %v13152_v42  ;;  %vm7546_vm8 = vcmp.lt.f32.partialorder %v13152_v42, 0.0  ;;  %v7538_v42 = vmul.f32 0.5, %v13149_v37 }
0x1e4f   : > { %v7558_v25 = vmul.f32 0.3275911, %v7554_v51  ;;  %v7606_v26 = vsub.f32 0.0, %v7554_v51 }
0x1e50   : > { %v7531_v28 = vpop.f32.mrf.mxu3 }
0x1e51   : > { %v9382_v36 = vpop.eup %9381  ;;  %v7562_v60 = vadd.f32 1.0, %v7558_v25  ;;  %v13155_v44 = vadd.f32 %v8930_v59, %v7531_v28  ;;  %v7610_v46 = vmul.f32 %v7606_v26, %v7554_v51  ;;  %v8931_v51 = vld [vmem:[#allocation26] ss:$0 sm:$0xff] }
0x1e52   : > { %v7569_v48 = vmul.f32 1.0614054, %v9382_v36 }
0x1e53   : > { %9383 = vrcp.f32 %v7562_v60  ;;  %v13158_v33 = vmul.f32 0.70710677, %v13155_v44  ;;  %v7615_v7 = vmul.f32 1.442695, %v7610_v46  ;;  %v7539_v37 = vmul.f32 0.5, %v13155_v44 }
0x1e54   : > { %v7573_v31 = vadd.f32 -1.4531521, %v7569_v48 }
0x1e55   : > { %v7555_v5 = vand.u32 2147483647, %v13158_v33  ;;  %vm7547_vm9 = vcmp.lt.f32.partialorder %v13158_v33, 0.0 }
0x1e56   : > { %v7577_v1 = vmul.f32 %v9382_v36, %v7573_v31 }
0x1e57   : > { %v7559_v40 = vmul.f32 0.3275911, %v7555_v5  ;;  %v7607_v34 = vsub.f32 0.0, %v7555_v5 }
0x1e58   : > { %v7581_v9 = vadd.f32 1.4214138, %v7577_v1  ;;  %v7534_v15 = vpop.f32.mrf.mxu3  ;;  %v7550_v1 = vsel %vm7546_vm8, -1.0, %v10058_v0 }
0x1e59   : > { %v9384_v14 = vpop.eup %9383  ;;  %v7563_v23 = vadd.f32 1.0, %v7559_v40  ;;  %v13161_v11 = vadd.f32 %v8930_v59, %v7534_v15  ;;  %v7611_v3 = vmul.f32 %v7607_v34, %v7555_v5  ;;  %v7537_v59 = vmul.f32 0.5, %v13143_v21 }
0x1e5a   : > { %v7585_v61 = vmul.f32 %v9382_v36, %v7581_v9  ;;  %v7570_v10 = vmul.f32 1.0614054, %v9384_v14 }
0x1e5b   : > { %9385 = vrcp.f32 %v7563_v23  ;;  %v13164_v63 = vmul.f32 0.70710677, %v13161_v11  ;;  %v7617_v16 = vmul.f32 1.442695, %v7611_v3 }
0x1e5c   : > { %v7589_v62 = vadd.f32 -0.28449672, %v7585_v61  ;;  %v7574_v19 = vadd.f32 -1.4531521, %v7570_v10  ;;  %9387 = vpow2.f32 %v7613_v8 }
0x1e5d   : > { %v7556_v43 = vand.u32 2147483647, %v13164_v63  ;;  %vm7548_vm10 = vcmp.lt.f32.partialorder %v13164_v63, 0.0 }
0x1e5e   : > { %v7593_v54 = vmul.f32 %v9382_v36, %v7589_v62  ;;  %v7578_v22 = vmul.f32 %v9384_v14, %v7574_v19 }
0x1e5f   : > { %v7560_v6 = vmul.f32 0.3275911, %v7556_v43  ;;  %v7608_v32 = vsub.f32 0.0, %v7556_v43 }
0x1e60   : > { %v7597_v27 = vadd.f32 0.2548296, %v7593_v54  ;;  %v7582_v55 = vadd.f32 1.4214138, %v7578_v22 }
0x1e61   : > { %v9386_v2 = vpop.eup %9385  ;;  %v7564_v56 = vadd.f32 1.0, %v7560_v6  ;;  %v7612_v48 = vmul.f32 %v7608_v32, %v7556_v43  ;;  %v7551_v6 = vsel %vm7547_vm9, -1.0, %v10058_v0 }
0x1e62   : > { %v7601_v35 = vmul.f32 %v9382_v36, %v7597_v27  ;;  %v7586_v38 = vmul.f32 %v9384_v14, %v7582_v55  ;;  %v7571_v57 = vmul.f32 1.0614054, %v9386_v2  ;;  %v9388_v50 = vpop.eup %9387 }
0x1e63   : > { %9389 = vrcp.f32 %v7564_v56  ;;  %v7619_v8 = vmul.f32 1.442695, %v7612_v48 }
0x1e64   : > { %v7621_v47 = vmul.f32 %v9388_v50, %v7601_v35  ;;  %v7590_v58 = vadd.f32 -0.28449672, %v7586_v38  ;;  %v7575_v12 = vadd.f32 -1.4531521, %v7571_v57  ;;  %9391 = vpow2.f32 %v7615_v7 }
0x1e65   : > { %9393 = vpow2.f32 %v7617_v16  ;;  %v7552_v50 = vsel %vm7548_vm10, -1.0, %v10058_v0 }
0x1e66   : > { %v7625_v45 = vsub.f32 1.0, %v7621_v47  ;;  %v7594_v53 = vmul.f32 %v9384_v14, %v7590_v58  ;;  %v7579_v24 = vmul.f32 %v9386_v2, %v7575_v12  ;;  %9395 = vpow2.f32 %v7619_v8 }
0x1e67   : > { %v7540_v12 = vmul.f32 0.5, %v13161_v11 }
0x1e68   : > { %v7629_v17 = vmul.f32 %v7625_v45, %v7549_v18  ;;  %v7598_v30 = vadd.f32 0.2548296, %v7594_v53  ;;  %v7583_v20 = vadd.f32 1.4214138, %v7579_v24  ;;  %v8932_v24 = vld [vmem:[#allocation2] ss:$0 sm:$0xff] }
0x1e69   : > { %v9390_v4 = vpop.eup %9389 }
0x1e6a   : > { %v7633_v13 = vadd.f32 1.0, %v7629_v17  ;;  %v7602_v41 = vmul.f32 %v9384_v14, %v7598_v30  ;;  %v7587_v29 = vmul.f32 %v9386_v2, %v7583_v20  ;;  %v7572_v39 = vmul.f32 1.0614054, %v9390_v4  ;;  %v9392_v25 = vpop.eup %9391 }
0x1e6b   : > { %v9394_v10 = vpop.eup %9393 }
0x1e6c   : > { %v7637_v28 = vmul.f32 %v7633_v13, %v7537_v59  ;;  %v7622_v36 = vmul.f32 %v9392_v25, %v7602_v41  ;;  %v7591_v49 = vadd.f32 -0.28449672, %v7587_v29  ;;  %v7576_v60 = vadd.f32 -1.4531521, %v7572_v39  ;;  %v9396_v56 = vpop.eup %9395 }
0x1e6e   : > { %v7626_v31 = vsub.f32 1.0, %v7622_v36  ;;  %v7595_v52 = vmul.f32 %v9386_v2, %v7591_v49  ;;  %v7580_v5 = vmul.f32 %v9390_v4, %v7576_v60  ;;  %v7645_v21 = vmul.f32 %v8931_v51, %v7637_v28 }
0x1e70   : > { %v7630_v40 = vmul.f32 %v7626_v31, %v7550_v1  ;;  %v7599_v9 = vadd.f32 0.2548296, %v7595_v52  ;;  %v7584_v15 = vadd.f32 1.4214138, %v7580_v5  ;;  %v7649_v14 = vsel %vm1370_vm2, %v7645_v21, 0.0 }
0x1e71   : > { %7650 = vadd.xlane.f32.xlu1 %v7649_v14 }
0x1e72   : > { %v7634_v26 = vadd.f32 1.0, %v7630_v40  ;;  %v7603_v23 = vmul.f32 %v9386_v2, %v7599_v9  ;;  %v7588_v61 = vmul.f32 %v9390_v4, %v7584_v15 }
0x1e74   : > { %v7638_v62 = vmul.f32 %v7634_v26, %v7538_v42  ;;  %v7623_v19 = vmul.f32 %v9394_v10, %v7603_v23  ;;  %v7592_v46 = vadd.f32 -0.28449672, %v7588_v61 }
0x1e76   : > { %v7627_v43 = vsub.f32 1.0, %v7623_v19  ;;  %v7596_v54 = vmul.f32 %v9390_v4, %v7592_v46  ;;  %v7646_v22 = vmul.f32 %v8931_v51, %v7638_v62 }
0x1e78   : > { %v7631_v27 = vmul.f32 %v7627_v43, %v7551_v6  ;;  %v7600_v55 = vadd.f32 0.2548296, %v7596_v54  ;;  %v7652_v7 = vsel %vm1370_vm2, %v7646_v22, 0.0 }
0x1e79   : > { %7653 = vadd.xlane.f32.xlu2 %v7652_v7 }
0x1e7a   : > { %v7635_v2 = vadd.f32 1.0, %v7631_v27  ;;  %v7604_v34 = vmul.f32 %v9390_v4, %v7600_v55 }
0x1e7c   : > { %v7639_v35 = vmul.f32 %v7635_v2, %v7539_v37  ;;  %v7624_v33 = vmul.f32 %v9396_v56, %v7604_v34 }
0x1e7e   : > { %v7628_v38 = vsub.f32 1.0, %v7624_v33  ;;  %v7647_v57 = vmul.f32 %v8931_v51, %v7639_v35 }
0x1e80   : > { %v7632_v47 = vmul.f32 %v7628_v38, %v7552_v50  ;;  %v7655_v58 = vsel %vm1370_vm2, %v7647_v57, 0.0 }
0x1e81   : > { %7656 = vadd.xlane.f32.xlu0 %v7655_v58 }
0x1e82   : > { %v7636_v3 = vadd.f32 1.0, %v7632_v47 }
0x1e84   : > { %v7640_v45 = vmul.f32 %v7636_v3, %v7540_v12 }
0x1e86   : > { %v7648_v44 = vmul.f32 %v8931_v51, %v7640_v45 }
0x1e88   : > { %v7658_v53 = vsel %vm1370_vm2, %v7648_v44, 0.0 }
0x1e89   : > { %7659 = vadd.xlane.f32.xlu2 %v7658_v53 }
0x1ee4   : > { %v7651_v18 = vpop.xlane.xlu1 %7650 }
0x1ee5   : > { %v13183_v63 = vadd.f32 %v8932_v24, %v7651_v18 }
0x1ee7   : > { %v13186_v17 = vmul.f32 0.70710677, %v13183_v63 }
0x1ee9   : > { %v7685_v30 = vand.u32 2147483647, %v13186_v17  ;;  %vm7677_vm2 = vcmp.lt.f32.partialorder %v13186_v17, 0.0 }
0x1eea   : > { %v7681_v12 = vsel %vm7677_vm2, -1.0, %v10058_v0 }
0x1eeb   : > { %v7689_v20 = vmul.f32 0.3275911, %v7685_v30  ;;  %v7737_v39 = vsub.f32 0.0, %v7685_v30 }
0x1eec   : > { %v7654_v4 = vpop.xlane.xlu2 %7653 }
0x1eed   : > { %v7693_v59 = vadd.f32 1.0, %v7689_v20  ;;  %v13189_v16 = vadd.f32 %v8932_v24, %v7654_v4  ;;  %v7741_v60 = vmul.f32 %v7737_v39, %v7685_v30 }
0x1eef   : > { %9397 = vrcp.f32 %v7693_v59  ;;  %v13192_v11 = vmul.f32 0.70710677, %v13189_v16  ;;  %v7745_v40 = vmul.f32 1.442695, %v7741_v60 }
0x1ef1   : > { %v7686_v32 = vand.u32 2147483647, %v13192_v11  ;;  %vm7678_vm12 = vcmp.lt.f32.partialorder %v13192_v11, 0.0  ;;  %v7670_v11 = vmul.f32 0.5, %v13189_v16 }
0x1ef2   : > { %v7682_v60 = vsel %vm7678_vm12, -1.0, %v10058_v0 }
0x1ef3   : > { %v7690_v13 = vmul.f32 0.3275911, %v7686_v32  ;;  %v7738_v9 = vsub.f32 0.0, %v7686_v32 }
0x1ef4   : > { %v7657_v41 = vpop.xlane.xlu0 %7656 }
0x1ef5   : > { %v9398_v29 = vpop.eup %9397  ;;  %v7694_v51 = vadd.f32 1.0, %v7690_v13  ;;  %v13195_v25 = vadd.f32 %v8932_v24, %v7657_v41  ;;  %v7742_v10 = vmul.f32 %v7738_v9, %v7686_v32 }
0x1ef6   : > { %v7701_v28 = vmul.f32 1.0614054, %v9398_v29 }
0x1ef7   : > { %9399 = vrcp.f32 %v7694_v51  ;;  %v13198_v36 = vmul.f32 0.70710677, %v13195_v25  ;;  %v7747_v27 = vmul.f32 1.442695, %v7742_v10 }
0x1ef8   : > { %v7705_v49 = vadd.f32 -1.4531521, %v7701_v28 }
0x1ef9   : > { %v7687_v48 = vand.u32 2147483647, %v13198_v36  ;;  %vm7679_vm13 = vcmp.lt.f32.partialorder %v13198_v36, 0.0 }
0x1efa   : > { %v7709_v31 = vmul.f32 %v9398_v29, %v7705_v49  ;;  %v7683_v10 = vsel %vm7679_vm13, -1.0, %v10058_v0 }
0x1efb   : > { %v7691_v52 = vmul.f32 0.3275911, %v7687_v48  ;;  %v7739_v55 = vsub.f32 0.0, %v7687_v48 }
0x1efc   : > { %v7713_v5 = vadd.f32 1.4214138, %v7709_v31  ;;  %v7660_v21 = vpop.xlane.xlu2 %7659 }
0x1efd   : > { %v9400_v1 = vpop.eup %9399  ;;  %v7695_v15 = vadd.f32 1.0, %v7691_v52  ;;  %v13201_v14 = vadd.f32 %v8932_v24, %v7660_v21  ;;  %v7743_v57 = vmul.f32 %v7739_v55, %v7687_v48  ;;  %v7669_v24 = vmul.f32 0.5, %v13183_v63 }
0x1efe   : > { %v7717_v8 = vmul.f32 %v9398_v29, %v7713_v5  ;;  %v7702_v42 = vmul.f32 1.0614054, %v9400_v1 }
0x1eff   : > { %9401 = vrcp.f32 %v7695_v15  ;;  %v13204_v26 = vmul.f32 0.70710677, %v13201_v14  ;;  %v7749_v18 = vmul.f32 1.442695, %v7743_v57 }
0x1f00   : > { %v7721_v23 = vadd.f32 -0.28449672, %v7717_v8  ;;  %v7706_v61 = vadd.f32 -1.4531521, %v7702_v42  ;;  %9403 = vpow2.f32 %v7745_v40 }
0x1f01   : > { %v7688_v62 = vand.u32 2147483647, %v13204_v26  ;;  %vm7680_vm14 = vcmp.lt.f32.partialorder %v13204_v26, 0.0 }
0x1f02   : > { %v7725_v19 = vmul.f32 %v9398_v29, %v7721_v23  ;;  %v7710_v46 = vmul.f32 %v9400_v1, %v7706_v61 }
0x1f03   : > { %v7692_v43 = vmul.f32 0.3275911, %v7688_v62  ;;  %v7740_v30 = vsub.f32 0.0, %v7688_v62 }
0x1f04   : > { %v7729_v54 = vadd.f32 0.2548296, %v7725_v19  ;;  %v7714_v22 = vadd.f32 1.4214138, %v7710_v46  ;;  %v7671_v19 = vmul.f32 0.5, %v13195_v25 }
0x1f05   : > { %v9402_v6 = vpop.eup %9401  ;;  %v7696_v7 = vadd.f32 1.0, %v7692_v43  ;;  %v7744_v39 = vmul.f32 %v7740_v30, %v7688_v62 }
0x1f06   : > { %v7733_v37 = vmul.f32 %v9398_v29, %v7729_v54  ;;  %v7718_v2 = vmul.f32 %v9400_v1, %v7714_v22  ;;  %v7703_v34 = vmul.f32 1.0614054, %v9402_v6  ;;  %v9404_v56 = vpop.eup %9403 }
0x1f07   : > { %9405 = vrcp.f32 %v7696_v7  ;;  %v7751_v5 = vmul.f32 1.442695, %v7744_v39  ;;  %v7672_v7 = vmul.f32 0.5, %v13201_v14 }
0x1f08   : > { %v7753_v35 = vmul.f32 %v9404_v56, %v7733_v37  ;;  %v7722_v33 = vadd.f32 -0.28449672, %v7718_v2  ;;  %v7707_v38 = vadd.f32 -1.4531521, %v7703_v34  ;;  %9407 = vpow2.f32 %v7747_v27 }
0x1f09   : > { %9409 = vpow2.f32 %v7749_v18  ;;  %v7684_v27 = vsel %vm7680_vm14, -1.0, %v10058_v0 }
0x1f0a   : > { %v7757_v50 = vsub.f32 1.0, %v7753_v35  ;;  %v7726_v47 = vmul.f32 %v9400_v1, %v7722_v33  ;;  %v7711_v58 = vmul.f32 %v9402_v6, %v7707_v38  ;;  %9411 = vpow2.f32 %v7751_v5 }
0x1f0c   : > { %v7761_v3 = vmul.f32 %v7757_v50, %v7681_v12  ;;  %v7730_v45 = vadd.f32 0.2548296, %v7726_v47  ;;  %v7715_v44 = vadd.f32 1.4214138, %v7711_v58 }
0x1f0d   : > { %v9406_v53 = vpop.eup %9405 }
0x1f0e   : > { %v7765_v17 = vadd.f32 1.0, %v7761_v3  ;;  %v7734_v20 = vmul.f32 %v9400_v1, %v7730_v45  ;;  %v7719_v4 = vmul.f32 %v9402_v6, %v7715_v44  ;;  %v7704_v59 = vmul.f32 1.0614054, %v9406_v53  ;;  %v9408_v32 = vpop.eup %9407 }
0x1f0f   : > { %v9410_v9 = vpop.eup %9409 }
0x1f10   : > { %v7769_v13 = vmul.f32 %v7765_v17, %v7669_v24  ;;  %v7754_v41 = vmul.f32 %v9408_v32, %v7734_v20  ;;  %v7723_v63 = vadd.f32 -0.28449672, %v7719_v4  ;;  %v7708_v29 = vadd.f32 -1.4531521, %v7704_v59  ;;  %v9412_v54 = vpop.eup %9411 }
0x1f12   : > { %7774 = vst.msk [vmem:[%s13215_s4] sm:$0xff] %vm7773_vm11, %v7769_v13  ;;  %v7758_v51 = vsub.f32 1.0, %v7754_v41  ;;  %v7727_v28 = vmul.f32 %v9402_v6, %v7723_v63  ;;  %v7712_v49 = vmul.f32 %v9406_v53, %v7708_v29 }
0x1f14   : > { %v7762_v48 = vmul.f32 %v7758_v51, %v7682_v60  ;;  %v7731_v31 = vadd.f32 0.2548296, %v7727_v28  ;;  %v7716_v52 = vadd.f32 1.4214138, %v7712_v49 }
0x1f16   : > { %v7766_v21 = vadd.f32 1.0, %v7762_v48  ;;  %v7735_v1 = vmul.f32 %v9402_v6, %v7731_v31  ;;  %v7720_v40 = vmul.f32 %v9406_v53, %v7716_v52 }
0x1f18   : > { %v7770_v15 = vmul.f32 %v7766_v21, %v7670_v11  ;;  %v7755_v8 = vmul.f32 %v9410_v9, %v7735_v1  ;;  %v7724_v42 = vadd.f32 -0.28449672, %v7720_v40 }
0x1f1a   : > { %7775 = vst.msk [vmem:[%s13215_s4 + $0x8] sm:$0xff] %vm7773_vm11, %v7770_v15  ;;  %v7759_v23 = vsub.f32 1.0, %v7755_v8  ;;  %v7728_v61 = vmul.f32 %v9406_v53, %v7724_v42 }
0x1f1c   : > { %v7763_v62 = vmul.f32 %v7759_v23, %v7683_v10  ;;  %v7732_v16 = vadd.f32 0.2548296, %v7728_v61 }
0x1f1e   : > { %v7767_v46 = vadd.f32 1.0, %v7763_v62  ;;  %v7736_v43 = vmul.f32 %v9406_v53, %v7732_v16 }
0x1f20   : > { %v7771_v22 = vmul.f32 %v7767_v46, %v7671_v19  ;;  %v7756_v36 = vmul.f32 %v9412_v54, %v7736_v43 }
0x1f22   : > { %7776 = vst.msk [vmem:[%s13215_s4 + $0x10] sm:$0xff] %vm7773_vm11, %v7771_v22  ;;  %v7760_v6 = vsub.f32 1.0, %v7756_v36 }
0x1f24   : > { %v7764_v55 = vmul.f32 %v7760_v6, %v7684_v27 }
0x1f26   : > { %v7768_v37 = vadd.f32 1.0, %v7764_v55 }
0x1f28   : > { %v7772_v2 = vmul.f32 %v7768_v37, %v7672_v7 }
0x1f2a   : > { %7777 = vst.msk [vmem:[%s13215_s4 + $0x18] sm:$0xff] %vm7773_vm11, %v7772_v2 }
0x1f2b PF: > { %s13314_s10 = sld [smem:[#allocation41_spill]] }
0x1f31   : > { %s50_s9 = sadd.s32 1, %s13314_s10  }
0x1f32   : > { %p47_p7 = scmp.ge.s32.totalorder %s50_s9, 4  }
0x1f34   :  { %49 = sbr.rel (!%p47_p7) target bundleno = 28 (0x1c), region = 266 }
0x1f39   :  { %7799 = vsyncpa [#allocation4], 1 }
0x1f3a   :  { %7801 = vsyncpa [#allocation4 + $0x1], 1 }
0x1f3b   :  { %7802 = vsyncpa [#allocation6], 1 }
0x1f3c   :  { %7803 = vsyncpa [#allocation9], 1 }
0x1f3d   :  { %7804 = vsyncpa [#allocation12], 1 }
0x1f3e   :  { %7805 = vsyncpa [#allocation15], 1 }
0x1f3f   :  { %7806 = vsyncpa [#allocation18], 1 }
0x1f40   :  { %7807 = vsyncpa [#allocation21], 1 }
0x1f41   :  { %7808 = vsyncpa [#allocation24], 1 }
0x1f42   :  { %7809 = vsyncpa [#allocation27], 1 }
0x1f43   :  { %7810 = vsyncpa [#allocation30], 1 }

</bundles_post_ra>
